<compile_context>
chip_gen: v6e
topology: v6e:2x2x1
jax: 0.10.0
libtpu: 0.0.40
codegen_flags: <defaults>
</compile_context>

<pallas_src>
import functools
import math

import jax
import jax.numpy as jnp
from jax.experimental import pallas as pl
from jax.experimental.pallas import tpu as pltpu

EPS = 1e-5  # config.layer_norm_eps


# ----------------------------- math helpers (traced) -------------------------

def _layernorm(x, g, b, eps=EPS):
    x = x.astype(jnp.float32)
    mean = jnp.mean(x, axis=-1, keepdims=True)
    var = jnp.mean(jnp.square(x - mean), axis=-1, keepdims=True)
    return (x - mean) * jax.lax.rsqrt(var + eps) * g + b


def _quick_gelu(x):
    # TODO(synk): hidden_act is taken as CLIP's default "quick_gelu"; other
    # ACT2FN choices would need the corresponding activation here.
    return x * jax.nn.sigmoid(1.702 * x)


# ----------------------------- fused encoder-layer kernel --------------------

def clip_encoder_layer_kernel(
        x_ref, ln1g_ref, ln1b_ref, wqkv_ref, bqkv_ref, wo_ref, bo_ref,
        ln2g_ref, ln2b_ref, w1_ref, b1_ref, w2_ref, b2_ref,
        o_ref,
        y_scr, h2_scr, acc_scr,
        *, num_heads, s_valid):
    i = pl.program_id(1)  # intermediate-dim (MLP) block index

    # ---- LN1 + attention + LN2: computed once per batch program (i == 0) ----
    @pl.when(i == 0)
    def _attention_and_ln():
        x = x_ref[0].astype(jnp.float32)              # (S, D)
        S, D = x.shape
        hd = D // num_heads

        h = _layernorm(x, ln1g_ref[...], ln1b_ref[...])

        # Fused QKV: one lane-dense (S,D)x(D,3D) MXU pass; the attention
        # scale is already folded into the Q columns of the weight/bias.
        qkv = jnp.dot(h.astype(jnp.bfloat16), wqkv_ref[...],
                      preferred_element_type=jnp.float32) + bqkv_ref[...]
        qkv = qkv.astype(jnp.bfloat16)                # single cast, halves footprint

        # First residual + out_proj bias; per-head out_proj partials are
        # accumulated into this f32 scratch below (no bf16 context scratch,
        # no sub-128-lane masked context stores).
        y_scr[...] = x + bo_ref[...]

        # TODO(synk): for 12-16 head configs, switch to a batched 3-D
        # dot_general over an (H, S, hd) layout (or a fori_loop over a
        # ref-resident qkv) so independent QK^T passes overlap the softmax
        # exp on the EUP and live ranges are bounded by the loop.
        for hh in range(num_heads):
            q_h = qkv[:, hh * hd:(hh + 1) * hd]
            k_h = qkv[:, D + hh * hd: D + (hh + 1) * hd]
            v_h = qkv[:, 2 * D + hh * hd: 2 * D + (hh + 1) * hd]

            s = jax.lax.dot_general(q_h, k_h, (((1,), (1,)), ((), ())),
                                    preferred_element_type=jnp.float32)  # (S,S)
            if s_valid is not None:
                # Mask padded key columns out of the softmax.
                col = jax.lax.broadcasted_iota(jnp.int32, s.shape, 1)
                s = jnp.where(col < s_valid, s, -1e30)
            s = s - jnp.max(s, axis=-1, keepdims=True)
            p = jnp.exp(s)
            p = p * pl.reciprocal(jnp.sum(p, axis=-1, keepdims=True), approx=True)

            ctx = jnp.dot(p.astype(jnp.bfloat16), v_h,
                          preferred_element_type=jnp.float32)            # (S,hd)
            # Fold out_proj per head: ctx_h @ wo[hh*hd:(hh+1)*hd, :]
            y_scr[...] += jnp.dot(ctx.astype(jnp.bfloat16),
                                  wo_ref[hh * hd:(hh + 1) * hd, :],
                                  preferred_element_type=jnp.float32)

        h2_scr[...] = _layernorm(y_scr[...], ln2g_ref[...],
                                 ln2b_ref[...]).astype(jnp.bfloat16)
        acc_scr[...] = jnp.zeros_like(acc_scr)

    # ---- MLP, tiled over the intermediate dim (fc2 reduced into acc_scr) ----
    t = jnp.dot(h2_scr[...], w1_ref[...],
                preferred_element_type=jnp.float32) + b1_ref[...]        # (S, TI)
    t = _quick_gelu(t)                                                   # f32
    acc_scr[...] += jnp.dot(t.astype(jnp.bfloat16), w2_ref[...],
                            preferred_element_type=jnp.float32)          # (S, D)

    @pl.when(i == pl.num_programs(1) - 1)
    def _finalize():
        o_ref[0] = (y_scr[...] + acc_scr[...] + b2_ref[...]).astype(o_ref.dtype)


# ----------------------------- VMEM / tile policy ----------------------------

def _vmem_cap_bytes():
    """0.8x of physical VMEM per core (generation-aware); fallback 128 MiB."""
    try:
        info = pltpu.get_tpu_info()
        cap = getattr(info, "vmem_capacity_bytes", None)
        if cap:
            return int(0.8 * cap)
    except Exception:
        pass
    return int(0.8 * (128 << 20))


def _vmem_estimate(S, D, TI):
    """Resident-buffer estimate for the kernel (bytes)."""
    bf16, f32 = 2, 4
    # invariant weights (single-buffered via pl.Buffered(1))
    inv_w = bf16 * (D * 3 * D + D * D)
    inv_v = f32 * (3 * D + 6 * D + D)
    # pipelined (double-buffered) fc1/fc2 weight + bias blocks
    mlp = 2 * (bf16 * (D * TI + TI * D) + f32 * TI)
    # double-buffered x / out blocks
    io = 2 * f32 * 2 * S * D
    # scratch: y (f32), acc (f32), h2 (bf16)
    scratch = f32 * 2 * S * D + bf16 * S * D
    # i==0 temporaries: qkv (f32 result + bf16), per-head scores/probs, fc1 act
    temps = f32 * (S * 3 * D) + bf16 * (S * 3 * D) + f32 * (2 * S * S) + f32 * (S * TI)
    return inv_w + inv_v + mlp + io + scratch + temps + (4 << 20)


def _select_ti(S, D, I, block_i, cap):
    TI = min(block_i, I)
    if I % TI != 0:
        TI = math.gcd(I, TI)
    # Shrink the MLP tile while the resident estimate exceeds the VMEM cap.
    while (_vmem_estimate(S, D, TI) > cap and TI > 256
           and TI % 2 == 0 and I % (TI // 2) == 0):
        TI //= 2
    return TI


# ----------------------------- wrapper ---------------------------------------

def clip_encoder_layer(hidden_states, params, *, num_heads, block_i=2048,
                       attention_mask=None, causal_attention_mask=None,
                       conditional_hidden_states=None):
    """Fused CLIPEncoderLayer forward: (B, S, D) -> (B, S, D)."""
    # TODO(synk): additive attention/causal masks and the is_add_fusion gated
    # adapter path (conditional_hidden_states) are not implemented; the
    # baseline vision forward passes None for all three.
    assert attention_mask is None and causal_attention_mask is None
    assert conditional_hidden_states is None

    B, S, D = hidden_states.shape
    I = params["w1"].shape[1]
    assert D % num_heads == 0
    head_dim = D // num_heads
    scale = head_dim ** -0.5

    # Fold the attention scale into the Q columns of the fused QKV projection
    # (one-time weight prep; removes an SxD multiply per batch program).
    qcols = jnp.concatenate([jnp.full((D,), scale, jnp.float32),
                             jnp.ones((2 * D,), jnp.float32)])
    w_qkv = (params["w_qkv"].astype(jnp.float32) * qcols).astype(params["w_qkv"].dtype)
    b_qkv = params["b_qkv"].astype(jnp.float32) * qcols

    # Pad S to a lane/sublane friendly multiple of 128; padded key columns are
    # masked inside the kernel, padded rows sliced off afterwards.
    S_pad = max(128, ((S + 127) // 128) * 128)
    if S_pad != S:
        x = jnp.pad(hidden_states, ((0, 0), (0, S_pad - S), (0, 0)))
        s_valid = S
    else:
        x = hidden_states
        s_valid = None

    cap = _vmem_cap_bytes()
    TI = _select_ti(S_pad, D, I, block_i, cap)
    assert I % TI == 0
    n_i = I // TI
    vmem_limit = int(min(max(_vmem_estimate(S_pad, D, TI), 32 << 20), cap))

    kern = functools.partial(clip_encoder_layer_kernel,
                             num_heads=num_heads, s_valid=s_valid)

    # Invariant weights/biases: constant index map + single buffer (fetched
    # once per batch program, never re-DMA'd -> no double-buffer VMEM waste).
    def const(shape):
        return pl.BlockSpec(shape, lambda b, i: (0, 0),
                            pipeline_mode=pl.Buffered(1))

    in_specs = [
        pl.BlockSpec((1, S_pad, D), lambda b, i: (b, 0, 0)),   # hidden_states
        const((1, D)), const((1, D)),                          # LN1 gamma/beta
        const((D, 3 * D)), const((1, 3 * D)),                  # fused QKV w/b
        const((D, D)), const((1, D)),                          # out_proj w/b
        const((1, D)), const((1, D)),                          # LN2 gamma/beta
        pl.BlockSpec((D, TI), lambda b, i: (0, i)),            # fc1 weight block
        pl.BlockSpec((1, TI), lambda b, i: (0, i)),            # fc1 bias block
        pl.BlockSpec((TI, D), lambda b, i: (i, 0)),            # fc2 weight block
        const((1, D)),                                         # fc2 bias
    ]
    out_spec = pl.BlockSpec((1, S_pad, D), lambda b, i: (b, 0, 0))

    scratch_shapes = [
        pltpu.VMEM((S_pad, D), jnp.float32),    # y: x + bo + per-head out_proj partials
        pltpu.VMEM((S_pad, D), jnp.bfloat16),   # LayerNorm2 output (MLP input)
        pltpu.VMEM((S_pad, D), jnp.float32),    # fc2 accumulator over I blocks
    ]

    # TODO(synk): for v7x (2 TensorCores) add a second "parallel" grid axis
    # splitting the query rows so small-batch inference uses both cores.
    out = pl.pallas_call(
        kern,
        out_shape=jax.ShapeDtypeStruct((B, S_pad, D), hidden_states.dtype),
        grid=(B, n_i),
        in_specs=in_specs,
        out_specs=out_spec,
        scratch_shapes=scratch_shapes,
        compiler_params=pltpu.CompilerParams(
            dimension_semantics=("parallel", "arbitrary"),
            vmem_limit_bytes=vmem_limit),
    )(x,
      params["ln1_g"], params["ln1_b"],
      w_qkv, b_qkv,
      params["wo"], params["bo"],
      params["ln2_g"], params["ln2_b"],
      params["w1"], params["b1"], params["w2"], params["b2"])

    if S_pad != S:
        out = out[:, :S, :]
    return out


# ----------------------------- pure-JAX reference -----------------------------

def clip_encoder_layer_ref(x, p, *, num_heads):
    """f32 reference for correctness checking (same bf16 weights, f32 math)."""
    B, S, D = x.shape
    hd = D // num_heads
    scale = hd ** -0.5
    f32 = lambda a: a.astype(jnp.float32)

    h = _layernorm(x, p["ln1_g"], p["ln1_b"])
    qkv = h @ f32(p["w_qkv"]) + p["b_qkv"]
    q = (qkv[..., :D] * scale).reshape(B, S, num_heads, hd).transpose(0, 2, 1, 3)
    k = qkv[..., D:2 * D].reshape(B, S, num_heads, hd).transpose(0, 2, 1, 3)
    v = qkv[..., 2 * D:].reshape(B, S, num_heads, hd).transpose(0, 2, 1, 3)
    s = jnp.einsum("bhqd,bhkd->bhqk", q, k)
    prob = jax.nn.softmax(s, axis=-1)
    ctx = jnp.einsum("bhqk,bhkd->bhqd", prob, v).transpose(0, 2, 1, 3).reshape(B, S, D)
    y = x + ctx @ f32(p["wo"]) + p["bo"]
    h2 = _layernorm(y, p["ln2_g"], p["ln2_b"])
    t = _quick_gelu(h2 @ f32(p["w1"]) + p["b1"])
    return y + t @ f32(p["w2"]) + p["b2"]


# ----------------------------- parameter init ---------------------------------

def init_layer_params(key, D, I, w_std=0.05, b_std=0.02):
    ks = jax.random.split(key, 12)
    w = lambda k, shp: (w_std * jax.random.normal(k, shp, jnp.float32)).astype(jnp.bfloat16)
    b = lambda k, shp: b_std * jax.random.normal(k, shp, jnp.float32)
    g = lambda k, shp: 1.0 + 0.1 * jax.random.normal(k, shp, jnp.float32)
    return {
        "ln1_g": g(ks[0], (1, D)), "ln1_b": b(ks[1], (1, D)),
        "w_qkv": w(ks[2], (D, 3 * D)), "b_qkv": b(ks[3], (1, 3 * D)),
        "wo": w(ks[4], (D, D)), "bo": b(ks[5], (1, D)),
        "ln2_g": g(ks[6], (1, D)), "ln2_b": b(ks[7], (1, D)),
        "w1": w(ks[8], (D, I)), "b1": b(ks[9], (1, I)),
        "w2": w(ks[10], (I, D)), "b2": b(ks[11], (1, D)),
    }


# ----------------------------- main -------------------------------------------

if __name__ == "__main__":
    # Small but lane/sublane-aligned demo shapes: B=2, S=128, D=256,
    # 4 heads (head_dim=64, as in real CLIP), intermediate=1024, 2 layers.
    B, S, D, H, I, L = 2, 128, 256, 4, 1024, 2

    key = jax.random.PRNGKey(0)
    kx, kp, kt = jax.random.split(key, 3)
    hidden_states = jax.random.normal(kx, (B, S, D), dtype=jnp.float32)
    layer_params = [init_layer_params(k, D, I) for k in jax.random.split(kp, L)]

    out = hidden_states
    for p in layer_params:
        out = clip_encoder_layer(out, p, num_heads=H)
    out = jax.block_until_ready(out)

    ref = hidden_states
    for p in layer_params:
        ref = clip_encoder_layer_ref(ref, p, num_heads=H)

    assert out.shape == (B, S, D)
    assert bool(jnp.all(jnp.isfinite(out)))
    # bf16 matmuls + approx reciprocal vs f32 reference: loose tolerance.
    assert bool(jnp.allclose(out.astype(jnp.float32), ref, rtol=0.05, atol=0.1)), (
        "kernel does not match pure-JAX reference (aligned case)")

    # Text-like unaligned sequence length (S=77) exercising the padding +
    # softmax key-mask path.
    x77 = jax.random.normal(kt, (1, 77, D), dtype=jnp.float32)
    out77 = jax.block_until_ready(
        clip_encoder_layer(x77, layer_params[0], num_heads=H))
    ref77 = clip_encoder_layer_ref(x77, layer_params[0], num_heads=H)
    assert out77.shape == (1, 77, D)
    assert bool(jnp.all(jnp.isfinite(out77)))
    assert bool(jnp.allclose(out77.astype(jnp.float32), ref77, rtol=0.05, atol=0.1)), (
        "kernel does not match pure-JAX reference (padded case)")

    print("KERNEL_OK")
</pallas_src>

<mosaic_0001>
module attributes {stable_mosaic.version = 11 : i64} {
  func.func @clip_encoder_layer_kernel(%arg0: i32, %arg1: i32, %arg2: memref<1x128x256xf32, #tpu.memory_space<vmem>>, %arg3: memref<1x256xf32, #tpu.memory_space<vmem>>, %arg4: memref<1x256xf32, #tpu.memory_space<vmem>>, %arg5: memref<256x768xbf16, #tpu.memory_space<vmem>>, %arg6: memref<1x768xf32, #tpu.memory_space<vmem>>, %arg7: memref<256x256xbf16, #tpu.memory_space<vmem>>, %arg8: memref<1x256xf32, #tpu.memory_space<vmem>>, %arg9: memref<1x256xf32, #tpu.memory_space<vmem>>, %arg10: memref<1x256xf32, #tpu.memory_space<vmem>>, %arg11: memref<256x1024xbf16, #tpu.memory_space<vmem>>, %arg12: memref<1x1024xf32, #tpu.memory_space<vmem>>, %arg13: memref<1024x256xbf16, #tpu.memory_space<vmem>>, %arg14: memref<1x256xf32, #tpu.memory_space<vmem>>, %arg15: memref<1x128x256xf32, #tpu.memory_space<vmem>>, %arg16: memref<128x256xf32, #tpu.memory_space<vmem>>, %arg17: memref<128x256xbf16, #tpu.memory_space<vmem>>, %arg18: memref<128x256xf32, #tpu.memory_space<vmem>>) attributes {dimension_semantics = [#tpu.dimension_semantics<parallel>, #tpu.dimension_semantics<arbitrary>], iteration_bounds = array<i64: 2, 1>, scalar_prefetch = 0 : i64, scratch_operands = 3 : i64, tpu.core_type = #tpu.core_type<tc>, window_params = [{transform_indices = @transform_0, window_bounds = array<i64: 1, 128, 256>}, {pipeline_mode = #tpu.pipeline_mode<synchronous>, transform_indices = @transform_1, window_bounds = array<i64: 1, 256>}, {pipeline_mode = #tpu.pipeline_mode<synchronous>, transform_indices = @transform_2, window_bounds = array<i64: 1, 256>}, {pipeline_mode = #tpu.pipeline_mode<synchronous>, transform_indices = @transform_3, window_bounds = array<i64: 256, 768>}, {pipeline_mode = #tpu.pipeline_mode<synchronous>, transform_indices = @transform_4, window_bounds = array<i64: 1, 768>}, {pipeline_mode = #tpu.pipeline_mode<synchronous>, transform_indices = @transform_5, window_bounds = array<i64: 256, 256>}, {pipeline_mode = #tpu.pipeline_mode<synchronous>, transform_indices = @transform_6, window_bounds = array<i64: 1, 256>}, {pipeline_mode = #tpu.pipeline_mode<synchronous>, transform_indices = @transform_7, window_bounds = array<i64: 1, 256>}, {pipeline_mode = #tpu.pipeline_mode<synchronous>, transform_indices = @transform_8, window_bounds = array<i64: 1, 256>}, {transform_indices = @transform_9, window_bounds = array<i64: 256, 1024>}, {transform_indices = @transform_10, window_bounds = array<i64: 1, 1024>}, {transform_indices = @transform_11, window_bounds = array<i64: 1024, 256>}, {pipeline_mode = #tpu.pipeline_mode<synchronous>, transform_indices = @transform_12, window_bounds = array<i64: 1, 256>}, {transform_indices = @transform_13, window_bounds = array<i64: 1, 128, 256>}]} {
    %c0_i32 = arith.constant 0 : i32
    %0 = arith.cmpi eq, %arg1, %c0_i32 : i32
    %1 = arith.extui %0 : i1 to i32
    %c0_i32_0 = arith.constant 0 : i32
    %2 = arith.cmpi ne, %1, %c0_i32_0 : i32
    scf.if %2 {
      %c0_17 = arith.constant 0 : index
      %c0_18 = arith.constant 0 : index
      %c0_19 = arith.constant 0 : index
      %26 = vector.load %arg2[%c0_17, %c0_18, %c0_19] : memref<1x128x256xf32, #tpu.memory_space<vmem>>, vector<1x128x256xf32>
      %27 = vector.shape_cast %26 : vector<1x128x256xf32> to vector<128x256xf32>
      %c0_20 = arith.constant 0 : index
      %c0_21 = arith.constant 0 : index
      %28 = vector.load %arg3[%c0_20, %c0_21] : memref<1x256xf32, #tpu.memory_space<vmem>>, vector<1x256xf32>
      %c0_22 = arith.constant 0 : index
      %c0_23 = arith.constant 0 : index
      %29 = vector.load %arg4[%c0_22, %c0_23] : memref<1x256xf32, #tpu.memory_space<vmem>>, vector<1x256xf32>
      %cst_24 = arith.constant dense<0.000000e+00> : vector<128xf32>
      %30 = vector.multi_reduction <add>, %27, %cst_24 [1] : vector<128x256xf32> to vector<128xf32>
      %31 = vector.shape_cast %30 : vector<128xf32> to vector<128x1xf32>
      %cst_25 = arith.constant 2.560000e+02 : f32
      %32 = vector.broadcast %cst_25 : f32 to vector<128x1xf32>
      %33 = arith.divf %31, %32 : vector<128x1xf32>
      %34 = vector.broadcast %33 : vector<128x1xf32> to vector<128x256xf32>
      %35 = arith.subf %27, %34 : vector<128x256xf32>
      %36 = arith.mulf %35, %35 : vector<128x256xf32>
      %cst_26 = arith.constant dense<0.000000e+00> : vector<128xf32>
      %37 = vector.multi_reduction <add>, %36, %cst_26 [1] : vector<128x256xf32> to vector<128xf32>
      %38 = vector.shape_cast %37 : vector<128xf32> to vector<128x1xf32>
      %cst_27 = arith.constant 2.560000e+02 : f32
      %39 = vector.broadcast %cst_27 : f32 to vector<128x1xf32>
      %40 = arith.divf %38, %39 : vector<128x1xf32>
      %41 = vector.broadcast %33 : vector<128x1xf32> to vector<128x256xf32>
      %42 = arith.subf %27, %41 : vector<128x256xf32>
      %cst_28 = arith.constant 9.99999974E-6 : f32
      %43 = vector.broadcast %cst_28 : f32 to vector<128x1xf32>
      %44 = arith.addf %40, %43 : vector<128x1xf32>
      %45 = math.rsqrt %44 : vector<128x1xf32>
      %46 = vector.broadcast %45 : vector<128x1xf32> to vector<128x256xf32>
      %47 = arith.mulf %42, %46 : vector<128x256xf32>
      %48 = vector.broadcast %28 : vector<1x256xf32> to vector<128x256xf32>
      %49 = arith.mulf %47, %48 : vector<128x256xf32>
      %50 = vector.broadcast %29 : vector<1x256xf32> to vector<128x256xf32>
      %51 = arith.addf %49, %50 : vector<128x256xf32>
      %52 = arith.truncf %51 : vector<128x256xf32> to vector<128x256xbf16>
      %c0_29 = arith.constant 0 : index
      %c0_30 = arith.constant 0 : index
      %53 = vector.load %arg5[%c0_29, %c0_30] : memref<256x768xbf16, #tpu.memory_space<vmem>>, vector<256x768xbf16>
      %cst_31 = arith.constant dense<0.000000e+00> : vector<128x768xf32>
      %54 = tpu.matmul %52, %53, %cst_31 {dimension_numbers = #tpu.dot_dimension_numbers<[1], [0], [0], [1], [0, 0, 1, 1], [], []>} : vector<128x256xbf16>, vector<256x768xbf16>, vector<128x768xf32> -> vector<128x768xf32>
      %c0_32 = arith.constant 0 : index
      %c0_33 = arith.constant 0 : index
      %55 = vector.load %arg6[%c0_32, %c0_33] : memref<1x768xf32, #tpu.memory_space<vmem>>, vector<1x768xf32>
      %56 = vector.broadcast %55 : vector<1x768xf32> to vector<128x768xf32>
      %57 = arith.addf %54, %56 : vector<128x768xf32>
      %58 = arith.truncf %57 : vector<128x768xf32> to vector<128x768xbf16>
      %c0_34 = arith.constant 0 : index
      %c0_35 = arith.constant 0 : index
      %59 = vector.load %arg8[%c0_34, %c0_35] : memref<1x256xf32, #tpu.memory_space<vmem>>, vector<1x256xf32>
      %60 = vector.broadcast %59 : vector<1x256xf32> to vector<128x256xf32>
      %61 = arith.addf %27, %60 : vector<128x256xf32>
      %c0_36 = arith.constant 0 : index
      %c0_37 = arith.constant 0 : index
      %62 = vector.load %arg16[%c0_36, %c0_37] : memref<128x256xf32, #tpu.memory_space<vmem>>, vector<128x256xf32>
      tpu.vector_store %arg16[%c0_36, %c0_37], %61 {strides = array<i32>} : memref<128x256xf32, #tpu.memory_space<vmem>>, vector<128x256xf32>,
      %63 = vector.extract_strided_slice %58 {offsets = [0, 0], sizes = [128, 64], strides = [1, 1]} : vector<128x768xbf16> to vector<128x64xbf16>
      %64 = vector.extract_strided_slice %58 {offsets = [0, 256], sizes = [128, 64], strides = [1, 1]} : vector<128x768xbf16> to vector<128x64xbf16>
      %65 = vector.extract_strided_slice %58 {offsets = [0, 512], sizes = [128, 64], strides = [1, 1]} : vector<128x768xbf16> to vector<128x64xbf16>
      %cst_38 = arith.constant dense<0.000000e+00> : vector<128x128xf32>
      %66 = tpu.matmul %63, %64, %cst_38 {dimension_numbers = #tpu.dot_dimension_numbers<[1], [1], [0], [0], [0, 0, 1, 0], [], []>} : vector<128x64xbf16>, vector<128x64xbf16>, vector<128x128xf32> -> vector<128x128xf32>
      %cst_39 = arith.constant dense<0xFF800000> : vector<128xf32>
      %67 = vector.multi_reduction <maximumf>, %66, %cst_39 [1] : vector<128x128xf32> to vector<128xf32>
      %68 = vector.shape_cast %67 : vector<128xf32> to vector<128x1xf32>
      %69 = vector.broadcast %68 : vector<128x1xf32> to vector<128x128xf32>
      %70 = arith.subf %66, %69 : vector<128x128xf32>
      %71 = math.exp %70 : vector<128x128xf32>
      %cst_40 = arith.constant dense<0.000000e+00> : vector<128xf32>
      %72 = vector.multi_reduction <add>, %71, %cst_40 [1] : vector<128x128xf32> to vector<128xf32>
      %73 = vector.shape_cast %72 : vector<128xf32> to vector<128x1xf32>
      %74 = tpu.reciprocal %73 {approx = true} : vector<128x1xf32> -> vector<128x1xf32>
      %75 = vector.broadcast %74 : vector<128x1xf32> to vector<128x128xf32>
      %76 = arith.mulf %71, %75 : vector<128x128xf32>
      %77 = arith.truncf %76 : vector<128x128xf32> to vector<128x128xbf16>
      %cst_41 = arith.constant dense<0.000000e+00> : vector<128x64xf32>
      %78 = tpu.matmul %77, %65, %cst_41 {dimension_numbers = #tpu.dot_dimension_numbers<[1], [0], [0], [1], [0, 0, 1, 1], [], []>} : vector<128x128xbf16>, vector<128x64xbf16>, vector<128x64xf32> -> vector<128x64xf32>
      %c0_42 = arith.constant 0 : index
      %c0_43 = arith.constant 0 : index
      %79 = vector.load %arg16[%c0_42, %c0_43] : memref<128x256xf32, #tpu.memory_space<vmem>>, vector<128x256xf32>
      %80 = arith.truncf %78 : vector<128x64xf32> to vector<128x64xbf16>
      %c0_44 = arith.constant 0 : index
      %c0_45 = arith.constant 0 : index
      %81 = vector.load %arg7[%c0_44, %c0_45] : memref<256x256xbf16, #tpu.memory_space<vmem>>, vector<64x256xbf16>
      %cst_46 = arith.constant dense<0.000000e+00> : vector<128x256xf32>
      %82 = tpu.matmul %80, %81, %cst_46 {dimension_numbers = #tpu.dot_dimension_numbers<[1], [0], [0], [1], [0, 0, 1, 1], [], []>} : vector<128x64xbf16>, vector<64x256xbf16>, vector<128x256xf32> -> vector<128x256xf32>
      %83 = arith.addf %79, %82 : vector<128x256xf32>
      %c0_47 = arith.constant 0 : index
      %c0_48 = arith.constant 0 : index
      %84 = vector.load %arg16[%c0_47, %c0_48] : memref<128x256xf32, #tpu.memory_space<vmem>>, vector<128x256xf32>
      tpu.vector_store %arg16[%c0_47, %c0_48], %83 {strides = array<i32>} : memref<128x256xf32, #tpu.memory_space<vmem>>, vector<128x256xf32>,
      %85 = vector.extract_strided_slice %58 {offsets = [0, 64], sizes = [128, 64], strides = [1, 1]} : vector<128x768xbf16> to vector<128x64xbf16>
      %86 = vector.extract_strided_slice %58 {offsets = [0, 320], sizes = [128, 64], strides = [1, 1]} : vector<128x768xbf16> to vector<128x64xbf16>
      %87 = vector.extract_strided_slice %58 {offsets = [0, 576], sizes = [128, 64], strides = [1, 1]} : vector<128x768xbf16> to vector<128x64xbf16>
      %cst_49 = arith.constant dense<0.000000e+00> : vector<128x128xf32>
      %88 = tpu.matmul %85, %86, %cst_49 {dimension_numbers = #tpu.dot_dimension_numbers<[1], [1], [0], [0], [0, 0, 1, 0], [], []>} : vector<128x64xbf16>, vector<128x64xbf16>, vector<128x128xf32> -> vector<128x128xf32>
      %cst_50 = arith.constant dense<0xFF800000> : vector<128xf32>
      %89 = vector.multi_reduction <maximumf>, %88, %cst_50 [1] : vector<128x128xf32> to vector<128xf32>
      %90 = vector.shape_cast %89 : vector<128xf32> to vector<128x1xf32>
      %91 = vector.broadcast %90 : vector<128x1xf32> to vector<128x128xf32>
      %92 = arith.subf %88, %91 : vector<128x128xf32>
      %93 = math.exp %92 : vector<128x128xf32>
      %cst_51 = arith.constant dense<0.000000e+00> : vector<128xf32>
      %94 = vector.multi_reduction <add>, %93, %cst_51 [1] : vector<128x128xf32> to vector<128xf32>
      %95 = vector.shape_cast %94 : vector<128xf32> to vector<128x1xf32>
      %96 = tpu.reciprocal %95 {approx = true} : vector<128x1xf32> -> vector<128x1xf32>
      %97 = vector.broadcast %96 : vector<128x1xf32> to vector<128x128xf32>
      %98 = arith.mulf %93, %97 : vector<128x128xf32>
      %99 = arith.truncf %98 : vector<128x128xf32> to vector<128x128xbf16>
      %cst_52 = arith.constant dense<0.000000e+00> : vector<128x64xf32>
      %100 = tpu.matmul %99, %87, %cst_52 {dimension_numbers = #tpu.dot_dimension_numbers<[1], [0], [0], [1], [0, 0, 1, 1], [], []>} : vector<128x128xbf16>, vector<128x64xbf16>, vector<128x64xf32> -> vector<128x64xf32>
      %c0_53 = arith.constant 0 : index
      %c0_54 = arith.constant 0 : index
      %101 = vector.load %arg16[%c0_53, %c0_54] : memref<128x256xf32, #tpu.memory_space<vmem>>, vector<128x256xf32>
      %102 = arith.truncf %100 : vector<128x64xf32> to vector<128x64xbf16>
      %c64 = arith.constant 64 : index
      %c0_55 = arith.constant 0 : index
      %103 = vector.load %arg7[%c64, %c0_55] : memref<256x256xbf16, #tpu.memory_space<vmem>>, vector<64x256xbf16>
      %cst_56 = arith.constant dense<0.000000e+00> : vector<128x256xf32>
      %104 = tpu.matmul %102, %103, %cst_56 {dimension_numbers = #tpu.dot_dimension_numbers<[1], [0], [0], [1], [0, 0, 1, 1], [], []>} : vector<128x64xbf16>, vector<64x256xbf16>, vector<128x256xf32> -> vector<128x256xf32>
      %105 = arith.addf %101, %104 : vector<128x256xf32>
      %c0_57 = arith.constant 0 : index
      %c0_58 = arith.constant 0 : index
      %106 = vector.load %arg16[%c0_57, %c0_58] : memref<128x256xf32, #tpu.memory_space<vmem>>, vector<128x256xf32>
      tpu.vector_store %arg16[%c0_57, %c0_58], %105 {strides = array<i32>} : memref<128x256xf32, #tpu.memory_space<vmem>>, vector<128x256xf32>,
      %107 = vector.extract_strided_slice %58 {offsets = [0, 128], sizes = [128, 64], strides = [1, 1]} : vector<128x768xbf16> to vector<128x64xbf16>
      %108 = vector.extract_strided_slice %58 {offsets = [0, 384], sizes = [128, 64], strides = [1, 1]} : vector<128x768xbf16> to vector<128x64xbf16>
      %109 = vector.extract_strided_slice %58 {offsets = [0, 640], sizes = [128, 64], strides = [1, 1]} : vector<128x768xbf16> to vector<128x64xbf16>
      %cst_59 = arith.constant dense<0.000000e+00> : vector<128x128xf32>
      %110 = tpu.matmul %107, %108, %cst_59 {dimension_numbers = #tpu.dot_dimension_numbers<[1], [1], [0], [0], [0, 0, 1, 0], [], []>} : vector<128x64xbf16>, vector<128x64xbf16>, vector<128x128xf32> -> vector<128x128xf32>
      %cst_60 = arith.constant dense<0xFF800000> : vector<128xf32>
      %111 = vector.multi_reduction <maximumf>, %110, %cst_60 [1] : vector<128x128xf32> to vector<128xf32>
      %112 = vector.shape_cast %111 : vector<128xf32> to vector<128x1xf32>
      %113 = vector.broadcast %112 : vector<128x1xf32> to vector<128x128xf32>
      %114 = arith.subf %110, %113 : vector<128x128xf32>
      %115 = math.exp %114 : vector<128x128xf32>
      %cst_61 = arith.constant dense<0.000000e+00> : vector<128xf32>
      %116 = vector.multi_reduction <add>, %115, %cst_61 [1] : vector<128x128xf32> to vector<128xf32>
      %117 = vector.shape_cast %116 : vector<128xf32> to vector<128x1xf32>
      %118 = tpu.reciprocal %117 {approx = true} : vector<128x1xf32> -> vector<128x1xf32>
      %119 = vector.broadcast %118 : vector<128x1xf32> to vector<128x128xf32>
      %120 = arith.mulf %115, %119 : vector<128x128xf32>
      %121 = arith.truncf %120 : vector<128x128xf32> to vector<128x128xbf16>
      %cst_62 = arith.constant dense<0.000000e+00> : vector<128x64xf32>
      %122 = tpu.matmul %121, %109, %cst_62 {dimension_numbers = #tpu.dot_dimension_numbers<[1], [0], [0], [1], [0, 0, 1, 1], [], []>} : vector<128x128xbf16>, vector<128x64xbf16>, vector<128x64xf32> -> vector<128x64xf32>
      %c0_63 = arith.constant 0 : index
      %c0_64 = arith.constant 0 : index
      %123 = vector.load %arg16[%c0_63, %c0_64] : memref<128x256xf32, #tpu.memory_space<vmem>>, vector<128x256xf32>
      %124 = arith.truncf %122 : vector<128x64xf32> to vector<128x64xbf16>
      %c128 = arith.constant 128 : index
      %c0_65 = arith.constant 0 : index
      %125 = vector.load %arg7[%c128, %c0_65] : memref<256x256xbf16, #tpu.memory_space<vmem>>, vector<64x256xbf16>
      %cst_66 = arith.constant dense<0.000000e+00> : vector<128x256xf32>
      %126 = tpu.matmul %124, %125, %cst_66 {dimension_numbers = #tpu.dot_dimension_numbers<[1], [0], [0], [1], [0, 0, 1, 1], [], []>} : vector<128x64xbf16>, vector<64x256xbf16>, vector<128x256xf32> -> vector<128x256xf32>
      %127 = arith.addf %123, %126 : vector<128x256xf32>
      %c0_67 = arith.constant 0 : index
      %c0_68 = arith.constant 0 : index
      %128 = vector.load %arg16[%c0_67, %c0_68] : memref<128x256xf32, #tpu.memory_space<vmem>>, vector<128x256xf32>
      tpu.vector_store %arg16[%c0_67, %c0_68], %127 {strides = array<i32>} : memref<128x256xf32, #tpu.memory_space<vmem>>, vector<128x256xf32>,
      %129 = vector.extract_strided_slice %58 {offsets = [0, 192], sizes = [128, 64], strides = [1, 1]} : vector<128x768xbf16> to vector<128x64xbf16>
      %130 = vector.extract_strided_slice %58 {offsets = [0, 448], sizes = [128, 64], strides = [1, 1]} : vector<128x768xbf16> to vector<128x64xbf16>
      %131 = vector.extract_strided_slice %58 {offsets = [0, 704], sizes = [128, 64], strides = [1, 1]} : vector<128x768xbf16> to vector<128x64xbf16>
      %cst_69 = arith.constant dense<0.000000e+00> : vector<128x128xf32>
      %132 = tpu.matmul %129, %130, %cst_69 {dimension_numbers = #tpu.dot_dimension_numbers<[1], [1], [0], [0], [0, 0, 1, 0], [], []>} : vector<128x64xbf16>, vector<128x64xbf16>, vector<128x128xf32> -> vector<128x128xf32>
      %cst_70 = arith.constant dense<0xFF800000> : vector<128xf32>
      %133 = vector.multi_reduction <maximumf>, %132, %cst_70 [1] : vector<128x128xf32> to vector<128xf32>
      %134 = vector.shape_cast %133 : vector<128xf32> to vector<128x1xf32>
      %135 = vector.broadcast %134 : vector<128x1xf32> to vector<128x128xf32>
      %136 = arith.subf %132, %135 : vector<128x128xf32>
      %137 = math.exp %136 : vector<128x128xf32>
      %cst_71 = arith.constant dense<0.000000e+00> : vector<128xf32>
      %138 = vector.multi_reduction <add>, %137, %cst_71 [1] : vector<128x128xf32> to vector<128xf32>
      %139 = vector.shape_cast %138 : vector<128xf32> to vector<128x1xf32>
      %140 = tpu.reciprocal %139 {approx = true} : vector<128x1xf32> -> vector<128x1xf32>
      %141 = vector.broadcast %140 : vector<128x1xf32> to vector<128x128xf32>
      %142 = arith.mulf %137, %141 : vector<128x128xf32>
      %143 = arith.truncf %142 : vector<128x128xf32> to vector<128x128xbf16>
      %cst_72 = arith.constant dense<0.000000e+00> : vector<128x64xf32>
      %144 = tpu.matmul %143, %131, %cst_72 {dimension_numbers = #tpu.dot_dimension_numbers<[1], [0], [0], [1], [0, 0, 1, 1], [], []>} : vector<128x128xbf16>, vector<128x64xbf16>, vector<128x64xf32> -> vector<128x64xf32>
      %c0_73 = arith.constant 0 : index
      %c0_74 = arith.constant 0 : index
      %145 = vector.load %arg16[%c0_73, %c0_74] : memref<128x256xf32, #tpu.memory_space<vmem>>, vector<128x256xf32>
      %146 = arith.truncf %144 : vector<128x64xf32> to vector<128x64xbf16>
      %c192 = arith.constant 192 : index
      %c0_75 = arith.constant 0 : index
      %147 = vector.load %arg7[%c192, %c0_75] : memref<256x256xbf16, #tpu.memory_space<vmem>>, vector<64x256xbf16>
      %cst_76 = arith.constant dense<0.000000e+00> : vector<128x256xf32>
      %148 = tpu.matmul %146, %147, %cst_76 {dimension_numbers = #tpu.dot_dimension_numbers<[1], [0], [0], [1], [0, 0, 1, 1], [], []>} : vector<128x64xbf16>, vector<64x256xbf16>, vector<128x256xf32> -> vector<128x256xf32>
      %149 = arith.addf %145, %148 : vector<128x256xf32>
      %c0_77 = arith.constant 0 : index
      %c0_78 = arith.constant 0 : index
      %150 = vector.load %arg16[%c0_77, %c0_78] : memref<128x256xf32, #tpu.memory_space<vmem>>, vector<128x256xf32>
      tpu.vector_store %arg16[%c0_77, %c0_78], %149 {strides = array<i32>} : memref<128x256xf32, #tpu.memory_space<vmem>>, vector<128x256xf32>,
      %c0_79 = arith.constant 0 : index
      %c0_80 = arith.constant 0 : index
      %151 = vector.load %arg16[%c0_79, %c0_80] : memref<128x256xf32, #tpu.memory_space<vmem>>, vector<128x256xf32>
      %c0_81 = arith.constant 0 : index
      %c0_82 = arith.constant 0 : index
      %152 = vector.load %arg9[%c0_81, %c0_82] : memref<1x256xf32, #tpu.memory_space<vmem>>, vector<1x256xf32>
      %c0_83 = arith.constant 0 : index
      %c0_84 = arith.constant 0 : index
      %153 = vector.load %arg10[%c0_83, %c0_84] : memref<1x256xf32, #tpu.memory_space<vmem>>, vector<1x256xf32>
      %cst_85 = arith.constant dense<0.000000e+00> : vector<128xf32>
      %154 = vector.multi_reduction <add>, %151, %cst_85 [1] : vector<128x256xf32> to vector<128xf32>
      %155 = vector.shape_cast %154 : vector<128xf32> to vector<128x1xf32>
      %cst_86 = arith.constant 2.560000e+02 : f32
      %156 = vector.broadcast %cst_86 : f32 to vector<128x1xf32>
      %157 = arith.divf %155, %156 : vector<128x1xf32>
      %158 = vector.broadcast %157 : vector<128x1xf32> to vector<128x256xf32>
      %159 = arith.subf %151, %158 : vector<128x256xf32>
      %160 = arith.mulf %159, %159 : vector<128x256xf32>
      %cst_87 = arith.constant dense<0.000000e+00> : vector<128xf32>
      %161 = vector.multi_reduction <add>, %160, %cst_87 [1] : vector<128x256xf32> to vector<128xf32>
      %162 = vector.shape_cast %161 : vector<128xf32> to vector<128x1xf32>
      %cst_88 = arith.constant 2.560000e+02 : f32
      %163 = vector.broadcast %cst_88 : f32 to vector<128x1xf32>
      %164 = arith.divf %162, %163 : vector<128x1xf32>
      %165 = vector.broadcast %157 : vector<128x1xf32> to vector<128x256xf32>
      %166 = arith.subf %151, %165 : vector<128x256xf32>
      %cst_89 = arith.constant 9.99999974E-6 : f32
      %167 = vector.broadcast %cst_89 : f32 to vector<128x1xf32>
      %168 = arith.addf %164, %167 : vector<128x1xf32>
      %169 = math.rsqrt %168 : vector<128x1xf32>
      %170 = vector.broadcast %169 : vector<128x1xf32> to vector<128x256xf32>
      %171 = arith.mulf %166, %170 : vector<128x256xf32>
      %172 = vector.broadcast %152 : vector<1x256xf32> to vector<128x256xf32>
      %173 = arith.mulf %171, %172 : vector<128x256xf32>
      %174 = vector.broadcast %153 : vector<1x256xf32> to vector<128x256xf32>
      %175 = arith.addf %173, %174 : vector<128x256xf32>
      %176 = arith.truncf %175 : vector<128x256xf32> to vector<128x256xbf16>
      %c0_90 = arith.constant 0 : index
      %c0_91 = arith.constant 0 : index
      %177 = vector.load %arg17[%c0_90, %c0_91] : memref<128x256xbf16, #tpu.memory_space<vmem>>, vector<128x256xbf16>
      tpu.vector_store %arg17[%c0_90, %c0_91], %176 {strides = array<i32>} : memref<128x256xbf16, #tpu.memory_space<vmem>>, vector<128x256xbf16>,
      %cst_92 = arith.constant 0.000000e+00 : f32
      %178 = vector.broadcast %cst_92 : f32 to vector<128x256xf32>
      %c0_93 = arith.constant 0 : index
      %c0_94 = arith.constant 0 : index
      %179 = vector.load %arg18[%c0_93, %c0_94] : memref<128x256xf32, #tpu.memory_space<vmem>>, vector<128x256xf32>
      tpu.vector_store %arg18[%c0_93, %c0_94], %178 {strides = array<i32>} : memref<128x256xf32, #tpu.memory_space<vmem>>, vector<128x256xf32>,
    } else {
    }
    %c0 = arith.constant 0 : index
    %c0_1 = arith.constant 0 : index
    %3 = vector.load %arg17[%c0, %c0_1] : memref<128x256xbf16, #tpu.memory_space<vmem>>, vector<128x256xbf16>
    %c0_2 = arith.constant 0 : index
    %c0_3 = arith.constant 0 : index
    %4 = vector.load %arg11[%c0_2, %c0_3] : memref<256x1024xbf16, #tpu.memory_space<vmem>>, vector<256x1024xbf16>
    %cst = arith.constant dense<0.000000e+00> : vector<128x1024xf32>
    %5 = tpu.matmul %3, %4, %cst {dimension_numbers = #tpu.dot_dimension_numbers<[1], [0], [0], [1], [0, 0, 1, 1], [], []>} : vector<128x256xbf16>, vector<256x1024xbf16>, vector<128x1024xf32> -> vector<128x1024xf32>
    %c0_4 = arith.constant 0 : index
    %c0_5 = arith.constant 0 : index
    %6 = vector.load %arg12[%c0_4, %c0_5] : memref<1x1024xf32, #tpu.memory_space<vmem>>, vector<1x1024xf32>
    %7 = vector.broadcast %6 : vector<1x1024xf32> to vector<128x1024xf32>
    %8 = arith.addf %5, %7 : vector<128x1024xf32>
    %cst_6 = arith.constant 1.702000e+00 : f32
    %9 = vector.broadcast %cst_6 : f32 to vector<128x1024xf32>
    %10 = arith.mulf %9, %8 : vector<128x1024xf32>
    %11 = arith.negf %10 : vector<128x1024xf32>
    %12 = math.exp %11 : vector<128x1024xf32>
    %cst_7 = arith.constant 1.000000e+00 : f32
    %13 = vector.broadcast %cst_7 : f32 to vector<128x1024xf32>
    %14 = arith.addf %13, %12 : vector<128x1024xf32>
    %15 = arith.divf %13, %14 : vector<128x1024xf32>
    %16 = arith.mulf %8, %15 : vector<128x1024xf32>
    %c0_8 = arith.constant 0 : index
    %c0_9 = arith.constant 0 : index
    %17 = vector.load %arg18[%c0_8, %c0_9] : memref<128x256xf32, #tpu.memory_space<vmem>>, vector<128x256xf32>
    %18 = arith.truncf %16 : vector<128x1024xf32> to vector<128x1024xbf16>
    %c0_10 = arith.constant 0 : index
    %c0_11 = arith.constant 0 : index
    %19 = vector.load %arg13[%c0_10, %c0_11] : memref<1024x256xbf16, #tpu.memory_space<vmem>>, vector<1024x256xbf16>
    %cst_12 = arith.constant dense<0.000000e+00> : vector<128x256xf32>
    %20 = tpu.matmul %18, %19, %cst_12 {dimension_numbers = #tpu.dot_dimension_numbers<[1], [0], [0], [1], [0, 0, 1, 1], [], []>} : vector<128x1024xbf16>, vector<1024x256xbf16>, vector<128x256xf32> -> vector<128x256xf32>
    %21 = arith.addf %17, %20 : vector<128x256xf32>
    %c0_13 = arith.constant 0 : index
    %c0_14 = arith.constant 0 : index
    %22 = vector.load %arg18[%c0_13, %c0_14] : memref<128x256xf32, #tpu.memory_space<vmem>>, vector<128x256xf32>
    tpu.vector_store %arg18[%c0_13, %c0_14], %21 {strides = array<i32>} : memref<128x256xf32, #tpu.memory_space<vmem>>, vector<128x256xf32>,
    %c0_i32_15 = arith.constant 0 : i32
    %23 = arith.cmpi eq, %arg1, %c0_i32_15 : i32
    %24 = arith.extui %23 : i1 to i32
    %c0_i32_16 = arith.constant 0 : i32
    %25 = arith.cmpi ne, %24, %c0_i32_16 : i32
    scf.if %25 {
      %c0_17 = arith.constant 0 : index
      %c0_18 = arith.constant 0 : index
      %26 = vector.load %arg16[%c0_17, %c0_18] : memref<128x256xf32, #tpu.memory_space<vmem>>, vector<128x256xf32>
      %c0_19 = arith.constant 0 : index
      %c0_20 = arith.constant 0 : index
      %27 = vector.load %arg18[%c0_19, %c0_20] : memref<128x256xf32, #tpu.memory_space<vmem>>, vector<128x256xf32>
      %28 = arith.addf %26, %27 : vector<128x256xf32>
      %c0_21 = arith.constant 0 : index
      %c0_22 = arith.constant 0 : index
      %29 = vector.load %arg14[%c0_21, %c0_22] : memref<1x256xf32, #tpu.memory_space<vmem>>, vector<1x256xf32>
      %30 = vector.broadcast %29 : vector<1x256xf32> to vector<128x256xf32>
      %31 = arith.addf %28, %30 : vector<128x256xf32>
      %c0_23 = arith.constant 0 : index
      %c0_24 = arith.constant 0 : index
      %c0_25 = arith.constant 0 : index
      %32 = vector.load %arg15[%c0_23, %c0_24, %c0_25] : memref<1x128x256xf32, #tpu.memory_space<vmem>>, vector<1x128x256xf32>
      %33 = vector.shape_cast %32 : vector<1x128x256xf32> to vector<128x256xf32>
      %34 = vector.shape_cast %31 : vector<128x256xf32> to vector<1x128x256xf32>
      tpu.vector_store %arg15[%c0_23, %c0_24, %c0_25], %34 {strides = array<i32>} : memref<1x128x256xf32, #tpu.memory_space<vmem>>, vector<1x128x256xf32>,
    } else {
    }
    return
  }
  func.func @transform_0(%arg0: i32, %arg1: i32) -> (i32, i32, i32) {
    %c0_i32 = arith.constant 0 : i32
    %c0_i32_0 = arith.constant 0 : i32
    %c0_i32_1 = arith.constant 0 : i32
    return %arg0, %c0_i32, %c0_i32_0 : i32, i32, i32
  }
  func.func @transform_1(%arg0: i32, %arg1: i32) -> (i32, i32) {
    %c0_i32 = arith.constant 0 : i32
    %c0_i32_0 = arith.constant 0 : i32
    %c0_i32_1 = arith.constant 0 : i32
    return %c0_i32, %c0_i32_0 : i32, i32
  }
  func.func @transform_2(%arg0: i32, %arg1: i32) -> (i32, i32) {
    %c0_i32 = arith.constant 0 : i32
    %c0_i32_0 = arith.constant 0 : i32
    %c0_i32_1 = arith.constant 0 : i32
    return %c0_i32, %c0_i32_0 : i32, i32
  }
  func.func @transform_3(%arg0: i32, %arg1: i32) -> (i32, i32) {
    %c0_i32 = arith.constant 0 : i32
    %c0_i32_0 = arith.constant 0 : i32
    %c0_i32_1 = arith.constant 0 : i32
    return %c0_i32, %c0_i32_0 : i32, i32
  }
  func.func @transform_4(%arg0: i32, %arg1: i32) -> (i32, i32) {
    %c0_i32 = arith.constant 0 : i32
    %c0_i32_0 = arith.constant 0 : i32
    %c0_i32_1 = arith.constant 0 : i32
    return %c0_i32, %c0_i32_0 : i32, i32
  }
  func.func @transform_5(%arg0: i32, %arg1: i32) -> (i32, i32) {
    %c0_i32 = arith.constant 0 : i32
    %c0_i32_0 = arith.constant 0 : i32
    %c0_i32_1 = arith.constant 0 : i32
    return %c0_i32, %c0_i32_0 : i32, i32
  }
  func.func @transform_6(%arg0: i32, %arg1: i32) -> (i32, i32) {
    %c0_i32 = arith.constant 0 : i32
    %c0_i32_0 = arith.constant 0 : i32
    %c0_i32_1 = arith.constant 0 : i32
    return %c0_i32, %c0_i32_0 : i32, i32
  }
  func.func @transform_7(%arg0: i32, %arg1: i32) -> (i32, i32) {
    %c0_i32 = arith.constant 0 : i32
    %c0_i32_0 = arith.constant 0 : i32
    %c0_i32_1 = arith.constant 0 : i32
    return %c0_i32, %c0_i32_0 : i32, i32
  }
  func.func @transform_8(%arg0: i32, %arg1: i32) -> (i32, i32) {
    %c0_i32 = arith.constant 0 : i32
    %c0_i32_0 = arith.constant 0 : i32
    %c0_i32_1 = arith.constant 0 : i32
    return %c0_i32, %c0_i32_0 : i32, i32
  }
  func.func @transform_9(%arg0: i32, %arg1: i32) -> (i32, i32) {
    %c0_i32 = arith.constant 0 : i32
    %c0_i32_0 = arith.constant 0 : i32
    return %c0_i32, %arg1 : i32, i32
  }
  func.func @transform_10(%arg0: i32, %arg1: i32) -> (i32, i32) {
    %c0_i32 = arith.constant 0 : i32
    %c0_i32_0 = arith.constant 0 : i32
    return %c0_i32, %arg1 : i32, i32
  }
  func.func @transform_11(%arg0: i32, %arg1: i32) -> (i32, i32) {
    %c0_i32 = arith.constant 0 : i32
    %c0_i32_0 = arith.constant 0 : i32
    return %arg1, %c0_i32 : i32, i32
  }
  func.func @transform_12(%arg0: i32, %arg1: i32) -> (i32, i32) {
    %c0_i32 = arith.constant 0 : i32
    %c0_i32_0 = arith.constant 0 : i32
    %c0_i32_1 = arith.constant 0 : i32
    return %c0_i32, %c0_i32_0 : i32, i32
  }
  func.func @transform_13(%arg0: i32, %arg1: i32) -> (i32, i32, i32) {
    %c0_i32 = arith.constant 0 : i32
    %c0_i32_0 = arith.constant 0 : i32
    %c0_i32_1 = arith.constant 0 : i32
    return %arg0, %c0_i32, %c0_i32_0 : i32, i32, i32
  }
}

</mosaic_0001>

<bundles_post_ra>
// kernel: tpu_custom_call.1
= control target key start
LH: loop header
LB: loop body
LE: loop exit
PB: predicated region body
PF: predicated region fallthrough
CT: control target
= control target key end

     0   :  { %s16459_s0 = inlined_call_operand.hbm [shape: f32[2,128,256], index: 0, kind: input, shape index: {}]   ;;  %s16460_s1 = inlined_call_operand.hbm [shape: f32[1,256], index: 1, kind: input, shape index: {}]   ;;  %s16461_s2 = inlined_call_operand.hbm [shape: f32[1,256], index: 2, kind: input, shape index: {}]   ;;  %s16462_s3 = inlined_call_operand.hbm [shape: bf16[256,768], index: 3, kind: input, shape index: {}]   ;;  %s16463_s4 = inlined_call_operand.vmem [shape: f32[1,768], index: 4, kind: input, shape index: {}]   ;;  %s16464_s5 = inlined_call_operand.hbm [shape: bf16[256,256], index: 5, kind: input, shape index: {}]   ;;  %s16465_s6 = inlined_call_operand.vmem [shape: f32[1,256], index: 6, kind: input, shape index: {}]   ;;  %s16466_s7 = inlined_call_operand.hbm [shape: f32[1,256], index: 7, kind: input, shape index: {}]   ;;  %s16467_s8 = inlined_call_operand.hbm [shape: f32[1,256], index: 8, kind: input, shape index: {}]   ;;  %s16468_s9 = inlined_call_operand.hbm [shape: bf16[256,1024], index: 9, kind: input, shape index: {}]   ;;  %s16469_s10 = inlined_call_operand.vmem [shape: f32[1,1024], index: 10, kind: input, shape index: {}]   ;;  %s16470_s11 = inlined_call_operand.hbm [shape: bf16[1024,256], index: 11, kind: input, shape index: {}]   ;;  %s16471_s12 = inlined_call_operand.vmem [shape: f32[1,256], index: 12, kind: input, shape index: {}]   ;;  %s16472_s13 = inlined_call_operand.hbm [shape: f32[2,128,256], index: 13, kind: output, shape index: {}]  }
   0x1   :  { %16577 = sst [smem:[#allocation80_spill]] %s16460_s1 }
   0x2   :  { %16578 = sst [smem:[#allocation81_spill]] %s16461_s2 }
   0x3   :  { %16579 = sst [smem:[#allocation82_spill]] %s16462_s3 }
   0x4   :  { %16580 = sst [smem:[#allocation83_spill]] %s16464_s5 }
   0x5   :  { %16581 = sst [smem:[#allocation84_spill]] %s16466_s7 }
   0x6   :  { %16582 = sst [smem:[#allocation85_spill]] %s16467_s8 }
   0x7   :  { %16583 = sst [smem:[#allocation86_spill]] %s16468_s9 }
   0x8   :  { %16584 = sst [smem:[#allocation87_spill]] %s16471_s12 }
   0x9   :  { %16585 = sst [smem:[#allocation88_spill]] %s16472_s13 }
   0xa   :  { %18 = vsyncpa [#allocation6], 0 }
   0xb   :  { %20 = vsyncpa [#allocation6 + $0x1], 0 }
   0xc   :  { %21 = vsyncpa [#allocation9], 0 }
   0xd   :  { %22 = vsyncpa [#allocation12], 0 }
   0xe   :  { %23 = vsyncpa [#allocation15], 0 }
   0xf   :  { %24 = vsyncpa [#allocation18], 0 }
  0x10   :  { %25 = vsyncpa [#allocation7], 0 }
  0x11   :  { %27 = vsyncpa [#allocation7 + $0x1], 0  ;;  %s12544_s25 = smov 0   ;;  %s12546_s26 = smov 0  }
  0x12   :  { %s12548_s27 = smov 0   ;;  %s12550_s28 = smov 0  }
  0x13   :  { %s12552_s29 = smov 0   ;;  %s12554_s30 = smov 0  }
  0x14 LB: > { %16586 = sst [smem:[#allocation27_spill]] %s12442_s28  ;;  %s16473_s14 = sadd.s32 4294967295, %s12450_s30   ;;  %s12450_s30 = sphi %s12554_s30, %s33_s30   ;;  %s12446_s29 = sphi %s12552_s29, %s16869_s29   ;;  %s12442_s28 = sphi %s12550_s28, %s16868_s28   ;;  %s12438_s27 = sphi %s12548_s27, %s16867_s27   ;;  %s12434_s26 = sphi %s12546_s26, %s16866_s26   ;;  %s12430_s25 = sphi %s12544_s25, %s16865_s25  }
  0x15   : > { %p9625_p0 = scmp.ge.s32.totalorder %s12450_s30, 1  ;;  %p12578_p1 = scmp.eq.s32.totalorder %s16473_s14, 0 }
  0x16   : > { %p369_p2 = scmp.lt.s32.totalorder %s12450_s30, 3  ;;  %s12452_s17 = smov [#allocation8]  }
  0x17   : > { %s16587_s15 = scalar_select %p12578_p1, 1, 0 }
  0x18   : > { %p12583_p3 = pnand %p9625_p0, %p369_p2  ;;  %s382_s18 = sshll.u32 %s12452_s17, 4  ;;  %s383_s18 = int_to_ptr.vmem [resolvable:$true] %s382_s18 }
  0x19   : > { %s12453_s19 = smov [#allocation11]   ;;  %s12454_s22 = smov [#allocation14]  }
  0x1a   : > { %s16588_s16 = scalar_select %p12583_p3, 1, 0 }
  0x1b   : > { %p10749_p5 = pneg %p12583_p3  ;;  %s403_s20 = sshll.u32 %s12453_s19, 4  ;;  %s404_s20 = int_to_ptr.vmem [resolvable:$true] %s403_s20 }
  0x1c   : > { %s436_s23 = sshll.u32 %s12454_s22, 4  ;;  %s12129_s17 = scalar_lea.vmem %s383_s18, 32  ;;  %s437_s23 = int_to_ptr.vmem [resolvable:$true] %s436_s23 }
  0x1d   : > { %p12592_p6 = pnand %p10749_p5, %p12578_p1  ;;  %p12130_p8 = scmp.ne.s32.totalorder %s383_s18, %s12129_s17 }
  0x1e   : > { %p12137_p11 = scmp.lt.s32.totalorder %s383_s18, %s383_s18  ;;  %p12138_p12 = scmp.lt.s32.totalorder %s12129_s17, %s12129_s17 }
  0x1f   : > { %p12598_p7 = pneg %p12592_p6 }
  0x20   : > { %p12139_p13 = por %p12138_p12, %p12137_p11 }
  0x21   : > { %p12132_p9 = pnand %p12130_p8, %p12598_p7 }
  0x23   : > { %p12133_p10 = pneg %p12132_p9 }
  0x25   : > { %p12140_p0 = pnand %p12139_p13, %p12133_p10 }
  0x27   : > { %12143 = shalt.err (!%p12140_p0)
}
  0x28   : > { %s16591_s1 = sld [smem:[#allocation80_spill]]  ;;  %s12155_s14 = scalar_lea.vmem %s404_s20, 12288 }
  0x29   : > { %p12156_p2 = scmp.ne.s32.totalorder %s404_s20, %s12155_s14  ;;  %p12163_p3 = scmp.lt.s32.totalorder %s404_s20, %s404_s20 }
  0x2a   : > { %p12164_p8 = scmp.lt.s32.totalorder %s12155_s14, %s12155_s14 }
  0x2b   : > { %p12158_p5 = pnand %p12156_p2, %p12598_p7 }
  0x2c   : > { %p12165_p9 = por %p12164_p8, %p12163_p3 }
  0x2d   : > { %p12159_p4 = pneg %p12158_p5 }
  0x2e   : > { %10752 = dma.hbm_to_vmem [thread:$0]  (!%p12592_p6), %s16591_s1, 32, %s383_s18, [#allocation9]  }
  0x2f   : > { %p12166_p1 = pnand %p12165_p9, %p12159_p4 }
  0x31   : > { %12169 = shalt.err (!%p12166_p1)
}
  0x32   : > { %s12455_s17 = smov 384   ;;  %s12456_s13 = smov 24  }
  0x33   : > { %s16592_s3 = sld [smem:[#allocation82_spill]]  ;;  %s12181_s18 = scalar_lea.vmem %s437_s23, 32 }
  0x34   : > { %p12182_p10 = scmp.ne.s32.totalorder %s437_s23, %s12181_s18  ;;  %p12189_p13 = scmp.lt.s32.totalorder %s437_s23, %s437_s23 }
  0x35   : > { %p12190_p0 = scmp.lt.s32.totalorder %s12181_s18, %s12181_s18 }
  0x36   : > { %p12184_p11 = pnand %p12182_p10, %p12598_p7 }
  0x37   : > { %p12191_p3 = por %p12190_p0, %p12189_p13 }
  0x38   : > { %p12185_p12 = pneg %p12184_p11 }
  0x39   : > { %10758 = dma.hbm_to_vmem [thread:$0]  (!%p12592_p6), %s16592_s3, 12288, %s404_s20, [#allocation12], %s12455_s17, %s12455_s17, %s12456_s13  }
  0x3a   : > { %p12192_p4 = pnand %p12191_p3, %p12185_p12 }
  0x3c   : > { %12195 = shalt.err (!%p12192_p4)
}
  0x3d   : > { %s16593_s7 = sld [smem:[#allocation84_spill]]  ;;  %s12457_s12 = smov [#allocation17]  }
  0x3e   : > { %s460_s13 = sshll.u32 %s12457_s12, 4  ;;  %s461_s13 = int_to_ptr.vmem [resolvable:$true] %s460_s13 }
  0x3f   : > { %s12207_s28 = scalar_lea.vmem %s461_s13, 16384  ;;  %p12215_p8 = scmp.lt.s32.totalorder %s461_s13, %s461_s13 }
  0x40   : > { %p12208_p1 = scmp.ne.s32.totalorder %s461_s13, %s12207_s28  ;;  %p12216_p9 = scmp.lt.s32.totalorder %s12207_s28, %s12207_s28 }
  0x42   : > { %p12210_p2 = pnand %p12208_p1, %p12598_p7  ;;  %p12217_p10 = por %p12216_p9, %p12215_p8 }
  0x43   : > { %10764 = dma.hbm_to_vmem [thread:$0]  (!%p12592_p6), %s16593_s7, 32, %s437_s23, [#allocation15]  }
  0x44   : > { %p12211_p5 = pneg %p12210_p2 }
  0x46   : > { %p12218_p11 = pnand %p12217_p10, %p12211_p5 }
  0x48   : > { %12221 = shalt.err (!%p12218_p11)
}
  0x49   : > { %s12458_s20 = smov 512   ;;  %s12459_s22 = smov 32  }
  0x4a   : > { %s16594_s9 = sld [smem:[#allocation86_spill]]  ;;  %s12460_s18 = smov [#allocation10]  }
  0x4b   : > { %s393_s14 = sshll.u32 %s12460_s18, 4  ;;  %s12461_s19 = smov [#allocation13]   ;;  %s394_s14 = int_to_ptr.vmem [resolvable:$true] %s393_s14 }
  0x4c   : > { %s419_s12 = sshll.u32 %s12461_s19, 4  ;;  %s12233_s1 = scalar_lea.vmem %s394_s14, 32  ;;  %s420_s12 = int_to_ptr.vmem [resolvable:$true] %s419_s12 }
  0x4d   : > { %p12234_p12 = scmp.ne.s32.totalorder %s394_s14, %s12233_s1  ;;  %p12241_p3 = scmp.lt.s32.totalorder %s394_s14, %s394_s14 }
  0x4e   : > { %p12242_p4 = scmp.lt.s32.totalorder %s12233_s1, %s12233_s1 }
  0x4f   : > { %p12236_p13 = pnand %p12234_p12, %p12598_p7 }
  0x50   : > { %10770 = dma.hbm_to_vmem [thread:$0]  (!%p12592_p6), %s16594_s9, 16384, %s461_s13, [#allocation18], %s12458_s20, %s12458_s20, %s12459_s22  }
  0x51   : > { %p12237_p0 = pneg %p12236_p13  ;;  %p12243_p1 = por %p12242_p4, %p12241_p3 }
  0x53   : > { %p12244_p2 = pnand %p12243_p1, %p12237_p0 }
  0x55   : > { %12247 = shalt.err (!%p12244_p2)
}
  0x56   : > { %s16595_s2 = sld [smem:[#allocation81_spill]]  ;;  %s12259_s20 = scalar_lea.vmem %s420_s12, 4096 }
  0x57   : > { %p12260_p5 = scmp.ne.s32.totalorder %s420_s12, %s12259_s20  ;;  %p12267_p10 = scmp.lt.s32.totalorder %s420_s12, %s420_s12 }
  0x58   : > { %p12268_p11 = scmp.lt.s32.totalorder %s12259_s20, %s12259_s20 }
  0x59   : > { %p12262_p8 = pnand %p12260_p5, %p12598_p7 }
  0x5a   : > { %p12269_p12 = por %p12268_p11, %p12267_p10 }
  0x5b   : > { %p12263_p9 = pneg %p12262_p8 }
  0x5c   : > { %10755 = dma.hbm_to_vmem [thread:$0]  (!%p12592_p6), %s16595_s2, 32, %s394_s14, [#allocation9]  }
  0x5d   : > { %p12270_p13 = pnand %p12269_p12, %p12263_p9 }
  0x5f   : > { %12273 = shalt.err (!%p12270_p13)
}
  0x60   : > { %s12462_s1 = smov 128   ;;  %s12463_s22 = smov 8  }
  0x61   : > { %s16596_s5 = sld [smem:[#allocation83_spill]]  ;;  %s12464_s18 = smov [#allocation16]  }
  0x62   : > { %s447_s14 = sshll.u32 %s12464_s18, 4  ;;  %s12465_s19 = smov [#allocation19]   ;;  %s448_s14 = int_to_ptr.vmem [resolvable:$true] %s447_s14 }
  0x63   : > { %s485_s28 = sshll.u32 %s12465_s19, 4  ;;  %s12285_s13 = scalar_lea.vmem %s448_s14, 32  ;;  %s486_s28 = int_to_ptr.vmem [resolvable:$true] %s485_s28 }
  0x64   : > { %p12286_p0 = scmp.ne.s32.totalorder %s448_s14, %s12285_s13  ;;  %p12293_p1 = scmp.lt.s32.totalorder %s448_s14, %s448_s14 }
  0x65   : > { %p12294_p2 = scmp.lt.s32.totalorder %s12285_s13, %s12285_s13 }
  0x66   : > { %p12288_p3 = pnand %p12286_p0, %p12598_p7 }
  0x67   : > { %10761 = dma.hbm_to_vmem [thread:$0]  (!%p12592_p6), %s16596_s5, 4096, %s420_s12, [#allocation12], %s12462_s1, %s12462_s1, %s12463_s22  }
  0x68   : > { %p12289_p4 = pneg %p12288_p3  ;;  %p12295_p5 = por %p12294_p2, %p12293_p1 }
  0x6a   : > { %p12296_p8 = pnand %p12295_p5, %p12289_p4 }
  0x6c   : > { %12299 = shalt.err (!%p12296_p8)
}
  0x6d   : > { %s16597_s8 = sld [smem:[#allocation85_spill]]  ;;  %s12311_s17 = scalar_lea.vmem %s486_s28, 16384 }
  0x6e   : > { %p12312_p9 = scmp.ne.s32.totalorder %s486_s28, %s12311_s17  ;;  %p12319_p12 = scmp.lt.s32.totalorder %s486_s28, %s486_s28 }
  0x6f   : > { %p12320_p13 = scmp.lt.s32.totalorder %s12311_s17, %s12311_s17 }
  0x70   : > { %p12314_p10 = pnand %p12312_p9, %p12598_p7 }
  0x71   : > { %p12321_p0 = por %p12320_p13, %p12319_p12 }
  0x72   : > { %p12315_p11 = pneg %p12314_p10 }
  0x73   : > { %10767 = dma.hbm_to_vmem [thread:$0]  (!%p12592_p6), %s16597_s8, 32, %s448_s14, [#allocation15]  }
  0x74   : > { %p12322_p3 = pnand %p12321_p0, %p12315_p11 }
  0x76   : > { %12325 = shalt.err (!%p12322_p3)
}
  0x77   : > { %10773 = dma.hbm_to_vmem [thread:$0]  (!%p12592_p6), %s16470_s11, 16384, %s486_s28, [#allocation18], %s12462_s1, %s12462_s1, %s12463_s22  }
  0x78   : > { %s9624_s21 = sadd.s32 4294967294, %s12450_s30   ;;  %s45_s24 = sadd.s32 1, %s12446_s29 }
  0x79   : > { %p47_p7 = scmp.ge.s32.totalorder %s45_s24, 2  ;;  %s52_s14 = sadd.s32 1, %s12438_s27 }
  0x7a   : > { %p59_p4 = scmp.ne.s32.totalorder %s12438_s27, %s12434_s26  ;;  %p60_p1 = scmp.eq.s32.totalorder %s12450_s30, 0 }
  0x7b   : > { %s16871_s24 = smov (%p47_p7, %s45_s24), 0  ;;  %p65_p5 = scmp.ne.s32.totalorder %s12434_s26, %s12430_s25 }
  0x7c   : > { %p12672_p2 = por %p60_p1, %p59_p4  ;;  %s49_s1 = ssub.s32 %s12446_s29, %s16871_s24 }
  0x7d   : > { %s16599_s22 = sadd.s32 4294967295, %s12450_s30   ;;  %p50_p8 = scmp.eq.s32.totalorder %s49_s1, 0 }
  0x7e   : > { %p356_p6 = scmp.eq.s32.totalorder %s16599_s22, 1  ;;  %p16600_p9 = scmp.ne.s32.totalorder %s16587_s15, 0 }
  0x7f   : > { %p362_p12 = scmp.eq.s32.totalorder %s9624_s21, 1  ;;  %p10790_p0 = scmp.lt.s32.totalorder %s12450_s30, 2 }
  0x80   : > { %p12684_p10 = por %p16600_p9, %p65_p5  ;;  %p12688_p11 = por %p356_p6, %p59_p4 }
  0x81   : > { %s12693_s20 = scalar_select %p50_p8, %s12438_s27, %s52_s14  }
  0x82   : > { %p12695_p13 = por %p362_p12, %p65_p5  ;;  %s502_s17 = sand.u32 1, %s12438_s27  }
  0x83   : > { %s10263_s23 = sshll.u32 %s12446_s29, 12  ;;  %s9636_s18 = sshll.u32 %s502_s17, 8 }
  0x84   : > { %s512_s2 = scalar_lea.hbm %s16459_s0, %s10263_s23  ;;  %s506_s3 = scalar_lea.vmem [#allocation5], %s9636_s18 }
  0x85   : > { %s513_s5 = sshll.u32 %s506_s3, 4  ;;  %p12707_p3 = pnand %p10790_p0, %p12672_p2  ;;  %s514_s5 = int_to_ptr.vmem [resolvable:$true] %s513_s5 }
  0x86   : > { %s503_s21 = scalar_lea.sflag [#allocation6], %s502_s17  ;;  %s12339_s14 = scalar_lea.vmem %s514_s5, 4096 }
  0x87   : > { %p12328_p7 = pneg %p12707_p3  ;;  %p12340_p4 = scmp.ne.s32.totalorder %s514_s5, %s12339_s14 }
  0x88   : > { %s12466_s8 = smov [#allocation5]  }
  0x89   : > { %p12342_p1 = pnand %p12340_p4, %p12328_p7  ;;  %s12344_s9 = sshll.u32 %s12466_s8, 4  ;;  %s12345_s9 = int_to_ptr.vmem [resolvable:$false] %s12344_s9 }
  0x8a   : > { %s12346_s23 = scalar_lea.vmem %s12345_s9, 8192  ;;  %p12347_p6 = scmp.lt.s32.totalorder %s514_s5, %s12345_s9 }
  0x8b   : > { %p12343_p5 = pneg %p12342_p1  ;;  %p12348_p8 = scmp.lt.s32.totalorder %s12346_s23, %s12339_s14 }
  0x8d   : > { %p12349_p9 = por %p12348_p8, %p12347_p6 }
  0x8f   : > { %p12350_p2 = pnand %p12349_p9, %p12343_p5 }
  0x91   : > { %12353 = shalt.err (!%p12350_p2)
}
  0x92   : > { %s12467_s3 = smov 256   ;;  %s12468_s19 = smov 16  }
  0x93   : > { %10777 = dma.hbm_to_vmem [thread:$0]  (!%p12707_p3), %s512_s2, 4096, %s514_s5, %s503_s21, %s12467_s3, %s12467_s3, %s12468_s19  }
  0x94   : > { %p16605_p12 = scmp.ne.s32.totalorder %s16588_s16, 0 }
  0x96   : > { %525 = sbr.rel (%p16605_p12) target bundleno = 4558 (0x11ce), region = 72 }
  0x9b   : > { %s12718_s17 = sand.u32 1, %s12434_s26  }
  0x9c   : > { %s9640_s8 = sshll.u32 %s12718_s17, 8  ;;  %s528_s9 = scalar_lea.sflag [#allocation6], %s12718_s17 }
  0x9d   : > { %s12724_s18 = scalar_lea.vmem [#allocation5], %s9640_s8 }
  0x9e   : > { %12405 = dma.done.wait (%p12684_p10), %s528_s9, 4096  }
  0x9f   : > { %12407 = vsyncadd (%p12684_p10), %s528_s9, 4294963200  ;;  %p16606_p0 = scmp.ne.s32.totalorder %s16587_s15, 0 }
  0xa1   : > { %12409 = dma.done.wait (%p16606_p0), [#allocation9], 64  }
  0xa2   : > { %12411 = vsyncadd (%p16606_p0), [#allocation9], 4294967232 }
  0xa3   : > { %12413 = dma.done.wait (%p16606_p0), [#allocation12], 16384  }
  0xa4   : > { %12415 = vsyncadd (%p16606_p0), [#allocation12], 4294950912 }
  0xa5   : > { %12417 = dma.done.wait (%p16606_p0), [#allocation15], 64  }
  0xa6   : > { %12419 = vsyncadd (%p16606_p0), [#allocation15], 4294967232 }
  0xa7   : > { %12421 = dma.done.wait (%p16606_p0), [#allocation18], 32768  }
  0xa8   : > { %12423 = vsyncadd (%p16606_p0), [#allocation18], 4294934528  ;;  %v12747_v0 = vld [vmem:[%s12724_s18] sm:$0xff]  ;;  %v12750_v1 = vld [vmem:[%s12724_s18 + $0x8] sm:$0xff]  ;;  %vm2086_vm0 = vcmask 523264   ;;  %s12469_s7 = smov 64  }
  0xa9   : > { %v12753_v2 = vld [vmem:[%s12724_s18 + $0x20] sm:$0xff]  ;;  %v656_v3 = vadd.f32 %v12750_v1, %v12747_v0  ;;  %v12758_v4 = vld [vmem:[%s12724_s18 + $0x28] sm:$0xff]  ;;  %v12761_v5 = vld [vmem:[%s12724_s18 + $0x10] sm:$0xff]  ;;  %s16827_s9 = sld [smem:[#allocation87_spill]]  ;;  %s9437_s1 = scalar_lea.sflag [#allocation7], %s12718_s17 }
  0xaa   : > { %v12764_v6 = vld [vmem:[%s12724_s18 + $0x18] sm:$0xff]  ;;  %v662_v7 = vadd.f32 %v12758_v4, %v12753_v2  ;;  %v12769_v8 = vld [vmem:[%s12724_s18 + $0x30] sm:$0xff]  ;;  %v12779_v12 = vld [vmem:[%s12724_s18 + $0x40] sm:$0xff]  ;;  %s16863_s16 = sld [smem:[#allocation88_spill]]  ;;  %s12471_s21 = smov [#allocation20]  }
  0xab   : > { %v12772_v9 = vld [vmem:[%s12724_s18 + $0x38] sm:$0xff]  ;;  %657 = vadd.xlane.f32.xlu0 %v656_v3  ;;  %v659_v10 = vadd.f32 %v12764_v6, %v12761_v5  ;;  %v12782_v13 = vld [vmem:[%s12724_s18 + $0x48] sm:$0xff]  ;;  %v12785_v14 = vld [vmem:[%s12724_s18 + $0x50] sm:$0xff]  ;;  %s12358_s14 = sshll.u32 %s12471_s21, 4  ;;  %s12359_s14 = int_to_ptr.vmem [resolvable:$false] %s12358_s14 }
  0xac   : > { %663 = vadd.xlane.f32.xlu1 %v662_v7  ;;  %v665_v11 = vadd.f32 %v12772_v9, %v12769_v8  ;;  %v12788_v15 = vld [vmem:[%s12724_s18 + $0x58] sm:$0xff]  ;;  %v668_v16 = vadd.f32 %v12782_v13, %v12779_v12  ;;  %v12795_v18 = vld [vmem:[%s12724_s18 + $0x60] sm:$0xff]  ;;  %v12798_v19 = vld [vmem:[%s12724_s18 + $0x68] sm:$0xff]  ;;  %s12360_s23 = scalar_lea.vmem %s12359_s14, 8192 }
  0xad   : > { %v671_v17 = vadd.f32 %v12788_v15, %v12785_v14  ;;  %v12801_v20 = vld [vmem:[%s12724_s18 + $0x70] sm:$0xff]  ;;  %v12804_v21 = vld [vmem:[%s12724_s18 + $0x78] sm:$0xff]  ;;  %v12807_v22 = vld [vmem:[%s12724_s18 + $0x80] sm:$0xff]  ;;  %v674_v24 = vadd.f32 %v12798_v19, %v12795_v18 }
  0xae   : > { %v12810_v23 = vld [vmem:[%s12724_s18 + $0x88] sm:$0xff]  ;;  %v12815_v25 = vld [vmem:[%s12724_s18 + $0x90] sm:$0xff]  ;;  %v12818_v26 = vld [vmem:[%s12724_s18 + $0x98] sm:$0xff]  ;;  %v677_v27 = vadd.f32 %v12804_v21, %v12801_v20 }
  0xaf   : > { %660 = vadd.xlane.f32.xlu0 %v659_v10  ;;  %v12823_v28 = vld [vmem:[%s12724_s18 + $0xa0] sm:$0xff]  ;;  %v12826_v29 = vld [vmem:[%s12724_s18 + $0xa8] sm:$0xff]  ;;  %v680_v30 = vadd.f32 %v12810_v23, %v12807_v22  ;;  %v12831_v31 = vld [vmem:[%s12724_s18 + $0xb0] sm:$0xff]  ;;  %v683_v33 = vadd.f32 %v12818_v26, %v12815_v25 }
  0xb0   : > { %666 = vadd.xlane.f32.xlu1 %v665_v11  ;;  %v12834_v32 = vld [vmem:[%s12724_s18 + $0xb8] sm:$0xff]  ;;  %v12839_v34 = vld [vmem:[%s12724_s18 + $0xc0] sm:$0xff]  ;;  %v12842_v35 = vld [vmem:[%s12724_s18 + $0xc8] sm:$0xff]  ;;  %v686_v36 = vadd.f32 %v12826_v29, %v12823_v28 }
  0xb1   : > { %v12847_v37 = vld [vmem:[%s12724_s18 + $0xd0] sm:$0xff]  ;;  %v12850_v38 = vld [vmem:[%s12724_s18 + $0xd8] sm:$0xff]  ;;  %v689_v39 = vadd.f32 %v12834_v32, %v12831_v31  ;;  %v12855_v40 = vld [vmem:[%s12724_s18 + $0xe0] sm:$0xff]  ;;  %v692_v42 = vadd.f32 %v12842_v35, %v12839_v34 }
  0xb2   : > { %v12858_v41 = vld [vmem:[%s12724_s18 + $0xe8] sm:$0xff]  ;;  %v12863_v43 = vld [vmem:[%s12724_s18 + $0xf0] sm:$0xff]  ;;  %v12866_v44 = vld [vmem:[%s12724_s18 + $0xf8] sm:$0xff]  ;;  %v695_v45 = vadd.f32 %v12850_v38, %v12847_v37 }
  0xb3   : > { %669 = vadd.xlane.f32.xlu0 %v668_v16  ;;  %v698_v46 = vadd.f32 %v12858_v41, %v12855_v40  ;;  %v701_v47 = vadd.f32 %v12866_v44, %v12863_v43  ;;  %v10868_v48 = vld [vmem:[#allocation11 + $0x154] ss:$24 sps:$4 sm:$0xff]   ;;  %v10872_v50 = vld [vmem:[#allocation11 + $0x150] ss:$24 sps:$4 sm:$0xff]   ;;  %v10874_v52 = vld [vmem:[#allocation11 + $0x124] ss:$24 sps:$4 sm:$0xff]  }
  0xb4   : > { %672 = vadd.xlane.f32.xlu1 %v671_v17  ;;  %v10870_v49 = vld [vmem:[#allocation11 + $0x15c] ss:$24 sps:$4 sm:$0xff]   ;;  %v10873_v51 = vld [vmem:[#allocation11 + $0x158] ss:$24 sps:$4 sm:$0xff]   ;;  %v10876_v53 = vld [vmem:[#allocation11 + $0x12c] ss:$24 sps:$4 sm:$0xff]   ;;  %1623 = vmatprep.subr.bf16.mxu0 %v10868_v48 }
  0xb5   : > { %1736 = vmatprep.subr.bf16.mxu1 %v10870_v49  ;;  %1624 = vmatpush1.bf16.msra.mxu0 %v10872_v50  ;;  %v10878_v54 = vld [vmem:[#allocation11 + $0x120] ss:$24 sps:$4 sm:$0xff]   ;;  %v10880_v56 = vld [vmem:[#allocation11 + $0xf4] ss:$24 sps:$4 sm:$0xff]   ;;  %v10884_v58 = vld [vmem:[#allocation11 + $0xf0] ss:$24 sps:$4 sm:$0xff]  }
  0xb6   : > { %1737 = vmatpush1.bf16.msra.mxu1 %v10873_v51  ;;  %v10879_v55 = vld [vmem:[#allocation11 + $0x128] ss:$24 sps:$4 sm:$0xff]   ;;  %1625 = vmatprep.subr.bf16.mxu0 %v10874_v52  ;;  %v10882_v57 = vld [vmem:[#allocation11 + $0xfc] ss:$24 sps:$4 sm:$0xff]   ;;  %v10885_v59 = vld [vmem:[#allocation11 + $0xf8] ss:$24 sps:$4 sm:$0xff]  }
  0xb7   : > { %675 = vadd.xlane.f32.xlu0 %v674_v24  ;;  %1738 = vmatprep.subr.bf16.mxu1 %v10876_v53  ;;  %v10886_v60 = vld [vmem:[#allocation11 + $0xc4] ss:$24 sps:$4 sm:$0xff]   ;;  %v10890_v62 = vld [vmem:[#allocation11 + $0xc0] ss:$24 sps:$4 sm:$0xff]   ;;  %v10892_v3 = vld [vmem:[#allocation11 + $0x94] ss:$24 sps:$4 sm:$0xff]  }
  0xb8   : > { %678 = vadd.xlane.f32.xlu1 %v677_v27  ;;  %v10888_v61 = vld [vmem:[#allocation11 + $0xcc] ss:$24 sps:$4 sm:$0xff]   ;;  %v10891_v63 = vld [vmem:[#allocation11 + $0xc8] ss:$24 sps:$4 sm:$0xff]   ;;  %v10894_v7 = vld [vmem:[#allocation11 + $0x9c] ss:$24 sps:$4 sm:$0xff]  }
  0xb9   : > { %1626 = vmatpush1.bf16.msra.mxu0 %v10878_v54  ;;  %v10896_v10 = vld [vmem:[#allocation11 + $0x90] ss:$24 sps:$4 sm:$0xff]   ;;  %v10898_v16 = vld [vmem:[#allocation11 + $0x64] ss:$24 sps:$4 sm:$0xff]   ;;  %v10902_v24 = vld [vmem:[#allocation11 + $0x60] ss:$24 sps:$4 sm:$0xff]  }
  0xba   : > { %1739 = vmatpush1.bf16.msra.mxu1 %v10879_v55  ;;  %1627 = vmatprep.subr.bf16.mxu0 %v10880_v56  ;;  %v10897_v11 = vld [vmem:[#allocation11 + $0x98] ss:$24 sps:$4 sm:$0xff]   ;;  %v10900_v17 = vld [vmem:[#allocation11 + $0x6c] ss:$24 sps:$4 sm:$0xff]   ;;  %v10903_v27 = vld [vmem:[#allocation11 + $0x68] ss:$24 sps:$4 sm:$0xff]  }
  0xbb   : > { %681 = vadd.xlane.f32.xlu0 %v680_v30  ;;  %1740 = vmatprep.subr.bf16.mxu1 %v10882_v57  ;;  %v10904_v30 = vld [vmem:[#allocation11 + $0x34] ss:$24 sps:$4 sm:$0xff]  }
  0xbc   : > { %684 = vadd.xlane.f32.xlu1 %v683_v33  ;;  %v10906_v33 = vld [vmem:[#allocation11 + $0x3c] ss:$24 sps:$4 sm:$0xff]  }
  0xbd   : > { %1628 = vmatpush1.bf16.msra.mxu0 %v10884_v58  ;;  %v10916_v48 = vld [vmem:[#allocation11 + $0x2d4] ss:$24 sps:$4 sm:$0xff]  }
  0xbe   : > { %1741 = vmatpush1.bf16.msra.mxu1 %v10885_v59  ;;  %1629 = vmatprep.subr.bf16.mxu0 %v10886_v60  ;;  %v10918_v49 = vld [vmem:[#allocation11 + $0x2dc] ss:$24 sps:$4 sm:$0xff]  }
  0xbf   : > { %687 = vadd.xlane.f32.xlu0 %v686_v36  ;;  %1742 = vmatprep.subr.bf16.mxu1 %v10888_v61  ;;  %v10908_v36 = vld [vmem:[#allocation11 + $0x30] ss:$24 sps:$4 sm:$0xff]  }
  0xc0   : > { %690 = vadd.xlane.f32.xlu1 %v689_v39  ;;  %v10909_v39 = vld [vmem:[#allocation11 + $0x38] ss:$24 sps:$4 sm:$0xff]  }
  0xc1   : > { %1630 = vmatpush1.bf16.msra.mxu0 %v10890_v62 }
  0xc2   : > { %1743 = vmatpush1.bf16.msra.mxu1 %v10891_v63  ;;  %1631 = vmatprep.subr.bf16.mxu0 %v10892_v3 }
  0xc3   : > { %693 = vadd.xlane.f32.xlu0 %v692_v42  ;;  %1744 = vmatprep.subr.bf16.mxu1 %v10894_v7  ;;  %v10910_v42 = vld [vmem:[#allocation11 + $0x4] ss:$24 sps:$4 sm:$0xff]  }
  0xc4   : > { %696 = vadd.xlane.f32.xlu1 %v695_v45  ;;  %v10912_v45 = vld [vmem:[#allocation11 + $0xc] ss:$24 sps:$4 sm:$0xff]  }
  0xc5   : > { %1632 = vmatpush1.bf16.msra.mxu0 %v10896_v10 }
  0xc6   : > { %1745 = vmatpush1.bf16.msra.mxu1 %v10897_v11  ;;  %1633 = vmatprep.subr.bf16.mxu0 %v10898_v16 }
  0xc7   : > { %699 = vadd.xlane.f32.xlu0 %v698_v46  ;;  %1746 = vmatprep.subr.bf16.mxu1 %v10900_v17  ;;  %v10914_v46 = vld [vmem:[#allocation11] ss:$24 sps:$4 sm:$0xff]  }
  0xc8   : > { %702 = vadd.xlane.f32.xlu1 %v701_v47  ;;  %v10915_v47 = vld [vmem:[#allocation11 + $0x8] ss:$24 sps:$4 sm:$0xff]  }
  0xc9   : > { %1634 = vmatpush1.bf16.msra.mxu0 %v10902_v24 }
  0xca   : > { %1747 = vmatpush1.bf16.msra.mxu1 %v10903_v27  ;;  %1635 = vmatprep.subr.bf16.mxu0 %v10904_v30 }
  0xcb   : > { %1748 = vmatprep.subr.bf16.mxu1 %v10906_v33 }
  0xcd   : > { %1636 = vmatpush1.bf16.msra.mxu0 %v10908_v36 }
  0xce   : > { %1749 = vmatpush1.bf16.msra.mxu1 %v10909_v39  ;;  %1637 = vmatprep.subr.bf16.mxu0 %v10910_v42 }
  0xcf   : > { %1750 = vmatprep.subr.bf16.mxu1 %v10912_v45 }
  0xd1   : > { %1638 = vmatpush1.bf16.msra.mxu0 %v10914_v46 }
  0xd2   : > { %1751 = vmatpush1.bf16.msra.mxu1 %v10915_v47  ;;  %1639 = vmatprep.subr.bf16.mxu0 %v10916_v48 }
  0xd3   : > { %1752 = vmatprep.subr.bf16.mxu1 %v10918_v49 }
 0x134   : > { %v658_v50 = vpop.xlane.xlu0 %657 }
 0x135   : > { %v705_v51 = vmul.f32 0.00390625, %v658_v50  ;;  %v664_v52 = vpop.xlane.xlu1 %663 }
 0x136   : > { %v707_v53 = vmul.f32 0.00390625, %v664_v52 }
 0x137   : > { %v12875_v54 = vsub.f32 %v12747_v0, %v705_v51  ;;  %v12878_v55 = vsub.f32 %v12750_v1, %v705_v51 }
 0x138   : > { %v12881_v56 = vsub.f32 %v12753_v2, %v707_v53  ;;  %v12884_v57 = vsub.f32 %v12758_v4, %v707_v53  ;;  %v661_v58 = vpop.xlane.xlu0 %660 }
 0x139   : > { %v706_v59 = vmul.f32 0.00390625, %v661_v58  ;;  %v667_v60 = vpop.xlane.xlu1 %666  ;;  %v753_v61 = vmul.f32 %v12875_v54, %v12875_v54  ;;  %v754_v62 = vmul.f32 %v12878_v55, %v12878_v55 }
 0x13a   : > { %v708_v0 = vmul.f32 0.00390625, %v667_v60  ;;  %v757_v1 = vmul.f32 %v12881_v56, %v12881_v56  ;;  %v758_v2 = vmul.f32 %v12884_v57, %v12884_v57 }
 0x13b   : > { %v12895_v63 = vsub.f32 %v12761_v5, %v706_v59  ;;  %v12898_v4 = vsub.f32 %v12764_v6, %v706_v59  ;;  %v785_v3 = vadd.f32 %v754_v62, %v753_v61 }
 0x13c   : > { %v12901_v7 = vsub.f32 %v12769_v8, %v708_v0  ;;  %v12904_v10 = vsub.f32 %v12772_v9, %v708_v0  ;;  %v670_v11 = vpop.xlane.xlu0 %669  ;;  %v791_v24 = vadd.f32 %v758_v2, %v757_v1  ;;  %v10920_v0 = vld [vmem:[#allocation11 + $0x2d0] ss:$24 sps:$4 sm:$0xff]  }
 0x13d   : > { %v709_v16 = vmul.f32 0.00390625, %v670_v11  ;;  %786 = vadd.xlane.f32.xlu0 %v785_v3  ;;  %v673_v17 = vpop.xlane.xlu1 %672  ;;  %v755_v27 = vmul.f32 %v12895_v63, %v12895_v63  ;;  %v756_v5 = vmul.f32 %v12898_v4, %v12898_v4  ;;  %v10921_v1 = vld [vmem:[#allocation11 + $0x2d8] ss:$24 sps:$4 sm:$0xff]   ;;  %1640 = vmatpush2.bf16.msra.mxu0 %v10920_v0 }
 0x13e   : > { %v710_v6 = vmul.f32 0.00390625, %v673_v17  ;;  %v759_v30 = vmul.f32 %v12901_v7, %v12901_v7  ;;  %v760_v8 = vmul.f32 %v12904_v10, %v12904_v10  ;;  %1753 = vmatpush2.bf16.msra.mxu1 %v10921_v1  ;;  %v10933_v0 = vld [vmem:[#allocation11 + $0x278] ss:$24 sps:$4 sm:$0xff]  }
 0x13f   : > { %v12915_v9 = vsub.f32 %v12779_v12, %v709_v16  ;;  %v12918_v33 = vsub.f32 %v12782_v13, %v709_v16  ;;  %v788_v36 = vadd.f32 %v756_v5, %v755_v27  ;;  %v10922_v5 = vld [vmem:[#allocation11 + $0x2a4] ss:$24 sps:$4 sm:$0xff]  }
 0x140   : > { %v12921_v39 = vsub.f32 %v12785_v14, %v710_v6  ;;  %v12924_v42 = vsub.f32 %v12788_v15, %v710_v6  ;;  %v676_v45 = vpop.xlane.xlu0 %675  ;;  %v794_v48 = vadd.f32 %v760_v8, %v759_v30  ;;  %v10924_v6 = vld [vmem:[#allocation11 + $0x2ac] ss:$24 sps:$4 sm:$0xff]   ;;  %1641 = vmatprep.subr.bf16.mxu0 %v10922_v5 }
 0x141   : > { %v711_v46 = vmul.f32 0.00390625, %v676_v45  ;;  %792 = vadd.xlane.f32.xlu0 %v791_v24  ;;  %789 = vadd.xlane.f32.xlu1 %v788_v36  ;;  %v679_v47 = vpop.xlane.xlu1 %678  ;;  %v761_v12 = vmul.f32 %v12915_v9, %v12915_v9  ;;  %v762_v13 = vmul.f32 %v12918_v33, %v12918_v33 }
 0x142   : > { %v712_v49 = vmul.f32 0.00390625, %v679_v47  ;;  %v763_v14 = vmul.f32 %v12921_v39, %v12921_v39  ;;  %v764_v15 = vmul.f32 %v12924_v42, %v12924_v42  ;;  %1754 = vmatprep.subr.bf16.mxu1 %v10924_v6  ;;  %v10927_v47 = vld [vmem:[#allocation11 + $0x2a8] ss:$24 sps:$4 sm:$0xff]  }
 0x143   : > { %v12935_v50 = vsub.f32 %v12795_v18, %v711_v46  ;;  %v12938_v51 = vsub.f32 %v12798_v19, %v711_v46  ;;  %v797_v52 = vadd.f32 %v762_v13, %v761_v12  ;;  %v10926_v46 = vld [vmem:[#allocation11 + $0x2a0] ss:$24 sps:$4 sm:$0xff]   ;;  %1755 = vmatpush2.bf16.msra.mxu1 %v10927_v47 }
 0x144   : > { %v12941_v53 = vsub.f32 %v12801_v20, %v712_v49  ;;  %v12944_v58 = vsub.f32 %v12804_v21, %v712_v49  ;;  %v682_v59 = vpop.xlane.xlu0 %681  ;;  %v800_v62 = vadd.f32 %v764_v15, %v763_v14  ;;  %1642 = vmatpush2.bf16.msra.mxu0 %v10926_v46 }
 0x145   : > { %v713_v60 = vmul.f32 0.00390625, %v682_v59  ;;  %795 = vadd.xlane.f32.xlu1 %v794_v48  ;;  %798 = vadd.xlane.f32.xlu0 %v797_v52  ;;  %v685_v61 = vpop.xlane.xlu1 %684  ;;  %v765_v18 = vmul.f32 %v12935_v50, %v12935_v50  ;;  %v766_v19 = vmul.f32 %v12938_v51, %v12938_v51 }
 0x146   : > { %v714_v2 = vmul.f32 0.00390625, %v685_v61  ;;  %v767_v20 = vmul.f32 %v12941_v53, %v12941_v53  ;;  %v768_v21 = vmul.f32 %v12944_v58, %v12944_v58  ;;  %v10928_v61 = vld [vmem:[#allocation11 + $0x274] ss:$24 sps:$4 sm:$0xff]  }
 0x147   : > { %v12955_v3 = vsub.f32 %v12807_v22, %v713_v60  ;;  %v12958_v11 = vsub.f32 %v12810_v23, %v713_v60  ;;  %v803_v16 = vadd.f32 %v766_v19, %v765_v18  ;;  %v10932_v19 = vld [vmem:[#allocation11 + $0x270] ss:$24 sps:$4 sm:$0xff]   ;;  %1643 = vmatprep.subr.bf16.mxu0 %v10928_v61 }
 0x148   : > { %v12961_v17 = vsub.f32 %v12815_v25, %v714_v2  ;;  %v12964_v24 = vsub.f32 %v12818_v26, %v714_v2  ;;  %v688_v27 = vpop.xlane.xlu0 %687  ;;  %v806_v8 = vadd.f32 %v768_v21, %v767_v20  ;;  %1644 = vmatpush2.bf16.msra.mxu0 %v10932_v19  ;;  %v10952_v19 = vld [vmem:[#allocation11 + $0x1b4] ss:$24 sps:$4 sm:$0xff]  }
 0x149   : > { %v715_v30 = vmul.f32 0.00390625, %v688_v27  ;;  %801 = vadd.xlane.f32.xlu1 %v800_v62  ;;  %804 = vadd.xlane.f32.xlu0 %v803_v16  ;;  %v691_v22 = vpop.xlane.xlu1 %690  ;;  %v769_v23 = vmul.f32 %v12955_v3, %v12955_v3  ;;  %v770_v36 = vmul.f32 %v12958_v11, %v12958_v11 }
 0x14a   : > { %v716_v45 = vmul.f32 0.00390625, %v691_v22  ;;  %v771_v25 = vmul.f32 %v12961_v17, %v12961_v17  ;;  %v772_v26 = vmul.f32 %v12964_v24, %v12964_v24  ;;  %v10934_v22 = vld [vmem:[#allocation11 + $0x244] ss:$24 sps:$4 sm:$0xff]  }
 0x14b   : > { %v12975_v48 = vsub.f32 %v12823_v28, %v715_v30  ;;  %v12978_v12 = vsub.f32 %v12826_v29, %v715_v30  ;;  %v809_v13 = vadd.f32 %v770_v36, %v769_v23  ;;  %v10938_v36 = vld [vmem:[#allocation11 + $0x240] ss:$24 sps:$4 sm:$0xff]   ;;  %1645 = vmatprep.subr.bf16.mxu0 %v10934_v22 }
 0x14c   : > { %v12981_v49 = vsub.f32 %v12831_v31, %v716_v45  ;;  %v12984_v14 = vsub.f32 %v12834_v32, %v716_v45  ;;  %v694_v15 = vpop.xlane.xlu0 %693  ;;  %v812_v60 = vadd.f32 %v772_v26, %v771_v25  ;;  %v10930_v31 = vld [vmem:[#allocation11 + $0x27c] ss:$24 sps:$4 sm:$0xff]   ;;  %v10939_v45 = vld [vmem:[#allocation11 + $0x248] ss:$24 sps:$4 sm:$0xff]   ;;  %1646 = vmatpush2.bf16.msra.mxu0 %v10938_v36 }
 0x14d   : > { %v717_v52 = vmul.f32 0.00390625, %v694_v15  ;;  %807 = vadd.xlane.f32.xlu1 %v806_v8  ;;  %810 = vadd.xlane.f32.xlu0 %v809_v13  ;;  %v697_v59 = vpop.xlane.xlu1 %696  ;;  %v773_v28 = vmul.f32 %v12975_v48, %v12975_v48  ;;  %v774_v29 = vmul.f32 %v12978_v12, %v12978_v12 }
 0x14e   : > { %v718_v62 = vmul.f32 0.00390625, %v697_v59  ;;  %v775_v32 = vmul.f32 %v12981_v49, %v12981_v49  ;;  %v776_v18 = vmul.f32 %v12984_v14, %v12984_v14  ;;  %1756 = vmatprep.subr.bf16.mxu1 %v10930_v31  ;;  %v10942_v59 = vld [vmem:[#allocation11 + $0x21c] ss:$24 sps:$4 sm:$0xff]  }
 0x14f   : > { %v12995_v1 = vsub.f32 %v12839_v34, %v717_v52  ;;  %v12998_v2 = vsub.f32 %v12842_v35, %v717_v52  ;;  %v815_v20 = vadd.f32 %v774_v29, %v773_v28  ;;  %1757 = vmatpush2.bf16.msra.mxu1 %v10933_v0  ;;  %v10940_v52 = vld [vmem:[#allocation11 + $0x214] ss:$24 sps:$4 sm:$0xff]   ;;  %v10945_v28 = vld [vmem:[#allocation11 + $0x218] ss:$24 sps:$4 sm:$0xff]   ;;  %v10946_v31 = vld [vmem:[#allocation11 + $0x1e4] ss:$24 sps:$4 sm:$0xff]  }
 0x150   : > { %v13001_v21 = vsub.f32 %v12847_v37, %v718_v62  ;;  %v13004_v16 = vsub.f32 %v12850_v38, %v718_v62  ;;  %v700_v27 = vpop.xlane.xlu0 %699  ;;  %v818_v6 = vadd.f32 %v776_v18, %v775_v32  ;;  %v10936_v37 = vld [vmem:[#allocation11 + $0x24c] ss:$24 sps:$4 sm:$0xff]   ;;  %1647 = vmatprep.subr.bf16.mxu0 %v10940_v52  ;;  %v10950_v32 = vld [vmem:[#allocation11 + $0x1e0] ss:$24 sps:$4 sm:$0xff]   ;;  %v10954_v0 = vld [vmem:[#allocation11 + $0x1bc] ss:$24 sps:$4 sm:$0xff]  }
 0x151   : > { %v719_v5 = vmul.f32 0.00390625, %v700_v27  ;;  %813 = vadd.xlane.f32.xlu1 %v812_v60  ;;  %816 = vadd.xlane.f32.xlu0 %v815_v20  ;;  %v703_v34 = vpop.xlane.xlu1 %702  ;;  %v777_v35 = vmul.f32 %v12995_v1, %v12995_v1  ;;  %v778_v30 = vmul.f32 %v12998_v2, %v12998_v2  ;;  %v10944_v60 = vld [vmem:[#allocation11 + $0x210] ss:$24 sps:$4 sm:$0xff]   ;;  %v10948_v62 = vld [vmem:[#allocation11 + $0x1ec] ss:$24 sps:$4 sm:$0xff]  }
 0x152   : > { %v720_v8 = vmul.f32 0.00390625, %v703_v34  ;;  %v779_v38 = vmul.f32 %v13001_v21, %v13001_v21  ;;  %v780_v23 = vmul.f32 %v13004_v16, %v13004_v16  ;;  %1758 = vmatprep.subr.bf16.mxu1 %v10936_v37  ;;  %1648 = vmatpush2.bf16.msra.mxu0 %v10944_v60  ;;  %v10951_v18 = vld [vmem:[#allocation11 + $0x1e8] ss:$24 sps:$4 sm:$0xff]   ;;  %v10957_v27 = vld [vmem:[#allocation11 + $0x1b8] ss:$24 sps:$4 sm:$0xff]  }
 0x153   : > { %v13015_v25 = vsub.f32 %v12855_v40, %v719_v5  ;;  %v13018_v26 = vsub.f32 %v12858_v41, %v719_v5  ;;  %v821_v46 = vadd.f32 %v778_v30, %v777_v35  ;;  %1759 = vmatpush2.bf16.msra.mxu1 %v10939_v45  ;;  %1649 = vmatprep.subr.bf16.mxu0 %v10946_v31  ;;  %v10956_v20 = vld [vmem:[#allocation11 + $0x1b0] ss:$24 sps:$4 sm:$0xff]   ;;  %v10958_v5 = vld [vmem:[#allocation11 + $0x184] ss:$24 sps:$4 sm:$0xff]  }
 0x154   : > { %v13021_v47 = vsub.f32 %v12863_v43, %v720_v8  ;;  %v13024_v13 = vsub.f32 %v12866_v44, %v720_v8  ;;  %v824_v15 = vadd.f32 %v780_v23, %v779_v38  ;;  %1760 = vmatprep.subr.bf16.mxu1 %v10942_v59  ;;  %v10960_v34 = vld [vmem:[#allocation11 + $0x18c] ss:$24 sps:$4 sm:$0xff]   ;;  %v10963_v35 = vld [vmem:[#allocation11 + $0x188] ss:$24 sps:$4 sm:$0xff]  }
 0x155   : > { %819 = vadd.xlane.f32.xlu1 %v818_v6  ;;  %822 = vadd.xlane.f32.xlu0 %v821_v46  ;;  %v781_v40 = vmul.f32 %v13015_v25, %v13015_v25  ;;  %v782_v41 = vmul.f32 %v13018_v26, %v13018_v26  ;;  %v10962_v6 = vld [vmem:[#allocation11 + $0x180] ss:$24 sps:$4 sm:$0xff]   ;;  %v10966_v30 = vld [vmem:[#allocation11 + $0x164] ss:$24 sps:$4 sm:$0xff]   ;;  %v914_v46 = vlaneseq }
 0x156   : > { %v783_v43 = vmul.f32 %v13021_v47, %v13021_v47  ;;  %v784_v44 = vmul.f32 %v13024_v13, %v13024_v13  ;;  %1650 = vmatpush2.bf16.msra.mxu0 %v10950_v32 }
 0x157   : > { %v827_v29 = vadd.f32 %v782_v41, %v781_v40  ;;  %1761 = vmatpush2.bf16.msra.mxu1 %v10945_v28  ;;  %1651 = vmatprep.subr.bf16.mxu0 %v10952_v19 }
 0x158   : > { %v830_v61 = vadd.f32 %v784_v44, %v783_v43  ;;  %1762 = vmatprep.subr.bf16.mxu1 %v10948_v62  ;;  %v13034_v44 = vshrl.u32 %v914_v46, 7 }
 0x159   : > { %825 = vadd.xlane.f32.xlu1 %v824_v15  ;;  %828 = vadd.xlane.f32.xlu0 %v827_v29 }
 0x15a   : > { %1652 = vmatpush2.bf16.msra.mxu0 %v10956_v20  ;;  %16607 = vst [vmem:[#allocation28_spill] sm:$0xff] %v13034_v44  ;;  %v13037_v32 = vsub.s32 1, %v13034_v44 }
 0x15b   : > { %1763 = vmatpush2.bf16.msra.mxu1 %v10951_v18  ;;  %1653 = vmatprep.subr.bf16.mxu0 %v10958_v5  ;;  %v13040_v18 = vsub.s32 0, %v13034_v44 }
 0x15c   : > { %1764 = vmatprep.subr.bf16.mxu1 %v10954_v0  ;;  %16608 = vst [vmem:[#allocation29_spill] sm:$0xff] %v13037_v32  ;;  %v654_v0 = vld [vmem:[#allocation8] sm:$0x3] }
 0x15d   : > { %831 = vadd.xlane.f32.xlu1 %v830_v61  ;;  %16609 = vst [vmem:[#allocation30_spill] sm:$0xff] %v13040_v18 }
 0x15e   : > { %1654 = vmatpush2.bf16.msra.mxu0 %v10962_v6 }
 0x15f   : > { %1765 = vmatpush2.bf16.msra.mxu1 %v10957_v27  ;;  %1849 = vmatprep.subr.bf16.mxu0 %v10966_v30  ;;  %v13046_v30 = vrot.slane %v654_v0, %v13040_v18 }
 0x160   : > { %1766 = vmatprep.subr.bf16.mxu1 %v10960_v34 }
 0x163   : > { %1767 = vmatpush2.bf16.msra.mxu1 %v10963_v35  ;;  %v13043_v35 = vrot.slane %v654_v0, %v13037_v32 }
 0x1c6   : > { %v787_v22 = vpop.xlane.xlu0 %786 }
 0x1c7   : > { %v833_v37 = vmul.f32 0.00390625, %v787_v22 }
 0x1c9   : > { %v849_v8 = vadd.f32 1e-05, %v833_v37  ;;  %v655_v37 = vld [vmem:[#allocation10] sm:$0x3] }
 0x1ca   : > { %v790_v38 = vpop.xlane.xlu1 %789  ;;  %v793_v23 = vpop.xlane.xlu0 %792 }
 0x1cb   : > { %11252 = vrsqrt.f32 %v849_v8  ;;  %v834_v36 = vmul.f32 0.00390625, %v790_v38  ;;  %v835_v45 = vmul.f32 0.00390625, %v793_v23 }
 0x1cd   : > { %v850_v15 = vadd.f32 1e-05, %v834_v36  ;;  %v851_v40 = vadd.f32 1e-05, %v835_v45 }
 0x1ce   : > { %v796_v41 = vpop.xlane.xlu1 %795  ;;  %v799_v52 = vpop.xlane.xlu0 %798 }
 0x1cf   : > { %11254 = vrsqrt.f32 %v850_v15  ;;  %v836_v59 = vmul.f32 0.00390625, %v796_v41  ;;  %v837_v43 = vmul.f32 0.00390625, %v799_v52  ;;  %v13056_v52 = vrot.slane %v655_v37, %v13040_v18 }
 0x1d0   : > { %11256 = vrsqrt.f32 %v851_v40  ;;  %v13052_v40 = vrot.slane %v655_v37, %v13037_v32 }
 0x1d1   : > { %v852_v60 = vadd.f32 1e-05, %v836_v59  ;;  %v853_v28 = vadd.f32 1e-05, %v837_v43 }
 0x1d2   : > { %v802_v29 = vpop.xlane.xlu1 %801  ;;  %v805_v61 = vpop.xlane.xlu0 %804 }
 0x1d3   : > { %11258 = vrsqrt.f32 %v852_v60  ;;  %v838_v31 = vmul.f32 0.00390625, %v802_v29  ;;  %v839_v62 = vmul.f32 0.00390625, %v805_v61 }
 0x1d4   : > { %11260 = vrsqrt.f32 %v853_v28 }
 0x1d5   : > { %v854_v19 = vadd.f32 1e-05, %v838_v31  ;;  %v855_v20 = vadd.f32 1e-05, %v839_v62 }
 0x1d6   : > { %v808_v27 = vpop.xlane.xlu1 %807  ;;  %v811_v6 = vpop.xlane.xlu0 %810 }
 0x1d7   : > { %11262 = vrsqrt.f32 %v854_v19  ;;  %v840_v5 = vmul.f32 0.00390625, %v808_v27  ;;  %v841_v36 = vmul.f32 0.00390625, %v811_v6 }
 0x1d8   : > { %v11253_v34 = vpop.eup %11252  ;;  %11264 = vrsqrt.f32 %v855_v20 }
 0x1d9   : > { %v856_v22 = vadd.f32 1e-05, %v840_v5  ;;  %v882_v8 = vmul.f32 %v11253_v34, %v12878_v55  ;;  %v881_v38 = vmul.f32 %v11253_v34, %v12875_v54  ;;  %v857_v29 = vadd.f32 1e-05, %v841_v36 }
 0x1da   : > { %v814_v23 = vpop.xlane.xlu1 %813  ;;  %v817_v62 = vpop.xlane.xlu0 %816 }
 0x1db   : > { %11266 = vrsqrt.f32 %v856_v22  ;;  %v842_v45 = vmul.f32 0.00390625, %v814_v23  ;;  %v925_v15 = vmul.f32 %v13043_v35, %v882_v8  ;;  %v924_v41 = vmul.f32 %v13046_v30, %v881_v38  ;;  %v10964_v38 = vld [vmem:[#allocation11 + $0x160] ss:$24 sps:$4 sm:$0xff]  }
 0x1dc   : > { %v11255_v46 = vpop.eup %11254  ;;  %v843_v37 = vmul.f32 0.00390625, %v817_v62 }
 0x1dd   : > { %v11257_v59 = vpop.eup %11256  ;;  %v858_v55 = vadd.f32 1e-05, %v842_v45  ;;  %v884_v54 = vmul.f32 %v11255_v46, %v12898_v4  ;;  %v883_v60 = vmul.f32 %v11255_v46, %v12895_v63  ;;  %v968_v19 = vadd.f32 %v13052_v40, %v925_v15 }
 0x1de   : > { %v820_v43 = vpop.xlane.xlu1 %819  ;;  %v886_v28 = vmul.f32 %v11257_v59, %v12884_v57  ;;  %v967_v20 = vadd.f32 %v13056_v52, %v924_v41  ;;  %v885_v6 = vmul.f32 %v11257_v59, %v12881_v56 }
 0x1df   : > { %v927_v61 = vmul.f32 %v13043_v35, %v884_v54  ;;  %v926_v0 = vmul.f32 %v13046_v30, %v883_v60  ;;  %11268 = vrsqrt.f32 %v858_v55  ;;  %v844_v27 = vmul.f32 0.00390625, %v820_v43 }
 0x1e0   : > { %v11259_v31 = vpop.eup %11258  ;;  %v929_v34 = vmul.f32 %v13043_v35, %v886_v28  ;;  %11270 = vrsqrt.f32 %v857_v29  ;;  %v928_v54 = vmul.f32 %v13046_v30, %v885_v6  ;;  %v859_v60 = vadd.f32 1e-05, %v843_v37  ;;  %v10967_v28 = vld [vmem:[#allocation11 + $0x130] ss:$24 sps:$4 sm:$0xff]   ;;  %v10970_v37 = vld [vmem:[#allocation11 + $0x100] ss:$24 sps:$4 sm:$0xff]  }
 0x1e1   : > { %v970_v4 = vadd.f32 %v13052_v40, %v927_v61  ;;  %v888_v5 = vmul.f32 %v11259_v31, %v12904_v10  ;;  %v11261_v63 = vpop.eup %11260  ;;  %v969_v57 = vadd.f32 %v13056_v52, %v926_v0  ;;  %v887_v22 = vmul.f32 %v11259_v31, %v12901_v7  ;;  %v10969_v10 = vld [vmem:[#allocation11 + $0x134] ss:$24 sps:$4 sm:$0xff]   ;;  %v823_v61 = vpop.xlane.xlu0 %822 }
 0x1e2   : > { %v860_v15 = vadd.f32 1e-05, %v844_v27  ;;  %v890_v56 = vmul.f32 %v11261_v63, %v12918_v33  ;;  %v826_v41 = vpop.xlane.xlu1 %825  ;;  %v972_v59 = vadd.f32 %v13052_v40, %v929_v34  ;;  %v845_v34 = vmul.f32 0.00390625, %v823_v61 }
 0x1e3   : > { %v13071_v8 = vpack.c.bf16 %v970_v4, %v968_v19  ;;  %v13073_v36 = vpack.c.bf16 %v969_v57, %v967_v20  ;;  %v931_v45 = vmul.f32 %v13043_v35, %v888_v5  ;;  %v930_v46 = vmul.f32 %v13046_v30, %v887_v22  ;;  %v10972_v19 = vld [vmem:[#allocation11 + $0x104] ss:$24 sps:$4 sm:$0xff]  }
 0x1e4   : > { %v11263_v23 = vpop.eup %11262  ;;  %v933_v29 = vmul.f32 %v13043_v35, %v890_v56  ;;  %11272 = vrsqrt.f32 %v860_v15  ;;  %v846_v20 = vmul.f32 0.00390625, %v826_v41  ;;  %v971_v4 = vadd.f32 %v13056_v52, %v928_v54  ;;  %v10973_v41 = vld [vmem:[#allocation11 + $0xd0] ss:$24 sps:$4 sm:$0xff]  }
 0x1e5   : > { %1655 = vmatprep.mubr.bf16.mxu0 %v13071_v8  ;;  %1768 = vmatprep.mubr.bf16.mxu1 %v13071_v8  ;;  %v892_v7 = vmul.f32 %v11263_v23, %v12924_v42  ;;  %v974_v55 = vadd.f32 %v13052_v40, %v931_v45  ;;  %v11265_v43 = vpop.eup %11264  ;;  %v973_v62 = vadd.f32 %v13056_v52, %v930_v46  ;;  %11274 = vrsqrt.f32 %v859_v60  ;;  %v10978_v60 = vld [vmem:[#allocation11 + $0xa4] ss:$24 sps:$4 sm:$0xff]  }
 0x1e6   : > { %1656 = vmatmul.mubr.bf16.vlgmr.msra.gmra.mxu0 %v13073_v36  ;;  %1769 = vmatmul.mubr.bf16.vlgmr.msra.gmra.mxu1 %v13073_v36  ;;  %v891_v0 = vmul.f32 %v11263_v23, %v12921_v39  ;;  %v889_v5 = vmul.f32 %v11261_v63, %v12915_v9  ;;  %v976_v6 = vadd.f32 %v13052_v40, %v933_v29  ;;  %v862_v23 = vadd.f32 1e-05, %v846_v20  ;;  %v832_v63 = vpop.xlane.xlu1 %831 }
 0x1e7   : > { %1850 = vmatpush1.bf16.msra.mxu0 %v10964_v38  ;;  %v935_v33 = vmul.f32 %v13043_v35, %v892_v7  ;;  %v13088_v31 = vpack.c.bf16 %v974_v55, %v972_v59  ;;  %v894_v39 = vmul.f32 %v11265_v43, %v12938_v51  ;;  %v13100_v22 = vpack.c.bf16 %v973_v62, %v971_v4  ;;  %v829_v7 = vpop.xlane.xlu0 %828 }
 0x1e8   : > { %v11267_v42 = vpop.eup %11266  ;;  %1851 = vmatprep.subr.bf16.mxu0 %v10969_v10  ;;  %v934_v38 = vmul.f32 %v13046_v30, %v891_v0  ;;  %v10975_v10 = vld [vmem:[#allocation11 + $0xd4] ss:$24 sps:$4 sm:$0xff]   ;;  %v932_v51 = vmul.f32 %v13046_v30, %v889_v5  ;;  %v861_v46 = vadd.f32 1e-05, %v845_v34  ;;  %11276 = vrsqrt.f32 %v862_v23 }
 0x1e9   : > { %v978_v27 = vadd.f32 %v13052_v40, %v935_v33  ;;  %1665 = vmatprep.mubr.bf16.mxu0 %v13088_v31  ;;  %1778 = vmatprep.mubr.bf16.mxu1 %v13088_v31  ;;  %v896_v57 = vmul.f32 %v11267_v42, %v12944_v58  ;;  %v937_v15 = vmul.f32 %v13043_v35, %v894_v39  ;;  %v848_v54 = vmul.f32 0.00390625, %v832_v63 }
 0x1ea   : > { %v977_v59 = vadd.f32 %v13056_v52, %v934_v38  ;;  %v895_v55 = vmul.f32 %v11267_v42, %v12941_v53  ;;  %v975_v33 = vadd.f32 %v13056_v52, %v932_v51  ;;  %v893_v61 = vmul.f32 %v11265_v43, %v12935_v50  ;;  %v10976_v42 = vld [vmem:[#allocation11 + $0xa0] ss:$24 sps:$4 sm:$0xff]   ;;  %v10984_v38 = vld [vmem:[#allocation11 + $0x44] ss:$24 sps:$4 sm:$0xff]  }
 0x1eb   : > { %1852 = vmatpush1.bf16.msra.mxu0 %v10967_v28  ;;  %v13103_v45 = vpack.c.bf16 %v978_v27, %v976_v6  ;;  %v939_v9 = vmul.f32 %v13043_v35, %v896_v57  ;;  %11278 = vrsqrt.f32 %v861_v46  ;;  %v847_v62 = vmul.f32 0.00390625, %v829_v7  ;;  %v10979_v6 = vld [vmem:[#allocation11 + $0x70] ss:$24 sps:$4 sm:$0xff]  }
 0x1ec   : > { %1853 = vmatprep.subr.bf16.mxu0 %v10972_v19  ;;  %v11269_v58 = vpop.eup %11268  ;;  %v980_v19 = vadd.f32 %v13052_v40, %v937_v15  ;;  %v13120_v53 = vpack.c.bf16 %v977_v59, %v975_v33  ;;  %v938_v20 = vmul.f32 %v13046_v30, %v895_v55  ;;  %v864_v27 = vadd.f32 1e-05, %v848_v54  ;;  %v10985_v55 = vld [vmem:[#allocation11 + $0x10] ss:$24 sps:$4 sm:$0xff]  }
 0x1ed   : > { %v11271_v56 = vpop.eup %11270  ;;  %v982_v28 = vadd.f32 %v13052_v40, %v939_v9  ;;  %v900_v29 = vmul.f32 %v11269_v58, %v12964_v24  ;;  %v10981_v24 = vld [vmem:[#allocation11 + $0x74] ss:$24 sps:$4 sm:$0xff]   ;;  %v863_v43 = vadd.f32 1e-05, %v847_v62 }
 0x1ee   : > { %1666 = vmatmul.mubr.bf16.gmra.mxu0 %v13100_v22  ;;  %1779 = vmatmul.mubr.bf16.gmra.mxu1 %v13100_v22  ;;  %v898_v0 = vmul.f32 %v11271_v56, %v12958_v11  ;;  %v936_v11 = vmul.f32 %v13046_v30, %v893_v61  ;;  %v981_v39 = vadd.f32 %v13056_v52, %v938_v20  ;;  %11280 = vrsqrt.f32 %v864_v27  ;;  %v10988_v20 = vld [vmem:[#allocation11 + $0x2e0] ss:$24 sps:$4 sm:$0xff]  }
 0x1ef   : > { %1675 = vmatprep.mubr.bf16.mxu0 %v13103_v45  ;;  %1788 = vmatprep.mubr.bf16.mxu1 %v13103_v45  ;;  %v13123_v4 = vpack.c.bf16 %v982_v28, %v980_v19  ;;  %v943_v5 = vmul.f32 %v13043_v35, %v900_v29  ;;  %v897_v63 = vmul.f32 %v11271_v56, %v12955_v3  ;;  %11282 = vrsqrt.f32 %v863_v43  ;;  %v10990_v28 = vld [vmem:[#allocation11 + $0x2e4] ss:$24 sps:$4 sm:$0xff]  }
 0x1f0   : > { %1854 = vmatpush1.bf16.msra.mxu0 %v10970_v37  ;;  %v941_v57 = vmul.f32 %v13043_v35, %v898_v0  ;;  %v899_v37 = vmul.f32 %v11269_v58, %v12961_v17  ;;  %v979_v9 = vadd.f32 %v13056_v52, %v936_v11  ;;  %v10982_v17 = vld [vmem:[#allocation11 + $0x40] ss:$24 sps:$4 sm:$0xff]   ;;  %v10991_v11 = vld [vmem:[#allocation11 + $0x2b0] ss:$24 sps:$4 sm:$0xff]  }
 0x1f1   : > { %1855 = vmatprep.subr.bf16.mxu0 %v10975_v10  ;;  %v11273_v50 = vpop.eup %11272  ;;  %v986_v23 = vadd.f32 %v13052_v40, %v943_v5  ;;  %v940_v3 = vmul.f32 %v13046_v30, %v897_v63  ;;  %v10994_v63 = vld [vmem:[#allocation11 + $0x280] ss:$24 sps:$4 sm:$0xff]  }
 0x1f2   : > { %v11275_v34 = vpop.eup %11274  ;;  %v904_v10 = vmul.f32 %v11273_v50, %v12984_v14  ;;  %v984_v51 = vadd.f32 %v13052_v40, %v941_v57  ;;  %v13140_v15 = vpack.c.bf16 %v981_v39, %v979_v9  ;;  %v942_v58 = vmul.f32 %v13046_v30, %v899_v37 }
 0x1f3   : > { %v902_v46 = vmul.f32 %v11275_v34, %v12978_v12  ;;  %v983_v61 = vadd.f32 %v13056_v52, %v940_v3  ;;  %v901_v62 = vmul.f32 %v11275_v34, %v12975_v48  ;;  %v10996_v34 = vld [vmem:[#allocation11 + $0x284] ss:$24 sps:$4 sm:$0xff]  }
 0x1f4   : > { %1856 = vmatpush1.bf16.msra.mxu0 %v10973_v41  ;;  %v13143_v7 = vpack.c.bf16 %v986_v23, %v984_v51  ;;  %v10987_v41 = vld [vmem:[#allocation11 + $0x14] ss:$24 sps:$4 sm:$0xff]   ;;  %v947_v14 = vmul.f32 %v13043_v35, %v904_v10  ;;  %v985_v54 = vadd.f32 %v13056_v52, %v942_v58 }
 0x1f5   : > { %1857 = vmatprep.subr.bf16.mxu0 %v10978_v60  ;;  %v11277_v59 = vpop.eup %11276  ;;  %v945_v12 = vmul.f32 %v13043_v35, %v902_v46  ;;  %v903_v60 = vmul.f32 %v11273_v50, %v12981_v49  ;;  %v944_v48 = vmul.f32 %v13046_v30, %v901_v62  ;;  %v10999_v46 = vld [vmem:[#allocation11 + $0x254] ss:$24 sps:$4 sm:$0xff]   ;;  %v11006_v62 = vld [vmem:[#allocation11 + $0x1c0] ss:$24 sps:$4 sm:$0xff]  }
 0x1f6   : > { %1676 = vmatmul.mubr.bf16.gmra.mxu0 %v13120_v53  ;;  %1789 = vmatmul.mubr.bf16.gmra.mxu1 %v13120_v53  ;;  %v990_v29 = vadd.f32 %v13052_v40, %v947_v14  ;;  %v908_v33 = vmul.f32 %v11277_v59, %v13004_v16  ;;  %v907_v57 = vmul.f32 %v11277_v59, %v13001_v21  ;;  %v11002_v14 = vld [vmem:[#allocation11 + $0x224] ss:$24 sps:$4 sm:$0xff]  }
 0x1f7   : > { %1685 = vmatprep.mubr.bf16.mxu0 %v13123_v4  ;;  %1798 = vmatprep.mubr.bf16.mxu1 %v13123_v4  ;;  %v988_v19 = vadd.f32 %v13052_v40, %v945_v12  ;;  %v946_v49 = vmul.f32 %v13046_v30, %v903_v60  ;;  %v987_v37 = vadd.f32 %v13056_v52, %v944_v48 }
 0x1f8   : > { %1858 = vmatpush1.bf16.msra.mxu0 %v10976_v42  ;;  %v11279_v56 = vpop.eup %11278  ;;  %v13160_v42 = vpack.c.bf16 %v985_v54, %v983_v61  ;;  %v951_v16 = vmul.f32 %v13043_v35, %v908_v33  ;;  %v950_v51 = vmul.f32 %v13046_v30, %v907_v57  ;;  %v11000_v54 = vld [vmem:[#allocation11 + $0x220] ss:$24 sps:$4 sm:$0xff]  }
 0x1f9   : > { %1859 = vmatprep.subr.bf16.mxu0 %v10981_v24  ;;  %v906_v0 = vmul.f32 %v11279_v56, %v12998_v2  ;;  %v13163_v27 = vpack.c.bf16 %v990_v29, %v988_v19  ;;  %v10993_v24 = vld [vmem:[#allocation11 + $0x2b4] ss:$24 sps:$4 sm:$0xff]   ;;  %v989_v43 = vadd.f32 %v13056_v52, %v946_v49  ;;  %v11003_v29 = vld [vmem:[#allocation11 + $0x1f0] ss:$24 sps:$4 sm:$0xff]  }
 0x1fa   : > { %v993_v58 = vadd.f32 %v13056_v52, %v950_v51  ;;  %v11011_v19 = vld [vmem:[#allocation11 + $0x194] ss:$24 sps:$4 sm:$0xff]  }
 0x1fb   : > { %v11281_v5 = vpop.eup %11280  ;;  %v949_v2 = vmul.f32 %v13043_v35, %v906_v0  ;;  %v1009_v9 = vpack.c.bf16 %v989_v43, %v987_v37 }
 0x1fc   : > { %1860 = vmatpush1.bf16.msra.mxu0 %v10979_v6  ;;  %v11283_v50 = vpop.eup %11282  ;;  %v994_v6 = vadd.f32 %v13052_v40, %v951_v16  ;;  %v912_v39 = vmul.f32 %v11281_v5, %v13024_v13 }
 0x1fd   : > { %1861 = vmatprep.subr.bf16.mxu0 %v10984_v38  ;;  %v905_v38 = vmul.f32 %v11279_v56, %v12995_v1  ;;  %v992_v23 = vadd.f32 %v13052_v40, %v949_v2  ;;  %v910_v10 = vmul.f32 %v11283_v50, %v13018_v26  ;;  %v10997_v26 = vld [vmem:[#allocation11 + $0x250] ss:$24 sps:$4 sm:$0xff]   ;;  %v909_v12 = vmul.f32 %v11283_v50, %v13015_v25 }
 0x1fe   : > { %1686 = vmatmul.mubr.bf16.gmra.mxu0 %v13140_v15  ;;  %1799 = vmatmul.mubr.bf16.gmra.mxu1 %v13140_v15 }
 0x1ff   : > { %1695 = vmatprep.mubr.bf16.mxu0 %v13143_v7  ;;  %1808 = vmatprep.mubr.bf16.mxu1 %v13143_v7  ;;  %v1012_v21 = vpack.c.bf16 %v994_v6, %v992_v23  ;;  %v948_v13 = vmul.f32 %v13046_v30, %v905_v38  ;;  %v953_v1 = vmul.f32 %v13043_v35, %v910_v10 }
 0x200   : > { %1862 = vmatpush1.bf16.msra.mxu0 %v10982_v17  ;;  %v955_v17 = vmul.f32 %v13043_v35, %v912_v39 }
 0x201   : > { %1863 = vmatprep.subr.bf16.mxu0 %v10987_v41  ;;  %v911_v41 = vmul.f32 %v11281_v5, %v13021_v47  ;;  %v991_v3 = vadd.f32 %v13056_v52, %v948_v13  ;;  %v996_v56 = vadd.f32 %v13052_v40, %v953_v1  ;;  %v952_v47 = vmul.f32 %v13046_v30, %v909_v12 }
 0x202   : > { %v998_v59 = vadd.f32 %v13052_v40, %v955_v17  ;;  %v11008_v40 = vld [vmem:[#allocation11 + $0x1c4] ss:$24 sps:$4 sm:$0xff]  }
 0x203   : > { %v954_v35 = vmul.f32 %v13046_v30, %v911_v41  ;;  %v995_v33 = vadd.f32 %v13056_v52, %v952_v47  ;;  %v11009_v30 = vld [vmem:[#allocation11 + $0x190] ss:$24 sps:$4 sm:$0xff]  }
 0x204   : > { %1864 = vmatpush1.bf16.msra.mxu0 %v10985_v55  ;;  %v1011_v55 = vpack.c.bf16 %v993_v58, %v991_v3  ;;  %v1014_v60 = vpack.c.bf16 %v998_v59, %v996_v56 }
 0x205   : > { %1865 = vmatprep.subr.bf16.mxu0 %v10990_v28  ;;  %v11005_v28 = vld [vmem:[#allocation11 + $0x1f4] ss:$24 sps:$4 sm:$0xff]   ;;  %v997_v25 = vadd.f32 %v13056_v52, %v954_v35  ;;  %v16479_v52 = vsub.s32 3, %v13034_v44 }
 0x206   : > { %1696 = vmatmul.mubr.bf16.gmra.mxu0 %v13160_v42  ;;  %1809 = vmatmul.mubr.bf16.gmra.mxu1 %v13160_v42 }
 0x207   : > { %1705 = vmatprep.mubr.bf16.mxu0 %v13163_v27  ;;  %1818 = vmatprep.mubr.bf16.mxu1 %v13163_v27  ;;  %v1013_v61 = vpack.c.bf16 %v997_v25, %v995_v33 }
 0x208   : > { %1866 = vmatpush2.bf16.msra.mxu0 %v10988_v20 }
 0x209   : > { %1867 = vmatprep.subr.bf16.mxu0 %v10993_v24 }
 0x20c   : > { %1868 = vmatpush2.bf16.msra.mxu0 %v10991_v11 }
 0x20d   : > { %1869 = vmatprep.subr.bf16.mxu0 %v10996_v34 }
 0x20e   : > { %1706 = vmatmul.mubr.bf16.gmra.mxu0 %v1009_v9  ;;  %1819 = vmatmul.mubr.bf16.gmra.mxu1 %v1009_v9 }
 0x20f   : > { %1715 = vmatprep.mubr.bf16.mxu0 %v1012_v21  ;;  %1828 = vmatprep.mubr.bf16.mxu1 %v1012_v21 }
 0x210   : > { %1870 = vmatpush2.bf16.msra.mxu0 %v10994_v63 }
 0x211   : > { %1871 = vmatprep.subr.bf16.mxu0 %v10999_v46 }
 0x214   : > { %1872 = vmatpush2.bf16.msra.mxu0 %v10997_v26 }
 0x215   : > { %1873 = vmatprep.subr.bf16.mxu0 %v11002_v14 }
 0x216   : > { %1716 = vmatmul.mubr.bf16.gmra.mxu0 %v1011_v55  ;;  %1829 = vmatmul.mubr.bf16.gmra.mxu1 %v1011_v55 }
 0x217   : > { %1725 = vmatprep.mubr.bf16.mxu0 %v1014_v60  ;;  %1838 = vmatprep.mubr.bf16.mxu1 %v1014_v60 }
 0x218   : > { %1874 = vmatpush2.bf16.msra.mxu0 %v11000_v54 }
 0x219   : > { %1875 = vmatprep.subr.bf16.mxu0 %v11005_v28 }
 0x21c   : > { %1876 = vmatpush2.bf16.msra.mxu0 %v11003_v29 }
 0x21d   : > { %1877 = vmatprep.subr.bf16.mxu0 %v11008_v40 }
 0x21e   : > { %1726 = vmatmul.mubr.bf16.gmra.mxu0 %v1013_v61  ;;  %1839 = vmatmul.mubr.bf16.gmra.mxu1 %v1013_v61 }
 0x21f   : > { %1881 = vmatprep.mubr.bf16.mxu0 %v13071_v8  ;;  %v16481_v8 = vsub.s32 2, %v13034_v44 }
 0x220   : > { %1878 = vmatpush2.bf16.msra.mxu0 %v11006_v62 }
 0x221   : > { %1879 = vmatprep.subr.bf16.mxu0 %v11011_v19 }
 0x224   : > { %1880 = vmatpush2.bf16.msra.mxu0 %v11009_v30 }
 0x227   : > { %1882 = vmatmul.mubr.bf16.vlgmr.msra.gmra.mxu0 %v13073_v36  ;;  %v13210_v36 = vld [vmem:[%s16463_s4] sm:$0x3f] }
 0x228   : > { %1891 = vmatprep.mubr.bf16.mxu0 %v13088_v31  ;;  %v13215_v31 = vrot.slane %v13210_v36, %v16479_v52 }
 0x22f   : > { %1892 = vmatmul.mubr.bf16.gmra.mxu0 %v13100_v22 }
 0x230   : > { %1901 = vmatprep.mubr.bf16.mxu0 %v13103_v45 }
 0x237   : > { %1902 = vmatmul.mubr.bf16.gmra.mxu0 %v13120_v53  ;;  %v13219_v53 = vrot.slane %v13210_v36, %v13040_v18 }
 0x238   : > { %1911 = vmatprep.mubr.bf16.mxu0 %v13123_v4  ;;  %v13224_v4 = vrot.slane %v13210_v36, %v16481_v8 }
 0x23f   : > { %1912 = vmatmul.mubr.bf16.gmra.mxu0 %v13140_v15 }
 0x240   : > { %1921 = vmatprep.mubr.bf16.mxu0 %v13143_v7 }
 0x247   : > { %1922 = vmatmul.mubr.bf16.gmra.mxu0 %v13160_v42 }
 0x248   : > { %1931 = vmatprep.mubr.bf16.mxu0 %v13163_v27 }
 0x24f   : > { %1932 = vmatmul.mubr.bf16.gmra.mxu0 %v1009_v9 }
 0x250   : > { %1941 = vmatprep.mubr.bf16.mxu0 %v1012_v21 }
 0x257   : > { %1942 = vmatmul.mubr.bf16.gmra.mxu0 %v1011_v55 }
 0x258   : > { %1951 = vmatprep.mubr.bf16.mxu0 %v1014_v60 }
 0x25f   : > { %1952 = vmatmul.mubr.bf16.gmra.mxu0 %v1013_v61 }
 0x2a6   : > { %v1657_v22 = vpop.f32.mrf.mxu0  ;;  %v1770_v45 = vpop.f32.mrf.mxu1 }
 0x2a7   : > { %v1658_v49 = vadd.f32 %v1657_v22, %v13219_v53  ;;  %v1771_v27 = vadd.f32 %v1770_v45, %v13224_v4 }
 0x2a8   : > { %v13226_v15 = vpop.f32.mrf.mxu0  ;;  %v1772_v7 = vpop.f32.mrf.mxu1 }
 0x2a9   : > { %16610 = vst [vmem:[#allocation31_spill] sm:$0xff] %v13226_v15  ;;  %v1773_v0 = vadd.f32 %v1772_v7, %v13215_v31 }
 0x2aa   : > { %v1661_v42 = vpop.f32.mrf.mxu0  ;;  %v1774_v20 = vpop.f32.mrf.mxu1 }
 0x2ab   : > { %v1662_v24 = vadd.f32 %v1661_v42, %v13219_v53  ;;  %v1775_v16 = vadd.f32 %v1774_v20, %v13224_v4 }
 0x2ac   : > { %v13233_v5 = vpop.f32.mrf.mxu0  ;;  %v1776_v48 = vpop.f32.mrf.mxu1 }
 0x2ad   : > { %16611 = vst [vmem:[#allocation32_spill] sm:$0xff] %v13233_v5  ;;  %v13235_v2 = vpack.c.bf16 %v1662_v24, %v1658_v49  ;;  %v13237_v50 = vpack.c.bf16 %v1775_v16, %v1771_v27  ;;  %v1777_v11 = vadd.f32 %v1776_v48, %v13215_v31 }
 0x2ae   : > { %v1667_v43 = vpop.f32.mrf.mxu0  ;;  %v1780_v57 = vpop.f32.mrf.mxu1 }
 0x2af   : > { %v13240_v34 = vpack.c.bf16 %v1777_v11, %v1773_v0  ;;  %v1668_v6 = vadd.f32 %v1667_v43, %v13219_v53  ;;  %10441 = vmatprep.mubr.msk.bf16.mxu1 %vm2086_vm0, %v13235_v2  ;;  %v1781_v9 = vadd.f32 %v1780_v57, %v13224_v4 }
 0x2b0   : > { %v13245_v39 = vpop.f32.mrf.mxu0  ;;  %v1782_v37 = vpop.f32.mrf.mxu1 }
 0x2b1   : > { %16612 = vst [vmem:[#allocation33_spill] sm:$0xff] %v13240_v34  ;;  %16613 = vst [vmem:[#allocation34_spill] sm:$0xff] %v13245_v39  ;;  %v1783_v38 = vadd.f32 %v1782_v37, %v13215_v31 }
 0x2b2   : > { %v1671_v23 = vpop.f32.mrf.mxu0  ;;  %v1784_v10 = vpop.f32.mrf.mxu1 }
 0x2b3   : > { %v1672_v63 = vadd.f32 %v1671_v23, %v13219_v53  ;;  %v1785_v51 = vadd.f32 %v1784_v10, %v13224_v4 }
 0x2b4   : > { %v13251_v21 = vpop.f32.mrf.mxu0  ;;  %v1786_v46 = vpop.f32.mrf.mxu1 }
 0x2b5   : > { %16614 = vst [vmem:[#allocation35_spill] sm:$0xff] %v13251_v21  ;;  %v13253_v17 = vpack.c.bf16 %v1672_v63, %v1668_v6  ;;  %v13255_v13 = vpack.c.bf16 %v1785_v51, %v1781_v9  ;;  %v1787_v1 = vadd.f32 %v1786_v46, %v13215_v31 }
 0x2b6   : > { %v1677_v26 = vpop.f32.mrf.mxu0  ;;  %v1790_v58 = vpop.f32.mrf.mxu1 }
 0x2b7   : > { %v13258_v41 = vpack.c.bf16 %v1787_v1, %v1783_v38  ;;  %v1678_v14 = vadd.f32 %v1677_v26, %v13219_v53  ;;  %v1791_v54 = vadd.f32 %v1790_v58, %v13224_v4 }
 0x2b8   : > { %v13261_v59 = vpop.f32.mrf.mxu0  ;;  %v1792_v3 = vpop.f32.mrf.mxu1 }
 0x2b9   : > { %16615 = vst [vmem:[#allocation36_spill] sm:$0xff] %v13258_v41  ;;  %16616 = vst [vmem:[#allocation37_spill] sm:$0xff] %v13261_v59  ;;  %v1793_v12 = vadd.f32 %v1792_v3, %v13215_v31 }
 0x2ba   : > { %v1681_v56 = vpop.f32.mrf.mxu0  ;;  %v1794_v55 = vpop.f32.mrf.mxu1 }
 0x2bb   : > { %v1682_v35 = vadd.f32 %v1681_v56, %v13219_v53  ;;  %v1795_v60 = vadd.f32 %v1794_v55, %v13224_v4 }
 0x2bc   : > { %v13267_v28 = vpop.f32.mrf.mxu0  ;;  %v1796_v47 = vpop.f32.mrf.mxu1 }
 0x2bd   : > { %16617 = vst [vmem:[#allocation38_spill] sm:$0xff] %v13267_v28  ;;  %v13269_v29 = vpack.c.bf16 %v1682_v35, %v1678_v14  ;;  %v13271_v25 = vpack.c.bf16 %v1795_v60, %v1791_v54  ;;  %v1797_v40 = vadd.f32 %v1796_v47, %v13215_v31 }
 0x2be   : > { %v1687_v33 = vpop.f32.mrf.mxu0  ;;  %v13274_v61 = vpop.f32.mrf.mxu1 }
 0x2bf   : > { %v13276_v62 = vpack.c.bf16 %v1797_v40, %v1793_v12  ;;  %v1688_v19 = vadd.f32 %v1687_v33, %v13219_v53 }
 0x2c0   : > { %v13279_v30 = vpop.f32.mrf.mxu0  ;;  %v1802_v22 = vpop.f32.mrf.mxu1 }
 0x2c1   : > { %16618 = vst [vmem:[#allocation39_spill] sm:$0xff] %v13276_v62  ;;  %16619 = vst [vmem:[#allocation40_spill] sm:$0xff] %v13279_v30  ;;  %v1803_v45 = vadd.f32 %v1802_v22, %v13215_v31 }
 0x2c2   : > { %v1691_v7 = vpop.f32.mrf.mxu0  ;;  %v13282_v0 = vpop.f32.mrf.mxu1 }
 0x2c3   : > { %v1692_v42 = vadd.f32 %v1691_v7, %v13219_v53 }
 0x2c4   : > { %v13285_v20 = vpop.f32.mrf.mxu0  ;;  %v1806_v49 = vpop.f32.mrf.mxu1 }
 0x2c5   : > { %16620 = vst [vmem:[#allocation41_spill] sm:$0xff] %v13285_v20  ;;  %v13287_v27 = vpack.c.bf16 %v1692_v42, %v1688_v19  ;;  %v1807_v24 = vadd.f32 %v1806_v49, %v13215_v31 }
 0x2c6   : > { %v1697_v16 = vpop.f32.mrf.mxu0  ;;  %v13290_v48 = vpop.f32.mrf.mxu1 }
 0x2c7   : > { %v13292_v11 = vpack.c.bf16 %v1807_v24, %v1803_v45  ;;  %v1698_v43 = vadd.f32 %v1697_v16, %v13219_v53 }
 0x2c8   : > { %v13295_v57 = vpop.f32.mrf.mxu0  ;;  %v1812_v6 = vpop.f32.mrf.mxu1 }
 0x2c9   : > { %16621 = vst [vmem:[#allocation42_spill] sm:$0xff] %v13292_v11  ;;  %16622 = vst [vmem:[#allocation43_spill] sm:$0xff] %v13295_v57  ;;  %v1813_v37 = vadd.f32 %v1812_v6, %v13215_v31 }
 0x2ca   : > { %v1701_v38 = vpop.f32.mrf.mxu0  ;;  %v13298_v23 = vpop.f32.mrf.mxu1 }
 0x2cb   : > { %v1702_v10 = vadd.f32 %v1701_v38, %v13219_v53 }
 0x2cc   : > { %v13301_v9 = vpop.f32.mrf.mxu0  ;;  %v1816_v63 = vpop.f32.mrf.mxu1 }
 0x2cd   : > { %16623 = vst [vmem:[#allocation44_spill] sm:$0xff] %v13301_v9  ;;  %v13303_v51 = vpack.c.bf16 %v1702_v10, %v1698_v43  ;;  %v1817_v46 = vadd.f32 %v1816_v63, %v13215_v31 }
 0x2ce   : > { %v1707_v1 = vpop.f32.mrf.mxu0  ;;  %v1820_v26 = vpop.f32.mrf.mxu1 }
 0x2cf   : > { %v13306_v58 = vpack.c.bf16 %v1817_v46, %v1813_v37  ;;  %v1708_v14 = vadd.f32 %v1707_v1, %v13219_v53 }
 0x2d0   : > { %v13309_v3 = vpop.f32.mrf.mxu0  ;;  %v1822_v12 = vpop.f32.mrf.mxu1 }
 0x2d1   : > { %16624 = vst [vmem:[#allocation45_spill] sm:$0xff] %v13306_v58  ;;  %16625 = vst [vmem:[#allocation46_spill] sm:$0xff] %v13309_v3  ;;  %v1823_v56 = vadd.f32 %v1822_v12, %v13215_v31 }
 0x2d2   : > { %v1711_v55 = vpop.f32.mrf.mxu0  ;;  %v1824_v54 = vpop.f32.mrf.mxu1 }
 0x2d3   : > { %v1712_v35 = vadd.f32 %v1711_v55, %v13219_v53 }
 0x2d4   : > { %v13313_v60 = vpop.f32.mrf.mxu0  ;;  %v1826_v47 = vpop.f32.mrf.mxu1 }
 0x2d5   : > { %16626 = vst [vmem:[#allocation47_spill] sm:$0xff] %v13313_v60  ;;  %v13315_v40 = vpack.c.bf16 %v1712_v35, %v1708_v14  ;;  %v1827_v33 = vadd.f32 %v1826_v47, %v13215_v31 }
 0x2d6   : > { %v1717_v19 = vpop.f32.mrf.mxu0  ;;  %v1830_v22 = vpop.f32.mrf.mxu1 }
 0x2d7   : > { %v13318_v45 = vpack.c.bf16 %v1827_v33, %v1823_v56  ;;  %v1718_v7 = vadd.f32 %v1717_v19, %v13219_v53  ;;  %v1831_v43 = vadd.f32 %v1830_v22, %v13224_v4  ;;  %v16478_v33 = vsub.s32 5, %v13034_v44 }
 0x2d8   : > { %v13321_v42 = vpop.f32.mrf.mxu0  ;;  %v13323_v49 = vpop.f32.mrf.mxu1 }
 0x2d9   : > { %16627 = vst [vmem:[#allocation48_spill] sm:$0xff] %v13321_v42 }
 0x2da   : > { %v1721_v24 = vpop.f32.mrf.mxu0  ;;  %v1834_v16 = vpop.f32.mrf.mxu1 }
 0x2db   : > { %v1722_v6 = vadd.f32 %v1721_v24, %v13219_v53  ;;  %v1835_v37 = vadd.f32 %v1834_v16, %v13224_v4  ;;  %v16480_v16 = vsub.s32 4, %v13034_v44 }
 0x2dc   : > { %v13328_v38 = vpop.f32.mrf.mxu0  ;;  %v13330_v10 = vpop.f32.mrf.mxu1 }
 0x2dd   : > { %16628 = vst [vmem:[#allocation49_spill] sm:$0xff] %v13328_v38  ;;  %v13332_v63 = vpack.c.bf16 %v1722_v6, %v1718_v7  ;;  %v2000_v46 = vpack.c.bf16 %v1835_v37, %v1831_v43  ;;  %v13352_v37 = vrot.slane %v13210_v36, %v16478_v33 }
 0x2de   : > { %v1727_v1 = vpop.f32.mrf.mxu0  ;;  %v1840_v14 = vpop.f32.mrf.mxu1 }
 0x2df   : > { %v1728_v12 = vadd.f32 %v1727_v1, %v13219_v53  ;;  %2814 = vrot.lane.b32.xlu1 %v2000_v46, %s12469_s7  ;;  %v1841_v19 = vadd.f32 %v1840_v14, %v13224_v4  ;;  %v13360_v14 = vrot.slane %v13210_v36, %v16480_v16  ;;  %v2130_v8 = vsel %vm2086_vm0, %v2000_v46, 0 }
 0x2e0   : > { %v13336_v56 = vpop.f32.mrf.mxu0  ;;  %v13338_v55 = vpop.f32.mrf.mxu1 }
 0x2e1   : > { %16629 = vst [vmem:[#allocation50_spill] sm:$0xff] %v13336_v56 }
 0x2e2   : > { %v1731_v35 = vpop.f32.mrf.mxu0  ;;  %v1844_v47 = vpop.f32.mrf.mxu1 }
 0x2e3   : > { %v1732_v22 = vadd.f32 %v1731_v35, %v13219_v53  ;;  %v1845_v7 = vadd.f32 %v1844_v47, %v13224_v4  ;;  %v1825_v47 = vadd.f32 %v1824_v54, %v13224_v4 }
 0x2e4   : > { %v13344_v24 = vpop.f32.mrf.mxu0 }
 0x2e5   : > { %16630 = vst [vmem:[#allocation51_spill] sm:$0xff] %v13344_v24  ;;  %v13347_v43 = vpack.c.bf16 %v1732_v22, %v1728_v12  ;;  %v2006_v6 = vpack.c.bf16 %v1845_v7, %v1841_v19 }
 0x2e7   : > { %v1883_v1 = vpop.f32.mrf.mxu0  ;;  %2816 = vrot.lane.b32.xlu0 %v2006_v6, %s12469_s7  ;;  %10681 = vmatprep.subr.msk.bf16.mxu1 %vm2086_vm0, %v2006_v6  ;;  %v2133_v53 = vsel %vm2086_vm0, %v2006_v6, 0  ;;  %v1821_v6 = vadd.f32 %v1820_v26, %v13224_v4  ;;  %v1815_v26 = vadd.f32 %v13298_v23, %v13224_v4 }
 0x2e8   : > { %10426 = vmatpush3.bf16.xpose.msra.mxu1 %v2133_v53  ;;  %v1884_v22 = vadd.f32 %v1883_v1, %v13360_v14 }
 0x2e9   : > { %v1885_v12 = vpop.f32.mrf.mxu0  ;;  %10682 = vmatprep.subr.msk.bf16.mxu1 %vm2086_vm0, %v2000_v46  ;;  %v13371_v53 = vpack.c.bf16 %v1825_v47, %v1821_v6  ;;  %v1811_v46 = vadd.f32 %v13290_v48, %v13224_v4 }
 0x2ea   : > { %v1886_v35 = vadd.f32 %v1885_v12, %v13352_v37 }
 0x2eb   : > { %v1887_v19 = vpop.f32.mrf.mxu0  ;;  %v2127_v23 = vsel %vm2086_vm0, %v13371_v53, 0 }
 0x2ec   : > { %v1888_v7 = vadd.f32 %v1887_v19, %v13360_v14 }
 0x2ed   : > { %v1889_v33 = vpop.f32.mrf.mxu0 }
 0x2ee   : > { %v13368_v52 = vpack.c.bf16 %v1888_v7, %v1884_v22  ;;  %v1890_v36 = vadd.f32 %v1889_v33, %v13352_v37  ;;  %v13388_v7 = vpack.c.bf16 %v1815_v26, %v1811_v46  ;;  %v1801_v26 = vadd.f32 %v13274_v61, %v13224_v4 }
 0x2ef   : > { %v1893_v16 = vpop.f32.mrf.mxu0 }
 0x2f0   : > { %v13374_v12 = vpack.c.bf16 %v1890_v36, %v1886_v35  ;;  %10428 = vmatpush3.bf16.xpose.msra.mxu1 %v2130_v8  ;;  %v1894_v33 = vadd.f32 %v1893_v16, %v13360_v14 }
 0x2f1   : > { %v1895_v54 = vpop.f32.mrf.mxu0  ;;  %10683 = vmatprep.subr.msk.bf16.mxu1 %vm2086_vm0, %v13371_v53 }
 0x2f2   : > { %16631 = vst [vmem:[#allocation52_spill] sm:$0xff] %v13374_v12  ;;  %v1896_v1 = vadd.f32 %v1895_v54, %v13352_v37  ;;  %v1805_v54 = vadd.f32 %v13282_v0, %v13224_v4 }
 0x2f3   : > { %v1897_v19 = vpop.f32.mrf.mxu0 }
 0x2f4   : > { %v1898_v47 = vadd.f32 %v1897_v19, %v13360_v14 }
 0x2f5   : > { %v1899_v35 = vpop.f32.mrf.mxu0 }
 0x2f6   : > { %v13385_v22 = vpack.c.bf16 %v1898_v47, %v1894_v33  ;;  %v1900_v8 = vadd.f32 %v1899_v35, %v13352_v37  ;;  %v2124_v35 = vsel %vm2086_vm0, %v13388_v7, 0 }
 0x2f7   : > { %v13390_v6 = vpop.f32.mrf.mxu0 }
 0x2f8   : > { %v13394_v36 = vpack.c.bf16 %v1900_v8, %v1896_v1  ;;  %10430 = vmatpush3.bf16.xpose.msra.mxu1 %v2127_v23  ;;  %v13406_v1 = vpack.c.bf16 %v1805_v54, %v1801_v26 }
 0x2f9   : > { %v1905_v16 = vpop.f32.mrf.mxu0  ;;  %10684 = vmatprep.subr.msk.bf16.mxu1 %vm2086_vm0, %v13388_v7 }
 0x2fa   : > { %16632 = vst [vmem:[#allocation53_spill] sm:$0xff] %v13394_v36  ;;  %v1906_v48 = vadd.f32 %v1905_v16, %v13352_v37  ;;  %v2121_v26 = vsel %vm2086_vm0, %v13406_v1, 0 }
 0x2fb   : > { %v13401_v19 = vpop.f32.mrf.mxu0 }
 0x2fd   : > { %v1909_v33 = vpop.f32.mrf.mxu0 }
 0x2fe   : > { %v1910_v47 = vadd.f32 %v1909_v33, %v13352_v37 }
 0x2ff   : > { %v13408_v46 = vpop.f32.mrf.mxu0 }
 0x300   : > { %v13412_v8 = vpack.c.bf16 %v1910_v47, %v1906_v48  ;;  %10432 = vmatpush3.bf16.xpose.msra.mxu1 %v2124_v35 }
 0x301   : > { %v1915_v23 = vpop.f32.mrf.mxu0  ;;  %10685 = vmatprep.subr.msk.bf16.mxu1 %vm2086_vm0, %v13406_v1 }
 0x302   : > { %16633 = vst [vmem:[#allocation54_spill] sm:$0xff] %v13412_v8  ;;  %v1916_v0 = vadd.f32 %v1915_v23, %v13352_v37 }
 0x303   : > { %v1917_v4 = vpop.f32.mrf.mxu0 }
 0x305   : > { %v1919_v61 = vpop.f32.mrf.mxu0 }
 0x306   : > { %v1920_v16 = vadd.f32 %v1919_v61, %v13352_v37  ;;  %v2118_v61 = vsel %vm2086_vm0, %v13271_v25, 0 }
 0x307   : > { %v1923_v54 = vpop.f32.mrf.mxu0 }
 0x308   : > { %v13420_v33 = vpack.c.bf16 %v1920_v16, %v1916_v0  ;;  %10434 = vmatpush3.bf16.xpose.msra.mxu1 %v2121_v26 }
 0x309   : > { %v1925_v48 = vpop.f32.mrf.mxu0  ;;  %10686 = vmatprep.subr.msk.bf16.mxu1 %vm2086_vm0, %v13271_v25 }
 0x30a   : > { %16634 = vst [vmem:[#allocation55_spill] sm:$0xff] %v13420_v33  ;;  %v1926_v47 = vadd.f32 %v1925_v48, %v13352_v37 }
 0x30b   : > { %v1927_v35 = vpop.f32.mrf.mxu0 }
 0x30d   : > { %v1929_v44 = vpop.f32.mrf.mxu0 }
 0x30e   : > { %v1930_v23 = vadd.f32 %v1929_v44, %v13352_v37  ;;  %v2115_v44 = vsel %vm2086_vm0, %v13255_v13, 0 }
 0x30f   : > { %v1933_v18 = vpop.f32.mrf.mxu0 }
 0x310   : > { %v13428_v12 = vpack.c.bf16 %v1930_v23, %v1926_v47  ;;  %10436 = vmatpush3.bf16.xpose.msra.mxu1 %v2118_v61 }
 0x311   : > { %v1935_v0 = vpop.f32.mrf.mxu0  ;;  %10687 = vmatprep.subr.msk.bf16.mxu1 %vm2086_vm0, %v13255_v13 }
 0x312   : > { %16635 = vst [vmem:[#allocation56_spill] sm:$0xff] %v13428_v12  ;;  %v1936_v16 = vadd.f32 %v1935_v0, %v13352_v37 }
 0x313   : > { %v1937_v26 = vpop.f32.mrf.mxu0 }
 0x315   : > { %v1939_v36 = vpop.f32.mrf.mxu0 }
 0x316   : > { %v1940_v48 = vadd.f32 %v1939_v36, %v13352_v37  ;;  %v2112_v36 = vsel %vm2086_vm0, %v13237_v50, 0 }
 0x317   : > { %v1943_v8 = vpop.f32.mrf.mxu0 }
 0x318   : > { %v13436_v33 = vpack.c.bf16 %v1940_v48, %v1936_v16  ;;  %10438 = vmatpush3.bf16.xpose.msra.mxu1 %v2115_v44  ;;  %v1944_v42 = vadd.f32 %v1943_v8, %v13360_v14  ;;  %v1928_v8 = vadd.f32 %v1927_v35, %v13360_v14 }
 0x319   : > { %v1945_v47 = vpop.f32.mrf.mxu0  ;;  %10688 = vmatprep.subr.msk.bf16.mxu1 %vm2086_vm0, %v13237_v50 }
 0x31a   : > { %16636 = vst [vmem:[#allocation57_spill] sm:$0xff] %v13436_v33  ;;  %v1946_v23 = vadd.f32 %v1945_v47, %v13352_v37 }
 0x31b   : > { %v1947_v61 = vpop.f32.mrf.mxu0 }
 0x31c   : > { %v1948_v44 = vadd.f32 %v1947_v61, %v13360_v14 }
 0x31d   : > { %v1949_v12 = vpop.f32.mrf.mxu0 }
 0x31e   : > { %v1950_v0 = vadd.f32 %v1949_v12, %v13352_v37  ;;  %v1938_v12 = vadd.f32 %v1937_v26, %v13360_v14  ;;  %v1918_v26 = vadd.f32 %v1917_v4, %v13360_v14  ;;  %v1904_v4 = vadd.f32 %v13390_v6, %v13360_v14  ;;  %v13509_v6 = vpop.f32.mrf.mxu1 }
 0x31f   : > { %v1953_v56 = vpop.f32.mrf.mxu0 }
 0x320   : > { %v13444_v24 = vpack.c.bf16 %v1950_v0, %v1946_v23  ;;  %10440 = vmatpush3.bf16.xpose.msra.mxu1 %v2112_v36  ;;  %v1954_v33 = vadd.f32 %v1953_v56, %v13360_v14  ;;  %v13457_v23 = vpack.c.bf16 %v1948_v44, %v1944_v42  ;;  %v1934_v56 = vadd.f32 %v1933_v18, %v13360_v14 }
 0x321   : > { %v13446_v16 = vpop.f32.mrf.mxu0  ;;  %v1924_v42 = vadd.f32 %v1923_v54, %v13360_v14  ;;  %v1914_v18 = vadd.f32 %v13408_v46, %v13360_v14  ;;  %v1908_v54 = vadd.f32 %v13401_v19, %v13360_v14 }
 0x322   : > { %16637 = vst [vmem:[#allocation58_spill] sm:$0xff] %v13444_v24 }
 0x323   : > { %v1957_v48 = vpop.f32.mrf.mxu0  ;;  %v13474_v61 = vpack.c.bf16 %v1928_v8, %v1924_v42  ;;  %v13484_v35 = vpack.c.bf16 %v1918_v26, %v1914_v18  ;;  %v13492_v0 = vpack.c.bf16 %v1908_v54, %v1904_v4 }
 0x324   : > { %v1958_v47 = vadd.f32 %v1957_v48, %v13360_v14 }
 0x326   : > { %v13452_v3 = vpack.c.bf16 %v1958_v47, %v1954_v33  ;;  %v13466_v33 = vpack.c.bf16 %v1938_v12, %v1934_v56 }
 0x327   : > { %10442 = vmatmul.mubr.msk.bf16.vlgmr.msra.gmra.mxu1 %vm2086_vm0, %v13253_v17 }
 0x328   : > { %10457 = vmatprep.subr.bf16.mxu1 %v13452_v3  ;;  %10445 = vmatprep.mubr.msk.bf16.mxu1 %vm2086_vm0, %v13269_v29 }
 0x329   : > { %10458 = vmatpush3.bf16.msra.mxu1 %v13452_v3 }
 0x32a   : > { %10459 = vmatprep.subr.bf16.mxu1 %v13457_v23 }
 0x32d   : > { %10460 = vmatpush3.bf16.msra.mxu1 %v13457_v23 }
 0x32e   : > { %10461 = vmatprep.subr.bf16.mxu1 %v13466_v33 }
 0x32f   : > { %10446 = vmatmul.mubr.msk.bf16.gmra.mxu1 %vm2086_vm0, %v13287_v27 }
 0x330   : > { %10449 = vmatprep.mubr.msk.bf16.mxu1 %vm2086_vm0, %v13303_v51 }
 0x331   : > { %10462 = vmatpush3.bf16.msra.mxu1 %v13466_v33 }
 0x332   : > { %10463 = vmatprep.subr.bf16.mxu1 %v13474_v61 }
 0x335   : > { %10464 = vmatpush3.bf16.msra.mxu1 %v13474_v61 }
 0x336   : > { %10465 = vmatprep.subr.bf16.mxu1 %v13484_v35 }
 0x337   : > { %10450 = vmatmul.mubr.msk.bf16.gmra.mxu1 %vm2086_vm0, %v13315_v40 }
 0x338   : > { %10453 = vmatprep.mubr.msk.bf16.mxu1 %vm2086_vm0, %v13332_v63 }
 0x339   : > { %10466 = vmatpush3.bf16.msra.mxu1 %v13484_v35 }
 0x33a   : > { %10467 = vmatprep.subr.bf16.mxu1 %v13492_v0 }
 0x33d   : > { %10468 = vmatpush3.bf16.msra.mxu1 %v13492_v0 }
 0x33e   : > { %10469 = vmatprep.subr.bf16.mxu1 %v13385_v22 }
 0x33f   : > { %10454 = vmatmul.mubr.msk.bf16.gmra.mxu1 %vm2086_vm0, %v13347_v43 }
 0x341   : > { %10470 = vmatpush3.bf16.msra.mxu1 %v13385_v22 }
 0x342   : > { %10471 = vmatprep.subr.bf16.mxu1 %v13368_v52 }
 0x345   : > { %10472 = vmatpush3.bf16.msra.mxu1 %v13368_v52 }
 0x351   : > { %v13539_v60 = vpop.permute.xlu1 %2814 }
 0x359   : > { %v13505_v14 = vpop.permute.xlu0 %2816 }
 0x35a   : > { %10689 = vmatprep.subr.msk.bf16.mxu1 %vm2086_vm0, %v13505_v14 }
 0x3e7   : > { %v10443_v19 = vpop.f32.mrf.mxu1 }
 0x3e8   : > { %2236 = vmax.xlane.f32.xlu0 %v10443_v19 }
 0x3e9   : > { %v2169_v46 = vpop.f32.mrf.mxu1 }
 0x3eb   : > { %v10444_v36 = vpop.f32.mrf.mxu1 }
 0x3ec   : > { %2232 = vmax.xlane.f32.xlu0 %v2169_v46  ;;  %2238 = vmax.xlane.f32.xlu1 %v10444_v36 }
 0x3ed   : > { %v2172_v48 = vpop.f32.mrf.mxu1 }
 0x3ef   : > { %v10447_v44 = vpop.f32.mrf.mxu1 }
 0x3f0   : > { %2234 = vmax.xlane.f32.xlu1 %v2172_v48  ;;  %2244 = vmax.xlane.f32.xlu0 %v10447_v44 }
 0x3f1   : > { %v13511_v47 = vpop.f32.mrf.mxu1 }
 0x3f3   : > { %v13513_v12 = vpop.f32.mrf.mxu1 }
 0x3f4   : > { %2240 = vmax.xlane.f32.xlu0 %v13511_v47  ;;  %2246 = vmax.xlane.f32.xlu1 %v13513_v12 }
 0x3f5   : > { %v2188_v56 = vpop.f32.mrf.mxu1 }
 0x3f7   : > { %v13517_v8 = vpop.f32.mrf.mxu1 }
 0x3f8   : > { %2242 = vmax.xlane.f32.xlu1 %v2188_v56  ;;  %2252 = vmax.xlane.f32.xlu0 %v13517_v8 }
 0x3f9   : > { %v13520_v42 = vpop.f32.mrf.mxu1 }
 0x3fb   : > { %v13522_v26 = vpop.f32.mrf.mxu1 }
 0x3fc   : > { %2248 = vmax.xlane.f32.xlu0 %v13520_v42  ;;  %2254 = vmax.xlane.f32.xlu1 %v13522_v26 }
 0x3fd   : > { %v13526_v18 = vpop.f32.mrf.mxu1 }
 0x3ff   : > { %v10455_v54 = vpop.f32.mrf.mxu1 }
 0x400   : > { %2250 = vmax.xlane.f32.xlu1 %v13526_v18  ;;  %2260 = vmax.xlane.f32.xlu0 %v10455_v54 }
 0x401   : > { %v2217_v4 = vpop.f32.mrf.mxu1 }
 0x403   : > { %v13533_v24 = vpop.f32.mrf.mxu1 }
 0x404   : > { %2256 = vmax.xlane.f32.xlu0 %v2217_v4 }
 0x405   : > { %v13536_v38 = vpop.f32.mrf.mxu1 }
 0x411   : > { %2810 = vrot.lane.b32.xlu1 %v13388_v7, %s12469_s7 }
 0x41a   : > { %2812 = vrot.lane.b32.xlu0 %v13371_v53, %s12469_s7 }
 0x435   : > { %2262 = vmax.xlane.f32.xlu1 %v13533_v24 }
 0x439   : > { %2258 = vmax.xlane.f32.xlu1 %v13536_v38 }
 0x471   : > { %v2237_v57 = vpop.xlane.xlu0 %2236 }
 0x472   : > { %v2266_v30 = vsub.f32 %v10443_v19, %v2237_v57 }
 0x474   : > { %v2284_v9 = vmul.f32 1.442695, %v2266_v30 }
 0x475   : > { %v2233_v20 = vpop.xlane.xlu0 %2232  ;;  %v2239_v59 = vpop.xlane.xlu1 %2238 }
 0x476   : > { %11284 = vpow2.f32 %v2284_v9  ;;  %v2264_v7 = vsub.f32 %v2169_v46, %v2233_v20  ;;  %v2267_v39 = vsub.f32 %v10444_v36, %v2239_v59 }
 0x478   : > { %v2280_v28 = vmul.f32 1.442695, %v2264_v7  ;;  %v2286_v53 = vmul.f32 1.442695, %v2267_v39 }
 0x479   : > { %v2235_v21 = vpop.xlane.xlu1 %2234  ;;  %v2245_v39 = vpop.xlane.xlu0 %2244 }
 0x47a   : > { %11286 = vpow2.f32 %v2280_v28  ;;  %v2265_v15 = vsub.f32 %v2172_v48, %v2235_v21  ;;  %v2270_v20 = vsub.f32 %v10447_v44, %v2245_v39 }
 0x47b   : > { %11288 = vpow2.f32 %v2286_v53 }
 0x47c   : > { %v2282_v5 = vmul.f32 1.442695, %v2265_v15  ;;  %v2292_v19 = vmul.f32 1.442695, %v2270_v20 }
 0x47d   : > { %v2241_v21 = vpop.xlane.xlu0 %2240 }
 0x47e   : > { %11290 = vpow2.f32 %v2282_v5  ;;  %v2247_v5 = vpop.xlane.xlu1 %2246  ;;  %v2268_v36 = vsub.f32 %v13511_v47, %v2241_v21 }
 0x47f   : > { %11292 = vpow2.f32 %v2292_v19  ;;  %v2271_v62 = vsub.f32 %v13513_v12, %v2247_v5 }
 0x480   : > { %v2288_v41 = vmul.f32 1.442695, %v2268_v36 }
 0x481   : > { %v2253_v15 = vpop.xlane.xlu0 %2252  ;;  %v2294_v58 = vmul.f32 1.442695, %v2271_v62 }
 0x482   : > { %v2243_v57 = vpop.xlane.xlu1 %2242  ;;  %v2274_v44 = vsub.f32 %v13517_v8, %v2253_v15 }
 0x483   : > { %v13541_v32 = vpop.eup %11284  ;;  %v2269_v46 = vsub.f32 %v2188_v56, %v2243_v57 }
 0x484   : > { %2316 = vadd.xlane.f32.xlu0 %v13541_v32  ;;  %v2300_v47 = vmul.f32 1.442695, %v2274_v44 }
 0x485   : > { %v2249_v28 = vpop.xlane.xlu0 %2248  ;;  %v2290_v7 = vmul.f32 1.442695, %v2269_v46 }
 0x486   : > { %v2255_v48 = vpop.xlane.xlu1 %2254  ;;  %v2272_v21 = vsub.f32 %v13520_v42, %v2249_v28 }
 0x487   : > { %v13544_v34 = vpop.eup %11286  ;;  %11294 = vpow2.f32 %v2290_v7 }
 0x488   : > { %v13546_v30 = vpop.eup %11288  ;;  %2312 = vadd.xlane.f32.xlu0 %v13544_v34  ;;  %11296 = vpow2.f32 %v2288_v41  ;;  %v2296_v12 = vmul.f32 1.442695, %v2272_v21 }
 0x489   : > { %2318 = vadd.xlane.f32.xlu1 %v13546_v30  ;;  %v2261_v9 = vpop.xlane.xlu0 %2260 }
 0x48a   : > { %v2278_v53 = vsub.f32 %v10455_v54, %v2261_v9  ;;  %v2251_v39 = vpop.xlane.xlu1 %2250 }
 0x48b   : > { %v13550_v59 = vpop.eup %11290  ;;  %v2273_v8 = vsub.f32 %v13526_v18, %v2251_v39 }
 0x48c   : > { %v2308_v11 = vmul.f32 1.442695, %v2278_v53  ;;  %v13563_v54 = vpop.eup %11292 }
 0x48d   : > { %2314 = vadd.xlane.f32.xlu1 %v13550_v59  ;;  %v2298_v28 = vmul.f32 1.442695, %v2273_v8 }
 0x48e   : > { %11298 = vpow2.f32 %v2308_v11  ;;  %v13561_v20 = vpop.permute.xlu1 %2810 }
 0x48f   : > { %11300 = vpow2.f32 %v2294_v58 }
 0x494   : > { %v13568_v11 = vpop.eup %11294 }
 0x495   : > { %v13571_v42 = vpop.eup %11296 }
 0x49e   : > { %2806 = vrot.lane.b32.xlu1 %v13271_v25, %s12469_s7  ;;  %2808 = vrot.lane.b32.xlu0 %v13406_v1, %s12469_s7  ;;  %v2257_v25 = vpop.xlane.xlu0 %2256 }
 0x49f   : > { %v2276_v1 = vsub.f32 %v2217_v4, %v2257_v25  ;;  %v2275_v4 = vsub.f32 %v13522_v26, %v2255_v48  ;;  %v13575_v26 = vpop.eup %11298 }
 0x4a0   : > { %v13578_v57 = vpop.eup %11300 }
 0x4a1   : > { %v2304_v56 = vmul.f32 1.442695, %v2276_v1  ;;  %v2302_v58 = vmul.f32 1.442695, %v2275_v4 }
 0x4a3   : > { %11302 = vpow2.f32 %v2304_v56 }
 0x4a4   : > { %11304 = vpow2.f32 %v2300_v47 }
 0x4a5   : > { %11306 = vpow2.f32 %v2296_v12  ;;  %v2864_v12 = vsel %vm2086_vm0, %v13505_v14, 0  ;;  %v2855_v14 = vsel %vm2086_vm0, %v13561_v20, 0 }
 0x4b0   : > { %v13582_v18 = vpop.eup %11302 }
 0x4b1   : > { %v13584_v19 = vpop.eup %11304 }
 0x4b2   : > { %v13588_v46 = vpop.eup %11306 }
 0x4bd   : > { %2324 = vadd.xlane.f32.xlu0 %v13563_v54 }
 0x4be   : > { %v2263_v41 = vpop.xlane.xlu1 %2262 }
 0x4bf   : > { %v2279_v62 = vsub.f32 %v13533_v24, %v2263_v41 }
 0x4c1   : > { %v2310_v15 = vmul.f32 1.442695, %v2279_v62  ;;  %2322 = vadd.xlane.f32.xlu0 %v13568_v11 }
 0x4c2   : > { %2320 = vadd.xlane.f32.xlu1 %v13571_v42  ;;  %v2259_v5 = vpop.xlane.xlu1 %2258 }
 0x4c3   : > { %11308 = vpow2.f32 %v2310_v15  ;;  %v2277_v24 = vsub.f32 %v13536_v38, %v2259_v5 }
 0x4c4   : > { %11310 = vpow2.f32 %v2302_v58 }
 0x4c5   : > { %2340 = vadd.xlane.f32.xlu0 %v13575_v26  ;;  %11312 = vpow2.f32 %v2298_v28  ;;  %v2306_v9 = vmul.f32 1.442695, %v2277_v24 }
 0x4c6   : > { %2326 = vadd.xlane.f32.xlu1 %v13578_v57 }
 0x4c7   : > { %11314 = vpow2.f32 %v2306_v9 }
 0x4c9   : > { %2336 = vadd.xlane.f32.xlu0 %v13582_v18 }
 0x4ca   : > { %2332 = vadd.xlane.f32.xlu1 %v13584_v19 }
 0x4ce   : > { %2328 = vadd.xlane.f32.xlu1 %v13588_v46 }
 0x4d0   : > { %v13591_v38 = vpop.eup %11308 }
 0x4d1   : > { %v13593_v36 = vpop.eup %11310  ;;  %2342 = vadd.xlane.f32.xlu0 %v13591_v38 }
 0x4d2   : > { %2334 = vadd.xlane.f32.xlu1 %v13593_v36  ;;  %v13597_v48 = vpop.eup %11312 }
 0x4d4   : > { %v13600_v7 = vpop.eup %11314 }
 0x4d6   : > { %2330 = vadd.xlane.f32.xlu1 %v13597_v48 }
 0x4da   : > { %2338 = vadd.xlane.f32.xlu1 %v13600_v7 }
 0x4e7   : > { %2804 = vrot.lane.b32.xlu0 %v13255_v13, %s12469_s7 }
 0x4eb   : > { %2802 = vrot.lane.b32.xlu1 %v13237_v50, %s12469_s7  ;;  %2778 = vrot.lane.b32.xlu0 %v13235_v2, %s12469_s7  ;;  %v2813_v2 = vpop.permute.xlu0 %2812 }
 0x4ef   : > { %2780 = vrot.lane.b32.xlu1 %v13253_v17, %s12469_s7  ;;  %2782 = vrot.lane.b32.xlu0 %v13269_v29, %s12469_s7 }
 0x4f3   : > { %2784 = vrot.lane.b32.xlu1 %v13287_v27, %s12469_s7  ;;  %2786 = vrot.lane.b32.xlu0 %v13303_v51, %s12469_s7  ;;  %v11024_v27 = vld [vmem:[#allocation13 + $0x30] ss:$8 sps:$4 sm:$0xff]   ;;  %v11026_v51 = vld [vmem:[#allocation13 + $0x34] ss:$8 sps:$4 sm:$0xff]  }
 0x4f4   : > { %2601 = vmatprep.subr.bf16.mxu0 %v11026_v51 }
 0x4f5   : > { %2602 = vmatpush1.bf16.msra.mxu0 %v11024_v27 }
 0x4f7   : > { %2788 = vrot.lane.b32.xlu1 %v13315_v40, %s12469_s7  ;;  %2790 = vrot.lane.b32.xlu0 %v13332_v63, %s12469_s7  ;;  %v11029_v40 = vld [vmem:[#allocation13 + $0x24] ss:$8 sps:$4 sm:$0xff]   ;;  %v11027_v63 = vld [vmem:[#allocation13 + $0x20] ss:$8 sps:$4 sm:$0xff]  }
 0x4f8   : > { %2603 = vmatprep.subr.bf16.mxu0 %v11029_v40 }
 0x4f9   : > { %2604 = vmatpush1.bf16.msra.mxu0 %v11027_v63 }
 0x4fb   : > { %2792 = vrot.lane.b32.xlu1 %v13347_v43, %s12469_s7 }
 0x4ff   : > { %3135 = vrot.lane.b32.xlu1 %v13457_v23, %s12469_s7 }
 0x50d   : > { %v2317_v50 = vpop.xlane.xlu0 %2316 }
 0x511   : > { %v2313_v17 = vpop.xlane.xlu0 %2312 }
 0x512   : > { %v2319_v13 = vpop.xlane.xlu1 %2318 }
 0x513   : > { %11316 = vrcp.f32 %v2319_v13 }
 0x514   : > { %11318 = vrcp.f32 %v2313_v17 }
 0x515   : > { %11320 = vrcp.f32 %v2317_v50 }
 0x516   : > { %v2315_v29 = vpop.xlane.xlu1 %2314 }
 0x517   : > { %11322 = vrcp.f32 %v2315_v29 }
 0x51a   : > { %v2807_v4 = vpop.permute.xlu1 %2806 }
 0x520   : > { %v11317_v43 = vpop.eup %11316 }
 0x521   : > { %v11319_v53 = vpop.eup %11318  ;;  %v2363_v1 = vmul.f32 %v11317_v43, %v13546_v30  ;;  %v2861_v30 = vsel %vm2086_vm0, %v13539_v60, 0 }
 0x522   : > { %v11321_v23 = vpop.eup %11320  ;;  %v2360_v44 = vmul.f32 %v11319_v53, %v13544_v34  ;;  %v2858_v34 = vsel %vm2086_vm0, %v2813_v2, 0 }
 0x523   : > { %v2362_v56 = vmul.f32 %v11321_v23, %v13541_v32  ;;  %v2809_v32 = vpop.permute.xlu0 %2808 }
 0x524   : > { %v11323_v25 = vpop.eup %11322 }
 0x525   : > { %v2361_v39 = vmul.f32 %v11323_v25, %v13550_v59  ;;  %v2377_v21 = vpack.c.bf16 %v2363_v1, %v2362_v56  ;;  %v11014_v25 = vld [vmem:[#allocation13 + $0x74] ss:$8 sps:$4 sm:$0xff]  }
 0x527   : > { %v2376_v47 = vpack.c.bf16 %v2361_v39, %v2360_v44  ;;  %v11030_v44 = vld [vmem:[#allocation13 + $0x10] ss:$8 sps:$4 sm:$0xff]   ;;  %v11032_v39 = vld [vmem:[#allocation13 + $0x14] ss:$8 sps:$4 sm:$0xff]  }
 0x528   : > { %2605 = vmatprep.subr.bf16.mxu0 %v11032_v39 }
 0x529   : > { %10473 = vmatprep.mubr.bf16.mxu1 %v2376_v47  ;;  %2606 = vmatpush1.bf16.msra.mxu0 %v11030_v44 }
 0x52a   : > { %10474 = vmatmul.mubr.bf16.vlgmr.msra.gmra.mxu1 %v2377_v21 }
 0x52b   : > { %10490 = vmatpush3.bf16.xpose.msra.mxu1 %v2864_v12 }
 0x52c   : > { %10690 = vmatprep.subr.msk.bf16.mxu1 %vm2086_vm0, %v13539_v60  ;;  %v2852_v60 = vsel %vm2086_vm0, %v2809_v32, 0 }
 0x533   : > { %10492 = vmatpush3.bf16.xpose.msra.mxu1 %v2861_v30 }
 0x534   : > { %10691 = vmatprep.subr.msk.bf16.mxu1 %vm2086_vm0, %v2813_v2 }
 0x53b   : > { %10494 = vmatpush3.bf16.xpose.msra.mxu1 %v2858_v34 }
 0x53c   : > { %10692 = vmatprep.subr.msk.bf16.mxu1 %vm2086_vm0, %v13561_v20  ;;  %v2849_v20 = vsel %vm2086_vm0, %v2807_v4, 0 }
 0x543   : > { %10496 = vmatpush3.bf16.xpose.msra.mxu1 %v2855_v14 }
 0x544   : > { %10693 = vmatprep.subr.msk.bf16.mxu1 %vm2086_vm0, %v2809_v32 }
 0x546   : > { %v2325_v59 = vpop.xlane.xlu0 %2324 }
 0x54a   : > { %v2323_v41 = vpop.xlane.xlu0 %2322 }
 0x54b   : > { %10498 = vmatpush3.bf16.xpose.msra.mxu1 %v2852_v60  ;;  %11324 = vrcp.f32 %v2323_v41  ;;  %v2321_v62 = vpop.xlane.xlu1 %2320 }
 0x54c   : > { %10694 = vmatprep.subr.msk.bf16.mxu1 %vm2086_vm0, %v2807_v4  ;;  %11326 = vrcp.f32 %v2321_v62  ;;  %v11035_v4 = vld [vmem:[#allocation13 + $0x4] ss:$8 sps:$4 sm:$0xff]  }
 0x54d   : > { %11328 = vrcp.f32 %v2325_v59  ;;  %v11033_v59 = vld [vmem:[#allocation13] ss:$8 sps:$4 sm:$0xff]   ;;  %2607 = vmatprep.subr.bf16.mxu0 %v11035_v4 }
 0x54e   : > { %v2341_v8 = vpop.xlane.xlu0 %2340  ;;  %2608 = vmatpush1.bf16.msra.mxu0 %v11033_v59 }
 0x54f   : > { %v2327_v58 = vpop.xlane.xlu1 %2326 }
 0x550   : > { %11330 = vrcp.f32 %v2327_v58 }
 0x552   : > { %v2337_v5 = vpop.xlane.xlu0 %2336 }
 0x553   : > { %10500 = vmatpush3.bf16.xpose.msra.mxu1 %v2849_v20  ;;  %v2333_v15 = vpop.xlane.xlu1 %2332 }
 0x557   : > { %v2329_v28 = vpop.xlane.xlu1 %2328 }
 0x558   : > { %v11325_v24 = vpop.eup %11324 }
 0x559   : > { %v11327_v9 = vpop.eup %11326  ;;  %v2365_v2 = vmul.f32 %v11325_v24, %v13568_v11  ;;  %v11017_v24 = vld [vmem:[#allocation13 + $0x64] ss:$8 sps:$4 sm:$0xff]  }
 0x55a   : > { %v2343_v50 = vpop.xlane.xlu0 %2342  ;;  %v2364_v17 = vmul.f32 %v11327_v9, %v13571_v42  ;;  %v11329_v13 = vpop.eup %11328 }
 0x55b   : > { %v2335_v29 = vpop.xlane.xlu1 %2334  ;;  %v2366_v63 = vmul.f32 %v11329_v13, %v13563_v54 }
 0x55c   : > { %v2378_v27 = vpack.c.bf16 %v2365_v2, %v2364_v17  ;;  %11332 = vrcp.f32 %v2335_v29  ;;  %v11015_v2 = vld [vmem:[#allocation13 + $0x60] ss:$8 sps:$4 sm:$0xff]   ;;  %v11023_v17 = vld [vmem:[#allocation13 + $0x44] ss:$8 sps:$4 sm:$0xff]  }
 0x55d   : > { %v11331_v51 = vpop.eup %11330  ;;  %11334 = vrcp.f32 %v2329_v28 }
 0x55e   : > { %10477 = vmatprep.mubr.bf16.mxu1 %v2378_v27  ;;  %v2805_v40 = vpop.permute.xlu0 %2804  ;;  %v2367_v43 = vmul.f32 %v11331_v51, %v13578_v57  ;;  %11336 = vrcp.f32 %v2333_v15  ;;  %v11021_v51 = vld [vmem:[#allocation13 + $0x40] ss:$8 sps:$4 sm:$0xff]  }
 0x55f   : > { %v2331_v53 = vpop.xlane.xlu1 %2330  ;;  %10695 = vmatprep.subr.msk.bf16.mxu1 %vm2086_vm0, %v2805_v40  ;;  %v2846_v11 = vsel %vm2086_vm0, %v2805_v40, 0  ;;  %v1956_v40 = vadd.f32 %v13446_v16, %v13352_v37 }
 0x560   : > { %11338 = vrcp.f32 %v2331_v53  ;;  %10502 = vmatpush3.bf16.xpose.msra.mxu1 %v2846_v11  ;;  %v2379_v42 = vpack.c.bf16 %v2367_v43, %v2366_v63 }
 0x561   : > { %11340 = vrcp.f32 %v2337_v5 }
 0x562   : > { %10478 = vmatmul.mubr.bf16.gmra.mxu1 %v2379_v42  ;;  %v2779_v28 = vpop.permute.xlu0 %2778 }
 0x563   : > { %v2339_v23 = vpop.xlane.xlu1 %2338 }
 0x564   : > { %11342 = vrcp.f32 %v2339_v23 }
 0x565   : > { %11344 = vrcp.f32 %v2343_v50  ;;  %v1959_v50 = vpop.f32.mrf.mxu0 }
 0x566   : > { %11346 = vrcp.f32 %v2341_v8  ;;  %v2783_v9 = vpop.permute.xlu0 %2782  ;;  %v1960_v29 = vadd.f32 %v1959_v50, %v13352_v37 }
 0x567   : > { %v2803_v1 = vpop.permute.xlu1 %2802 }
 0x568   : > { %10696 = vmatprep.subr.msk.bf16.mxu1 %vm2086_vm0, %v2803_v1  ;;  %v2843_v54 = vsel %vm2086_vm0, %v2803_v1, 0  ;;  %v13670_v63 = vpack.c.bf16 %v1960_v29, %v1956_v40 }
 0x569   : > { %10504 = vmatpush3.bf16.xpose.msra.mxu1 %v2843_v54  ;;  %v11333_v57 = vpop.eup %11332 }
 0x56a   : > { %3364 = vmatprep.subr.bf16.mxu1 %v11014_v25  ;;  %v11335_v56 = vpop.eup %11334  ;;  %v2371_v12 = vmul.f32 %v11333_v57, %v13593_v36  ;;  %v2787_v27 = vpop.permute.xlu0 %2786  ;;  %16638 = vst [vmem:[#allocation59_spill] sm:$0xff] %v13670_v63 }
 0x56b   : > { %v11337_v47 = vpop.eup %11336  ;;  %v2368_v30 = vmul.f32 %v11335_v56, %v13588_v46  ;;  %v16502_v46 = vmov 0  }
 0x56c   : > { %v2370_v14 = vmul.f32 %v11337_v47, %v13584_v19  ;;  %2625 = vmatprep.mubr.bf16.mxu0 %v16502_v46 }
 0x56d   : > { %v11339_v21 = vpop.eup %11338 }
 0x56e   : > { %v2369_v34 = vmul.f32 %v11339_v21, %v13597_v48  ;;  %v11341_v32 = vpop.eup %11340  ;;  %v2381_v62 = vpack.c.bf16 %v2371_v12, %v2370_v14  ;;  %v2791_v53 = vpop.permute.xlu0 %2790 }
 0x56f   : > { %v2372_v8 = vmul.f32 %v11341_v32, %v13582_v18  ;;  %v11012_v18 = vld [vmem:[#allocation13 + $0x70] ss:$8 sps:$4 sm:$0xff]  }
 0x570   : > { %v2380_v60 = vpack.c.bf16 %v2369_v34, %v2368_v30 }
 0x571   : > { %v11343_v41 = vpop.eup %11342 }
 0x572   : > { %v11345_v58 = vpop.eup %11344  ;;  %10481 = vmatprep.mubr.bf16.mxu1 %v2380_v60  ;;  %v2373_v36 = vmul.f32 %v11343_v41, %v13600_v7  ;;  %v2781_v7 = vpop.permute.xlu1 %2780 }
 0x573   : > { %10482 = vmatmul.mubr.bf16.gmra.mxu1 %v2381_v62  ;;  %v11347_v48 = vpop.eup %11346  ;;  %v2375_v19 = vmul.f32 %v11345_v58, %v13591_v38  ;;  %v11020_v38 = vld [vmem:[#allocation13 + $0x54] ss:$8 sps:$4 sm:$0xff]  }
 0x574   : > { %v2382_v20 = vpack.c.bf16 %v2373_v36, %v2372_v8  ;;  %v2374_v15 = vmul.f32 %v11347_v48, %v13575_v26  ;;  %v11018_v26 = vld [vmem:[#allocation13 + $0x50] ss:$8 sps:$4 sm:$0xff]  }
 0x576   : > { %10485 = vmatprep.mubr.bf16.mxu1 %v2382_v20  ;;  %v2383_v5 = vpack.c.bf16 %v2375_v19, %v2374_v15  ;;  %v2785_v13 = vpop.permute.xlu1 %2784 }
 0x57a   : > { %v2789_v43 = vpop.permute.xlu1 %2788 }
 0x57b   : > { %10486 = vmatmul.mubr.bf16.gmra.mxu1 %v2383_v5 }
 0x57c   : > { %10505 = vmatprep.mubr.msk.bf16.mxu1 %vm2086_vm0, %v2779_v28 }
 0x57e   : > { %v2793_v11 = vpop.permute.xlu1 %2792 }
 0x583   : > { %10506 = vmatmul.mubr.msk.bf16.vlgmr.msra.gmra.mxu1 %vm2086_vm0, %v2781_v7 }
 0x584   : > { %3365 = vmatpush1.bf16.msra.mxu1 %v11012_v18  ;;  %10509 = vmatprep.mubr.msk.bf16.mxu1 %vm2086_vm0, %v2783_v9 }
 0x585   : > { %3366 = vmatprep.subr.bf16.mxu1 %v11017_v24 }
 0x588   : > { %3367 = vmatpush1.bf16.msra.mxu1 %v11015_v2 }
 0x589   : > { %3368 = vmatprep.subr.bf16.mxu1 %v11020_v38 }
 0x58b   : > { %10510 = vmatmul.mubr.msk.bf16.gmra.mxu1 %vm2086_vm0, %v2785_v13 }
 0x58c   : > { %3369 = vmatpush1.bf16.msra.mxu1 %v11018_v26  ;;  %10513 = vmatprep.mubr.msk.bf16.mxu1 %vm2086_vm0, %v2787_v27 }
 0x58d   : > { %3370 = vmatprep.subr.bf16.mxu1 %v11023_v17  ;;  %v3136_v17 = vpop.permute.xlu1 %3135 }
 0x590   : > { %3371 = vmatpush1.bf16.msra.mxu1 %v11021_v51 }
 0x591   : > { %10585 = vmatprep.subr.bf16.mxu1 %v13670_v63 }
 0x593   : > { %10514 = vmatmul.mubr.msk.bf16.gmra.mxu1 %vm2086_vm0, %v2789_v43 }
 0x594   : > { %10517 = vmatprep.mubr.msk.bf16.mxu1 %vm2086_vm0, %v2791_v53 }
 0x59b   : > { %10518 = vmatmul.mubr.msk.bf16.gmra.mxu1 %vm2086_vm0, %v2793_v11 }
 0x59c   : > { %3388 = vmatprep.mubr.bf16.mxu1 %v16502_v46 }
 0x5ea   : > { %v10475_v42 = vpop.f32.mrf.mxu1 }
 0x5ec   : > { %v2418_v23 = vpop.f32.mrf.mxu1 }
 0x5ee   : > { %v10476_v37 = vpop.f32.mrf.mxu1 }
 0x5ef   : > { %v2514_v1 = vpack.c.bf16 %v10476_v37, %v10475_v42 }
 0x5f0   : > { %v2421_v16 = vpop.f32.mrf.mxu1 }
 0x5f1   : > { %v2513_v25 = vpack.c.bf16 %v2421_v16, %v2418_v23 }
 0x5f3   : > { %9762 = vmatmul.mubr.msk.bf16.vlgmr.msra.gmra.mxu0 %vm2086_vm0, %v2513_v25 }
 0x5f4   : > { %2635 = vmatprep.mubr.bf16.mxu0 %v16502_v46 }
 0x5fb   : > { %9763 = vmatmul.mubr.msk.bf16.gmra.mxu0 %vm2086_vm0, %v2514_v1 }
 0x5fc   : > { %2645 = vmatprep.mubr.bf16.mxu0 %v16502_v46 }
 0x622   : > { %v10479_v54 = vpop.f32.mrf.mxu1 }
 0x624   : > { %v2434_v57 = vpop.f32.mrf.mxu1 }
 0x626   : > { %v10480_v44 = vpop.f32.mrf.mxu1 }
 0x627   : > { %v2516_v47 = vpack.c.bf16 %v10480_v44, %v10479_v54 }
 0x628   : > { %v2437_v39 = vpop.f32.mrf.mxu1 }
 0x629   : > { %v2515_v56 = vpack.c.bf16 %v2437_v39, %v2434_v57 }
 0x62b   : > { %9764 = vmatmul.mubr.msk.bf16.gmra.mxu0 %vm2086_vm0, %v2515_v56 }
 0x62c   : > { %2655 = vmatprep.mubr.bf16.mxu0 %v16502_v46 }
 0x633   : > { %v10483_v21 = vpop.f32.mrf.mxu1  ;;  %9765 = vmatmul.mubr.msk.bf16.gmra.mxu0 %vm2086_vm0, %v2516_v47 }
 0x634   : > { %2665 = vmatprep.mubr.bf16.mxu0 %v16502_v46 }
 0x635   : > { %v2450_v12 = vpop.f32.mrf.mxu1 }
 0x637   : > { %v10484_v30 = vpop.f32.mrf.mxu1 }
 0x638   : > { %v2518_v41 = vpack.c.bf16 %v10484_v30, %v10483_v21 }
 0x639   : > { %v2453_v34 = vpop.f32.mrf.mxu1 }
 0x63a   : > { %v2517_v32 = vpack.c.bf16 %v2453_v34, %v2450_v12 }
 0x63b   : > { %v10487_v14 = vpop.f32.mrf.mxu1 }
 0x63c   : > { %9766 = vmatmul.mubr.msk.bf16.gmra.mxu0 %vm2086_vm0, %v2517_v32 }
 0x63d   : > { %v2466_v59 = vpop.f32.mrf.mxu1  ;;  %2675 = vmatprep.mubr.bf16.mxu0 %v16502_v46 }
 0x63f   : > { %v10488_v4 = vpop.f32.mrf.mxu1 }
 0x640   : > { %v2520_v28 = vpack.c.bf16 %v10488_v4, %v10487_v14 }
 0x641   : > { %v2469_v60 = vpop.f32.mrf.mxu1 }
 0x642   : > { %v2519_v48 = vpack.c.bf16 %v2469_v60, %v2466_v59 }
 0x643   : > { %v10507_v62 = vpop.f32.mrf.mxu1 }
 0x644   : > { %9767 = vmatmul.mubr.msk.bf16.gmra.mxu0 %vm2086_vm0, %v2518_v41  ;;  %2967 = vmax.xlane.f32.xlu0 %v10507_v62 }
 0x645   : > { %v2900_v58 = vpop.f32.mrf.mxu1  ;;  %2685 = vmatprep.mubr.bf16.mxu0 %v16502_v46 }
 0x647   : > { %v10508_v8 = vpop.f32.mrf.mxu1 }
 0x648   : > { %2963 = vmax.xlane.f32.xlu0 %v2900_v58 }
 0x649   : > { %v2903_v36 = vpop.f32.mrf.mxu1 }
 0x64a   : > { %2965 = vmax.xlane.f32.xlu1 %v2903_v36 }
 0x64b   : > { %v13689_v20 = vpop.f32.mrf.mxu1 }
 0x64c   : > { %9768 = vmatmul.mubr.msk.bf16.gmra.mxu0 %vm2086_vm0, %v2519_v48  ;;  %2969 = vmax.xlane.f32.xlu0 %v10508_v8 }
 0x64d   : > { %v13692_v19 = vpop.f32.mrf.mxu1  ;;  %2695 = vmatprep.mubr.bf16.mxu0 %v16502_v46 }
 0x64f   : > { %v13695_v15 = vpop.f32.mrf.mxu1 }
 0x650   : > { %2977 = vmax.xlane.f32.xlu1 %v13695_v15 }
 0x651   : > { %v13698_v5 = vpop.f32.mrf.mxu1 }
 0x653   : > { %v13700_v18 = vpop.f32.mrf.mxu1 }
 0x654   : > { %9769 = vmatmul.mubr.msk.bf16.gmra.mxu0 %vm2086_vm0, %v2520_v28  ;;  %2973 = vmax.xlane.f32.xlu1 %v13698_v5 }
 0x655   : > { %v13704_v24 = vpop.f32.mrf.mxu1 }
 0x657   : > { %v13706_v7 = vpop.f32.mrf.mxu1 }
 0x658   : > { %2985 = vmax.xlane.f32.xlu1 %v13706_v7 }
 0x659   : > { %v13709_v9 = vpop.f32.mrf.mxu1 }
 0x65b   : > { %v13711_v2 = vpop.f32.mrf.mxu1 }
 0x65c   : > { %2981 = vmax.xlane.f32.xlu1 %v13709_v9 }
 0x65d   : > { %v13714_v38 = vpop.f32.mrf.mxu1 }
 0x65f   : > { %v13716_v50 = vpop.f32.mrf.mxu1 }
 0x660   : > { %2993 = vmax.xlane.f32.xlu1 %v13716_v50 }
 0x661   : > { %v13721_v26 = vpop.f32.mrf.mxu1 }
 0x662   : > { %3137 = vrot.lane.b32.xlu0 %v13452_v3, %s12469_s7 }
 0x664   : > { %2989 = vmax.xlane.f32.xlu1 %v13721_v26 }
 0x675   : > { %3127 = vrot.lane.b32.xlu1 %v13492_v0, %s12469_s7 }
 0x681   : > { %2975 = vmax.xlane.f32.xlu0 %v13689_v20 }
 0x685   : > { %2971 = vmax.xlane.f32.xlu0 %v13692_v19 }
 0x689   : > { %2983 = vmax.xlane.f32.xlu0 %v13700_v18 }
 0x68d   : > { %2979 = vmax.xlane.f32.xlu0 %v13704_v24 }
 0x691   : > { %2991 = vmax.xlane.f32.xlu0 %v13711_v2 }
 0x695   : > { %2987 = vmax.xlane.f32.xlu0 %v13714_v38 }
 0x6ab   : > { %3133 = vrot.lane.b32.xlu0 %v13466_v33, %s12469_s7 }
 0x6af   : > { %3131 = vrot.lane.b32.xlu0 %v13474_v61, %s12469_s7 }
 0x6b3   : > { %3129 = vrot.lane.b32.xlu0 %v13484_v35, %s12469_s7 }
 0x6b7   : > { %3125 = vrot.lane.b32.xlu0 %v13385_v22, %s12469_s7 }
 0x6cd   : > { %v2968_v3 = vpop.xlane.xlu0 %2967 }
 0x6ce   : > { %v2997_v0 = vsub.f32 %v10507_v62, %v2968_v3 }
 0x6d0   : > { %v3015_v13 = vmul.f32 1.442695, %v2997_v0 }
 0x6d1   : > { %v2964_v29 = vpop.xlane.xlu0 %2963 }
 0x6d2   : > { %11348 = vpow2.f32 %v3015_v13  ;;  %v2995_v27 = vsub.f32 %v2900_v58, %v2964_v29 }
 0x6d3   : > { %v2966_v51 = vpop.xlane.xlu1 %2965 }
 0x6d4   : > { %v3011_v40 = vmul.f32 1.442695, %v2995_v27  ;;  %v2996_v33 = vsub.f32 %v2903_v36, %v2966_v51 }
 0x6d5   : > { %v2970_v43 = vpop.xlane.xlu0 %2969 }
 0x6d6   : > { %11350 = vpow2.f32 %v3011_v40  ;;  %v2998_v53 = vsub.f32 %v10508_v8, %v2970_v43  ;;  %v3013_v42 = vmul.f32 1.442695, %v2996_v33 }
 0x6d8   : > { %v3017_v61 = vmul.f32 1.442695, %v2998_v53 }
 0x6d9   : > { %v3138_v11 = vpop.permute.xlu0 %3137  ;;  %v2978_v16 = vpop.xlane.xlu1 %2977 }
 0x6da   : > { %11352 = vpow2.f32 %v3017_v61  ;;  %10521 = vmatprep.subr.bf16.mxu0 %v3138_v11  ;;  %v3002_v32 = vsub.f32 %v13695_v15, %v2978_v16 }
 0x6db   : > { %10522 = vmatpush3.bf16.msra.mxu0 %v3138_v11  ;;  %11354 = vpow2.f32 %v3013_v42 }
 0x6dc   : > { %10523 = vmatprep.subr.bf16.mxu0 %v3136_v17  ;;  %v3025_v41 = vmul.f32 1.442695, %v3002_v32 }
 0x6dd   : > { %v2974_v25 = vpop.xlane.xlu1 %2973 }
 0x6de   : > { %v3000_v57 = vsub.f32 %v13698_v5, %v2974_v25  ;;  %v1837_v25 = vadd.f32 %v13330_v10, %v13215_v31 }
 0x6df   : > { %v13740_v22 = vpop.eup %11348  ;;  %10524 = vmatpush3.bf16.msra.mxu0 %v3136_v17 }
 0x6e0   : > { %3047 = vadd.xlane.f32.xlu1 %v13740_v22  ;;  %v3021_v56 = vmul.f32 1.442695, %v3000_v57  ;;  %v1847_v57 = vadd.f32 %v13509_v6, %v13215_v31 }
 0x6e1   : > { %v2986_v1 = vpop.xlane.xlu1 %2985 }
 0x6e2   : > { %11356 = vpow2.f32 %v3021_v56  ;;  %v3006_v59 = vsub.f32 %v13706_v7, %v2986_v1  ;;  %v1833_v1 = vadd.f32 %v13323_v49, %v13215_v31 }
 0x6e3   : > { %v13743_v35 = vpop.eup %11350 }
 0x6e4   : > { %3043 = vadd.xlane.f32.xlu1 %v13743_v35  ;;  %v3033_v8 = vmul.f32 1.442695, %v3006_v59 }
 0x6e5   : > { %v2982_v54 = vpop.xlane.xlu1 %2981 }
 0x6e6   : > { %v3004_v47 = vsub.f32 %v13709_v9, %v2982_v54  ;;  %v2001_v54 = vpack.c.bf16 %v1837_v25, %v1833_v1 }
 0x6e7   : > { %v13746_v23 = vpop.eup %11352 }
 0x6e8   : > { %3049 = vadd.xlane.f32.xlu1 %v13746_v23  ;;  %v13749_v37 = vpop.eup %11354  ;;  %v3029_v14 = vmul.f32 1.442695, %v3004_v47 }
 0x6e9   : > { %v2994_v39 = vpop.xlane.xlu1 %2993 }
 0x6ea   : > { %v3010_v48 = vsub.f32 %v13716_v50, %v2994_v39 }
 0x6ec   : > { %3045 = vadd.xlane.f32.xlu1 %v13749_v37  ;;  %v3041_v28 = vmul.f32 1.442695, %v3010_v48 }
 0x6ed   : > { %v2990_v4 = vpop.xlane.xlu1 %2989 }
 0x6ee   : > { %v3008_v62 = vsub.f32 %v13721_v26, %v2990_v4 }
 0x6ef   : > { %v13764_v9 = vpop.eup %11356 }
 0x6f1   : > { %v3128_v33 = vpop.permute.xlu1 %3127 }
 0x6fd   : > { %3123 = vrot.lane.b32.xlu1 %v13368_v52, %s12469_s7 }
 0x70a   : > { %v2976_v44 = vpop.xlane.xlu0 %2975 }
 0x70b   : > { %v3001_v12 = vsub.f32 %v13689_v20, %v2976_v44  ;;  %v3037_v20 = vmul.f32 1.442695, %v3008_v62  ;;  %v1843_v44 = vadd.f32 %v13338_v55, %v13215_v31 }
 0x70d   : > { %v3023_v60 = vmul.f32 1.442695, %v3001_v12  ;;  %v2007_v39 = vpack.c.bf16 %v1847_v57, %v1843_v44 }
 0x70e   : > { %v2972_v21 = vpop.xlane.xlu0 %2971 }
 0x70f   : > { %v2999_v30 = vsub.f32 %v13692_v19, %v2972_v21  ;;  %v3579_v4 = vsel %vm2086_vm0, %v2007_v39, 0 }
 0x711   : > { %v3019_v34 = vmul.f32 1.442695, %v2999_v30 }
 0x712   : > { %v2984_v52 = vpop.xlane.xlu0 %2983 }
 0x713   : > { %11358 = vpow2.f32 %v3019_v34  ;;  %v3005_v15 = vsub.f32 %v13700_v18, %v2984_v52 }
 0x714   : > { %11360 = vpow2.f32 %v3029_v14 }
 0x715   : > { %11362 = vpow2.f32 %v3023_v60  ;;  %v3031_v26 = vmul.f32 1.442695, %v3005_v15  ;;  %v3576_v60 = vsel %vm2086_vm0, %v2001_v54, 0 }
 0x716   : > { %v2980_v58 = vpop.xlane.xlu0 %2979  ;;  %11364 = vpow2.f32 %v3025_v41 }
 0x717   : > { %v3003_v36 = vsub.f32 %v13704_v24, %v2980_v58  ;;  %11366 = vpow2.f32 %v3033_v8  ;;  %v16641_v8 = vld [vmem:[#allocation39_spill] sm:$0xff] }
 0x718   : > { %11368 = vpow2.f32 %v3037_v20  ;;  %v3564_v20 = vsel %vm2086_vm0, %v16641_v8, 0 }
 0x719   : > { %v3027_v5 = vmul.f32 1.442695, %v3003_v36 }
 0x71a   : > { %v2992_v19 = vpop.xlane.xlu0 %2991 }
 0x71b   : > { %11370 = vpow2.f32 %v3027_v5  ;;  %v3009_v18 = vsub.f32 %v13711_v2, %v2992_v19  ;;  %v16642_v5 = vld [vmem:[#allocation36_spill] sm:$0xff] }
 0x71c   : > { %11372 = vpow2.f32 %v3041_v28 }
 0x71d   : > { %11374 = vpow2.f32 %v3031_v26  ;;  %v3039_v27 = vmul.f32 1.442695, %v3009_v18 }
 0x71e   : > { %v2988_v7 = vpop.xlane.xlu0 %2987 }
 0x71f   : > { %v3007_v3 = vsub.f32 %v13714_v38, %v2988_v7 }
 0x720   : > { %v13767_v0 = vpop.eup %11358 }
 0x721   : > { %3051 = vadd.xlane.f32.xlu0 %v13767_v0  ;;  %3053 = vadd.xlane.f32.xlu1 %v13764_v9  ;;  %v13771_v50 = vpop.eup %11360  ;;  %v3035_v17 = vmul.f32 1.442695, %v3007_v3 }
 0x722   : > { %v3134_v24 = vpop.permute.xlu0 %3133  ;;  %v13774_v13 = vpop.eup %11362 }
 0x723   : > { %10525 = vmatprep.subr.bf16.mxu0 %v3134_v24  ;;  %v13778_v29 = vpop.eup %11364  ;;  %11376 = vpow2.f32 %v3035_v17 }
 0x724   : > { %10526 = vmatpush3.bf16.msra.mxu0 %v3134_v24  ;;  %v13780_v51 = vpop.eup %11366  ;;  %11378 = vpow2.f32 %v3039_v27  ;;  %v3561_v24 = vsel %vm2086_vm0, %v16642_v5, 0  ;;  %v16643_v27 = vld [vmem:[#allocation33_spill] sm:$0xff] }
 0x725   : > { %3055 = vadd.xlane.f32.xlu0 %v13774_v13  ;;  %3061 = vadd.xlane.f32.xlu1 %v13771_v50  ;;  %v13784_v40 = vpop.eup %11368 }
 0x726   : > { %v3132_v38 = vpop.permute.xlu0 %3131 }
 0x727   : > { %10527 = vmatprep.subr.bf16.mxu0 %v3132_v38 }
 0x728   : > { %10528 = vmatpush3.bf16.msra.mxu0 %v3132_v38  ;;  %v13786_v43 = vpop.eup %11370 }
 0x729   : > { %3057 = vadd.xlane.f32.xlu0 %v13778_v29  ;;  %3065 = vadd.xlane.f32.xlu1 %v13780_v51  ;;  %v13790_v53 = vpop.eup %11372 }
 0x72a   : > { %v3130_v2 = vpop.permute.xlu0 %3129  ;;  %v13792_v61 = vpop.eup %11374 }
 0x72b   : > { %10529 = vmatprep.subr.bf16.mxu0 %v3130_v2 }
 0x72c   : > { %10530 = vmatpush3.bf16.msra.mxu0 %v3130_v2 }
 0x72d   : > { %3059 = vadd.xlane.f32.xlu0 %v13786_v43  ;;  %3069 = vadd.xlane.f32.xlu1 %v13784_v40 }
 0x72e   : > { %10531 = vmatprep.subr.bf16.mxu0 %v3128_v33  ;;  %v3126_v11 = vpop.permute.xlu0 %3125 }
 0x730   : > { %10532 = vmatpush3.bf16.msra.mxu0 %v3128_v33  ;;  %v13796_v42 = vpop.eup %11376 }
 0x731   : > { %3063 = vadd.xlane.f32.xlu0 %v13792_v61  ;;  %3073 = vadd.xlane.f32.xlu1 %v13790_v53  ;;  %v13799_v16 = vpop.eup %11378 }
 0x732   : > { %10533 = vmatprep.subr.bf16.mxu0 %v3126_v11 }
 0x734   : > { %10534 = vmatpush3.bf16.msra.mxu0 %v3126_v11 }
 0x735   : > { %3067 = vadd.xlane.f32.xlu0 %v13796_v42 }
 0x739   : > { %3071 = vadd.xlane.f32.xlu0 %v13799_v16 }
 0x742   : > { %4260 = vrot.lane.b32.xlu1 %v2001_v54, %s12469_s7 }
 0x74f   : > { %4262 = vrot.lane.b32.xlu0 %v2007_v39, %s12469_s7 }
 0x769   : > { %v3048_v56 = vpop.xlane.xlu1 %3047 }
 0x76d   : > { %v3044_v47 = vpop.xlane.xlu1 %3043 }
 0x771   : > { %v3050_v21 = vpop.xlane.xlu1 %3049 }
 0x772   : > { %11380 = vrcp.f32 %v3050_v21 }
 0x773   : > { %11382 = vrcp.f32 %v3044_v47 }
 0x774   : > { %11384 = vrcp.f32 %v3048_v56 }
 0x775   : > { %v3046_v10 = vpop.xlane.xlu1 %3045 }
 0x776   : > { %11386 = vrcp.f32 %v3046_v10 }
 0x779   : > { %v3124_v49 = vpop.permute.xlu1 %3123 }
 0x77a   : > { %10535 = vmatprep.subr.bf16.mxu0 %v3124_v49 }
 0x77b   : > { %10536 = vmatpush3.bf16.msra.mxu0 %v3124_v49 }
 0x77c   : > { %10697 = vmatprep.subr.msk.bf16.mxu0 %vm2086_vm0, %v2007_v39 }
 0x77f   : > { %v11381_v6 = vpop.eup %11380 }
 0x780   : > { %v11383_v12 = vpop.eup %11382  ;;  %v3094_v55 = vmul.f32 %v11381_v6, %v13746_v23 }
 0x781   : > { %v11385_v30 = vpop.eup %11384  ;;  %v3091_v34 = vmul.f32 %v11383_v12, %v13743_v35  ;;  %v3573_v35 = vsel %vm2086_vm0, %v13318_v45, 0 }
 0x782   : > { %v3093_v14 = vmul.f32 %v11385_v30, %v13740_v22  ;;  %v16639_v22 = vld [vmem:[#allocation45_spill] sm:$0xff] }
 0x783   : > { %v11387_v31 = vpop.eup %11386  ;;  %v3570_v23 = vsel %vm2086_vm0, %v16639_v22, 0 }
 0x784   : > { %v3092_v32 = vmul.f32 %v11387_v31, %v13749_v37  ;;  %v3108_v59 = vpack.c.bf16 %v3094_v55, %v3093_v14  ;;  %v16640_v37 = vld [vmem:[#allocation42_spill] sm:$0xff]  ;;  %v13852_v55 = vpop.f32.mrf.mxu0  ;;  %v16644_v14 = vld [vmem:[#allocation29_spill] sm:$0xff] }
 0x785   : > { %v3567_v41 = vsel %vm2086_vm0, %v16640_v37, 0 }
 0x786   : > { %v3107_v52 = vpack.c.bf16 %v3092_v32, %v3091_v34 }
 0x788   : > { %10537 = vmatprep.mubr.bf16.mxu0 %v3107_v52 }
 0x789   : > { %10538 = vmatmul.mubr.bf16.vlgmr.msra.gmra.mxu0 %v3108_v59 }
 0x78a   : > { %10554 = vmatpush3.bf16.xpose.msra.mxu0 %v3579_v4 }
 0x78b   : > { %10698 = vmatprep.subr.msk.bf16.mxu0 %vm2086_vm0, %v2001_v54 }
 0x792   : > { %10556 = vmatpush3.bf16.xpose.msra.mxu0 %v3576_v60  ;;  %v13861_v60 = vpop.f32.mrf.mxu0 }
 0x793   : > { %10699 = vmatprep.subr.msk.bf16.mxu0 %vm2086_vm0, %v13318_v45 }
 0x79a   : > { %10558 = vmatpush3.bf16.xpose.msra.mxu0 %v3573_v35 }
 0x79b   : > { %10700 = vmatprep.subr.msk.bf16.mxu0 %vm2086_vm0, %v16639_v22 }
 0x7a2   : > { %10560 = vmatpush3.bf16.xpose.msra.mxu0 %v3570_v23  ;;  %v16646_v23 = vld [vmem:[#allocation31_spill] sm:$0xff] }
 0x7a3   : > { %10701 = vmatprep.subr.msk.bf16.mxu0 %vm2086_vm0, %v16640_v37 }
 0x7aa   : > { %10562 = vmatpush3.bf16.xpose.msra.mxu0 %v3567_v41  ;;  %v3052_v62 = vpop.xlane.xlu0 %3051  ;;  %v3054_v58 = vpop.xlane.xlu1 %3053 }
 0x7ab   : > { %11388 = vrcp.f32 %v3052_v62  ;;  %10702 = vmatprep.subr.msk.bf16.mxu0 %vm2086_vm0, %v16641_v8 }
 0x7ac   : > { %11390 = vrcp.f32 %v3054_v58  ;;  %v13868_v58 = vpop.f32.mrf.mxu0 }
 0x7ae   : > { %v3056_v36 = vpop.xlane.xlu0 %3055  ;;  %v3062_v48 = vpop.xlane.xlu1 %3061 }
 0x7af   : > { %11392 = vrcp.f32 %v3056_v36  ;;  %v16647_v36 = vld [vmem:[#allocation35_spill] sm:$0xff] }
 0x7b2   : > { %10564 = vmatpush3.bf16.xpose.msra.mxu0 %v3564_v20  ;;  %v3058_v19 = vpop.xlane.xlu0 %3057  ;;  %v3066_v15 = vpop.xlane.xlu1 %3065  ;;  %v16648_v20 = vld [vmem:[#allocation38_spill] sm:$0xff] }
 0x7b3   : > { %11394 = vrcp.f32 %v3058_v19  ;;  %10703 = vmatprep.subr.msk.bf16.mxu0 %vm2086_vm0, %v16642_v5 }
 0x7b4   : > { %11396 = vrcp.f32 %v3062_v48 }
 0x7b6   : > { %v3060_v28 = vpop.xlane.xlu0 %3059  ;;  %v3070_v26 = vpop.xlane.xlu1 %3069 }
 0x7b7   : > { %11398 = vrcp.f32 %v3060_v28 }
 0x7b8   : > { %v11389_v7 = vpop.eup %11388  ;;  %11400 = vrcp.f32 %v3066_v15  ;;  %v16649_v15 = vld [vmem:[#allocation34_spill] sm:$0xff] }
 0x7b9   : > { %v11391_v3 = vpop.eup %11390  ;;  %v3095_v18 = vmul.f32 %v11389_v7, %v13767_v0  ;;  %v3558_v0 = vsel %vm2086_vm0, %v16643_v27, 0 }
 0x7ba   : > { %10566 = vmatpush3.bf16.xpose.msra.mxu0 %v3561_v24  ;;  %v3064_v17 = vpop.xlane.xlu0 %3063  ;;  %v3096_v38 = vmul.f32 %v11391_v3, %v13764_v9  ;;  %v3074_v11 = vpop.xlane.xlu1 %3073 }
 0x7bb   : > { %11402 = vrcp.f32 %v3064_v17  ;;  %10704 = vmatprep.subr.msk.bf16.mxu0 %vm2086_vm0, %v16643_v27 }
 0x7bc   : > { %v3109_v2 = vpack.c.bf16 %v3096_v38, %v3095_v18  ;;  %11404 = vrcp.f32 %v3070_v26  ;;  %v11393_v33 = vpop.eup %11392  ;;  %v16652_v18 = vld [vmem:[#allocation41_spill] sm:$0xff]  ;;  %v16653_v38 = vld [vmem:[#allocation44_spill] sm:$0xff] }
 0x7bd   : > { %v3097_v54 = vmul.f32 %v11393_v33, %v13774_v13  ;;  %v16654_v33 = vld [vmem:[#allocation40_spill] sm:$0xff] }
 0x7be   : > { %10541 = vmatprep.mubr.bf16.mxu0 %v3109_v2  ;;  %v3068_v25 = vpop.xlane.xlu0 %3067 }
 0x7bf   : > { %11406 = vrcp.f32 %v3068_v25 }
 0x7c0   : > { %v11395_v1 = vpop.eup %11394  ;;  %11408 = vrcp.f32 %v3074_v11 }
 0x7c1   : > { %v3098_v9 = vmul.f32 %v11395_v1, %v13778_v29  ;;  %v11397_v57 = vpop.eup %11396  ;;  %v16655_v1 = vld [vmem:[#allocation43_spill] sm:$0xff] }
 0x7c2   : > { %10568 = vmatpush3.bf16.xpose.msra.mxu0 %v3558_v0  ;;  %v3072_v44 = vpop.xlane.xlu0 %3071  ;;  %v3100_v21 = vmul.f32 %v11397_v57, %v13771_v50  ;;  %v12084_v50 = vld [vmem:[%s16463_s4] sm:$0x3f] }
 0x7c3   : > { %11410 = vrcp.f32 %v3072_v44  ;;  %v3110_v39 = vpack.c.bf16 %v3098_v9, %v3097_v54  ;;  %v1120_v52 = vrot.slane %v12084_v50, %v16644_v14  ;;  %v16658_v44 = vld [vmem:[#allocation47_spill] sm:$0xff] }
 0x7c4   : > { %v11399_v56 = vpop.eup %11398 }
 0x7c5   : > { %10542 = vmatmul.mubr.bf16.gmra.mxu0 %v3110_v39  ;;  %v3099_v47 = vmul.f32 %v11399_v56, %v13786_v43  ;;  %v11401_v10 = vpop.eup %11400  ;;  %v1674_v48 = vadd.f32 %v16647_v36, %v1120_v52  ;;  %v1684_v19 = vadd.f32 %v16648_v20, %v1120_v52  ;;  %v1670_v28 = vadd.f32 %v16649_v15, %v1120_v52  ;;  %v16659_v56 = vld [vmem:[#allocation49_spill] sm:$0xff] }
 0x7c6   : > { %v3102_v13 = vmul.f32 %v11401_v10, %v13780_v51  ;;  %v16645_v51 = vld [vmem:[#allocation32_spill] sm:$0xff]  ;;  %v1694_v17 = vadd.f32 %v16652_v18, %v1120_v52  ;;  %v1704_v2 = vadd.f32 %v16653_v38, %v1120_v52  ;;  %v1690_v11 = vadd.f32 %v16654_v33, %v1120_v52 }
 0x7c7   : > { %v3111_v49 = vpack.c.bf16 %v3100_v21, %v3099_v47  ;;  %v1664_v4 = vadd.f32 %v16645_v51, %v1120_v52  ;;  %v13878_v26 = vpack.c.bf16 %v1674_v48, %v1670_v28  ;;  %v1700_v0 = vadd.f32 %v16655_v1, %v1120_v52  ;;  %v16660_v21 = vld [vmem:[#allocation46_spill] sm:$0xff] }
 0x7c8   : > { %v11403_v6 = vpop.eup %11402  ;;  %v13894_v54 = vpack.c.bf16 %v1694_v17, %v1690_v11  ;;  %v1714_v39 = vadd.f32 %v16658_v44, %v1120_v52  ;;  %v1724_v47 = vadd.f32 %v16659_v56, %v1120_v52  ;;  %v1710_v10 = vadd.f32 %v16660_v21, %v1120_v52  ;;  %v16674_v56 = vld [vmem:[#allocation58_spill] sm:$0xff]  ;;  %v16675_v21 = vld [vmem:[#allocation57_spill] sm:$0xff] }
 0x7c9   : > { %10545 = vmatprep.mubr.bf16.mxu0 %v3111_v49  ;;  %v3101_v12 = vmul.f32 %v11403_v6, %v13792_v61  ;;  %v11405_v29 = vpop.eup %11404  ;;  %v13896_v9 = vpack.c.bf16 %v1704_v2, %v1700_v0  ;;  %v16662_v6 = vld [vmem:[#allocation48_spill] sm:$0xff] }
 0x7ca   : > { %v3104_v43 = vmul.f32 %v11405_v29, %v13784_v40  ;;  %v1660_v40 = vadd.f32 %v16646_v23, %v1120_v52  ;;  %16656 = vst [vmem:[#allocation42_spill] sm:$0xff] %v13894_v54 }
 0x7cb   : > { %v3112_v30 = vpack.c.bf16 %v3102_v13, %v3101_v12  ;;  %16657 = vst [vmem:[#allocation39_spill] sm:$0xff] %v13896_v9  ;;  %v1720_v12 = vadd.f32 %v16662_v6, %v1120_v52  ;;  %v13910_v13 = vpack.c.bf16 %v1714_v39, %v1710_v10  ;;  %v16676_v10 = vld [vmem:[#allocation56_spill] sm:$0xff]  ;;  %v16677_v6 = vld [vmem:[#allocation55_spill] sm:$0xff] }
 0x7cc   : > { %v11407_v31 = vpop.eup %11406  ;;  %v13866_v62 = vpack.c.bf16 %v1664_v4, %v1660_v40 }
 0x7cd   : > { %10546 = vmatmul.mubr.bf16.gmra.mxu0 %v3112_v30  ;;  %v3103_v34 = vmul.f32 %v11407_v31, %v13796_v42  ;;  %v11409_v32 = vpop.eup %11408  ;;  %16663 = vst [vmem:[#allocation33_spill] sm:$0xff] %v13910_v13  ;;  %v13914_v30 = vpack.c.bf16 %v1724_v47, %v1720_v12  ;;  %v16665_v31 = vld [vmem:[#allocation51_spill] sm:$0xff]  ;;  %v16678_v12 = vld [vmem:[#allocation54_spill] sm:$0xff] }
 0x7ce   : > { %v3106_v42 = vmul.f32 %v11409_v32, %v13790_v53  ;;  %v16651_v53 = vld [vmem:[#allocation37_spill] sm:$0xff]  ;;  %v16666_v32 = vld [vmem:[#allocation50_spill] sm:$0xff] }
 0x7cf   : > { %v3113_v61 = vpack.c.bf16 %v3104_v43, %v3103_v34  ;;  %v1680_v7 = vadd.f32 %v16651_v53, %v1120_v52  ;;  %16664 = vst [vmem:[#allocation32_spill] sm:$0xff] %v13914_v30  ;;  %v1734_v34 = vadd.f32 %v16665_v31, %v1120_v52  ;;  %v1730_v50 = vadd.f32 %v16666_v32, %v1120_v52  ;;  %v16679_v31 = vld [vmem:[#allocation53_spill] sm:$0xff]  ;;  %v13991_v32 = vpop.permute.xlu0 %4262 }
 0x7d0   : > { %v11411_v59 = vpop.eup %11410  ;;  %16681 = vst [vmem:[#allocation40_spill] sm:$0xff] %v13991_v32 }
 0x7d1   : > { %10549 = vmatprep.mubr.bf16.mxu0 %v3113_v61  ;;  %v3105_v35 = vmul.f32 %v11411_v59, %v13799_v16  ;;  %v13875_v16 = vpop.f32.mrf.mxu0  ;;  %v13880_v3 = vpack.c.bf16 %v1684_v19, %v1680_v7  ;;  %v13924_v61 = vpack.c.bf16 %v1734_v34, %v1730_v50  ;;  %v16680_v34 = vld [vmem:[#allocation52_spill] sm:$0xff] }
 0x7d2   : > { %16650 = vst [vmem:[#allocation45_spill] sm:$0xff] %v13875_v16 }
 0x7d3   : > { %v3114_v41 = vpack.c.bf16 %v3106_v42, %v3105_v35  ;;  %v13882_v24 = vpop.f32.mrf.mxu0  ;;  %16667 = vst [vmem:[#allocation31_spill] sm:$0xff] %v13924_v61 }
 0x7d5   : > { %10550 = vmatmul.mubr.bf16.gmra.mxu0 %v3114_v41  ;;  %v13891_v25 = vpop.f32.mrf.mxu0 }
 0x7d6   : > { %10569 = vmatprep.mubr.msk.bf16.mxu0 %vm2086_vm0, %v13866_v62 }
 0x7d7   : > { %v13898_v57 = vpop.f32.mrf.mxu0 }
 0x7d9   : > { %v13907_v49 = vpop.f32.mrf.mxu0 }
 0x7da   : > { %16661 = vst [vmem:[#allocation36_spill] sm:$0xff] %v13907_v49 }
 0x7db   : > { %v13912_v29 = vpop.f32.mrf.mxu0 }
 0x7dd   : > { %10570 = vmatmul.mubr.msk.bf16.vlgmr.msra.gmra.mxu0 %vm2086_vm0, %v13878_v26  ;;  %v13921_v43 = vpop.f32.mrf.mxu0 }
 0x7de   : > { %10573 = vmatprep.mubr.msk.bf16.mxu0 %vm2086_vm0, %v13880_v3 }
 0x7df   : > { %v13926_v59 = vpop.f32.mrf.mxu0 }
 0x7e1   : > { %v13931_v51 = vpop.f32.mrf.mxu0 }
 0x7e2   : > { %16668 = vst [vmem:[#allocation35_spill] sm:$0xff] %v13931_v51 }
 0x7e3   : > { %v13933_v4 = vpop.f32.mrf.mxu0 }
 0x7e5   : > { %10574 = vmatmul.mubr.msk.bf16.gmra.mxu0 %vm2086_vm0, %v13894_v54  ;;  %v13935_v35 = vpop.f32.mrf.mxu0  ;;  %v12089_v54 = vld [vmem:[%s12724_s18 + $0x28] sm:$0xff] }
 0x7e6   : > { %10577 = vmatprep.mubr.msk.bf16.mxu0 %vm2086_vm0, %v13896_v9 }
 0x7e7   : > { %v13937_v42 = vpop.f32.mrf.mxu0 }
 0x7e9   : > { %v13939_v23 = vpop.f32.mrf.mxu0 }
 0x7ea   : > { %16669 = vst [vmem:[#allocation38_spill] sm:$0xff] %v13939_v23 }
 0x7eb   : > { %v13941_v52 = vpop.f32.mrf.mxu0 }
 0x7ed   : > { %10578 = vmatmul.mubr.msk.bf16.gmra.mxu0 %vm2086_vm0, %v13910_v13  ;;  %v13943_v40 = vpop.f32.mrf.mxu0  ;;  %v12088_v13 = vld [vmem:[%s12724_s18 + $0x20] sm:$0xff] }
 0x7ee   : > { %10581 = vmatprep.mubr.msk.bf16.mxu0 %vm2086_vm0, %v13914_v30 }
 0x7ef   : > { %v13945_v41 = vpop.f32.mrf.mxu0 }
 0x7f1   : > { %v13947_v36 = vpop.f32.mrf.mxu0 }
 0x7f2   : > { %16670 = vst [vmem:[#allocation34_spill] sm:$0xff] %v13947_v36 }
 0x7f3   : > { %v13949_v48 = vpop.f32.mrf.mxu0 }
 0x7f5   : > { %10582 = vmatmul.mubr.msk.bf16.gmra.mxu0 %vm2086_vm0, %v13924_v61  ;;  %v13951_v20 = vpop.f32.mrf.mxu0 }
 0x7f6   : > { %4071 = vmatprep.mubr.bf16.mxu0 %v16502_v46 }
 0x7f7   : > { %v13953_v19 = vpop.f32.mrf.mxu0 }
 0x7f9   : > { %v13955_v15 = vpop.f32.mrf.mxu0 }
 0x7fa   : > { %16671 = vst [vmem:[#allocation37_spill] sm:$0xff] %v13955_v15 }
 0x7fb   : > { %v13957_v28 = vpop.f32.mrf.mxu0 }
 0x7fd   : > { %v13959_v53 = vpop.f32.mrf.mxu0 }
 0x7ff   : > { %v13961_v7 = vpop.f32.mrf.mxu0 }
 0x801   : > { %v13963_v18 = vpop.f32.mrf.mxu0 }
 0x802   : > { %16672 = vst [vmem:[#allocation41_spill] sm:$0xff] %v13963_v18 }
 0x803   : > { %v13965_v17 = vpop.f32.mrf.mxu0 }
 0x805   : > { %v13967_v38 = vpop.f32.mrf.mxu0 }
 0x807   : > { %v13969_v2 = vpop.f32.mrf.mxu0 }
 0x809   : > { %v13971_v33 = vpop.f32.mrf.mxu0 }
 0x80a   : > { %16673 = vst [vmem:[#allocation44_spill] sm:$0xff] %v13971_v33 }
 0x849   : > { %v10539_v11 = vpop.f32.mrf.mxu0 }
 0x84b   : > { %v3181_v1 = vpop.f32.mrf.mxu0 }
 0x84d   : > { %v10540_v0 = vpop.f32.mrf.mxu0 }
 0x84e   : > { %v3277_v47 = vpack.c.bf16 %v10540_v0, %v10539_v11 }
 0x84f   : > { %v3184_v44 = vpop.f32.mrf.mxu0 }
 0x850   : > { %v3276_v39 = vpack.c.bf16 %v3184_v44, %v3181_v1 }
 0x852   : > { %9786 = vmatmul.mubr.msk.bf16.vlgmr.msra.gmra.mxu1 %vm2086_vm0, %v3276_v39 }
 0x853   : > { %10586 = vmatpush3.bf16.msra.mxu1 %v13670_v63  ;;  %3398 = vmatprep.mubr.bf16.mxu1 %v16502_v46 }
 0x854   : > { %10587 = vmatprep.subr.bf16.mxu1 %v16674_v56 }
 0x857   : > { %10588 = vmatpush3.bf16.msra.mxu1 %v16674_v56  ;;  %v12087_v56 = vld [vmem:[%s12724_s18 + $0x10] sm:$0xff] }
 0x858   : > { %10589 = vmatprep.subr.bf16.mxu1 %v16675_v21 }
 0x85a   : > { %9787 = vmatmul.mubr.msk.bf16.gmra.mxu1 %vm2086_vm0, %v3277_v47 }
 0x85b   : > { %10590 = vmatpush3.bf16.msra.mxu1 %v16675_v21  ;;  %3408 = vmatprep.mubr.bf16.mxu1 %v16502_v46 }
 0x85c   : > { %10591 = vmatprep.subr.bf16.mxu1 %v16676_v10 }
 0x85f   : > { %10592 = vmatpush3.bf16.msra.mxu1 %v16676_v10 }
 0x860   : > { %10593 = vmatprep.subr.bf16.mxu1 %v16677_v6 }
 0x863   : > { %10594 = vmatpush3.bf16.msra.mxu1 %v16677_v6 }
 0x864   : > { %10595 = vmatprep.subr.bf16.mxu1 %v16678_v12 }
 0x867   : > { %10596 = vmatpush3.bf16.msra.mxu1 %v16678_v12 }
 0x868   : > { %10597 = vmatprep.subr.bf16.mxu1 %v16679_v31 }
 0x86b   : > { %10598 = vmatpush3.bf16.msra.mxu1 %v16679_v31 }
 0x86c   : > { %10599 = vmatprep.subr.bf16.mxu1 %v16680_v34 }
 0x86f   : > { %10600 = vmatpush3.bf16.msra.mxu1 %v16680_v34 }
 0x870   : > { %10705 = vmatprep.subr.msk.bf16.mxu1 %vm2086_vm0, %v13991_v32  ;;  %v12086_v32 = vld [vmem:[%s12724_s18 + $0x8] sm:$0xff] }
 0x885   : > { %v10543_v50 = vpop.f32.mrf.mxu0 }
 0x887   : > { %v3197_v11 = vpop.f32.mrf.mxu0 }
 0x889   : > { %v10544_v1 = vpop.f32.mrf.mxu0 }
 0x88a   : > { %v3279_v15 = vpack.c.bf16 %v10544_v1, %v10543_v50 }
 0x88b   : > { %v3200_v0 = vpop.f32.mrf.mxu0 }
 0x88c   : > { %v3278_v44 = vpack.c.bf16 %v3200_v0, %v3197_v11 }
 0x88d   : > { %v10547_v39 = vpop.f32.mrf.mxu0 }
 0x88e   : > { %9788 = vmatmul.mubr.msk.bf16.gmra.mxu1 %vm2086_vm0, %v3278_v44 }
 0x88f   : > { %v3213_v47 = vpop.f32.mrf.mxu0  ;;  %3418 = vmatprep.mubr.bf16.mxu1 %v16502_v46 }
 0x891   : > { %v10548_v33 = vpop.f32.mrf.mxu0 }
 0x892   : > { %v3281_v1 = vpack.c.bf16 %v10548_v33, %v10547_v39 }
 0x893   : > { %v3216_v18 = vpop.f32.mrf.mxu0 }
 0x894   : > { %v3280_v16 = vpack.c.bf16 %v3216_v18, %v3213_v47 }
 0x895   : > { %v10551_v36 = vpop.f32.mrf.mxu0 }
 0x896   : > { %9789 = vmatmul.mubr.msk.bf16.gmra.mxu1 %vm2086_vm0, %v3279_v15 }
 0x897   : > { %v3229_v23 = vpop.f32.mrf.mxu0  ;;  %3428 = vmatprep.mubr.bf16.mxu1 %v16502_v46 }
 0x899   : > { %v10552_v51 = vpop.f32.mrf.mxu0 }
 0x89b   : > { %v3232_v49 = vpop.f32.mrf.mxu0 }
 0x89c   : > { %v3282_v33 = vpack.c.bf16 %v3232_v49, %v3229_v23  ;;  %v3283_v49 = vpack.c.bf16 %v10552_v51, %v10551_v36 }
 0x89d   : > { %v14000_v31 = vpop.f32.mrf.mxu0 }
 0x89e   : > { %9790 = vmatmul.mubr.msk.bf16.gmra.mxu1 %vm2086_vm0, %v3280_v16  ;;  %3682 = vmax.xlane.f32.xlu0 %v14000_v31 }
 0x89f   : > { %v14004_v11 = vpop.f32.mrf.mxu0  ;;  %3438 = vmatprep.mubr.bf16.mxu1 %v16502_v46 }
 0x8a1   : > { %v14007_v50 = vpop.f32.mrf.mxu0 }
 0x8a2   : > { %3678 = vmax.xlane.f32.xlu0 %v14004_v11  ;;  %3684 = vmax.xlane.f32.xlu1 %v14007_v50 }
 0x8a3   : > { %v14011_v15 = vpop.f32.mrf.mxu0 }
 0x8a5   : > { %v14013_v18 = vpop.f32.mrf.mxu0 }
 0x8a6   : > { %9791 = vmatmul.mubr.msk.bf16.gmra.mxu1 %vm2086_vm0, %v3281_v1  ;;  %3680 = vmax.xlane.f32.xlu1 %v14011_v15 }
 0x8a7   : > { %3690 = vmax.xlane.f32.xlu0 %v14013_v18  ;;  %v14018_v16 = vpop.f32.mrf.mxu0  ;;  %3448 = vmatprep.mubr.bf16.mxu1 %v16502_v46 }
 0x8a9   : > { %v14021_v0 = vpop.f32.mrf.mxu0 }
 0x8aa   : > { %3692 = vmax.xlane.f32.xlu1 %v14021_v0 }
 0x8ab   : > { %3686 = vmax.xlane.f32.xlu0 %v14018_v16  ;;  %v14025_v44 = vpop.f32.mrf.mxu0 }
 0x8ad   : > { %v14027_v39 = vpop.f32.mrf.mxu0 }
 0x8ae   : > { %3688 = vmax.xlane.f32.xlu1 %v14025_v44  ;;  %9792 = vmatmul.mubr.msk.bf16.gmra.mxu1 %vm2086_vm0, %v3282_v33 }
 0x8af   : > { %3698 = vmax.xlane.f32.xlu0 %v14027_v39  ;;  %v14032_v47 = vpop.f32.mrf.mxu0  ;;  %3458 = vmatprep.mubr.bf16.mxu1 %v16502_v46  ;;  %v16682_v46 = vld [vmem:[#allocation30_spill] sm:$0xff] }
 0x8b1   : > { %v14035_v1 = vpop.f32.mrf.mxu0 }
 0x8b2   : > { %3700 = vmax.xlane.f32.xlu1 %v14035_v1 }
 0x8b3   : > { %3694 = vmax.xlane.f32.xlu0 %v14032_v47  ;;  %v14039_v34 = vpop.f32.mrf.mxu0 }
 0x8b5   : > { %v14041_v23 = vpop.f32.mrf.mxu0 }
 0x8b6   : > { %3696 = vmax.xlane.f32.xlu1 %v14039_v34  ;;  %9793 = vmatmul.mubr.msk.bf16.gmra.mxu1 %vm2086_vm0, %v3283_v49  ;;  %v2010_v49 = vld [vmem:[%s16465_s6] sm:$0x3] }
 0x8b7   : > { %3706 = vmax.xlane.f32.xlu0 %v14041_v23  ;;  %v14046_v33 = vpop.f32.mrf.mxu0  ;;  %v14063_v6 = vrot.slane %v2010_v49, %v16682_v46 }
 0x8b9   : > { %v14053_v51 = vpop.f32.mrf.mxu0  ;;  %v2024_v63 = vadd.f32 %v12087_v56, %v14063_v6 }
 0x8bb   : > { %3702 = vmax.xlane.f32.xlu0 %v14046_v33  ;;  %v14056_v36 = vpop.f32.mrf.mxu0 }
 0x8c7   : > { %4256 = vrot.lane.b32.xlu1 %v16639_v22, %s12469_s7  ;;  %v14066_v22 = vrot.slane %v2010_v49, %v16644_v14  ;;  %v2708_v14 = vadd.f32 %v13868_v58, %v2024_v63 }
 0x8c9   : > { %v2023_v10 = vadd.f32 %v12086_v32, %v14066_v22 }
 0x8cb   : > { %v2707_v46 = vadd.f32 %v13861_v60, %v2023_v10 }
 0x8d1   : > { %4258 = vrot.lane.b32.xlu0 %v13318_v45, %s12469_s7  ;;  %v12085_v45 = vld [vmem:[%s12724_s18] sm:$0xff] }
 0x8d2   : > { %v2022_v12 = vadd.f32 %v12085_v45, %v14063_v6  ;;  %v2026_v45 = vadd.f32 %v12088_v13, %v14063_v6 }
 0x8d4   : > { %v2706_v21 = vadd.f32 %v13852_v55, %v2022_v12  ;;  %v2027_v55 = vadd.f32 %v12089_v54, %v14066_v22  ;;  %v2710_v60 = vadd.f32 %v13882_v24, %v2026_v45 }
 0x8d6   : > { %v2711_v63 = vadd.f32 %v13891_v25, %v2027_v55 }
 0x8eb   : > { %3708 = vmax.xlane.f32.xlu1 %v14053_v51 }
 0x8ef   : > { %3704 = vmax.xlane.f32.xlu1 %v14056_v36 }
 0x912   : > { %v3390_v61 = vpop.f32.mrf.mxu1 }
 0x913   : > { %v14076_v30 = vadd.f32 %v3390_v61, %v2706_v21  ;;  %v12090_v61 = vld [vmem:[%s12724_s18 + $0x30] sm:$0xff] }
 0x914   : > { %v3392_v49 = vpop.f32.mrf.mxu1  ;;  %v2028_v21 = vadd.f32 %v12090_v61, %v14063_v6 }
 0x915   : > { %v14081_v9 = vadd.f32 %v3392_v49, %v2707_v46 }
 0x916   : > { %v3394_v32 = vpop.f32.mrf.mxu1  ;;  %v2712_v13 = vadd.f32 %v13898_v57, %v2028_v21 }
 0x917   : > { %v14085_v12 = vadd.f32 %v3394_v32, %v2708_v14  ;;  %v14100_v32 = vpop.permute.xlu1 %4260 }
 0x918   : > { %v14087_v56 = vpop.f32.mrf.mxu1 }
 0x919   : > { %16683 = vst [vmem:[#allocation43_spill] sm:$0xff] %v14085_v12  ;;  %16684 = vst [vmem:[#allocation47_spill] sm:$0xff] %v14087_v56 }
 0x91a   : > { %v3400_v10 = vpop.f32.mrf.mxu1 }
 0x91b   : > { %v14093_v58 = vadd.f32 %v3400_v10, %v2710_v60 }
 0x91c   : > { %v3402_v46 = vpop.f32.mrf.mxu1 }
 0x91d   : > { %v14096_v49 = vadd.f32 %v3402_v46, %v2711_v63 }
 0x91e   : > { %v3404_v54 = vpop.f32.mrf.mxu1 }
 0x91f   : > { %16685 = vst [vmem:[#allocation49_spill] sm:$0xff] %v14096_v49  ;;  %v14098_v14 = vadd.f32 %v3404_v54, %v2712_v13  ;;  %v12092_v13 = vld [vmem:[%s12724_s18 + $0x48] sm:$0xff] }
 0x920   : > { %v2031_v54 = vadd.f32 %v12092_v13, %v14066_v22 }
 0x921   : > { %16686 = vst [vmem:[#allocation46_spill] sm:$0xff] %v14098_v14 }
 0x927   : > { %v3683_v56 = vpop.xlane.xlu0 %3682 }
 0x928   : > { %v3712_v24 = vsub.f32 %v14000_v31, %v3683_v56 }
 0x92a   : > { %v3730_v45 = vmul.f32 1.442695, %v3712_v24  ;;  %v14122_v24 = vpop.f32.mrf.mxu1 }
 0x92b   : > { %v3679_v61 = vpop.xlane.xlu0 %3678  ;;  %v3685_v12 = vpop.xlane.xlu1 %3684  ;;  %16687 = vst [vmem:[#allocation48_spill] sm:$0xff] %v14122_v24 }
 0x92c   : > { %11412 = vpow2.f32 %v3730_v45  ;;  %v3710_v25 = vsub.f32 %v14004_v11, %v3679_v61  ;;  %v3713_v55 = vsub.f32 %v14007_v50, %v3685_v12  ;;  %v12091_v12 = vld [vmem:[%s12724_s18 + $0x40] sm:$0xff]  ;;  %v12093_v61 = vld [vmem:[%s12724_s18 + $0x50] sm:$0xff] }
 0x92d   : > { %v2030_v46 = vadd.f32 %v12091_v12, %v14063_v6  ;;  %v12094_v12 = vld [vmem:[%s12724_s18 + $0x60] sm:$0xff] }
 0x92e   : > { %v3726_v60 = vmul.f32 1.442695, %v3710_v25  ;;  %v3732_v57 = vmul.f32 1.442695, %v3713_v55  ;;  %v2032_v25 = vadd.f32 %v12093_v61, %v14063_v6  ;;  %v2034_v13 = vadd.f32 %v12094_v12, %v14063_v6  ;;  %v12097_v12 = vld [vmem:[%s12724_s18 + $0x80] sm:$0xff] }
 0x92f   : > { %v3681_v21 = vpop.xlane.xlu1 %3680  ;;  %v2714_v45 = vadd.f32 %v13912_v29, %v2030_v46  ;;  %v12095_v46 = vld [vmem:[%s12724_s18 + $0x68] sm:$0xff] }
 0x930   : > { %11414 = vpow2.f32 %v3726_v60  ;;  %v3711_v10 = vsub.f32 %v14011_v15, %v3681_v21  ;;  %v3691_v15 = vpop.xlane.xlu0 %3690  ;;  %v2035_v61 = vadd.f32 %v12095_v46, %v14066_v22  ;;  %v12098_v46 = vld [vmem:[%s12724_s18 + $0x88] sm:$0xff] }
 0x931   : > { %11416 = vpow2.f32 %v3732_v57  ;;  %v2715_v57 = vadd.f32 %v13921_v43, %v2031_v54  ;;  %v12096_v54 = vld [vmem:[%s12724_s18 + $0x70] sm:$0xff] }
 0x932   : > { %v3728_v63 = vmul.f32 1.442695, %v3711_v10 }
 0x934   : > { %11418 = vpow2.f32 %v3728_v63  ;;  %v14127_v55 = vpop.xlane.xlu0 %3686  ;;  %v2716_v63 = vadd.f32 %v13926_v59, %v2032_v25  ;;  %v2718_v59 = vadd.f32 %v13933_v4, %v2034_v13 }
 0x938   : > { %v14141_v49 = vpop.xlane.xlu0 %3698 }
 0x939   : > { %v14106_v31 = vpop.eup %11412 }
 0x93a   : > { %3762 = vadd.xlane.f32.xlu0 %v14106_v31 }
 0x93c   : > { %v14160_v4 = vpop.xlane.xlu0 %3694 }
 0x93d   : > { %v14109_v56 = vpop.eup %11414 }
 0x93e   : > { %v14111_v11 = vpop.eup %11416  ;;  %3758 = vadd.xlane.f32.xlu0 %v14109_v56 }
 0x93f   : > { %3764 = vadd.xlane.f32.xlu1 %v14111_v11 }
 0x941   : > { %v14115_v50 = vpop.eup %11418 }
 0x943   : > { %3760 = vadd.xlane.f32.xlu1 %v14115_v50 }
 0x94e   : > { %v3410_v60 = vpop.f32.mrf.mxu1 }
 0x94f   : > { %v14130_v21 = vadd.f32 %v3410_v60, %v2714_v45  ;;  %v2036_v45 = vadd.f32 %v12096_v54, %v14063_v6  ;;  %v2719_v60 = vadd.f32 %v13935_v35, %v2035_v61  ;;  %v2039_v54 = vadd.f32 %v12098_v46, %v14066_v22  ;;  %v12100_v46 = vld [vmem:[%s12724_s18 + $0xa0] sm:$0xff] }
 0x950   : > { %v3412_v10 = vpop.f32.mrf.mxu1 }
 0x951   : > { %v14135_v24 = vadd.f32 %v3412_v10, %v2715_v57  ;;  %v3693_v10 = vpop.xlane.xlu1 %3692 }
 0x952   : > { %v3414_v29 = vpop.f32.mrf.mxu1 }
 0x953   : > { %v14139_v14 = vadd.f32 %v3414_v29, %v2716_v63  ;;  %v2038_v29 = vadd.f32 %v12097_v12, %v14063_v6 }
 0x954   : > { %4252 = vrot.lane.b32.xlu1 %v16641_v8, %s12469_s7  ;;  %v14145_v43 = vpop.f32.mrf.mxu1  ;;  %4254 = vrot.lane.b32.xlu0 %v16640_v37, %s12469_s7  ;;  %v2720_v8 = vadd.f32 %v13937_v42, %v2036_v45  ;;  %v3716_v45 = vsub.f32 %v14013_v18, %v3691_v15  ;;  %v3714_v18 = vsub.f32 %v14018_v16, %v14127_v55 }
 0x955   : > { %16688 = vst [vmem:[#allocation51_spill] sm:$0xff] %v14145_v43  ;;  %v2722_v61 = vadd.f32 %v13941_v52, %v2038_v29 }
 0x956   : > { %v3420_v25 = vpop.f32.mrf.mxu1  ;;  %v3738_v29 = vmul.f32 1.442695, %v3716_v45  ;;  %v3734_v55 = vmul.f32 1.442695, %v3714_v18 }
 0x957   : > { %v14153_v57 = vadd.f32 %v3420_v25, %v2718_v59  ;;  %v12099_v59 = vld [vmem:[%s12724_s18 + $0x90] sm:$0xff]  ;;  %v3689_v25 = vpop.xlane.xlu1 %3688 }
 0x958   : > { %v3422_v63 = vpop.f32.mrf.mxu1  ;;  %v2040_v42 = vadd.f32 %v12099_v59, %v14063_v6  ;;  %v3715_v59 = vsub.f32 %v14025_v44, %v3689_v25  ;;  %11420 = vpow2.f32 %v3738_v29 }
 0x959   : > { %v14158_v37 = vadd.f32 %v3422_v63, %v2719_v60  ;;  %v2723_v63 = vadd.f32 %v13943_v40, %v2039_v54 }
 0x95a   : > { %v3424_v13 = vpop.f32.mrf.mxu1  ;;  %v2724_v52 = vadd.f32 %v13945_v41, %v2040_v42  ;;  %v3717_v42 = vsub.f32 %v14021_v0, %v3693_v10 }
 0x95b   : > { %16689 = vst [vmem:[#allocation50_spill] sm:$0xff] %v14158_v37  ;;  %v14164_v43 = vadd.f32 %v3424_v13, %v2720_v8  ;;  %v2042_v8 = vadd.f32 %v12100_v46, %v14063_v6  ;;  %v3707_v13 = vpop.xlane.xlu0 %3706  ;;  %v12101_v37 = vld [vmem:[%s12724_s18 + $0xa8] sm:$0xff]  ;;  %v14189_v46 = vpop.xlane.xlu1 %3700 }
 0x95c   : > { %v14166_v35 = vpop.f32.mrf.mxu1  ;;  %v2043_v40 = vadd.f32 %v12101_v37, %v14066_v22  ;;  %v3724_v16 = vsub.f32 %v14041_v23, %v3707_v13  ;;  %v3740_v0 = vmul.f32 1.442695, %v3717_v42 }
 0x95d   : > { %16690 = vst [vmem:[#allocation60_spill] sm:$0xff] %v14164_v43  ;;  %16691 = vst [vmem:[#allocation61_spill] sm:$0xff] %v14166_v35  ;;  %v2726_v44 = vadd.f32 %v13949_v48, %v2042_v8 }
 0x95e   : > { %v3430_v60 = vpop.f32.mrf.mxu1  ;;  %v2727_v25 = vadd.f32 %v13951_v20, %v2043_v40  ;;  %v3754_v8 = vmul.f32 1.442695, %v3724_v16  ;;  %v3720_v20 = vsub.f32 %v14027_v39, %v14141_v49  ;;  %v3718_v39 = vsub.f32 %v14032_v47, %v14160_v4 }
 0x95f   : > { %v14173_v12 = vadd.f32 %v3430_v60, %v2722_v61  ;;  %v12102_v61 = vld [vmem:[%s12724_s18 + $0xb0] sm:$0xff]  ;;  %v3703_v37 = vpop.xlane.xlu0 %3702  ;;  %v3697_v10 = vpop.xlane.xlu1 %3696 }
 0x960   : > { %v3432_v35 = vpop.f32.mrf.mxu1  ;;  %v2044_v60 = vadd.f32 %v12102_v61, %v14063_v6  ;;  %v3722_v23 = vsub.f32 %v14046_v33, %v3703_v37  ;;  %v12105_v33 = vld [vmem:[%s12724_s18 + $0xd0] sm:$0xff]  ;;  %v3746_v16 = vmul.f32 1.442695, %v3720_v20  ;;  %v3742_v47 = vmul.f32 1.442695, %v3718_v39 }
 0x961   : > { %v14179_v43 = vadd.f32 %v3432_v35, %v2723_v63  ;;  %v3736_v35 = vmul.f32 1.442695, %v3715_v59  ;;  %v12104_v59 = vld [vmem:[%s12724_s18 + $0xc8] sm:$0xff] }
 0x962   : > { %v3434_v15 = vpop.f32.mrf.mxu1 }
 0x963   : > { %v14185_v54 = vadd.f32 %v3434_v15, %v2724_v52  ;;  %v2728_v52 = vadd.f32 %v13953_v19, %v2044_v60  ;;  %v12103_v15 = vld [vmem:[%s12724_s18 + $0xc0] sm:$0xff]  ;;  %11422 = vpow2.f32 %v3736_v35  ;;  %v2047_v19 = vadd.f32 %v12104_v59, %v14066_v22  ;;  %v14221_v37 = vpop.permute.xlu1 %4256 }
 0x964   : > { %v14191_v41 = vpop.f32.mrf.mxu1  ;;  %v2046_v61 = vadd.f32 %v12103_v15, %v14063_v6  ;;  %11424 = vpow2.f32 %v3734_v55  ;;  %v3750_v35 = vmul.f32 1.442695, %v3722_v23 }
 0x965   : > { %11426 = vpow2.f32 %v3754_v8  ;;  %v2731_v55 = vadd.f32 %v13959_v53, %v2047_v19  ;;  %v3721_v53 = vsub.f32 %v14035_v1, %v14189_v46  ;;  %v3719_v46 = vsub.f32 %v14039_v34, %v3697_v10 }
 0x966   : > { %v3440_v45 = vpop.f32.mrf.mxu1  ;;  %v2730_v60 = vadd.f32 %v13957_v28, %v2046_v61  ;;  %11428 = vpow2.f32 %v3740_v0  ;;  %v14228_v61 = vpop.eup %11420 }
 0x967   : > { %v14197_v63 = vadd.f32 %v3440_v45, %v2726_v44  ;;  %v2048_v44 = vadd.f32 %v12105_v33, %v14063_v6  ;;  %11430 = vpow2.f32 %v3750_v35  ;;  %v3748_v1 = vmul.f32 1.442695, %v3721_v53 }
 0x968   : > { %v3442_v48 = vpop.f32.mrf.mxu1  ;;  %11432 = vpow2.f32 %v3746_v16  ;;  %v3744_v10 = vmul.f32 1.442695, %v3719_v46  ;;  %v16694_v46 = vld [vmem:[#allocation42_spill] sm:$0xff] }
 0x969   : > { %v14203_v13 = vadd.f32 %v3442_v48, %v2727_v25  ;;  %v2732_v28 = vadd.f32 %v13961_v7, %v2048_v44  ;;  %v12106_v25 = vld [vmem:[%s12724_s18 + $0xe0] sm:$0xff]  ;;  %v12107_v48 = vld [vmem:[%s12724_s18 + $0xe8] sm:$0xff]  ;;  %11434 = vpow2.f32 %v3742_v47 }
 0x96a   : > { %v3444_v29 = vpop.f32.mrf.mxu1  ;;  %v2051_v8 = vadd.f32 %v12107_v48, %v14066_v22 }
 0x96b   : > { %v14209_v18 = vadd.f32 %v3444_v29, %v2728_v52  ;;  %v2050_v52 = vadd.f32 %v12106_v25, %v14063_v6  ;;  %v12108_v29 = vld [vmem:[%s12724_s18 + $0xf0] sm:$0xff] }
 0x96c   : > { %v14211_v40 = vpop.f32.mrf.mxu1  ;;  %v2052_v59 = vadd.f32 %v12108_v29, %v14063_v6  ;;  %v2735_v35 = vadd.f32 %v13967_v38, %v2051_v8  ;;  %v11036_v8 = vld [vmem:[#allocation13 + $0xb0] ss:$8 sps:$4 sm:$0xff]   ;;  %v11041_v29 = vld [vmem:[#allocation13 + $0xa4] ss:$8 sps:$4 sm:$0xff]  }
 0x96d   : > { %16692 = vst [vmem:[#allocation62_spill] sm:$0xff] %v14211_v40  ;;  %v2734_v20 = vadd.f32 %v13965_v17, %v2050_v52 }
 0x96e   : > { %v3450_v49 = vpop.f32.mrf.mxu1 }
 0x96f   : > { %v14219_v42 = vadd.f32 %v3450_v49, %v2730_v60 }
 0x970   : > { %v3452_v45 = vpop.f32.mrf.mxu1  ;;  %v14243_v60 = vpop.eup %11422 }
 0x971   : > { %v14226_v15 = vadd.f32 %v3452_v45, %v2731_v55  ;;  %v14246_v44 = vpop.eup %11424 }
 0x972   : > { %v3454_v4 = vpop.f32.mrf.mxu1  ;;  %v14256_v34 = vpop.eup %11426 }
 0x973   : > { %v14234_v23 = vadd.f32 %v3454_v4, %v2732_v28  ;;  %3770 = vadd.xlane.f32.xlu0 %v14228_v61  ;;  %v14259_v45 = vpop.eup %11428 }
 0x974   : > { %v14237_v7 = vpop.f32.mrf.mxu1  ;;  %v3709_v0 = vpop.xlane.xlu1 %3708 }
 0x975   : > { %16693 = vst [vmem:[#allocation63_spill] sm:$0xff] %v14237_v7  ;;  %v3725_v19 = vsub.f32 %v14053_v51, %v3709_v0  ;;  %v2736_v51 = vadd.f32 %v13969_v2, %v2052_v59  ;;  %v14265_v25 = vpop.eup %11430  ;;  %v11038_v0 = vld [vmem:[#allocation13 + $0xb4] ss:$8 sps:$4 sm:$0xff]  }
 0x976   : > { %v3460_v33 = vpop.f32.mrf.mxu1  ;;  %v14267_v52 = vpop.eup %11432  ;;  %4047 = vmatprep.subr.bf16.mxu0 %v11038_v0  ;;  %v11044_v59 = vld [vmem:[#allocation13 + $0x94] ss:$8 sps:$4 sm:$0xff]  }
 0x977   : > { %v3756_v16 = vmul.f32 1.442695, %v3725_v19  ;;  %v14249_v39 = vadd.f32 %v3460_v33, %v2734_v20  ;;  %3768 = vadd.xlane.f32.xlu0 %v14243_v60  ;;  %4048 = vmatpush1.bf16.msra.mxu0 %v11036_v8  ;;  %v11039_v20 = vld [vmem:[#allocation13 + $0xa0] ss:$8 sps:$4 sm:$0xff]   ;;  %v11042_v19 = vld [vmem:[#allocation13 + $0x90] ss:$8 sps:$4 sm:$0xff]  }
 0x978   : > { %3766 = vadd.xlane.f32.xlu1 %v14246_v44  ;;  %v3462_v17 = vpop.f32.mrf.mxu1  ;;  %v3705_v6 = vpop.xlane.xlu1 %3704  ;;  %4049 = vmatprep.subr.bf16.mxu0 %v11041_v29  ;;  %v16697_v33 = vld [vmem:[#allocation32_spill] sm:$0xff] }
 0x979   : > { %11436 = vpow2.f32 %v3756_v16  ;;  %v14254_v49 = vadd.f32 %v3462_v17, %v2735_v35  ;;  %v3723_v38 = vsub.f32 %v14056_v36, %v3705_v6  ;;  %v14271_v36 = vpop.eup %11434  ;;  %v16700_v35 = vld [vmem:[#allocation58_spill] sm:$0xff]  ;;  %v16701_v16 = vld [vmem:[#allocation57_spill] sm:$0xff]  ;;  %v16702_v17 = vld [vmem:[#allocation56_spill] sm:$0xff]  ;;  %v4259_v6 = vpop.permute.xlu0 %4258 }
 0x97a   : > { %11438 = vpow2.f32 %v3748_v1  ;;  %v3464_v55 = vpop.f32.mrf.mxu1  ;;  %v11047_v1 = vld [vmem:[#allocation13 + $0x84] ss:$8 sps:$4 sm:$0xff]  }
 0x97b   : > { %v14261_v28 = vadd.f32 %v3464_v55, %v2736_v51  ;;  %3786 = vadd.xlane.f32.xlu0 %v14256_v34  ;;  %11440 = vpow2.f32 %v3744_v10  ;;  %v3752_v2 = vmul.f32 1.442695, %v3723_v38  ;;  %4050 = vmatpush1.bf16.msra.mxu0 %v11039_v20 }
 0x97c   : > { %3772 = vadd.xlane.f32.xlu1 %v14259_v45  ;;  %4051 = vmatprep.subr.bf16.mxu0 %v11044_v59 }
 0x97d   : > { %11442 = vpow2.f32 %v3752_v2 }
 0x97f   : > { %3782 = vadd.xlane.f32.xlu0 %v14265_v25  ;;  %4052 = vmatpush1.bf16.msra.mxu0 %v11042_v19 }
 0x980   : > { %3778 = vadd.xlane.f32.xlu1 %v14267_v52  ;;  %4053 = vmatprep.subr.bf16.mxu0 %v11047_v1 }
 0x984   : > { %3774 = vadd.xlane.f32.xlu1 %v14271_v36 }
 0x986   : > { %v14274_v47 = vpop.eup %11436 }
 0x987   : > { %v14276_v53 = vpop.eup %11438  ;;  %3788 = vadd.xlane.f32.xlu0 %v14274_v47 }
 0x988   : > { %3780 = vadd.xlane.f32.xlu1 %v14276_v53  ;;  %v14280_v4 = vpop.eup %11440 }
 0x98a   : > { %v14283_v48 = vpop.eup %11442 }
 0x98c   : > { %3776 = vadd.xlane.f32.xlu1 %v14280_v4 }
 0x990   : > { %3784 = vadd.xlane.f32.xlu1 %v14283_v48 }
 0x99d   : > { %4250 = vrot.lane.b32.xlu0 %v16642_v5, %s12469_s7  ;;  %v11045_v5 = vld [vmem:[#allocation13 + $0x80] ss:$8 sps:$4 sm:$0xff]  }
 0x99e   : > { %4054 = vmatpush1.bf16.msra.mxu0 %v11045_v5 }
 0x9a1   : > { %4248 = vrot.lane.b32.xlu1 %v16643_v27, %s12469_s7  ;;  %4224 = vrot.lane.b32.xlu0 %v13866_v62, %s12469_s7  ;;  %v16695_v27 = vld [vmem:[#allocation39_spill] sm:$0xff]  ;;  %v16696_v62 = vld [vmem:[#allocation33_spill] sm:$0xff] }
 0x9a5   : > { %4226 = vrot.lane.b32.xlu1 %v13878_v26, %s12469_s7  ;;  %4228 = vrot.lane.b32.xlu0 %v13880_v3, %s12469_s7  ;;  %v16698_v26 = vld [vmem:[#allocation31_spill] sm:$0xff] }
 0x9a6   : > { %v16699_v3 = vld [vmem:[#allocation59_spill] sm:$0xff] }
 0x9a9   : > { %4230 = vrot.lane.b32.xlu1 %v16694_v46, %s12469_s7  ;;  %4232 = vrot.lane.b32.xlu0 %v16695_v27, %s12469_s7  ;;  %v16703_v27 = vld [vmem:[#allocation40_spill] sm:$0xff] }
 0x9ad   : > { %4234 = vrot.lane.b32.xlu1 %v16696_v62, %s12469_s7  ;;  %4236 = vrot.lane.b32.xlu0 %v16697_v33, %s12469_s7  ;;  %v4310_v62 = vsel %vm2086_vm0, %v16703_v27, 0 }
 0x9b1   : > { %4238 = vrot.lane.b32.xlu1 %v16698_v26, %s12469_s7  ;;  %4583 = vrot.lane.b32.xlu0 %v16699_v3, %s12469_s7 }
 0x9b5   : > { %4581 = vrot.lane.b32.xlu1 %v16700_v35, %s12469_s7  ;;  %4579 = vrot.lane.b32.xlu0 %v16701_v16, %s12469_s7 }
 0x9b9   : > { %4577 = vrot.lane.b32.xlu0 %v16702_v17, %s12469_s7 }
 0x9c3   : > { %v3763_v51 = vpop.xlane.xlu0 %3762 }
 0x9c7   : > { %v3759_v10 = vpop.xlane.xlu0 %3758 }
 0x9c8   : > { %v3765_v38 = vpop.xlane.xlu1 %3764 }
 0x9c9   : > { %11444 = vrcp.f32 %v3765_v38 }
 0x9ca   : > { %11446 = vrcp.f32 %v3759_v10 }
 0x9cb   : > { %11448 = vrcp.f32 %v3763_v51 }
 0x9cc   : > { %v3761_v55 = vpop.xlane.xlu1 %3760 }
 0x9cd   : > { %11450 = vrcp.f32 %v3761_v55 }
 0x9d0   : > { %v4253_v26 = vpop.permute.xlu1 %4252 }
 0x9d6   : > { %v11445_v2 = vpop.eup %11444 }
 0x9d7   : > { %v11447_v8 = vpop.eup %11446  ;;  %v3809_v29 = vmul.f32 %v11445_v2, %v14111_v11  ;;  %v4307_v11 = vsel %vm2086_vm0, %v14100_v32, 0 }
 0x9d8   : > { %v11449_v0 = vpop.eup %11448  ;;  %v3806_v59 = vmul.f32 %v11447_v8, %v14109_v56  ;;  %v4304_v56 = vsel %vm2086_vm0, %v4259_v6, 0 }
 0x9d9   : > { %v3808_v5 = vmul.f32 %v11449_v0, %v14106_v31  ;;  %v4255_v31 = vpop.permute.xlu0 %4254 }
 0x9da   : > { %v11451_v20 = vpop.eup %11450 }
 0x9db   : > { %v3807_v19 = vmul.f32 %v11451_v20, %v14115_v50  ;;  %v3823_v46 = vpack.c.bf16 %v3809_v29, %v3808_v5  ;;  %v4301_v50 = vsel %vm2086_vm0, %v14221_v37, 0 }
 0x9dd   : > { %v3822_v1 = vpack.c.bf16 %v3807_v19, %v3806_v59 }
 0x9df   : > { %10601 = vmatprep.mubr.bf16.mxu1 %v3822_v1 }
 0x9e0   : > { %10602 = vmatmul.mubr.bf16.vlgmr.msra.gmra.mxu1 %v3823_v46 }
 0x9e1   : > { %10618 = vmatpush3.bf16.xpose.msra.mxu1 %v4310_v62 }
 0x9e2   : > { %10706 = vmatprep.subr.msk.bf16.mxu1 %vm2086_vm0, %v14100_v32  ;;  %v4298_v32 = vsel %vm2086_vm0, %v4255_v31, 0 }
 0x9e9   : > { %10620 = vmatpush3.bf16.xpose.msra.mxu1 %v4307_v11 }
 0x9ea   : > { %10707 = vmatprep.subr.msk.bf16.mxu1 %vm2086_vm0, %v4259_v6 }
 0x9f1   : > { %10622 = vmatpush3.bf16.xpose.msra.mxu1 %v4304_v56 }
 0x9f2   : > { %10708 = vmatprep.subr.msk.bf16.mxu1 %vm2086_vm0, %v14221_v37  ;;  %v4295_v37 = vsel %vm2086_vm0, %v4253_v26, 0 }
 0x9f9   : > { %10624 = vmatpush3.bf16.xpose.msra.mxu1 %v4301_v50 }
 0x9fa   : > { %10709 = vmatprep.subr.msk.bf16.mxu1 %vm2086_vm0, %v4255_v31 }
 0x9fc   : > { %v3771_v33 = vpop.xlane.xlu0 %3770 }
 0xa00   : > { %v3769_v3 = vpop.xlane.xlu0 %3768 }
 0xa01   : > { %10626 = vmatpush3.bf16.xpose.msra.mxu1 %v4298_v32  ;;  %11452 = vrcp.f32 %v3769_v3  ;;  %v3767_v35 = vpop.xlane.xlu1 %3766 }
 0xa02   : > { %10710 = vmatprep.subr.msk.bf16.mxu1 %vm2086_vm0, %v4253_v26  ;;  %11454 = vrcp.f32 %v3767_v35 }
 0xa03   : > { %11456 = vrcp.f32 %v3771_v33 }
 0xa04   : > { %v3787_v17 = vpop.xlane.xlu0 %3786 }
 0xa05   : > { %v3773_v16 = vpop.xlane.xlu1 %3772 }
 0xa06   : > { %11458 = vrcp.f32 %v3773_v16 }
 0xa08   : > { %v3783_v51 = vpop.xlane.xlu0 %3782 }
 0xa09   : > { %10628 = vmatpush3.bf16.xpose.msra.mxu1 %v4295_v37  ;;  %v3779_v6 = vpop.xlane.xlu1 %3778 }
 0xa0d   : > { %v3775_v10 = vpop.xlane.xlu1 %3774 }
 0xa0e   : > { %v11453_v38 = vpop.eup %11452 }
 0xa0f   : > { %v11455_v55 = vpop.eup %11454  ;;  %v3811_v2 = vmul.f32 %v11453_v38, %v14243_v60 }
 0xa10   : > { %v3789_v8 = vpop.xlane.xlu0 %3788  ;;  %v3810_v0 = vmul.f32 %v11455_v55, %v14246_v44  ;;  %v11457_v20 = vpop.eup %11456 }
 0xa11   : > { %v3781_v29 = vpop.xlane.xlu1 %3780  ;;  %v3812_v1 = vmul.f32 %v11457_v20, %v14228_v61 }
 0xa12   : > { %v3824_v59 = vpack.c.bf16 %v3811_v2, %v3810_v0  ;;  %11460 = vrcp.f32 %v3781_v29 }
 0xa13   : > { %v11459_v19 = vpop.eup %11458  ;;  %11462 = vrcp.f32 %v3775_v10 }
 0xa14   : > { %10605 = vmatprep.mubr.bf16.mxu1 %v3824_v59  ;;  %v4251_v5 = vpop.permute.xlu0 %4250  ;;  %v3813_v46 = vmul.f32 %v11459_v19, %v14259_v45  ;;  %11464 = vrcp.f32 %v3779_v6  ;;  %v14359_v59 = vpop.f32.mrf.mxu1 }
 0xa15   : > { %v4292_v27 = vsel %vm2086_vm0, %v4251_v5, 0  ;;  %v3777_v62 = vpop.xlane.xlu1 %3776  ;;  %10711 = vmatprep.subr.msk.bf16.mxu1 %vm2086_vm0, %v4251_v5  ;;  %16705 = vst [vmem:[#allocation42_spill] sm:$0xff] %v14359_v59 }
 0xa16   : > { %11466 = vrcp.f32 %v3777_v62  ;;  %10630 = vmatpush3.bf16.xpose.msra.mxu1 %v4292_v27  ;;  %v3825_v60 = vpack.c.bf16 %v3813_v46, %v3812_v1 }
 0xa17   : > { %11468 = vrcp.f32 %v3783_v51 }
 0xa18   : > { %10606 = vmatmul.mubr.bf16.gmra.mxu1 %v3825_v60  ;;  %v4225_v44 = vpop.permute.xlu0 %4224 }
 0xa19   : > { %v3785_v11 = vpop.xlane.xlu1 %3784 }
 0xa1a   : > { %11470 = vrcp.f32 %v3785_v11 }
 0xa1b   : > { %11472 = vrcp.f32 %v3789_v8 }
 0xa1c   : > { %v4229_v56 = vpop.permute.xlu0 %4228  ;;  %11474 = vrcp.f32 %v3787_v17 }
 0xa1d   : > { %v4249_v61 = vpop.permute.xlu1 %4248 }
 0xa1e   : > { %v4289_v45 = vsel %vm2086_vm0, %v4249_v61, 0  ;;  %10712 = vmatprep.subr.msk.bf16.mxu1 %vm2086_vm0, %v4249_v61 }
 0xa1f   : > { %10632 = vmatpush3.bf16.xpose.msra.mxu1 %v4289_v45  ;;  %v11461_v31 = vpop.eup %11460 }
 0xa20   : > { %v4233_v50 = vpop.permute.xlu0 %4232  ;;  %v11463_v33 = vpop.eup %11462  ;;  %v3817_v3 = vmul.f32 %v11461_v31, %v14276_v53 }
 0xa21   : > { %v11465_v26 = vpop.eup %11464  ;;  %v3814_v16 = vmul.f32 %v11463_v33, %v14271_v36  ;;  %v4227_v29 = vpop.permute.xlu1 %4226 }
 0xa22   : > { %v3816_v17 = vmul.f32 %v11465_v26, %v14267_v52 }
 0xa23   : > { %v11467_v32 = vpop.eup %11466 }
 0xa24   : > { %v4237_v35 = vpop.permute.xlu0 %4236  ;;  %v3815_v37 = vmul.f32 %v11467_v32, %v14280_v4  ;;  %v11469_v6 = vpop.eup %11468  ;;  %v3827_v38 = vpack.c.bf16 %v3817_v3, %v3816_v17 }
 0xa25   : > { %v3818_v8 = vmul.f32 %v11469_v6, %v14265_v25  ;;  %v4231_v25 = vpop.permute.xlu1 %4230 }
 0xa26   : > { %v3826_v51 = vpack.c.bf16 %v3815_v37, %v3814_v16 }
 0xa27   : > { %v11471_v10 = vpop.eup %11470 }
 0xa28   : > { %v11473_v55 = vpop.eup %11472  ;;  %10609 = vmatprep.mubr.bf16.mxu1 %v3826_v51  ;;  %v4584_v2 = vpop.permute.xlu0 %4583  ;;  %v3819_v0 = vmul.f32 %v11471_v10, %v14283_v48 }
 0xa29   : > { %10610 = vmatmul.mubr.bf16.gmra.mxu1 %v3827_v38  ;;  %10649 = vmatprep.subr.bf16.mxu0 %v4584_v2  ;;  %v11475_v53 = vpop.eup %11474  ;;  %v3821_v36 = vmul.f32 %v11473_v55, %v14274_v47  ;;  %v4235_v48 = vpop.permute.xlu1 %4234  ;;  %v16704_v47 = vmov 0  }
 0xa2a   : > { %v3828_v20 = vpack.c.bf16 %v3819_v0, %v3818_v8  ;;  %v3820_v4 = vmul.f32 %v11475_v53, %v14256_v34 }
 0xa2c   : > { %10613 = vmatprep.mubr.bf16.mxu1 %v3828_v20  ;;  %v3829_v52 = vpack.c.bf16 %v3821_v36, %v3820_v4  ;;  %v4580_v60 = vpop.permute.xlu0 %4579 }
 0xa2d   : > { %v4239_v34 = vpop.permute.xlu1 %4238 }
 0xa30   : > { %v4578_v11 = vpop.permute.xlu0 %4577 }
 0xa31   : > { %10614 = vmatmul.mubr.bf16.gmra.mxu1 %v3829_v52  ;;  %v4582_v62 = vpop.permute.xlu1 %4581 }
 0xa32   : > { %10633 = vmatprep.mubr.msk.bf16.mxu1 %vm2086_vm0, %v4225_v44 }
 0xa39   : > { %10634 = vmatmul.mubr.msk.bf16.vlgmr.msra.gmra.mxu1 %vm2086_vm0, %v4227_v29 }
 0xa3a   : > { %10637 = vmatprep.mubr.msk.bf16.mxu1 %vm2086_vm0, %v4229_v56 }
 0xa41   : > { %10638 = vmatmul.mubr.msk.bf16.gmra.mxu1 %vm2086_vm0, %v4231_v25 }
 0xa42   : > { %10641 = vmatprep.mubr.msk.bf16.mxu1 %vm2086_vm0, %v4233_v50 }
 0xa49   : > { %10642 = vmatmul.mubr.msk.bf16.gmra.mxu1 %vm2086_vm0, %v4235_v48 }
 0xa4a   : > { %10645 = vmatprep.mubr.msk.bf16.mxu1 %vm2086_vm0, %v4237_v35 }
 0xa51   : > { %10646 = vmatmul.mubr.msk.bf16.gmra.mxu1 %vm2086_vm0, %v4239_v34 }
 0xa52   : > { %4834 = vmatprep.mubr.bf16.mxu1 %v16704_v47 }
 0xaa0   : > { %v10603_v19 = vpop.f32.mrf.mxu1 }
 0xaa2   : > { %v3864_v5 = vpop.f32.mrf.mxu1 }
 0xaa4   : > { %v10604_v1 = vpop.f32.mrf.mxu1 }
 0xaa5   : > { %v3960_v44 = vpack.c.bf16 %v10604_v1, %v10603_v19  ;;  %v16706_v1 = vld [vmem:[#allocation54_spill] sm:$0xff] }
 0xaa6   : > { %v3867_v46 = vpop.f32.mrf.mxu1 }
 0xaa7   : > { %v3959_v27 = vpack.c.bf16 %v3867_v46, %v3864_v5  ;;  %v16707_v46 = vld [vmem:[#allocation55_spill] sm:$0xff] }
 0xaa9   : > { %9810 = vmatmul.mubr.msk.bf16.vlgmr.msra.gmra.mxu0 %vm2086_vm0, %v3959_v27 }
 0xaaa   : > { %10650 = vmatpush3.bf16.msra.mxu0 %v4584_v2  ;;  %4081 = vmatprep.mubr.bf16.mxu0 %v16704_v47 }
 0xaab   : > { %10651 = vmatprep.subr.bf16.mxu0 %v4582_v62 }
 0xaae   : > { %10652 = vmatpush3.bf16.msra.mxu0 %v4582_v62 }
 0xaaf   : > { %10653 = vmatprep.subr.bf16.mxu0 %v4580_v60 }
 0xab1   : > { %9811 = vmatmul.mubr.msk.bf16.gmra.mxu0 %vm2086_vm0, %v3960_v44 }
 0xab2   : > { %10654 = vmatpush3.bf16.msra.mxu0 %v4580_v60  ;;  %4091 = vmatprep.mubr.bf16.mxu0 %v16704_v47 }
 0xab3   : > { %10655 = vmatprep.subr.bf16.mxu0 %v4578_v11 }
 0xab6   : > { %10656 = vmatpush3.bf16.msra.mxu0 %v4578_v11 }
 0xad8   : > { %v10607_v56 = vpop.f32.mrf.mxu1 }
 0xada   : > { %v3880_v61 = vpop.f32.mrf.mxu1 }
 0xadc   : > { %v10608_v45 = vpop.f32.mrf.mxu1 }
 0xadd   : > { %v3962_v33 = vpack.c.bf16 %v10608_v45, %v10607_v56  ;;  %v16708_v45 = vld [vmem:[#allocation43_spill] sm:$0xff] }
 0xade   : > { %v3883_v31 = vpop.f32.mrf.mxu1 }
 0xadf   : > { %v3961_v50 = vpack.c.bf16 %v3883_v31, %v3880_v61 }
 0xae1   : > { %9812 = vmatmul.mubr.msk.bf16.gmra.mxu0 %vm2086_vm0, %v3961_v50 }
 0xae2   : > { %4101 = vmatprep.mubr.bf16.mxu0 %v16704_v47 }
 0xae9   : > { %v10611_v26 = vpop.f32.mrf.mxu1  ;;  %9813 = vmatmul.mubr.msk.bf16.gmra.mxu0 %vm2086_vm0, %v3962_v33 }
 0xaea   : > { %4111 = vmatprep.mubr.bf16.mxu0 %v16704_v47 }
 0xaeb   : > { %v3896_v32 = vpop.f32.mrf.mxu1 }
 0xaed   : > { %v10612_v3 = vpop.f32.mrf.mxu1 }
 0xaee   : > { %v3964_v10 = vpack.c.bf16 %v10612_v3, %v10611_v26  ;;  %v16709_v3 = vld [vmem:[#allocation49_spill] sm:$0xff] }
 0xaef   : > { %v3899_v35 = vpop.f32.mrf.mxu1 }
 0xaf0   : > { %v3963_v16 = vpack.c.bf16 %v3899_v35, %v3896_v32 }
 0xaf1   : > { %v10615_v37 = vpop.f32.mrf.mxu1 }
 0xaf2   : > { %9814 = vmatmul.mubr.msk.bf16.gmra.mxu0 %vm2086_vm0, %v3963_v16  ;;  %v16710_v16 = vld [vmem:[#allocation46_spill] sm:$0xff] }
 0xaf3   : > { %v3912_v6 = vpop.f32.mrf.mxu1  ;;  %4121 = vmatprep.mubr.bf16.mxu0 %v16704_v47 }
 0xaf5   : > { %v10616_v17 = vpop.f32.mrf.mxu1 }
 0xaf6   : > { %v3966_v52 = vpack.c.bf16 %v10616_v17, %v10615_v37 }
 0xaf7   : > { %v3915_v51 = vpop.f32.mrf.mxu1 }
 0xaf8   : > { %v3965_v0 = vpack.c.bf16 %v3915_v51, %v3912_v6 }
 0xaf9   : > { %v10635_v38 = vpop.f32.mrf.mxu1 }
 0xafa   : > { %9815 = vmatmul.mubr.msk.bf16.gmra.mxu0 %vm2086_vm0, %v3964_v10  ;;  %4413 = vmax.xlane.f32.xlu0 %v10635_v38 }
 0xafb   : > { %v4346_v55 = vpop.f32.mrf.mxu1  ;;  %4131 = vmatprep.mubr.bf16.mxu0 %v16704_v47 }
 0xafd   : > { %v10636_v2 = vpop.f32.mrf.mxu1 }
 0xafe   : > { %4409 = vmax.xlane.f32.xlu0 %v4346_v55 }
 0xaff   : > { %v4349_v8 = vpop.f32.mrf.mxu1 }
 0xb00   : > { %4411 = vmax.xlane.f32.xlu1 %v4349_v8 }
 0xb01   : > { %v14373_v53 = vpop.f32.mrf.mxu1 }
 0xb02   : > { %9816 = vmatmul.mubr.msk.bf16.gmra.mxu0 %vm2086_vm0, %v3965_v0  ;;  %4415 = vmax.xlane.f32.xlu0 %v10636_v2 }
 0xb03   : > { %v14376_v20 = vpop.f32.mrf.mxu1  ;;  %4141 = vmatprep.mubr.bf16.mxu0 %v16704_v47 }
 0xb05   : > { %v10640_v36 = vpop.f32.mrf.mxu1 }
 0xb06   : > { %4421 = vmax.xlane.f32.xlu0 %v14373_v53  ;;  %4423 = vmax.xlane.f32.xlu1 %v10640_v36 }
 0xb07   : > { %v14380_v4 = vpop.f32.mrf.mxu1 }
 0xb09   : > { %v14382_v29 = vpop.f32.mrf.mxu1 }
 0xb0a   : > { %9817 = vmatmul.mubr.msk.bf16.gmra.mxu0 %vm2086_vm0, %v3966_v52  ;;  %4417 = vmax.xlane.f32.xlu0 %v14376_v20 }
 0xb0b   : > { %4419 = vmax.xlane.f32.xlu1 %v14380_v4  ;;  %v14387_v25 = vpop.f32.mrf.mxu1 }
 0xb0d   : > { %v14389_v48 = vpop.f32.mrf.mxu1 }
 0xb0e   : > { %4429 = vmax.xlane.f32.xlu0 %v14382_v29 }
 0xb0f   : > { %4431 = vmax.xlane.f32.xlu1 %v14389_v48  ;;  %v14393_v34 = vpop.f32.mrf.mxu1 }
 0xb11   : > { %v14397_v19 = vpop.f32.mrf.mxu1 }
 0xb12   : > { %4425 = vmax.xlane.f32.xlu0 %v14387_v25 }
 0xb13   : > { %4427 = vmax.xlane.f32.xlu1 %v14393_v34  ;;  %v14400_v5 = vpop.f32.mrf.mxu1 }
 0xb15   : > { %v14407_v27 = vpop.f32.mrf.mxu1 }
 0xb16   : > { %4437 = vmax.xlane.f32.xlu0 %v14397_v19 }
 0xb17   : > { %v14410_v62 = vpop.f32.mrf.mxu1 }
 0xb1a   : > { %4433 = vmax.xlane.f32.xlu0 %v14400_v5 }
 0xb24   : > { %4573 = vrot.lane.b32.xlu1 %v16706_v1, %s12469_s7 }
 0xb30   : > { %4575 = vrot.lane.b32.xlu0 %v16707_v46, %s12469_s7 }
 0xb48   : > { %4439 = vmax.xlane.f32.xlu1 %v14407_v27 }
 0xb4c   : > { %4435 = vmax.xlane.f32.xlu1 %v14410_v62 }
 0xb69   : > { %v4073_v60 = vpop.f32.mrf.mxu0 }
 0xb6a   : > { %v14414_v44 = vadd.f32 %v4073_v60, %v14076_v30 }
 0xb6b   : > { %v4075_v11 = vpop.f32.mrf.mxu0 }
 0xb6c   : > { %v14417_v56 = vadd.f32 %v4075_v11, %v14081_v9 }
 0xb6d   : > { %v4077_v61 = vpop.f32.mrf.mxu0 }
 0xb6e   : > { %v14420_v31 = vadd.f32 %v4077_v61, %v16708_v45 }
 0xb6f   : > { %v14422_v50 = vpop.f32.mrf.mxu0 }
 0xb71   : > { %v4083_v33 = vpop.f32.mrf.mxu0 }
 0xb72   : > { %v14425_v26 = vadd.f32 %v4083_v33, %v14093_v58 }
 0xb73   : > { %v4085_v32 = vpop.f32.mrf.mxu0 }
 0xb74   : > { %v14428_v35 = vadd.f32 %v4085_v32, %v16709_v3 }
 0xb75   : > { %v4087_v30 = vpop.f32.mrf.mxu0 }
 0xb76   : > { %v14431_v37 = vadd.f32 %v4087_v30, %v16710_v16 }
 0xb83   : > { %v4414_v9 = vpop.xlane.xlu0 %4413 }
 0xb84   : > { %v4443_v6 = vsub.f32 %v10635_v38, %v4414_v9 }
 0xb86   : > { %v4461_v17 = vmul.f32 1.442695, %v4443_v6 }
 0xb87   : > { %v4410_v51 = vpop.xlane.xlu0 %4409 }
 0xb88   : > { %11476 = vpow2.f32 %v4461_v17  ;;  %v4441_v10 = vsub.f32 %v4346_v55, %v4410_v51 }
 0xb89   : > { %v4412_v0 = vpop.xlane.xlu1 %4411 }
 0xb8a   : > { %v4457_v52 = vmul.f32 1.442695, %v4441_v10  ;;  %v4442_v1 = vsub.f32 %v4349_v8, %v4412_v0 }
 0xb8b   : > { %v4416_v46 = vpop.xlane.xlu0 %4415 }
 0xb8c   : > { %11478 = vpow2.f32 %v4457_v52  ;;  %v4444_v58 = vsub.f32 %v10636_v2, %v4416_v46  ;;  %v4459_v11 = vmul.f32 1.442695, %v4442_v1 }
 0xb8e   : > { %v4463_v60 = vmul.f32 1.442695, %v4444_v58 }
 0xb8f   : > { %v4422_v61 = vpop.xlane.xlu0 %4421  ;;  %v4424_v45 = vpop.xlane.xlu1 %4423 }
 0xb90   : > { %11480 = vpow2.f32 %v4463_v60  ;;  %v4447_v33 = vsub.f32 %v14373_v53, %v4422_v61  ;;  %v4448_v32 = vsub.f32 %v10640_v36, %v4424_v45 }
 0xb91   : > { %11482 = vpow2.f32 %v4459_v11 }
 0xb92   : > { %v4469_v3 = vmul.f32 1.442695, %v4447_v33  ;;  %v4471_v38 = vmul.f32 1.442695, %v4448_v32 }
 0xb93   : > { %v4418_v30 = vpop.xlane.xlu0 %4417 }
 0xb94   : > { %11484 = vpow2.f32 %v4469_v3  ;;  %v4445_v55 = vsub.f32 %v14376_v20, %v4418_v30  ;;  %v4420_v16 = vpop.xlane.xlu1 %4419 }
 0xb95   : > { %v14435_v8 = vpop.eup %11476  ;;  %v4446_v2 = vsub.f32 %v14380_v4, %v4420_v16  ;;  %11486 = vpow2.f32 %v4471_v38  ;;  %v14451_v4 = vpop.f32.mrf.mxu0 }
 0xb96   : > { %v4465_v9 = vmul.f32 1.442695, %v4445_v55  ;;  %4493 = vadd.xlane.f32.xlu1 %v14435_v8 }
 0xb97   : > { %v14439_v6 = vpop.xlane.xlu0 %4429  ;;  %v4467_v53 = vmul.f32 1.442695, %v4446_v2  ;;  %v16711_v2 = vld [vmem:[#allocation50_spill] sm:$0xff] }
 0xb98   : > { %11488 = vpow2.f32 %v4465_v9  ;;  %v14446_v20 = vpop.xlane.xlu1 %4431 }
 0xb99   : > { %v14441_v36 = vpop.eup %11478  ;;  %11490 = vpow2.f32 %v4467_v53 }
 0xb9a   : > { %4489 = vadd.xlane.f32.xlu1 %v14441_v36 }
 0xb9b   : > { %v14444_v17 = vpop.xlane.xlu0 %4425 }
 0xb9c   : > { %v4428_v46 = vpop.xlane.xlu1 %4427 }
 0xb9d   : > { %v14448_v51 = vpop.eup %11480 }
 0xb9e   : > { %4495 = vadd.xlane.f32.xlu1 %v14448_v51  ;;  %v14455_v0 = vpop.eup %11482 }
 0xb9f   : > { %v14453_v10 = vpop.xlane.xlu0 %4437 }
 0xba0   : > { %v4574_v55 = vpop.permute.xlu1 %4573 }
 0xba1   : > { %v14457_v52 = vpop.eup %11484  ;;  %v4093_v1 = vpop.f32.mrf.mxu0 }
 0xba2   : > { %v14460_v58 = vadd.f32 %v4093_v1, %v14130_v21  ;;  %4501 = vadd.xlane.f32.xlu0 %v14457_v52  ;;  %4491 = vadd.xlane.f32.xlu1 %v14455_v0  ;;  %v14466_v61 = vpop.eup %11486  ;;  %v16712_v1 = vld [vmem:[#allocation60_spill] sm:$0xff] }
 0xba3   : > { %v4095_v60 = vpop.f32.mrf.mxu0  ;;  %v14464_v11 = vpop.xlane.xlu0 %4433 }
 0xba4   : > { %v14469_v45 = vadd.f32 %v4095_v60, %v14135_v24 }
 0xba5   : > { %v14471_v33 = vpop.eup %11488  ;;  %v4097_v32 = vpop.f32.mrf.mxu0 }
 0xba6   : > { %v14474_v3 = vadd.f32 %v4097_v32, %v14139_v14  ;;  %4497 = vadd.xlane.f32.xlu1 %v14471_v33  ;;  %4503 = vadd.xlane.f32.xlu0 %v14466_v61  ;;  %v14480_v30 = vpop.eup %11490 }
 0xba7   : > { %v14478_v21 = vpop.f32.mrf.mxu0  ;;  %v4576_v38 = vpop.permute.xlu0 %4575 }
 0xba8   : > { %10657 = vmatprep.subr.bf16.mxu0 %v4576_v38 }
 0xba9   : > { %v4103_v16 = vpop.f32.mrf.mxu0  ;;  %10658 = vmatpush3.bf16.msra.mxu0 %v4576_v38 }
 0xbaa   : > { %v14483_v24 = vadd.f32 %v4103_v16, %v14153_v57  ;;  %4499 = vadd.xlane.f32.xlu0 %v14480_v30  ;;  %10659 = vmatprep.subr.bf16.mxu0 %v4574_v55 }
 0xbab   : > { %v4105_v14 = vpop.f32.mrf.mxu0 }
 0xbac   : > { %v14487_v9 = vadd.f32 %v4105_v14, %v16711_v2  ;;  %v16714_v14 = vld [vmem:[#allocation52_spill] sm:$0xff] }
 0xbad   : > { %v4107_v53 = vpop.f32.mrf.mxu0  ;;  %10660 = vmatpush3.bf16.msra.mxu0 %v4574_v55 }
 0xbae   : > { %v14490_v60 = vadd.f32 %v4107_v53, %v16712_v1 }
 0xbaf   : > { %v14492_v32 = vpop.f32.mrf.mxu0 }
 0xbb2   : > { %v4113_v59 = vpop.f32.mrf.mxu0 }
 0xbb3   : > { %v14495_v38 = vadd.f32 %v4113_v59, %v14173_v12 }
 0xbb4   : > { %v4115_v57 = vpop.f32.mrf.mxu0 }
 0xbb5   : > { %v14498_v16 = vadd.f32 %v4115_v57, %v14179_v43 }
 0xbb6   : > { %v4117_v7 = vpop.f32.mrf.mxu0 }
 0xbb7   : > { %v14501_v40 = vadd.f32 %v4117_v7, %v14185_v54  ;;  %4569 = vrot.lane.b32.xlu1 %v16714_v14, %s12469_s7  ;;  %v16715_v54 = vld [vmem:[#allocation53_spill] sm:$0xff] }
 0xbb8   : > { %v14505_v55 = vpop.f32.mrf.mxu0 }
 0xbb9   : > { %16713 = vst [vmem:[#allocation39_spill] sm:$0xff] %v14501_v40 }
 0xbba   : > { %v4123_v2 = vpop.f32.mrf.mxu0 }
 0xbbb   : > { %v14508_v53 = vadd.f32 %v4123_v2, %v14197_v63  ;;  %v4449_v63 = vsub.f32 %v14387_v25, %v14444_v17 }
 0xbbc   : > { %v4125_v1 = vpop.f32.mrf.mxu0 }
 0xbbd   : > { %v14511_v12 = vadd.f32 %v4125_v1, %v14203_v13  ;;  %v4452_v1 = vsub.f32 %v14389_v48, %v14446_v20 }
 0xbbe   : > { %v4127_v59 = vpop.f32.mrf.mxu0 }
 0xbbf   : > { %v14514_v43 = vadd.f32 %v4127_v59, %v14209_v18  ;;  %v4479_v25 = vmul.f32 1.442695, %v4452_v1 }
 0xbc0   : > { %v14516_v57 = vpop.f32.mrf.mxu0  ;;  %4571 = vrot.lane.b32.xlu0 %v16715_v54, %s12469_s7  ;;  %v4473_v54 = vmul.f32 1.442695, %v4449_v63 }
 0xbc2   : > { %v4133_v7 = vpop.f32.mrf.mxu0  ;;  %11492 = vpow2.f32 %v4473_v54 }
 0xbc3   : > { %v14521_v14 = vadd.f32 %v4133_v7, %v14219_v42  ;;  %v4450_v42 = vsub.f32 %v14393_v34, %v4428_v46  ;;  %11494 = vpow2.f32 %v4479_v25  ;;  %v11048_v25 = vld [vmem:[#allocation13 + $0xf0] ss:$8 sps:$4 sm:$0xff]  }
 0xbc4   : > { %v4135_v40 = vpop.f32.mrf.mxu0 }
 0xbc5   : > { %16716 = vst [vmem:[#allocation33_spill] sm:$0xff] %v14521_v14  ;;  %v14526_v13 = vadd.f32 %v4135_v40, %v14226_v15  ;;  %v4451_v40 = vsub.f32 %v14382_v29, %v14439_v6  ;;  %v4475_v15 = vmul.f32 1.442695, %v4450_v42  ;;  %v4455_v29 = vsub.f32 %v14397_v19, %v14453_v10 }
 0xbc6   : > { %v4137_v2 = vpop.f32.mrf.mxu0 }
 0xbc7   : > { %v14529_v18 = vadd.f32 %v4137_v2, %v14234_v23  ;;  %v4477_v34 = vmul.f32 1.442695, %v4451_v40  ;;  %11496 = vpow2.f32 %v4475_v15  ;;  %v11053_v40 = vld [vmem:[#allocation13 + $0xe4] ss:$8 sps:$4 sm:$0xff]   ;;  %v11051_v15 = vld [vmem:[#allocation13 + $0xe0] ss:$8 sps:$4 sm:$0xff]  }
 0xbc8   : > { %v14533_v59 = vpop.f32.mrf.mxu0 }
 0xbc9   : > { %11498 = vpow2.f32 %v4477_v34 }
 0xbca   : > { %v4143_v7 = vpop.f32.mrf.mxu0 }
 0xbcb   : > { %v14537_v14 = vadd.f32 %v4143_v7, %v14249_v39  ;;  %v4453_v39 = vsub.f32 %v14400_v5, %v14464_v11 }
 0xbcc   : > { %v4145_v17 = vpop.f32.mrf.mxu0 }
 0xbcd   : > { %v14542_v23 = vadd.f32 %v4145_v17, %v14254_v49  ;;  %v4481_v6 = vmul.f32 1.442695, %v4453_v39  ;;  %v11050_v17 = vld [vmem:[#allocation13 + $0xf4] ss:$8 sps:$4 sm:$0xff]  }
 0xbce   : > { %v4147_v48 = vpop.f32.mrf.mxu0  ;;  %4810 = vmatprep.subr.bf16.mxu1 %v11050_v17 }
 0xbcf   : > { %v14545_v20 = vadd.f32 %v4147_v48, %v14261_v28  ;;  %v4485_v28 = vmul.f32 1.442695, %v4455_v29  ;;  %11500 = vpow2.f32 %v4481_v6  ;;  %v14553_v54 = vpop.eup %11492  ;;  %4811 = vmatpush1.bf16.msra.mxu1 %v11048_v25 }
 0xbd0   : > { %v14556_v5 = vpop.eup %11494  ;;  %4812 = vmatprep.subr.bf16.mxu1 %v11053_v40 }
 0xbd1   : > { %v4440_v46 = vpop.xlane.xlu1 %4439 }
 0xbd2   : > { %v4456_v49 = vsub.f32 %v14407_v27, %v4440_v46 }
 0xbd3   : > { %4813 = vmatpush1.bf16.msra.mxu1 %v11051_v15 }
 0xbd4   : > { %v4487_v42 = vmul.f32 1.442695, %v4456_v49  ;;  %v14558_v11 = vpop.eup %11496 }
 0xbd5   : > { %v4436_v63 = vpop.xlane.xlu1 %4435 }
 0xbd6   : > { %v4454_v2 = vsub.f32 %v14410_v62, %v4436_v63  ;;  %v14562_v19 = vpop.eup %11498 }
 0xbd8   : > { %v4483_v1 = vmul.f32 1.442695, %v4454_v2 }
 0xbda   : > { %11502 = vpow2.f32 %v4483_v1 }
 0xbdb   : > { %4505 = vadd.xlane.f32.xlu1 %v14553_v54  ;;  %11504 = vpow2.f32 %v4485_v28 }
 0xbdc   : > { %11506 = vpow2.f32 %v4487_v42  ;;  %v14565_v27 = vpop.eup %11500 }
 0xbdf   : > { %4511 = vadd.xlane.f32.xlu1 %v14556_v5  ;;  %4507 = vadd.xlane.f32.xlu0 %v14558_v11 }
 0xbe3   : > { %4509 = vadd.xlane.f32.xlu0 %v14562_v19 }
 0xbe7   : > { %v14567_v62 = vpop.eup %11502  ;;  %4513 = vadd.xlane.f32.xlu0 %v14565_v27 }
 0xbe8   : > { %4515 = vadd.xlane.f32.xlu1 %v14567_v62  ;;  %v14571_v10 = vpop.eup %11504 }
 0xbe9   : > { %v14573_v7 = vpop.eup %11506 }
 0xbeb   : > { %4517 = vadd.xlane.f32.xlu0 %v14571_v10 }
 0xbec   : > { %4519 = vadd.xlane.f32.xlu1 %v14573_v7 }
 0xc1f   : > { %v4494_v48 = vpop.xlane.xlu1 %4493 }
 0xc23   : > { %v4490_v34 = vpop.xlane.xlu1 %4489 }
 0xc27   : > { %v4496_v39 = vpop.xlane.xlu1 %4495 }
 0xc28   : > { %11508 = vrcp.f32 %v4496_v39 }
 0xc29   : > { %11510 = vrcp.f32 %v4490_v34 }
 0xc2a   : > { %11512 = vrcp.f32 %v4494_v48 }
 0xc2b   : > { %v4502_v46 = vpop.xlane.xlu0 %4501  ;;  %v4492_v29 = vpop.xlane.xlu1 %4491 }
 0xc2c   : > { %11514 = vrcp.f32 %v4492_v29 }
 0xc2f   : > { %v4504_v6 = vpop.xlane.xlu0 %4503  ;;  %v4498_v63 = vpop.xlane.xlu1 %4497 }
 0xc30   : > { %11516 = vrcp.f32 %v4504_v6 }
 0xc31   : > { %11518 = vrcp.f32 %v4498_v63 }
 0xc32   : > { %11520 = vrcp.f32 %v4502_v46 }
 0xc33   : > { %v4500_v49 = vpop.xlane.xlu0 %4499  ;;  %v4570_v25 = vpop.permute.xlu1 %4569 }
 0xc34   : > { %11522 = vrcp.f32 %v4500_v49 }
 0xc35   : > { %v11509_v2 = vpop.eup %11508 }
 0xc36   : > { %v11511_v28 = vpop.eup %11510  ;;  %v4540_v40 = vmul.f32 %v11509_v2, %v14448_v51 }
 0xc37   : > { %v4572_v1 = vpop.permute.xlu0 %4571  ;;  %v11513_v42 = vpop.eup %11512  ;;  %v4537_v15 = vmul.f32 %v11511_v28, %v14441_v36 }
 0xc38   : > { %10661 = vmatprep.subr.bf16.mxu0 %v4572_v1  ;;  %v4539_v34 = vmul.f32 %v11513_v42, %v14435_v8 }
 0xc39   : > { %10662 = vmatpush3.bf16.msra.mxu0 %v4572_v1  ;;  %v11515_v17 = vpop.eup %11514 }
 0xc3a   : > { %10663 = vmatprep.subr.bf16.mxu0 %v4570_v25  ;;  %v4538_v48 = vmul.f32 %v11515_v17, %v14455_v0  ;;  %v4554_v29 = vpack.c.bf16 %v4540_v40, %v4539_v34 }
 0xc3c   : > { %v4553_v39 = vpack.c.bf16 %v4538_v48, %v4537_v15 }
 0xc3d   : > { %10664 = vmatpush3.bf16.msra.mxu0 %v4570_v25  ;;  %v11517_v46 = vpop.eup %11516 }
 0xc3e   : > { %v11519_v6 = vpop.eup %11518  ;;  %10665 = vmatprep.mubr.bf16.mxu0 %v4553_v39  ;;  %v4544_v2 = vmul.f32 %v11517_v46, %v14466_v61 }
 0xc3f   : > { %v11521_v63 = vpop.eup %11520  ;;  %v4541_v1 = vmul.f32 %v11519_v6, %v14471_v33 }
 0xc40   : > { %10666 = vmatmul.mubr.bf16.vlgmr.msra.gmra.mxu0 %v4554_v29  ;;  %v4543_v0 = vmul.f32 %v11521_v63, %v14457_v52 }
 0xc41   : > { %v11523_v49 = vpop.eup %11522 }
 0xc42   : > { %v4542_v51 = vmul.f32 %v11523_v49, %v14480_v30  ;;  %v4556_v8 = vpack.c.bf16 %v4544_v2, %v4543_v0  ;;  %v11054_v0 = vld [vmem:[#allocation13 + $0xd0] ss:$8 sps:$4 sm:$0xff]  }
 0xc44   : > { %v4555_v36 = vpack.c.bf16 %v4542_v51, %v4541_v1 }
 0xc46   : > { %10669 = vmatprep.mubr.bf16.mxu0 %v4555_v36 }
 0xc48   : > { %10670 = vmatmul.mubr.bf16.gmra.mxu0 %v4556_v8 }
 0xc64   : > { %v4506_v28 = vpop.xlane.xlu1 %4505 }
 0xc65   : > { %11524 = vrcp.f32 %v4506_v28 }
 0xc68   : > { %v4508_v42 = vpop.xlane.xlu0 %4507  ;;  %v4512_v25 = vpop.xlane.xlu1 %4511 }
 0xc69   : > { %11526 = vrcp.f32 %v4508_v42 }
 0xc6a   : > { %11528 = vrcp.f32 %v4512_v25  ;;  %v11059_v25 = vld [vmem:[#allocation13 + $0xc4] ss:$8 sps:$4 sm:$0xff]  }
 0xc6c   : > { %v4510_v17 = vpop.xlane.xlu0 %4509 }
 0xc6d   : > { %11530 = vrcp.f32 %v4510_v17 }
 0xc70   : > { %v4514_v40 = vpop.xlane.xlu0 %4513 }
 0xc71   : > { %11532 = vrcp.f32 %v4514_v40  ;;  %v4516_v33 = vpop.xlane.xlu1 %4515 }
 0xc72   : > { %11534 = vrcp.f32 %v4516_v33  ;;  %v11525_v30 = vpop.eup %11524 }
 0xc73   : > { %v4545_v48 = vmul.f32 %v11525_v30, %v14553_v54  ;;  %v11056_v54 = vld [vmem:[#allocation13 + $0xd4] ss:$8 sps:$4 sm:$0xff]  }
 0xc74   : > { %v4518_v61 = vpop.xlane.xlu0 %4517  ;;  %4814 = vmatprep.subr.bf16.mxu1 %v11056_v54 }
 0xc75   : > { %11536 = vrcp.f32 %v4518_v61  ;;  %v4520_v15 = vpop.xlane.xlu1 %4519  ;;  %4815 = vmatpush1.bf16.msra.mxu1 %v11054_v0 }
 0xc76   : > { %v11527_v52 = vpop.eup %11526  ;;  %11538 = vrcp.f32 %v4520_v15  ;;  %4816 = vmatprep.subr.bf16.mxu1 %v11059_v25 }
 0xc77   : > { %v4546_v34 = vmul.f32 %v11527_v52, %v14558_v11  ;;  %v11529_v39 = vpop.eup %11528 }
 0xc78   : > { %v4548_v63 = vmul.f32 %v11529_v39, %v14556_v5 }
 0xc79   : > { %v4557_v46 = vpack.c.bf16 %v4546_v34, %v4545_v48 }
 0xc7a   : > { %v11531_v29 = vpop.eup %11530 }
 0xc7b   : > { %10673 = vmatprep.mubr.bf16.mxu0 %v4557_v46  ;;  %v4547_v6 = vmul.f32 %v11531_v29, %v14562_v19  ;;  %v11057_v19 = vld [vmem:[#allocation13 + $0xc0] ss:$8 sps:$4 sm:$0xff]  }
 0xc7c   : > { %4817 = vmatpush1.bf16.msra.mxu1 %v11057_v19 }
 0xc7d   : > { %v4558_v49 = vpack.c.bf16 %v4548_v63, %v4547_v6 }
 0xc7e   : > { %v11533_v1 = vpop.eup %11532 }
 0xc7f   : > { %v11535_v51 = vpop.eup %11534  ;;  %10674 = vmatmul.mubr.bf16.gmra.mxu0 %v4558_v49  ;;  %v4549_v2 = vmul.f32 %v11533_v1, %v14565_v27  ;;  %v14593_v27 = vpop.f32.mrf.mxu0 }
 0xc80   : > { %v4550_v36 = vmul.f32 %v11535_v51, %v14567_v62 }
 0xc82   : > { %v11537_v8 = vpop.eup %11536  ;;  %v4559_v11 = vpack.c.bf16 %v4550_v36, %v4549_v2 }
 0xc83   : > { %v11539_v28 = vpop.eup %11538  ;;  %v4551_v42 = vmul.f32 %v11537_v8, %v14571_v10 }
 0xc84   : > { %10677 = vmatprep.mubr.bf16.mxu0 %v4559_v11  ;;  %v4552_v5 = vmul.f32 %v11539_v28, %v14573_v7  ;;  %v12109_v11 = vld [vmem:[%s12724_s18 + $0x18] sm:$0xff] }
 0xc85   : > { %v2025_v28 = vadd.f32 %v12109_v11, %v14066_v22 }
 0xc86   : > { %v4560_v17 = vpack.c.bf16 %v4552_v5, %v4551_v42  ;;  %v16717_v5 = vld [vmem:[#allocation45_spill] sm:$0xff] }
 0xc87   : > { %v2709_v19 = vadd.f32 %v16717_v5, %v2025_v28 }
 0xc88   : > { %10678 = vmatmul.mubr.bf16.gmra.mxu0 %v4560_v17  ;;  %v16718_v17 = vld [vmem:[#allocation47_spill] sm:$0xff] }
 0xd00   : > { %v10667_v62 = vpop.f32.mrf.mxu0 }
 0xd02   : > { %v4627_v40 = vpop.f32.mrf.mxu0 }
 0xd04   : > { %v10668_v33 = vpop.f32.mrf.mxu0 }
 0xd05   : > { %v4723_v7 = vpack.c.bf16 %v10668_v33, %v10667_v62  ;;  %v3472_v62 = vadd.f32 %v16718_v17, %v2709_v19 }
 0xd06   : > { %v4630_v30 = vpop.f32.mrf.mxu0 }
 0xd07   : > { %v4722_v61 = vpack.c.bf16 %v4630_v30, %v4627_v40 }
 0xd08   : > { %v10671_v15 = vpop.f32.mrf.mxu0 }
 0xd09   : > { %9834 = vmatmul.mubr.msk.bf16.vlgmr.msra.gmra.mxu1 %vm2086_vm0, %v4722_v61 }
 0xd0a   : > { %4844 = vmatprep.mubr.bf16.mxu1 %v16704_v47  ;;  %v4643_v10 = vpop.f32.mrf.mxu0 }
 0xd0c   : > { %v10672_v52 = vpop.f32.mrf.mxu0 }
 0xd0d   : > { %v4725_v39 = vpack.c.bf16 %v10672_v52, %v10671_v15  ;;  %v4155_v15 = vadd.f32 %v14422_v50, %v3472_v62 }
 0xd0e   : > { %v4646_v48 = vpop.f32.mrf.mxu0 }
 0xd0f   : > { %v4724_v34 = vpack.c.bf16 %v4646_v48, %v4643_v10 }
 0xd11   : > { %9835 = vmatmul.mubr.msk.bf16.gmra.mxu1 %vm2086_vm0, %v4723_v7 }
 0xd12   : > { %4854 = vmatprep.mubr.bf16.mxu1 %v16704_v47 }
 0xd19   : > { %9836 = vmatmul.mubr.msk.bf16.gmra.mxu1 %vm2086_vm0, %v4724_v34 }
 0xd1a   : > { %4864 = vmatprep.mubr.bf16.mxu1 %v16704_v47 }
 0xd21   : > { %9837 = vmatmul.mubr.msk.bf16.gmra.mxu1 %vm2086_vm0, %v4725_v39 }
 0xd22   : > { %4874 = vmatprep.mubr.bf16.mxu1 %v16704_v47 }
 0xd3f   : > { %v10675_v46 = vpop.f32.mrf.mxu0 }
 0xd41   : > { %v4659_v29 = vpop.f32.mrf.mxu0 }
 0xd43   : > { %v10676_v6 = vpop.f32.mrf.mxu0 }
 0xd44   : > { %v4727_v2 = vpack.c.bf16 %v10676_v6, %v10675_v46 }
 0xd45   : > { %v4662_v63 = vpop.f32.mrf.mxu0 }
 0xd46   : > { %v4726_v49 = vpack.c.bf16 %v4662_v63, %v4659_v29  ;;  %v16724_v29 = vld [vmem:[#allocation48_spill] sm:$0xff] }
 0xd48   : > { %v10679_v1 = vpop.f32.mrf.mxu0  ;;  %9838 = vmatmul.mubr.msk.bf16.gmra.mxu1 %vm2086_vm0, %v4726_v49  ;;  %v12111_v49 = vld [vmem:[%s12724_s18 + $0x58] sm:$0xff] }
 0xd49   : > { %4884 = vmatprep.mubr.bf16.mxu1 %v16704_v47 }
 0xd4a   : > { %v4675_v51 = vpop.f32.mrf.mxu0 }
 0xd4c   : > { %v10680_v36 = vpop.f32.mrf.mxu0 }
 0xd4d   : > { %v4729_v8 = vpack.c.bf16 %v10680_v36, %v10679_v1  ;;  %v2033_v1 = vadd.f32 %v12111_v49, %v14066_v22 }
 0xd4e   : > { %v4678_v0 = vpop.f32.mrf.mxu0 }
 0xd4f   : > { %v4728_v54 = vpack.c.bf16 %v4678_v0, %v4675_v51 }
 0xd50   : > { %9839 = vmatmul.mubr.msk.bf16.gmra.mxu1 %vm2086_vm0, %v4727_v2 }
 0xd51   : > { %4894 = vmatprep.mubr.bf16.mxu1 %v16704_v47 }
 0xd58   : > { %9840 = vmatmul.mubr.msk.bf16.gmra.mxu1 %vm2086_vm0, %v4728_v54  ;;  %v16729_v54 = vld [vmem:[#allocation35_spill] sm:$0xff] }
 0xd59   : > { %4904 = vmatprep.mubr.bf16.mxu1 %v16704_v47  ;;  %v12110_v47 = vld [vmem:[%s12724_s18 + $0x38] sm:$0xff] }
 0xd5a   : > { %v2029_v61 = vadd.f32 %v12110_v47, %v14066_v22 }
 0xd60   : > { %9841 = vmatmul.mubr.msk.bf16.gmra.mxu1 %vm2086_vm0, %v4729_v8  ;;  %v2717_v8 = vadd.f32 %v16729_v54, %v2033_v1 }
 0xdc9   : > { %v4836_v42 = vpop.f32.mrf.mxu1 }
 0xdca   : > { %v14615_v40 = vadd.f32 %v4836_v42, %v14414_v44  ;;  %v16730_v42 = vld [vmem:[#allocation51_spill] sm:$0xff] }
 0xdcb   : > { %v4838_v25 = vpop.f32.mrf.mxu1  ;;  %v3480_v5 = vadd.f32 %v16730_v42, %v2717_v8 }
 0xdcc   : > { %16719 = vst [vmem:[#allocation32_spill] sm:$0xff] %v14615_v40  ;;  %v14618_v33 = vadd.f32 %v4838_v25, %v14417_v56  ;;  %v16723_v56 = vld [vmem:[#allocation36_spill] sm:$0xff]  ;;  %v12112_v25 = vld [vmem:[%s12724_s18 + $0x78] sm:$0xff] }
 0xdcd   : > { %v4840_v30 = vpop.f32.mrf.mxu1  ;;  %v2713_v34 = vadd.f32 %v16723_v56, %v2029_v61  ;;  %v2037_v17 = vadd.f32 %v12112_v25, %v14066_v22  ;;  %v4163_v62 = vadd.f32 %v14478_v21, %v3480_v5  ;;  %v16736_v56 = vld [vmem:[#allocation61_spill] sm:$0xff]  ;;  %v16744_v25 = vld [vmem:[#allocation39_spill] sm:$0xff] }
 0xdce   : > { %16720 = vst [vmem:[#allocation31_spill] sm:$0xff] %v14618_v33  ;;  %v5013_v10 = vadd.f32 %v14618_v33, %v14615_v40  ;;  %v14626_v52 = vadd.f32 %v4840_v30, %v14420_v31 }
 0xdcf   : > { %v4842_v7 = vpop.f32.mrf.mxu1  ;;  %v3476_v6 = vadd.f32 %v16724_v29, %v2713_v34 }
 0xdd0   : > { %16721 = vst [vmem:[#allocation59_spill] sm:$0xff] %v14626_v52  ;;  %v14628_v48 = vadd.f32 %v4842_v7, %v4155_v15  ;;  %5014 = vadd.xlane.f32.xlu0 %v5013_v10 }
 0xdd1   : > { %v4846_v44 = vpop.f32.mrf.mxu1  ;;  %v4159_v51 = vadd.f32 %v14451_v4, %v3476_v6 }
 0xdd2   : > { %16722 = vst [vmem:[#allocation58_spill] sm:$0xff] %v14628_v48  ;;  %v5016_v39 = vadd.f32 %v14628_v48, %v14626_v52  ;;  %v14635_v50 = vadd.f32 %v4846_v44, %v14425_v26 }
 0xdd3   : > { %v4848_v46 = vpop.f32.mrf.mxu1 }
 0xdd4   : > { %16725 = vst [vmem:[#allocation57_spill] sm:$0xff] %v14635_v50  ;;  %v14638_v63 = vadd.f32 %v4848_v46, %v14428_v35  ;;  %5017 = vadd.xlane.f32.xlu1 %v5016_v39 }
 0xdd5   : > { %v4850_v31 = vpop.f32.mrf.mxu1 }
 0xdd6   : > { %16726 = vst [vmem:[#allocation56_spill] sm:$0xff] %v14638_v63  ;;  %v5019_v2 = vadd.f32 %v14638_v63, %v14635_v50  ;;  %v14646_v0 = vadd.f32 %v4850_v31, %v14431_v37 }
 0xdd7   : > { %v4852_v36 = vpop.f32.mrf.mxu1 }
 0xdd8   : > { %16727 = vst [vmem:[#allocation40_spill] sm:$0xff] %v14646_v0  ;;  %v14648_v26 = vadd.f32 %v4852_v36, %v4159_v51  ;;  %5020 = vadd.xlane.f32.xlu0 %v5019_v2 }
 0xdd9   : > { %v4856_v35 = vpop.f32.mrf.mxu1 }
 0xdda   : > { %16728 = vst [vmem:[#allocation54_spill] sm:$0xff] %v14648_v26  ;;  %v5022_v11 = vadd.f32 %v14648_v26, %v14646_v0  ;;  %v14655_v4 = vadd.f32 %v4856_v35, %v14460_v58 }
 0xddb   : > { %v4858_v28 = vpop.f32.mrf.mxu1 }
 0xddc   : > { %16731 = vst [vmem:[#allocation55_spill] sm:$0xff] %v14655_v4  ;;  %v14658_v19 = vadd.f32 %v4858_v28, %v14469_v45  ;;  %5023 = vadd.xlane.f32.xlu1 %v5022_v11  ;;  %v16735_v45 = vld [vmem:[#allocation38_spill] sm:$0xff] }
 0xddd   : > { %v4860_v37 = vpop.f32.mrf.mxu1  ;;  %v2721_v10 = vadd.f32 %v16735_v45, %v2037_v17  ;;  %v12114_v11 = vld [vmem:[%s12724_s18 + $0xb8] sm:$0xff] }
 0xdde   : > { %16732 = vst [vmem:[#allocation43_spill] sm:$0xff] %v14658_v19  ;;  %v5025_v30 = vadd.f32 %v14658_v19, %v14655_v4  ;;  %v14666_v61 = vadd.f32 %v4860_v37, %v14474_v3  ;;  %v2045_v28 = vadd.f32 %v12114_v11, %v14066_v22 }
 0xddf   : > { %v4862_v47 = vpop.f32.mrf.mxu1  ;;  %v3484_v21 = vadd.f32 %v16736_v56, %v2721_v10 }
 0xde0   : > { %16733 = vst [vmem:[#allocation49_spill] sm:$0xff] %v14666_v61  ;;  %v14668_v15 = vadd.f32 %v4862_v47, %v4163_v62  ;;  %5026 = vadd.xlane.f32.xlu0 %v5025_v30 }
 0xde1   : > { %v4866_v58 = vpop.f32.mrf.mxu1  ;;  %v4167_v46 = vadd.f32 %v14492_v32, %v3484_v21  ;;  %v16741_v32 = vld [vmem:[#allocation34_spill] sm:$0xff] }
 0xde2   : > { %16734 = vst [vmem:[#allocation46_spill] sm:$0xff] %v14668_v15  ;;  %v5028_v7 = vadd.f32 %v14668_v15, %v14666_v61  ;;  %v14675_v34 = vadd.f32 %v4866_v58, %v14483_v24  ;;  %v16748_v58 = vld [vmem:[#allocation62_spill] sm:$0xff] }
 0xde3   : > { %v4868_v44 = vpop.f32.mrf.mxu1 }
 0xde4   : > { %16737 = vst [vmem:[#allocation50_spill] sm:$0xff] %v14675_v34  ;;  %v14678_v39 = vadd.f32 %v4868_v44, %v14487_v9  ;;  %5029 = vadd.xlane.f32.xlu1 %v5028_v7  ;;  %v12113_v9 = vld [vmem:[%s12724_s18 + $0x98] sm:$0xff] }
 0xde5   : > { %v4870_v3 = vpop.f32.mrf.mxu1  ;;  %v2041_v1 = vadd.f32 %v12113_v9, %v14066_v22  ;;  %v12115_v44 = vld [vmem:[%s12724_s18 + $0xd8] sm:$0xff] }
 0xde6   : > { %16738 = vst [vmem:[#allocation60_spill] sm:$0xff] %v14678_v39  ;;  %v5031_v29 = vadd.f32 %v14678_v39, %v14675_v34  ;;  %v14684_v31 = vadd.f32 %v4870_v3, %v14490_v60  ;;  %v2049_v56 = vadd.f32 %v12115_v44, %v14066_v22 }
 0xde7   : > { %v4872_v6 = vpop.f32.mrf.mxu1  ;;  %v2725_v2 = vadd.f32 %v16741_v32, %v2041_v1 }
 0xde8   : > { %16739 = vst [vmem:[#allocation52_spill] sm:$0xff] %v14684_v31  ;;  %v14686_v49 = vadd.f32 %v4872_v6, %v4167_v46  ;;  %5032 = vadd.xlane.f32.xlu0 %v5031_v29  ;;  %v16753_v6 = vld [vmem:[#allocation41_spill] sm:$0xff] }
 0xde9   : > { %v3488_v35 = vadd.f32 %v14191_v41, %v2725_v2 }
 0xdea   : > { %16740 = vst [vmem:[#allocation53_spill] sm:$0xff] %v14686_v49  ;;  %v5034_v24 = vadd.f32 %v14686_v49, %v14684_v31 }
 0xdeb   : > { %v4171_v42 = vadd.f32 %v14505_v55, %v3488_v35  ;;  %v12116_v35 = vld [vmem:[%s12724_s18 + $0xf8] sm:$0xff]  ;;  %s16281_s18 = scalar_lea.vmem [#allocation20], %s9640_s8  ;;  %s16858_s8 = sld [smem:[#allocation27_spill]] }
 0xdec   : > { %5035 = vadd.xlane.f32.xlu1 %v5034_v24  ;;  %v2733_v24 = vadd.f32 %v16753_v6, %v2049_v56  ;;  %v5563_v6 = vld [vmem:[#allocation17 + $0x180] sm:$0xff]  ;;  %s9450_s5 = sshll.u32 %s16281_s18, 4  ;;  %s16408_s5 = int_to_ptr.vmem [resolvable:$true] %s9450_s5 }
 0xded   : > { %s12354_s22 = scalar_lea.vmem %s16408_s5, 4096  ;;  %p12361_p4 = scmp.lt.s32.totalorder %s16408_s5, %s12359_s14 }
 0xdee   : > { %p12355_p10 = scmp.ne.s32.totalorder %s16408_s5, %s12354_s22  ;;  %p12362_p1 = scmp.lt.s32.totalorder %s12360_s23, %s12354_s22 }
 0xdf0   : > { %p12356_p3 = pnand %p12355_p10, %p12688_p11  ;;  %p12363_p5 = por %p12362_p1, %p12361_p4 }
 0xdf1   : > { %s10280_s2 = sshll.u32 %s16858_s8, 12 }
 0xdf2   : > { %s16406_s28 = scalar_lea.hbm %s16863_s16, %s10280_s2  ;;  %p12357_p7 = pneg %p12356_p3 }
 0xdf4   : > { %p12364_p6 = pnand %p12363_p5, %p12357_p7 }
 0xe08   : > { %v4876_v51 = vpop.f32.mrf.mxu1 }
 0xe09   : > { %v14695_v54 = vadd.f32 %v4876_v51, %v14495_v38  ;;  %v16754_v51 = vld [vmem:[#allocation63_spill] sm:$0xff] }
 0xe0a   : > { %v4878_v36 = vpop.f32.mrf.mxu1  ;;  %v3496_v32 = vadd.f32 %v16754_v51, %v2733_v24  ;;  %v5567_v24 = vld [vmem:[#allocation17 + $0x1a0] sm:$0xff] }
 0xe0b   : > { %16742 = vst [vmem:[#allocation45_spill] sm:$0xff] %v14695_v54  ;;  %v14698_v60 = vadd.f32 %v4878_v36, %v14498_v16  ;;  %v16747_v16 = vld [vmem:[#allocation37_spill] sm:$0xff]  ;;  %v9923_v51 = vcombine.high %v5563_v6, %v5567_v24 }
 0xe0c   : > { %v4880_v8 = vpop.f32.mrf.mxu1  ;;  %v2729_v62 = vadd.f32 %v16747_v16, %v2045_v28  ;;  %v4179_v11 = vadd.f32 %v14533_v59, %v3496_v32  ;;  %v5568_v32 = vld [vmem:[#allocation17 + $0x1a8] sm:$0xff] }
 0xe0d   : > { %16743 = vst [vmem:[#allocation47_spill] sm:$0xff] %v14698_v60  ;;  %v5037_v5 = vadd.f32 %v14698_v60, %v14695_v54  ;;  %v14706_v17 = vadd.f32 %v4880_v8, %v16744_v25  ;;  %v2053_v8 = vadd.f32 %v12116_v35, %v14066_v22  ;;  %v16761_v22 = vld [vmem:[#allocation42_spill] sm:$0xff]  ;;  %v5559_v35 = vld [vmem:[#allocation17 + $0x160] sm:$0xff] }
 0xe0e   : > { %v4882_v37 = vpop.f32.mrf.mxu1  ;;  %v3492_v45 = vadd.f32 %v16748_v58, %v2729_v62 }
 0xe0f   : > { %16745 = vst [vmem:[#allocation36_spill] sm:$0xff] %v14706_v17  ;;  %v14708_v41 = vadd.f32 %v4882_v37, %v4171_v42  ;;  %5038 = vadd.xlane.f32.xlu0 %v5037_v5 }
 0xe10   : > { %v4886_v38 = vpop.f32.mrf.mxu1  ;;  %v4175_v21 = vadd.f32 %v14516_v57, %v3492_v45  ;;  %v16755_v57 = vld [vmem:[#allocation33_spill] sm:$0xff] }
 0xe11   : > { %16746 = vst [vmem:[#allocation48_spill] sm:$0xff] %v14708_v41  ;;  %v5040_v30 = vadd.f32 %v14708_v41, %v14706_v17  ;;  %v14715_v55 = vadd.f32 %v4886_v38, %v14508_v53 }
 0xe12   : > { %v4888_v47 = vpop.f32.mrf.mxu1 }
 0xe13   : > { %16749 = vst [vmem:[#allocation35_spill] sm:$0xff] %v14715_v55  ;;  %v14718_v10 = vadd.f32 %v4888_v47, %v14511_v12  ;;  %5041 = vadd.xlane.f32.xlu1 %v5040_v30 }
 0xe14   : > { %v4890_v7 = vpop.f32.mrf.mxu1 }
 0xe15   : > { %16750 = vst [vmem:[#allocation51_spill] sm:$0xff] %v14718_v10  ;;  %v5043_v3 = vadd.f32 %v14718_v10, %v14715_v55  ;;  %v14726_v29 = vadd.f32 %v4890_v7, %v14514_v43 }
 0xe16   : > { %v4892_v46 = vpop.f32.mrf.mxu1 }
 0xe17   : > { %16751 = vst [vmem:[#allocation38_spill] sm:$0xff] %v14726_v29  ;;  %v14728_v53 = vadd.f32 %v4892_v46, %v4175_v21  ;;  %5044 = vadd.xlane.f32.xlu0 %v5043_v3  ;;  %v5575_v21 = vld [vmem:[#allocation17 + $0x1e0] sm:$0xff]  ;;  %v5572_v3 = vld [vmem:[#allocation17 + $0x1c8] sm:$0xff] }
 0xe18   : > { %v4896_v12 = vpop.f32.mrf.mxu1 }
 0xe19   : > { %16752 = vst [vmem:[#allocation61_spill] sm:$0xff] %v14728_v53  ;;  %v5046_v9 = vadd.f32 %v14728_v53, %v14726_v29  ;;  %v14735_v2 = vadd.f32 %v4896_v12, %v16755_v57  ;;  %v5555_v57 = vld [vmem:[#allocation17 + $0x140] sm:$0xff] }
 0xe1a   : > { %v4898_v1 = vpop.f32.mrf.mxu1 }
 0xe1b   : > { %16756 = vst [vmem:[#allocation34_spill] sm:$0xff] %v14735_v2  ;;  %v14738_v36 = vadd.f32 %v4898_v1, %v14526_v13  ;;  %5047 = vadd.xlane.f32.xlu1 %v5046_v9  ;;  %v16760_v13 = vld [vmem:[#allocation44_spill] sm:$0xff] }
 0xe1c   : > { %v4900_v43 = vpop.f32.mrf.mxu1  ;;  %v2737_v38 = vadd.f32 %v16760_v13, %v2053_v8  ;;  %v5556_v8 = vld [vmem:[#allocation17 + $0x148] sm:$0xff] }
 0xe1d   : > { %16757 = vst [vmem:[#allocation39_spill] sm:$0xff] %v14738_v36  ;;  %v5049_v28 = vadd.f32 %v14738_v36, %v14735_v2  ;;  %v14746_v5 = vadd.f32 %v4900_v43, %v14529_v18 }
 0xe1e   : > { %v4902_v42 = vpop.f32.mrf.mxu1  ;;  %v3500_v30 = vadd.f32 %v16761_v22, %v2737_v38  ;;  %v5547_v38 = vld [vmem:[#allocation17 + $0x100] sm:$0xff]  ;;  %v5552_v22 = vld [vmem:[#allocation17 + $0x128] sm:$0xff] }
 0xe1f   : > { %16758 = vst [vmem:[#allocation37_spill] sm:$0xff] %v14746_v5  ;;  %v14748_v37 = vadd.f32 %v4902_v42, %v4179_v11  ;;  %5050 = vadd.xlane.f32.xlu0 %v5049_v28  ;;  %v5560_v11 = vld [vmem:[#allocation17 + $0x168] sm:$0xff]  ;;  %v9922_v28 = vcombine.low %v5563_v6, %v5567_v24  ;;  %v5531_v6 = vld [vmem:[#allocation17 + $0x80] sm:$0xff] }
 0xe20   : > { %v4906_v25 = vpop.f32.mrf.mxu1  ;;  %v4183_v58 = vadd.f32 %v14593_v27, %v3500_v30  ;;  %v5576_v27 = vld [vmem:[#allocation17 + $0x1e8] sm:$0xff]  ;;  %v9917_v13 = vcombine.high %v5556_v8, %v5560_v11  ;;  %v9914_v30 = vcombine.low %v5555_v57, %v5559_v35  ;;  %v5535_v24 = vld [vmem:[#allocation17 + $0xa0] sm:$0xff] }
 0xe21   : > { %16759 = vst [vmem:[#allocation62_spill] sm:$0xff] %v14748_v37  ;;  %v5052_v16 = vadd.f32 %v14748_v37, %v14746_v5  ;;  %v14755_v59 = vadd.f32 %v4906_v25, %v14537_v14  ;;  %v9932_v9 = vcombine.low %v5572_v3, %v5576_v27  ;;  %v9933_v1 = vcombine.high %v5572_v3, %v5576_v27 }
 0xe22   : > { %v4908_v62 = vpop.f32.mrf.mxu1  ;;  %v9915_v25 = vcombine.high %v5555_v57, %v5559_v35  ;;  %v5527_v35 = vld [vmem:[#allocation17 + $0x60] sm:$0xff] }
 0xe23   : > { %16762 = vst [vmem:[#allocation41_spill] sm:$0xff] %v14755_v59  ;;  %v14758_v47 = vadd.f32 %v4908_v62, %v14542_v23  ;;  %5053 = vadd.xlane.f32.xlu1 %v5052_v16  ;;  %v5571_v23 = vld [vmem:[#allocation17 + $0x1c0] sm:$0xff]  ;;  %6518 = vmatprep.subr.bf16.mxu1 %v9933_v1  ;;  %v5548_v62 = vld [vmem:[#allocation17 + $0x108] sm:$0xff] }
 0xe24   : > { %v4910_v18 = vpop.f32.mrf.mxu1  ;;  %v9930_v46 = vcombine.low %v5571_v23, %v5575_v21  ;;  %v9931_v12 = vcombine.high %v5571_v23, %v5575_v21  ;;  %6519 = vmatpush1.bf16.msra.mxu1 %v9932_v9  ;;  %v5551_v16 = vld [vmem:[#allocation17 + $0x120] sm:$0xff]  ;;  %v5540_v23 = vld [vmem:[#allocation17 + $0xc8] sm:$0xff] }
 0xe25   : > { %16763 = vst [vmem:[#allocation63_spill] sm:$0xff] %v14758_v47  ;;  %v5055_v45 = vadd.f32 %v14758_v47, %v14755_v59  ;;  %v14764_v44 = vadd.f32 %v4910_v18, %v14545_v20  ;;  %v5564_v20 = vld [vmem:[#allocation17 + $0x188] sm:$0xff]  ;;  %v9916_v18 = vcombine.low %v5556_v8, %v5560_v11  ;;  %v9906_v3 = vcombine.low %v5547_v38, %v5551_v16 }
 0xe26   : > { %v4912_v7 = vpop.f32.mrf.mxu1  ;;  %6405 = vmatprep.subr.bf16.mxu0 %v9931_v12  ;;  %v9925_v43 = vcombine.high %v5564_v20, %v5568_v32  ;;  %v9924_v42 = vcombine.low %v5564_v20, %v5568_v32  ;;  %v5544_v21 = vld [vmem:[#allocation17 + $0xe8] sm:$0xff]  ;;  %v9891_v32 = vcombine.high %v5531_v6, %v5535_v24 }
 0xe27   : > { %16764 = vst [vmem:[#allocation33_spill] sm:$0xff] %v14764_v44  ;;  %v14766_v56 = vadd.f32 %v4912_v7, %v4183_v58  ;;  %5056 = vadd.xlane.f32.xlu0 %v5055_v45  ;;  %6406 = vmatpush1.bf16.msra.mxu0 %v9930_v46  ;;  %v9907_v58 = vcombine.high %v5547_v38, %v5551_v16  ;;  %v5539_v7 = vld [vmem:[#allocation17 + $0xc0] sm:$0xff]  ;;  %v5532_v9 = vld [vmem:[#allocation17 + $0x88] sm:$0xff] }
 0xe28   : > { %6407 = vmatprep.subr.bf16.mxu0 %v9923_v51  ;;  %6520 = vmatprep.subr.bf16.mxu1 %v9925_v43  ;;  %v9909_v45 = vcombine.high %v5548_v62, %v5552_v22  ;;  %v9908_v46 = vcombine.low %v5548_v62, %v5552_v22  ;;  %v9901_v27 = vcombine.high %v5540_v23, %v5544_v21  ;;  %v5536_v1 = vld [vmem:[#allocation17 + $0xa8] sm:$0xff]  ;;  %v5523_v43 = vld [vmem:[#allocation17 + $0x40] sm:$0xff] }
 0xe29   : > { %16765 = vst [vmem:[#allocation44_spill] sm:$0xff] %v14766_v56  ;;  %v5058_v14 = vadd.f32 %v14766_v56, %v14764_v44  ;;  %6521 = vmatpush1.bf16.msra.mxu1 %v9924_v42  ;;  %v9900_v20 = vcombine.low %v5540_v23, %v5544_v21  ;;  %v9893_v57 = vcombine.high %v5532_v9, %v5536_v1  ;;  %v5524_v8 = vld [vmem:[#allocation17 + $0x48] sm:$0xff]  ;;  %v5515_v38 = vld [vmem:[#allocation17] sm:$0xff] }
 0xe2a   : > { %6522 = vmatprep.subr.bf16.mxu1 %v9917_v13  ;;  %v5528_v11 = vld [vmem:[#allocation17 + $0x68] sm:$0xff]  ;;  %v9892_v42 = vcombine.low %v5532_v9, %v5536_v1  ;;  %v5519_v16 = vld [vmem:[#allocation17 + $0x20] sm:$0xff] }
 0xe2b   : > { %5059 = vadd.xlane.f32.xlu1 %v5058_v14  ;;  %6408 = vmatpush1.bf16.msra.mxu0 %v9922_v28  ;;  %v5543_v14 = vld [vmem:[#allocation17 + $0xe0] sm:$0xff]  ;;  %v9890_v28 = vcombine.low %v5531_v6, %v5535_v24  ;;  %v9885_v13 = vcombine.high %v5524_v8, %v5528_v11  ;;  %v5516_v62 = vld [vmem:[#allocation17 + $0x8] sm:$0xff] }
 0xe2c   : > { %6409 = vmatprep.subr.bf16.mxu0 %v9915_v25  ;;  %v9899_v12 = vcombine.high %v5539_v7, %v5543_v14  ;;  %v9898_v51 = vcombine.low %v5539_v7, %v5543_v14  ;;  %v9883_v25 = vcombine.high %v5523_v43, %v5527_v35  ;;  %v5520_v22 = vld [vmem:[#allocation17 + $0x28] sm:$0xff]  ;;  %v5635_v7 = vld [vmem:[#allocation17 + $0x3c0] sm:$0xff] }
 0xe2d   : > { %6523 = vmatpush1.bf16.msra.mxu1 %v9916_v18  ;;  %v9884_v18 = vcombine.low %v5524_v8, %v5528_v11  ;;  %v5639_v14 = vld [vmem:[#allocation17 + $0x3e0] sm:$0xff]  ;;  %v5636_v23 = vld [vmem:[#allocation17 + $0x3c8] sm:$0xff] }
 0xe2e   : > { %6524 = vmatprep.subr.bf16.mxu1 %v9909_v45  ;;  %v9877_v45 = vcombine.high %v5516_v62, %v5520_v22  ;;  %v5640_v21 = vld [vmem:[#allocation17 + $0x3e8] sm:$0xff]  ;;  %v9995_v6 = vcombine.high %v5635_v7, %v5639_v14 }
 0xe2f   : > { %6410 = vmatpush1.bf16.msra.mxu0 %v9914_v30  ;;  %v9882_v30 = vcombine.low %v5523_v43, %v5527_v35  ;;  %v9997_v24 = vcombine.high %v5636_v23, %v5640_v21  ;;  %v9996_v35 = vcombine.low %v5636_v23, %v5640_v21 }
 0xe30   : > { %6411 = vmatprep.subr.bf16.mxu0 %v9907_v58  ;;  %v9875_v58 = vcombine.high %v5515_v38, %v5519_v16 }
 0xe31   : > { %6525 = vmatpush1.bf16.msra.mxu1 %v9908_v46  ;;  %v9874_v46 = vcombine.low %v5515_v38, %v5519_v16 }
 0xe32   : > { %6526 = vmatprep.subr.bf16.mxu1 %v9901_v27  ;;  %v9876_v27 = vcombine.low %v5516_v62, %v5520_v22 }
 0xe33   : > { %6412 = vmatpush1.bf16.msra.mxu0 %v9906_v3 }
 0xe34   : > { %6413 = vmatprep.subr.bf16.mxu0 %v9899_v12 }
 0xe35   : > { %6527 = vmatpush1.bf16.msra.mxu1 %v9900_v20  ;;  %v9994_v20 = vcombine.low %v5635_v7, %v5639_v14 }
 0xe36   : > { %6528 = vmatprep.subr.bf16.mxu1 %v9893_v57 }
 0xe37   : > { %6414 = vmatpush1.bf16.msra.mxu0 %v9898_v51 }
 0xe38   : > { %6415 = vmatprep.subr.bf16.mxu0 %v9891_v32 }
 0xe39   : > { %6529 = vmatpush1.bf16.msra.mxu1 %v9892_v42 }
 0xe3a   : > { %6530 = vmatprep.subr.bf16.mxu1 %v9885_v13 }
 0xe3b   : > { %6416 = vmatpush1.bf16.msra.mxu0 %v9890_v28 }
 0xe3c   : > { %6417 = vmatprep.subr.bf16.mxu0 %v9883_v25 }
 0xe3d   : > { %6531 = vmatpush1.bf16.msra.mxu1 %v9884_v18 }
 0xe3e   : > { %6532 = vmatprep.subr.bf16.mxu1 %v9877_v45 }
 0xe3f   : > { %6418 = vmatpush1.bf16.msra.mxu0 %v9882_v30 }
 0xe40   : > { %6419 = vmatprep.subr.bf16.mxu0 %v9875_v58 }
 0xe41   : > { %6533 = vmatpush1.bf16.msra.mxu1 %v9876_v27 }
 0xe42   : > { %6534 = vmatprep.subr.bf16.mxu1 %v9997_v24 }
 0xe43   : > { %6420 = vmatpush1.bf16.msra.mxu0 %v9874_v46 }
 0xe44   : > { %6421 = vmatprep.subr.bf16.mxu0 %v9995_v6 }
 0xe45   : > { %6535 = vmatpush2.bf16.msra.mxu1 %v9996_v35 }
 0xe47   : > { %6422 = vmatpush2.bf16.msra.mxu0 %v9994_v20 }
 0xe59   : > { %v5015_v3 = vpop.xlane.xlu0 %5014 }
 0xe5a   : > { %v5061_v12 = vmul.f32 0.00390625, %v5015_v3 }
 0xe5c   : > { %v14771_v9 = vsub.f32 %v14615_v40, %v5061_v12  ;;  %v14774_v1 = vsub.f32 %v14618_v33, %v5061_v12 }
 0xe5d   : > { %v5018_v51 = vpop.xlane.xlu1 %5017 }
 0xe5e   : > { %v5109_v32 = vmul.f32 %v14771_v9, %v14771_v9  ;;  %v5110_v57 = vmul.f32 %v14774_v1, %v14774_v1  ;;  %v5062_v43 = vmul.f32 0.00390625, %v5018_v51 }
 0xe60   : > { %v14781_v8 = vsub.f32 %v14626_v52, %v5062_v43  ;;  %v14784_v11 = vsub.f32 %v14628_v48, %v5062_v43  ;;  %v5141_v28 = vadd.f32 %v5110_v57, %v5109_v32 }
 0xe61   : > { %v5021_v42 = vpop.xlane.xlu0 %5020 }
 0xe62   : > { %v5111_v25 = vmul.f32 %v14781_v8, %v14781_v8  ;;  %v5112_v13 = vmul.f32 %v14784_v11, %v14784_v11  ;;  %v5063_v38 = vmul.f32 0.00390625, %v5021_v42  ;;  %5142 = vadd.xlane.f32.xlu0 %v5141_v28 }
 0xe64   : > { %v14791_v16 = vsub.f32 %v14635_v50, %v5063_v38  ;;  %v14794_v62 = vsub.f32 %v14638_v63, %v5063_v38  ;;  %v5144_v22 = vadd.f32 %v5112_v13, %v5111_v25  ;;  %v5627_v25 = vld [vmem:[#allocation17 + $0x380] sm:$0xff]  ;;  %v5628_v38 = vld [vmem:[#allocation17 + $0x388] sm:$0xff] }
 0xe65   : > { %v5024_v30 = vpop.xlane.xlu1 %5023  ;;  %v5631_v13 = vld [vmem:[#allocation17 + $0x3a0] sm:$0xff] }
 0xe66   : > { %v5113_v18 = vmul.f32 %v14791_v16, %v14791_v16  ;;  %v5114_v58 = vmul.f32 %v14794_v62, %v14794_v62  ;;  %v5064_v45 = vmul.f32 0.00390625, %v5024_v30  ;;  %5145 = vadd.xlane.f32.xlu1 %v5144_v22 }
 0xe68   : > { %v14801_v7 = vsub.f32 %v14646_v0, %v5064_v45  ;;  %v14804_v14 = vsub.f32 %v14648_v26, %v5064_v45  ;;  %v5147_v23 = vadd.f32 %v5114_v58, %v5113_v18  ;;  %v9987_v58 = vcombine.high %v5627_v25, %v5631_v13  ;;  %v5632_v45 = vld [vmem:[#allocation17 + $0x3a8] sm:$0xff] }
 0xe69   : > { %v5027_v21 = vpop.xlane.xlu0 %5026 }
 0xe6a   : > { %v5115_v3 = vmul.f32 %v14801_v7, %v14801_v7  ;;  %v5116_v46 = vmul.f32 %v14804_v14, %v14804_v14  ;;  %v5065_v12 = vmul.f32 0.00390625, %v5027_v21  ;;  %5148 = vadd.xlane.f32.xlu0 %v5147_v23  ;;  %v9986_v23 = vcombine.low %v5627_v25, %v5631_v13  ;;  %6423 = vmatprep.subr.bf16.mxu0 %v9987_v58 }
 0xe6b   : > { %v9988_v21 = vcombine.low %v5628_v38, %v5632_v45 }
 0xe6c   : > { %v14811_v27 = vsub.f32 %v14655_v4, %v5065_v12  ;;  %v14814_v6 = vsub.f32 %v14658_v19, %v5065_v12  ;;  %v5150_v24 = vadd.f32 %v5116_v46, %v5115_v3  ;;  %v9989_v3 = vcombine.high %v5628_v38, %v5632_v45  ;;  %6424 = vmatpush2.bf16.msra.mxu0 %v9986_v23  ;;  %v5624_v38 = vld [vmem:[#allocation17 + $0x368] sm:$0xff]  ;;  %v5565_v4 = vld [vmem:[#allocation17 + $0x190] sm:$0xff] }
 0xe6d   : > { %v5030_v51 = vpop.xlane.xlu1 %5029 }
 0xe6e   : > { %v5117_v20 = vmul.f32 %v14811_v27, %v14811_v27  ;;  %v5118_v32 = vmul.f32 %v14814_v6, %v14814_v6  ;;  %v5066_v57 = vmul.f32 0.00390625, %v5030_v51  ;;  %5151 = vadd.xlane.f32.xlu1 %v5150_v24  ;;  %6536 = vmatprep.subr.bf16.mxu1 %v9989_v3  ;;  %v5611_v3 = vld [vmem:[#allocation17 + $0x300] sm:$0xff] }
 0xe6f   : > { %6537 = vmatpush2.bf16.msra.mxu1 %v9988_v21 }
 0xe70   : > { %v14821_v43 = vsub.f32 %v14666_v61, %v5066_v57  ;;  %v14824_v35 = vsub.f32 %v14668_v15, %v5066_v57  ;;  %v5153_v28 = vadd.f32 %v5118_v32, %v5117_v20  ;;  %v5619_v20 = vld [vmem:[#allocation17 + $0x340] sm:$0xff]  ;;  %v5620_v57 = vld [vmem:[#allocation17 + $0x348] sm:$0xff] }
 0xe71   : > { %v5033_v42 = vpop.xlane.xlu0 %5032  ;;  %v5623_v32 = vld [vmem:[#allocation17 + $0x360] sm:$0xff] }
 0xe72   : > { %v5119_v22 = vmul.f32 %v14821_v43, %v14821_v43  ;;  %v5120_v30 = vmul.f32 %v14824_v35, %v14824_v35  ;;  %v5067_v18 = vmul.f32 0.00390625, %v5033_v42  ;;  %5154 = vadd.xlane.f32.xlu0 %v5153_v28  ;;  %v9979_v13 = vcombine.high %v5619_v20, %v5623_v32 }
 0xe74   : > { %v14831_v46 = vsub.f32 %v14675_v34, %v5067_v18  ;;  %v14834_v12 = vsub.f32 %v14678_v39, %v5067_v18  ;;  %v5156_v24 = vadd.f32 %v5120_v30, %v5119_v22  ;;  %v9978_v18 = vcombine.low %v5619_v20, %v5623_v32  ;;  %6425 = vmatprep.subr.bf16.mxu0 %v9979_v13  ;;  %v5615_v39 = vld [vmem:[#allocation17 + $0x320] sm:$0xff]  ;;  %v5616_v32 = vld [vmem:[#allocation17 + $0x328] sm:$0xff] }
 0xe75   : > { %v5036_v51 = vpop.xlane.xlu1 %5035  ;;  %v9980_v22 = vcombine.low %v5620_v57, %v5624_v38  ;;  %v9981_v30 = vcombine.high %v5620_v57, %v5624_v38  ;;  %v9971_v20 = vcombine.high %v5611_v3, %v5615_v39  ;;  %v9970_v57 = vcombine.low %v5611_v3, %v5615_v39  ;;  %v5607_v13 = vld [vmem:[#allocation17 + $0x2e0] sm:$0xff]  ;;  %v5596_v3 = vld [vmem:[#allocation17 + $0x288] sm:$0xff] }
 0xe76   : > { %v5121_v28 = vmul.f32 %v14831_v46, %v14831_v46  ;;  %v5122_v42 = vmul.f32 %v14834_v12, %v14834_v12  ;;  %v5068_v25 = vmul.f32 0.00390625, %v5036_v51  ;;  %5157 = vadd.xlane.f32.xlu1 %v5156_v24  ;;  %6426 = vmatpush2.bf16.msra.mxu0 %v9978_v18  ;;  %v5612_v51 = vld [vmem:[#allocation17 + $0x308] sm:$0xff]  ;;  %v5595_v39 = vld [vmem:[#allocation17 + $0x280] sm:$0xff] }
 0xe77   : > { %6538 = vmatprep.subr.bf16.mxu1 %v9981_v30  ;;  %v9973_v38 = vcombine.high %v5612_v51, %v5616_v32  ;;  %6427 = vmatprep.subr.bf16.mxu0 %v9971_v20  ;;  %v5604_v18 = vld [vmem:[#allocation17 + $0x2c8] sm:$0xff] }
 0xe78   : > { %v14841_v58 = vsub.f32 %v14684_v31, %v5068_v25  ;;  %v14844_v45 = vsub.f32 %v14686_v49, %v5068_v25  ;;  %v5159_v23 = vadd.f32 %v5122_v42, %v5121_v28  ;;  %6539 = vmatpush2.bf16.msra.mxu1 %v9980_v22  ;;  %v9972_v25 = vcombine.low %v5612_v51, %v5616_v32  ;;  %v5603_v42 = vld [vmem:[#allocation17 + $0x2c0] sm:$0xff]  ;;  %v5608_v49 = vld [vmem:[#allocation17 + $0x2e8] sm:$0xff] }
 0xe79   : > { %6540 = vmatprep.subr.bf16.mxu1 %v9973_v38  ;;  %v9963_v30 = vcombine.high %v5603_v42, %v5607_v13  ;;  %v9962_v31 = vcombine.low %v5603_v42, %v5607_v13  ;;  %v9964_v34 = vcombine.low %v5604_v18, %v5608_v49  ;;  %v5599_v22 = vld [vmem:[#allocation17 + $0x2a0] sm:$0xff]  ;;  %v5588_v38 = vld [vmem:[#allocation17 + $0x248] sm:$0xff] }
 0xe7a   : > { %v5123_v21 = vmul.f32 %v14841_v58, %v14841_v58  ;;  %v5124_v24 = vmul.f32 %v14844_v45, %v14844_v45  ;;  %5160 = vadd.xlane.f32.xlu0 %v5159_v23  ;;  %6428 = vmatpush2.bf16.msra.mxu0 %v9970_v57  ;;  %v9965_v23 = vcombine.high %v5604_v18, %v5608_v49  ;;  %v5587_v57 = vld [vmem:[#allocation17 + $0x240] sm:$0xff]  ;;  %v5592_v42 = vld [vmem:[#allocation17 + $0x268] sm:$0xff] }
 0xe7b   : > { %6429 = vmatprep.subr.bf16.mxu0 %v9963_v30  ;;  %v9955_v51 = vcombine.high %v5595_v39, %v5599_v22  ;;  %v9949_v13 = vcombine.high %v5588_v38, %v5592_v42  ;;  %v5583_v18 = vld [vmem:[#allocation17 + $0x220] sm:$0xff]  ;;  %v5580_v30 = vld [vmem:[#allocation17 + $0x208] sm:$0xff] }
 0xe7c   : > { %v5162_v28 = vadd.f32 %v5124_v24, %v5123_v21  ;;  %6541 = vmatpush2.bf16.msra.mxu1 %v9972_v25  ;;  %v5600_v21 = vld [vmem:[#allocation17 + $0x2a8] sm:$0xff]  ;;  %v9954_v24 = vcombine.low %v5595_v39, %v5599_v22  ;;  %v5591_v25 = vld [vmem:[#allocation17 + $0x260] sm:$0xff] }
 0xe7d   : > { %6542 = vmatprep.subr.bf16.mxu1 %v9965_v23  ;;  %v9956_v20 = vcombine.low %v5596_v3, %v5600_v21  ;;  %v9957_v32 = vcombine.high %v5596_v3, %v5600_v21  ;;  %v9947_v49 = vcombine.high %v5587_v57, %v5591_v25  ;;  %v5584_v22 = vld [vmem:[#allocation17 + $0x228] sm:$0xff] }
 0xe7e   : > { %5163 = vadd.xlane.f32.xlu1 %v5162_v28  ;;  %6430 = vmatpush2.bf16.msra.mxu0 %v9962_v31  ;;  %v9946_v28 = vcombine.low %v5587_v57, %v5591_v25  ;;  %v9948_v31 = vcombine.low %v5588_v38, %v5592_v42  ;;  %v9940_v3 = vcombine.low %v5580_v30, %v5584_v22 }
 0xe7f   : > { %6431 = vmatprep.subr.bf16.mxu0 %v9955_v51  ;;  %v9941_v51 = vcombine.high %v5580_v30, %v5584_v22 }
 0xe80   : > { %6543 = vmatpush2.bf16.msra.mxu1 %v9964_v34  ;;  %v5579_v34 = vld [vmem:[#allocation17 + $0x200] sm:$0xff] }
 0xe81   : > { %6544 = vmatprep.subr.bf16.mxu1 %v9957_v32  ;;  %v9938_v23 = vcombine.low %v5579_v34, %v5583_v18  ;;  %v9939_v39 = vcombine.high %v5579_v34, %v5583_v18 }
 0xe82   : > { %6432 = vmatpush2.bf16.msra.mxu0 %v9954_v24 }
 0xe83   : > { %6433 = vmatprep.subr.bf16.mxu0 %v9947_v49 }
 0xe84   : > { %6545 = vmatpush2.bf16.msra.mxu1 %v9956_v20 }
 0xe85   : > { %6546 = vmatprep.subr.bf16.mxu1 %v9949_v13 }
 0xe86   : > { %6434 = vmatpush2.bf16.msra.mxu0 %v9946_v28 }
 0xe87   : > { %6435 = vmatprep.subr.bf16.mxu0 %v9939_v39 }
 0xe88   : > { %6547 = vmatpush2.bf16.msra.mxu1 %v9948_v31 }
 0xe89   : > { %6548 = vmatprep.subr.bf16.mxu1 %v9941_v51  ;;  %v14878_v51 = vld [vmem:[#allocation17 + $0x1f0] sm:$0xff] }
 0xe8a   : > { %6436 = vmatpush2.bf16.msra.mxu0 %v9938_v23 }
 0xe8c   : > { %6549 = vmatpush2.bf16.msra.mxu1 %v9940_v3  ;;  %v14876_v3 = vld [vmem:[#allocation17 + $0x1d0] sm:$0xff] }
 0xe98   : > { %v5039_v21 = vpop.xlane.xlu0 %5038 }
 0xe99   : > { %v5069_v24 = vmul.f32 0.00390625, %v5039_v21  ;;  %v14880_v21 = vld [vmem:[#allocation17 + $0x1d8] sm:$0xff] }
 0xe9b   : > { %v14851_v20 = vsub.f32 %v14695_v54, %v5069_v24  ;;  %v14854_v32 = vsub.f32 %v14698_v60, %v5069_v24  ;;  %v5011_v54 = vld [vmem:[#allocation14] sm:$0x3] }
 0xe9c   : > { %v5042_v57 = vpop.xlane.xlu1 %5041 }
 0xe9d   : > { %v5125_v25 = vmul.f32 %v14851_v20, %v14851_v20  ;;  %v5126_v38 = vmul.f32 %v14854_v32, %v14854_v32  ;;  %v5070_v28 = vmul.f32 0.00390625, %v5042_v57 }
 0xe9f   : > { %v14861_v49 = vsub.f32 %v14706_v17, %v5070_v28  ;;  %v14864_v42 = vsub.f32 %v14708_v41, %v5070_v28  ;;  %v5165_v31 = vadd.f32 %v5126_v38, %v5125_v25  ;;  %v9935_v25 = vcombine.high %v14876_v3, %v14878_v51  ;;  %v14886_v38 = vld [vmem:[#allocation17 + $0x1f8] sm:$0xff] }
 0xea0   : > { %v5045_v13 = vpop.xlane.xlu0 %5044 }
 0xea1   : > { %v5127_v34 = vmul.f32 %v14861_v49, %v14861_v49  ;;  %v5128_v18 = vmul.f32 %v14864_v42, %v14864_v42  ;;  %v5071_v30 = vmul.f32 0.00390625, %v5045_v13  ;;  %5166 = vadd.xlane.f32.xlu0 %v5165_v31  ;;  %6631 = vmatprep.subr.bf16.mxu0 %v9935_v25 }
 0xea3   : > { %v14871_v23 = vsub.f32 %v14715_v55, %v5071_v30  ;;  %v14874_v39 = vsub.f32 %v14718_v10, %v5071_v30  ;;  %v5168_v22 = vadd.f32 %v5128_v18, %v5127_v34  ;;  %v9937_v18 = vcombine.high %v14880_v21, %v14886_v38 }
 0xea4   : > { %v5048_v24 = vpop.xlane.xlu1 %5047 }
 0xea5   : > { %v5129_v28 = vmul.f32 %v14871_v23, %v14871_v23  ;;  %v5130_v31 = vmul.f32 %v14874_v39, %v14874_v39  ;;  %v5072_v13 = vmul.f32 0.00390625, %v5048_v24  ;;  %5169 = vadd.xlane.f32.xlu1 %v5168_v22  ;;  %6744 = vmatprep.subr.bf16.mxu1 %v9937_v18 }
 0xea7   : > { %v14897_v30 = vsub.f32 %v14726_v29, %v5072_v13  ;;  %v14900_v57 = vsub.f32 %v14728_v53, %v5072_v13  ;;  %v5171_v10 = vadd.f32 %v5130_v31, %v5129_v28 }
 0xea8   : > { %v5051_v55 = vpop.xlane.xlu0 %5050 }
 0xea9   : > { %v5131_v24 = vmul.f32 %v14897_v30, %v14897_v30  ;;  %v5132_v22 = vmul.f32 %v14900_v57, %v14900_v57  ;;  %v5073_v34 = vmul.f32 0.00390625, %v5051_v55  ;;  %5172 = vadd.xlane.f32.xlu0 %v5171_v10 }
 0xeab   : > { %v14907_v25 = vsub.f32 %v14735_v2, %v5073_v34  ;;  %v14910_v29 = vsub.f32 %v14738_v36, %v5073_v34  ;;  %v5174_v41 = vadd.f32 %v5132_v22, %v5131_v24 }
 0xeac   : > { %v5054_v13 = vpop.xlane.xlu1 %5053 }
 0xead   : > { %v5133_v28 = vmul.f32 %v14907_v25, %v14907_v25  ;;  %v5134_v31 = vmul.f32 %v14910_v29, %v14910_v29  ;;  %v5074_v18 = vmul.f32 0.00390625, %v5054_v13  ;;  %5175 = vadd.xlane.f32.xlu1 %v5174_v41 }
 0xeaf   : > { %v14917_v53 = vsub.f32 %v14746_v5, %v5074_v18  ;;  %v14920_v55 = vsub.f32 %v14748_v37, %v5074_v18  ;;  %v5177_v10 = vadd.f32 %v5134_v31, %v5133_v28 }
 0xeb0   : > { %v5057_v2 = vpop.xlane.xlu0 %5056 }
 0xeb1   : > { %v5135_v34 = vmul.f32 %v14917_v53, %v14917_v53  ;;  %v5136_v24 = vmul.f32 %v14920_v55, %v14920_v55  ;;  %v5075_v22 = vmul.f32 0.00390625, %v5057_v2  ;;  %5178 = vadd.xlane.f32.xlu0 %v5177_v10 }
 0xeb3   : > { %v14927_v36 = vsub.f32 %v14755_v59, %v5075_v22  ;;  %v14930_v41 = vsub.f32 %v14758_v47, %v5075_v22  ;;  %v5180_v13 = vadd.f32 %v5136_v24, %v5135_v34 }
 0xeb4   : > { %v5060_v5 = vpop.xlane.xlu1 %5059 }
 0xeb5   : > { %v5137_v28 = vmul.f32 %v14927_v36, %v14927_v36  ;;  %v5138_v31 = vmul.f32 %v14930_v41, %v14930_v41  ;;  %v5076_v18 = vmul.f32 0.00390625, %v5060_v5  ;;  %5181 = vadd.xlane.f32.xlu1 %v5180_v13 }
 0xeb7   : > { %v14937_v37 = vsub.f32 %v14764_v44, %v5076_v18  ;;  %v14940_v2 = vsub.f32 %v14766_v56, %v5076_v18  ;;  %v5183_v10 = vadd.f32 %v5138_v31, %v5137_v28 }
 0xeb9   : > { %v5139_v22 = vmul.f32 %v14937_v37, %v14937_v37  ;;  %v5140_v34 = vmul.f32 %v14940_v2, %v14940_v2  ;;  %5184 = vadd.xlane.f32.xlu0 %v5183_v10 }
 0xebb   : > { %v5186_v24 = vadd.f32 %v5140_v34, %v5139_v22  ;;  %v16766_v34 = vld [vmem:[#allocation30_spill] sm:$0xff] }
 0xebd   : > { %5187 = vadd.xlane.f32.xlu1 %v5186_v24 }
 0xeeb   : > { %v5143_v47 = vpop.xlane.xlu0 %5142 }
 0xeec   : > { %v5189_v59 = vmul.f32 0.00390625, %v5143_v47  ;;  %v14947_v47 = vrot.slane %v5011_v54, %v16766_v34 }
 0xeee   : > { %v5205_v5 = vadd.f32 1e-05, %v5189_v59  ;;  %v16767_v59 = vld [vmem:[#allocation29_spill] sm:$0xff] }
 0xeef   : > { %v5146_v13 = vpop.xlane.xlu1 %5145  ;;  %v14950_v24 = vrot.slane %v5011_v54, %v16767_v59 }
 0xef0   : > { %11540 = vrsqrt.f32 %v5205_v5  ;;  %v5190_v44 = vmul.f32 0.00390625, %v5146_v13 }
 0xef2   : > { %v5206_v17 = vadd.f32 1e-05, %v5190_v44 }
 0xef3   : > { %v5149_v60 = vpop.xlane.xlu0 %5148 }
 0xef4   : > { %11542 = vrsqrt.f32 %v5206_v17  ;;  %v5191_v18 = vmul.f32 0.00390625, %v5149_v60  ;;  %v5012_v60 = vld [vmem:[#allocation16] sm:$0x3] }
 0xef5   : > { %v14960_v54 = vrot.slane %v5012_v60, %v16767_v59 }
 0xef6   : > { %v5207_v28 = vadd.f32 1e-05, %v5191_v18 }
 0xef7   : > { %v5152_v31 = vpop.xlane.xlu1 %5151 }
 0xef8   : > { %11544 = vrsqrt.f32 %v5207_v28  ;;  %v5192_v56 = vmul.f32 0.00390625, %v5152_v31  ;;  %v14957_v28 = vrot.slane %v5012_v60, %v16766_v34 }
 0xefa   : > { %v5208_v15 = vadd.f32 1e-05, %v5192_v56 }
 0xefb   : > { %v5155_v61 = vpop.xlane.xlu0 %5154 }
 0xefc   : > { %11546 = vrsqrt.f32 %v5208_v15  ;;  %v5193_v10 = vmul.f32 0.00390625, %v5155_v61 }
 0xefd   : > { %v11541_v22 = vpop.eup %11540 }
 0xefe   : > { %v5237_v44 = vmul.f32 %v11541_v22, %v14771_v9  ;;  %v5209_v17 = vadd.f32 1e-05, %v5193_v10  ;;  %v5238_v5 = vmul.f32 %v11541_v22, %v14774_v1 }
 0xeff   : > { %v5158_v13 = vpop.xlane.xlu1 %5157 }
 0xf00   : > { %11548 = vrsqrt.f32 %v5209_v17  ;;  %v5194_v18 = vmul.f32 0.00390625, %v5158_v13  ;;  %v5280_v15 = vmul.f32 %v14947_v47, %v5237_v44  ;;  %v5281_v61 = vmul.f32 %v14950_v24, %v5238_v5 }
 0xf01   : > { %v11543_v56 = vpop.eup %11542 }
 0xf02   : > { %v5239_v9 = vmul.f32 %v11543_v56, %v14781_v8  ;;  %v5210_v31 = vadd.f32 1e-05, %v5194_v18  ;;  %v5240_v10 = vmul.f32 %v11543_v56, %v14784_v11  ;;  %v5324_v5 = vadd.f32 %v14960_v54, %v5281_v61  ;;  %v5569_v18 = vld [vmem:[#allocation17 + $0x1b0] sm:$0xff]  ;;  %v5566_v56 = vld [vmem:[#allocation17 + $0x198] sm:$0xff] }
 0xf03   : > { %v5161_v1 = vpop.xlane.xlu0 %5160  ;;  %v5323_v19 = vadd.f32 %v14957_v28, %v5280_v15 }
 0xf04   : > { %v5282_v22 = vmul.f32 %v14947_v47, %v5239_v9  ;;  %11550 = vrsqrt.f32 %v5210_v31  ;;  %v5195_v17 = vmul.f32 0.00390625, %v5161_v1  ;;  %v5283_v44 = vmul.f32 %v14950_v24, %v5240_v10  ;;  %v5570_v9 = vld [vmem:[#allocation17 + $0x1b8] sm:$0xff] }
 0xf05   : > { %v11545_v13 = vpop.eup %11544  ;;  %v9929_v63 = vcombine.high %v5566_v56, %v5570_v9 }
 0xf06   : > { %v5211_v60 = vadd.f32 1e-05, %v5195_v17  ;;  %v5326_v26 = vadd.f32 %v14960_v54, %v5283_v44  ;;  %v5325_v8 = vadd.f32 %v14957_v28, %v5282_v22  ;;  %v5242_v11 = vmul.f32 %v11545_v13, %v14794_v62 }
 0xf07   : > { %v5164_v31 = vpop.xlane.xlu1 %5163  ;;  %v5241_v1 = vmul.f32 %v11545_v13, %v14791_v16  ;;  %v9927_v22 = vcombine.high %v5565_v4, %v5569_v18 }
 0xf08   : > { %11552 = vrsqrt.f32 %v5211_v60  ;;  %v5196_v10 = vmul.f32 0.00390625, %v5164_v31  ;;  %v14972_v0 = vpack.c.bf16 %v5326_v26, %v5324_v5  ;;  %v14974_v61 = vpack.c.bf16 %v5325_v8, %v5323_v19  ;;  %v5557_v26 = vld [vmem:[#allocation17 + $0x150] sm:$0xff] }
 0xf09   : > { %v11547_v15 = vpop.eup %11546  ;;  %v5285_v17 = vmul.f32 %v14950_v24, %v5242_v11  ;;  %v5284_v44 = vmul.f32 %v14947_v47, %v5241_v1  ;;  %v5561_v5 = vld [vmem:[#allocation17 + $0x170] sm:$0xff]  ;;  %v9926_v19 = vcombine.low %v5565_v4, %v5569_v18  ;;  %v16768_v11 = vcombine.low %v14876_v3, %v14878_v51  ;;  %v5558_v18 = vld [vmem:[#allocation17 + $0x158] sm:$0xff] }
 0xf0a   : > { %v5212_v62 = vadd.f32 1e-05, %v5196_v10  ;;  %6437 = vmatprep.mubr.bf16.mxu0 %v14972_v0  ;;  %6550 = vmatprep.mubr.bf16.mxu1 %v14972_v0  ;;  %v5244_v16 = vmul.f32 %v11547_v15, %v14804_v14  ;;  %v5243_v13 = vmul.f32 %v11547_v15, %v14801_v7  ;;  %v16769_v14 = vcombine.low %v14880_v21, %v14886_v38  ;;  %v5562_v15 = vld [vmem:[#allocation17 + $0x178] sm:$0xff]  ;;  %v5549_v38 = vld [vmem:[#allocation17 + $0x110] sm:$0xff] }
 0xf0b   : > { %6438 = vmatmul.mubr.bf16.vlgmr.msra.gmra.mxu0 %v14974_v61  ;;  %6551 = vmatmul.mubr.bf16.vlgmr.msra.gmra.mxu1 %v14974_v61  ;;  %v9928_v7 = vcombine.low %v5566_v56, %v5570_v9  ;;  %v5328_v1 = vadd.f32 %v14960_v54, %v5285_v17  ;;  %v5327_v10 = vadd.f32 %v14957_v28, %v5284_v44  ;;  %v5553_v56 = vld [vmem:[#allocation17 + $0x130] sm:$0xff]  ;;  %v5554_v17 = vld [vmem:[#allocation17 + $0x138] sm:$0xff] }
 0xf0c   : > { %11554 = vrsqrt.f32 %v5212_v62  ;;  %v5287_v60 = vmul.f32 %v14950_v24, %v5244_v16  ;;  %v5286_v8 = vmul.f32 %v14947_v47, %v5243_v13  ;;  %6632 = vmatpush1.bf16.msra.mxu0 %v16768_v11  ;;  %6745 = vmatpush1.bf16.msra.mxu1 %v16769_v14  ;;  %v9919_v4 = vcombine.high %v5557_v26, %v5561_v5  ;;  %v5550_v16 = vld [vmem:[#allocation17 + $0x118] sm:$0xff]  ;;  %v5545_v14 = vld [vmem:[#allocation17 + $0xf0] sm:$0xff] }
 0xf0d   : > { %v11549_v31 = vpop.eup %11548  ;;  %6633 = vmatprep.subr.bf16.mxu0 %v9927_v22  ;;  %6746 = vmatprep.subr.bf16.mxu1 %v9929_v63  ;;  %v9918_v9 = vcombine.low %v5557_v26, %v5561_v5  ;;  %v9920_v63 = vcombine.low %v5558_v18, %v5562_v15  ;;  %v9921_v22 = vcombine.high %v5558_v18, %v5562_v15  ;;  %v5542_v15 = vld [vmem:[#allocation17 + $0xd8] sm:$0xff] }
 0xf0e   : > { %v5330_v62 = vadd.f32 %v14960_v54, %v5287_v60  ;;  %v5329_v3 = vadd.f32 %v14957_v28, %v5286_v8  ;;  %v5246_v51 = vmul.f32 %v11549_v31, %v14814_v6  ;;  %v5245_v21 = vmul.f32 %v11549_v31, %v14811_v27 }
 0xf0f   : > { %v9911_v27 = vcombine.high %v5549_v38, %v5553_v56  ;;  %v9913_v5 = vcombine.high %v5550_v16, %v5554_v17  ;;  %v9910_v31 = vcombine.low %v5549_v38, %v5553_v56 }
 0xf10   : > { %v14998_v13 = vpack.c.bf16 %v5330_v62, %v5328_v1  ;;  %v15000_v44 = vpack.c.bf16 %v5329_v3, %v5327_v10  ;;  %6634 = vmatpush1.bf16.msra.mxu0 %v9926_v19  ;;  %v5289_v60 = vmul.f32 %v14950_v24, %v5246_v51  ;;  %v5288_v8 = vmul.f32 %v14947_v47, %v5245_v21  ;;  %v5541_v19 = vld [vmem:[#allocation17 + $0xd0] sm:$0xff]  ;;  %v5546_v62 = vld [vmem:[#allocation17 + $0xf8] sm:$0xff] }
 0xf11   : > { %v11551_v11 = vpop.eup %11550  ;;  %6747 = vmatpush1.bf16.msra.mxu1 %v9928_v7  ;;  %6635 = vmatprep.subr.bf16.mxu0 %v9919_v4  ;;  %v9912_v10 = vcombine.low %v5550_v16, %v5554_v17  ;;  %v9903_v18 = vcombine.high %v5541_v19, %v5545_v14  ;;  %v5533_v3 = vld [vmem:[#allocation17 + $0x90] sm:$0xff]  ;;  %v5534_v16 = vld [vmem:[#allocation17 + $0x98] sm:$0xff] }
 0xf12   : > { %6447 = vmatprep.mubr.bf16.mxu0 %v14998_v13  ;;  %6560 = vmatprep.mubr.bf16.mxu1 %v14998_v13  ;;  %v5248_v6 = vmul.f32 %v11551_v11, %v14824_v35  ;;  %v5247_v26 = vmul.f32 %v11551_v11, %v14821_v43  ;;  %v5332_v35 = vadd.f32 %v14960_v54, %v5289_v60  ;;  %v5538_v17 = vld [vmem:[#allocation17 + $0xb8] sm:$0xff] }
 0xf13   : > { %6448 = vmatmul.mubr.bf16.gmra.mxu0 %v15000_v44  ;;  %6561 = vmatmul.mubr.bf16.gmra.mxu1 %v15000_v44  ;;  %v5331_v43 = vadd.f32 %v14957_v28, %v5288_v8  ;;  %v9904_v60 = vcombine.low %v5542_v15, %v5546_v62  ;;  %v9905_v8 = vcombine.high %v5542_v15, %v5546_v62 }
 0xf14   : > { %v5291_v7 = vmul.f32 %v14950_v24, %v5248_v6  ;;  %v5290_v1 = vmul.f32 %v14947_v47, %v5247_v26  ;;  %6748 = vmatprep.subr.bf16.mxu1 %v9921_v22  ;;  %6636 = vmatpush1.bf16.msra.mxu0 %v9918_v9  ;;  %v5537_v9 = vld [vmem:[#allocation17 + $0xb0] sm:$0xff]  ;;  %v9902_v22 = vcombine.low %v5541_v19, %v5545_v14 }
 0xf15   : > { %v11553_v4 = vpop.eup %11552  ;;  %6749 = vmatpush1.bf16.msra.mxu1 %v9920_v63  ;;  %6637 = vmatprep.subr.bf16.mxu0 %v9911_v27  ;;  %v9897_v26 = vcombine.high %v5534_v16, %v5538_v17  ;;  %v5525_v14 = vld [vmem:[#allocation17 + $0x50] sm:$0xff] }
 0xf16   : > { %v5334_v51 = vadd.f32 %v14960_v54, %v5291_v7  ;;  %v5333_v21 = vadd.f32 %v14957_v28, %v5290_v1  ;;  %v5250_v38 = vmul.f32 %v11553_v4, %v14834_v12  ;;  %v5249_v56 = vmul.f32 %v11553_v4, %v14831_v46  ;;  %6750 = vmatprep.subr.bf16.mxu1 %v9913_v5 }
 0xf17   : > { %v9895_v12 = vcombine.high %v5533_v3, %v5537_v9 }
 0xf18   : > { %v15018_v11 = vpack.c.bf16 %v5334_v51, %v5332_v35  ;;  %v15020_v63 = vpack.c.bf16 %v5333_v21, %v5331_v43  ;;  %6638 = vmatpush1.bf16.msra.mxu0 %v9910_v31  ;;  %v5293_v6 = vmul.f32 %v14950_v24, %v5250_v38  ;;  %v5292_v19 = vmul.f32 %v14947_v47, %v5249_v56  ;;  %v5529_v31 = vld [vmem:[#allocation17 + $0x70] sm:$0xff]  ;;  %v5530_v35 = vld [vmem:[#allocation17 + $0x78] sm:$0xff] }
 0xf19   : > { %v11555_v27 = vpop.eup %11554  ;;  %6751 = vmatpush1.bf16.msra.mxu1 %v9912_v10  ;;  %6639 = vmatprep.subr.bf16.mxu0 %v9903_v18  ;;  %v9894_v10 = vcombine.low %v5533_v3, %v5537_v9  ;;  %v9887_v4 = vcombine.high %v5525_v14, %v5529_v31  ;;  %v5517_v51 = vld [vmem:[#allocation17 + $0x10] sm:$0xff]  ;;  %v5518_v38 = vld [vmem:[#allocation17 + $0x18] sm:$0xff] }
 0xf1a   : > { %6457 = vmatprep.mubr.bf16.mxu0 %v15018_v11  ;;  %6570 = vmatprep.mubr.bf16.mxu1 %v15018_v11  ;;  %v5252_v46 = vmul.f32 %v11555_v27, %v14844_v45  ;;  %v5251_v5 = vmul.f32 %v11555_v27, %v14841_v58  ;;  %v9896_v45 = vcombine.low %v5534_v16, %v5538_v17  ;;  %v5526_v58 = vld [vmem:[#allocation17 + $0x58] sm:$0xff]  ;;  %v5521_v21 = vld [vmem:[#allocation17 + $0x30] sm:$0xff] }
 0xf1b   : > { %6458 = vmatmul.mubr.bf16.gmra.mxu0 %v15020_v63  ;;  %6571 = vmatmul.mubr.bf16.gmra.mxu1 %v15020_v63  ;;  %v5336_v43 = vadd.f32 %v14960_v54, %v5293_v6  ;;  %v5335_v15 = vadd.f32 %v14957_v28, %v5292_v19  ;;  %v5522_v56 = vld [vmem:[#allocation17 + $0x38] sm:$0xff]  ;;  %v9886_v16 = vcombine.low %v5525_v14, %v5529_v31  ;;  %v5637_v27 = vld [vmem:[#allocation17 + $0x3d0] sm:$0xff] }
 0xf1c   : > { %v5295_v7 = vmul.f32 %v14950_v24, %v5252_v46  ;;  %v5294_v1 = vmul.f32 %v14947_v47, %v5251_v5  ;;  %6752 = vmatprep.subr.bf16.mxu1 %v9905_v8  ;;  %6640 = vmatpush1.bf16.msra.mxu0 %v9902_v22  ;;  %v9889_v17 = vcombine.high %v5526_v58, %v5530_v35  ;;  %v5641_v6 = vld [vmem:[#allocation17 + $0x3f0] sm:$0xff] }
 0xf1d   : > { %6753 = vmatpush1.bf16.msra.mxu1 %v9904_v60  ;;  %6641 = vmatprep.subr.bf16.mxu0 %v9895_v12  ;;  %v9888_v22 = vcombine.low %v5526_v58, %v5530_v35  ;;  %v9879_v60 = vcombine.high %v5517_v51, %v5521_v21  ;;  %v9881_v8 = vcombine.high %v5518_v38, %v5522_v56  ;;  %v5638_v12 = vld [vmem:[#allocation17 + $0x3d8] sm:$0xff]  ;;  %v5629_v31 = vld [vmem:[#allocation17 + $0x390] sm:$0xff] }
 0xf1e   : > { %v5338_v18 = vadd.f32 %v14960_v54, %v5295_v7  ;;  %v5337_v62 = vadd.f32 %v14957_v28, %v5294_v1  ;;  %6754 = vmatprep.subr.bf16.mxu1 %v9897_v26  ;;  %v5642_v26 = vld [vmem:[#allocation17 + $0x3f8] sm:$0xff]  ;;  %v9878_v46 = vcombine.low %v5517_v51, %v5521_v21  ;;  %v9880_v5 = vcombine.low %v5518_v38, %v5522_v56  ;;  %v5633_v7 = vld [vmem:[#allocation17 + $0x3b0] sm:$0xff] }
 0xf1f   : > { %v9999_v19 = vcombine.high %v5637_v27, %v5641_v6  ;;  %v10001_v14 = vcombine.high %v5638_v12, %v5642_v26  ;;  %v5630_v1 = vld [vmem:[#allocation17 + $0x398] sm:$0xff]  ;;  %v9991_v58 = vcombine.high %v5629_v31, %v5633_v7  ;;  %v9990_v38 = vcombine.low %v5629_v31, %v5633_v7 }
 0xf20   : > { %v15036_v3 = vpack.c.bf16 %v5338_v18, %v5336_v43  ;;  %v15038_v9 = vpack.c.bf16 %v5337_v62, %v5335_v15  ;;  %6642 = vmatpush1.bf16.msra.mxu0 %v9894_v10  ;;  %v5634_v10 = vld [vmem:[#allocation17 + $0x3b8] sm:$0xff]  ;;  %v5621_v18 = vld [vmem:[#allocation17 + $0x350] sm:$0xff] }
 0xf21   : > { %6755 = vmatpush1.bf16.msra.mxu1 %v9896_v45  ;;  %6643 = vmatprep.subr.bf16.mxu0 %v9887_v4  ;;  %v9998_v45 = vcombine.low %v5637_v27, %v5641_v6  ;;  %v10000_v4 = vcombine.low %v5638_v12, %v5642_v26  ;;  %v9993_v43 = vcombine.high %v5630_v1, %v5634_v10  ;;  %v5625_v15 = vld [vmem:[#allocation17 + $0x370] sm:$0xff]  ;;  %v5622_v51 = vld [vmem:[#allocation17 + $0x358] sm:$0xff] }
 0xf22   : > { %6467 = vmatprep.mubr.bf16.mxu0 %v15036_v3  ;;  %6580 = vmatprep.mubr.bf16.mxu1 %v15036_v3  ;;  %v5626_v21 = vld [vmem:[#allocation17 + $0x378] sm:$0xff]  ;;  %v5617_v27 = vld [vmem:[#allocation17 + $0x330] sm:$0xff] }
 0xf23   : > { %6468 = vmatmul.mubr.bf16.gmra.mxu0 %v15038_v9  ;;  %6581 = vmatmul.mubr.bf16.gmra.mxu1 %v15038_v9  ;;  %v5614_v12 = vld [vmem:[#allocation17 + $0x318] sm:$0xff] }
 0xf24   : > { %6756 = vmatprep.subr.bf16.mxu1 %v9889_v17  ;;  %6644 = vmatpush1.bf16.msra.mxu0 %v9886_v16  ;;  %v9992_v16 = vcombine.low %v5630_v1, %v5634_v10  ;;  %v9983_v17 = vcombine.high %v5621_v18, %v5625_v15  ;;  %v5618_v26 = vld [vmem:[#allocation17 + $0x338] sm:$0xff]  ;;  %v5605_v1 = vld [vmem:[#allocation17 + $0x2d0] sm:$0xff] }
 0xf25   : > { %6757 = vmatpush1.bf16.msra.mxu1 %v9888_v22  ;;  %6645 = vmatprep.subr.bf16.mxu0 %v9879_v60  ;;  %v9985_v60 = vcombine.high %v5622_v51, %v5626_v21  ;;  %v9977_v7 = vcombine.high %v5614_v12, %v5618_v26  ;;  %v5609_v10 = vld [vmem:[#allocation17 + $0x2f0] sm:$0xff] }
 0xf26   : > { %6758 = vmatprep.subr.bf16.mxu1 %v9881_v8  ;;  %v5613_v8 = vld [vmem:[#allocation17 + $0x310] sm:$0xff] }
 0xf28   : > { %6646 = vmatpush1.bf16.msra.mxu0 %v9878_v46  ;;  %v9982_v46 = vcombine.low %v5621_v18, %v5625_v15  ;;  %v9976_v18 = vcombine.low %v5614_v12, %v5618_v26  ;;  %v9967_v15 = vcombine.high %v5605_v1, %v5609_v10  ;;  %v5589_v26 = vld [vmem:[#allocation17 + $0x250] sm:$0xff] }
 0xf29   : > { %6759 = vmatpush1.bf16.msra.mxu1 %v9880_v5  ;;  %6647 = vmatprep.subr.bf16.mxu0 %v9999_v19  ;;  %v9984_v19 = vcombine.low %v5622_v51, %v5626_v21  ;;  %v5597_v21 = vld [vmem:[#allocation17 + $0x290] sm:$0xff] }
 0xf2a   : > { %v5167_v35 = vpop.xlane.xlu0 %5166  ;;  %6760 = vmatprep.subr.bf16.mxu1 %v10001_v14  ;;  %v9975_v14 = vcombine.high %v5613_v8, %v5617_v27 }
 0xf2b   : > { %v5197_v62 = vmul.f32 0.00390625, %v5167_v35  ;;  %v9974_v35 = vcombine.low %v5613_v8, %v5617_v27 }
 0xf2c   : > { %6648 = vmatpush2.bf16.msra.mxu0 %v9998_v45 }
 0xf2d   : > { %v5213_v56 = vadd.f32 1e-05, %v5197_v62  ;;  %6761 = vmatpush2.bf16.msra.mxu1 %v10000_v4  ;;  %6649 = vmatprep.subr.bf16.mxu0 %v9991_v58  ;;  %v5606_v4 = vld [vmem:[#allocation17 + $0x2d8] sm:$0xff] }
 0xf2e   : > { %v5170_v22 = vpop.xlane.xlu1 %5169  ;;  %6762 = vmatprep.subr.bf16.mxu1 %v9993_v43  ;;  %v5610_v58 = vld [vmem:[#allocation17 + $0x2f8] sm:$0xff] }
 0xf2f   : > { %11556 = vrsqrt.f32 %v5213_v56  ;;  %v5198_v6 = vmul.f32 0.00390625, %v5170_v22  ;;  %v9969_v51 = vcombine.high %v5606_v4, %v5610_v58  ;;  %v9966_v22 = vcombine.low %v5605_v1, %v5609_v10 }
 0xf30   : > { %6650 = vmatpush2.bf16.msra.mxu0 %v9990_v38  ;;  %v5601_v38 = vld [vmem:[#allocation17 + $0x2b0] sm:$0xff]  ;;  %v9968_v8 = vcombine.low %v5606_v4, %v5610_v58 }
 0xf31   : > { %v5214_v5 = vadd.f32 1e-05, %v5198_v6  ;;  %6763 = vmatpush2.bf16.msra.mxu1 %v9992_v16  ;;  %6651 = vmatprep.subr.bf16.mxu0 %v9983_v17  ;;  %v5598_v16 = vld [vmem:[#allocation17 + $0x298] sm:$0xff]  ;;  %v9959_v27 = vcombine.high %v5597_v21, %v5601_v38 }
 0xf32   : > { %v5173_v31 = vpop.xlane.xlu0 %5172  ;;  %6764 = vmatprep.subr.bf16.mxu1 %v9985_v60  ;;  %v5602_v17 = vld [vmem:[#allocation17 + $0x2b8] sm:$0xff] }
 0xf33   : > { %11558 = vrsqrt.f32 %v5214_v5  ;;  %v5199_v45 = vmul.f32 0.00390625, %v5173_v31  ;;  %v9961_v12 = vcombine.high %v5598_v16, %v5602_v17 }
 0xf34   : > { %6652 = vmatpush2.bf16.msra.mxu0 %v9982_v46  ;;  %v5593_v46 = vld [vmem:[#allocation17 + $0x270] sm:$0xff] }
 0xf35   : > { %v5215_v43 = vadd.f32 1e-05, %v5199_v45  ;;  %6765 = vmatpush2.bf16.msra.mxu1 %v9984_v19  ;;  %6653 = vmatprep.subr.bf16.mxu0 %v9975_v14  ;;  %v5590_v19 = vld [vmem:[#allocation17 + $0x258] sm:$0xff]  ;;  %v9960_v45 = vcombine.low %v5598_v16, %v5602_v17  ;;  %v9951_v4 = vcombine.high %v5589_v26, %v5593_v46 }
 0xf36   : > { %v5176_v62 = vpop.xlane.xlu1 %5175  ;;  %6766 = vmatprep.subr.bf16.mxu1 %v9977_v7  ;;  %v5594_v14 = vld [vmem:[#allocation17 + $0x278] sm:$0xff]  ;;  %v9958_v7 = vcombine.low %v5597_v21, %v5601_v38 }
 0xf37   : > { %11560 = vrsqrt.f32 %v5215_v43  ;;  %v5200_v56 = vmul.f32 0.00390625, %v5176_v62  ;;  %v9953_v43 = vcombine.high %v5590_v19, %v5594_v14 }
 0xf38   : > { %6654 = vmatpush2.bf16.msra.mxu0 %v9974_v35 }
 0xf39   : > { %v5216_v60 = vadd.f32 1e-05, %v5200_v56  ;;  %6767 = vmatpush2.bf16.msra.mxu1 %v9976_v18  ;;  %6655 = vmatprep.subr.bf16.mxu0 %v9967_v15  ;;  %v5581_v18 = vld [vmem:[#allocation17 + $0x210] sm:$0xff]  ;;  %v5586_v56 = vld [vmem:[#allocation17 + $0x238] sm:$0xff] }
 0xf3a   : > { %v5179_v6 = vpop.xlane.xlu0 %5178  ;;  %6768 = vmatprep.subr.bf16.mxu1 %v9969_v51  ;;  %v5585_v15 = vld [vmem:[#allocation17 + $0x230] sm:$0xff]  ;;  %v5582_v51 = vld [vmem:[#allocation17 + $0x218] sm:$0xff] }
 0xf3b   : > { %11562 = vrsqrt.f32 %v5216_v60  ;;  %v5201_v5 = vmul.f32 0.00390625, %v5179_v6  ;;  %v9945_v6 = vcombine.high %v5582_v51, %v5586_v56 }
 0xf3c   : > { %v11557_v31 = vpop.eup %11556  ;;  %6656 = vmatpush2.bf16.msra.mxu0 %v9966_v22 }
 0xf3d   : > { %v5217_v35 = vadd.f32 1e-05, %v5201_v5  ;;  %v5254_v1 = vmul.f32 %v11557_v31, %v14854_v32  ;;  %v5253_v10 = vmul.f32 %v11557_v31, %v14851_v20  ;;  %6769 = vmatpush2.bf16.msra.mxu1 %v9968_v8  ;;  %6657 = vmatprep.subr.bf16.mxu0 %v9959_v27  ;;  %v9950_v32 = vcombine.low %v5589_v26, %v5593_v46 }
 0xf3e   : > { %v5182_v58 = vpop.xlane.xlu1 %5181  ;;  %6770 = vmatprep.subr.bf16.mxu1 %v9961_v12  ;;  %v9952_v20 = vcombine.low %v5590_v19, %v5594_v14  ;;  %v9943_v8 = vcombine.high %v5581_v18, %v5585_v15 }
 0xf3f   : > { %11564 = vrsqrt.f32 %v5217_v35  ;;  %v5202_v62 = vmul.f32 0.00390625, %v5182_v58  ;;  %v5297_v21 = vmul.f32 %v14950_v24, %v5254_v1  ;;  %v5296_v38 = vmul.f32 %v14947_v47, %v5253_v10 }
 0xf40   : > { %v11559_v22 = vpop.eup %11558  ;;  %6658 = vmatpush2.bf16.msra.mxu0 %v9958_v7  ;;  %v9944_v10 = vcombine.low %v5582_v51, %v5586_v56 }
 0xf41   : > { %v5218_v16 = vadd.f32 1e-05, %v5202_v62  ;;  %v5256_v17 = vmul.f32 %v11559_v22, %v14864_v42  ;;  %v5255_v60 = vmul.f32 %v11559_v22, %v14861_v49  ;;  %6771 = vmatpush2.bf16.msra.mxu1 %v9960_v45  ;;  %6659 = vmatprep.subr.bf16.mxu0 %v9951_v4  ;;  %v5340_v26 = vadd.f32 %v14960_v54, %v5297_v21 }
 0xf42   : > { %v5185_v27 = vpop.xlane.xlu0 %5184  ;;  %6772 = vmatprep.subr.bf16.mxu1 %v9953_v43  ;;  %v5339_v46 = vadd.f32 %v14957_v28, %v5296_v38  ;;  %v9942_v42 = vcombine.low %v5581_v18, %v5585_v15  ;;  %v11062_v18 = vld [vmem:[#allocation19 + $0x74] ss:$8 sps:$4 sm:$0xff]  }
 0xf43   : > { %11566 = vrsqrt.f32 %v5218_v16  ;;  %v5203_v12 = vmul.f32 0.00390625, %v5185_v27  ;;  %v5299_v5 = vmul.f32 %v14950_v24, %v5256_v17  ;;  %v5298_v31 = vmul.f32 %v14947_v47, %v5255_v60 }
 0xf44   : > { %v11561_v7 = vpop.eup %11560  ;;  %6660 = vmatpush2.bf16.msra.mxu0 %v9950_v32 }
 0xf45   : > { %v5219_v49 = vadd.f32 1e-05, %v5203_v12  ;;  %v5342_v19 = vadd.f32 %v14960_v54, %v5299_v5  ;;  %v5341_v14 = vadd.f32 %v14957_v28, %v5298_v31  ;;  %v5258_v45 = vmul.f32 %v11561_v7, %v14874_v39  ;;  %6773 = vmatpush2.bf16.msra.mxu1 %v9952_v20  ;;  %6661 = vmatprep.subr.bf16.mxu0 %v9943_v8  ;;  %v11065_v39 = vld [vmem:[#allocation19 + $0x174] ss:$8 sps:$4 sm:$0xff]  }
 0xf46   : > { %v5188_v35 = vpop.xlane.xlu1 %5187  ;;  %v5257_v1 = vmul.f32 %v11561_v7, %v14871_v23  ;;  %6774 = vmatprep.subr.bf16.mxu1 %v9945_v6 }
 0xf47   : > { %11568 = vrsqrt.f32 %v5219_v49  ;;  %v5204_v4 = vmul.f32 0.00390625, %v5188_v35  ;;  %v15058_v58 = vpack.c.bf16 %v5342_v19, %v5340_v26  ;;  %v15060_v43 = vpack.c.bf16 %v5341_v14, %v5339_v46 }
 0xf48   : > { %v11563_v15 = vpop.eup %11562  ;;  %v5301_v62 = vmul.f32 %v14950_v24, %v5258_v45  ;;  %v5300_v22 = vmul.f32 %v14947_v47, %v5257_v1  ;;  %6662 = vmatpush2.bf16.msra.mxu0 %v9942_v42 }
 0xf49   : > { %v5220_v21 = vadd.f32 1e-05, %v5204_v4  ;;  %6477 = vmatprep.mubr.bf16.mxu0 %v15058_v58  ;;  %6590 = vmatprep.mubr.bf16.mxu1 %v15058_v58  ;;  %v5260_v23 = vmul.f32 %v11563_v15, %v14900_v57  ;;  %v5259_v51 = vmul.f32 %v11563_v15, %v14897_v30 }
 0xf4a   : > { %6478 = vmatmul.mubr.bf16.gmra.mxu0 %v15060_v43  ;;  %6591 = vmatmul.mubr.bf16.gmra.mxu1 %v15060_v43  ;;  %v5344_v20 = vadd.f32 %v14960_v54, %v5301_v62  ;;  %v5343_v16 = vadd.f32 %v14957_v28, %v5300_v22 }
 0xf4b   : > { %11570 = vrsqrt.f32 %v5220_v21  ;;  %v5303_v56 = vmul.f32 %v14950_v24, %v5260_v23  ;;  %v5302_v38 = vmul.f32 %v14947_v47, %v5259_v51  ;;  %6775 = vmatpush2.bf16.msra.mxu1 %v9944_v10  ;;  %8745 = vmatprep.subr.bf16.mxu0 %v11062_v18  ;;  %v11066_v21 = vld [vmem:[#allocation19 + $0x60] ss:$8 sps:$4 sm:$0xff]   ;;  %v11074_v51 = vld [vmem:[#allocation19 + $0x54] ss:$8 sps:$4 sm:$0xff]  }
 0xf4c   : > { %v11565_v32 = vpop.eup %11564  ;;  %8858 = vmatprep.subr.bf16.mxu1 %v11065_v39  ;;  %v11069_v23 = vld [vmem:[#allocation19 + $0x160] ss:$8 sps:$4 sm:$0xff]  }
 0xf4d   : > { %v5346_v57 = vadd.f32 %v14960_v54, %v5303_v56  ;;  %v5345_v30 = vadd.f32 %v14957_v28, %v5302_v38  ;;  %v5262_v17 = vmul.f32 %v11565_v32, %v14910_v29  ;;  %v5261_v60 = vmul.f32 %v11565_v32, %v14907_v25  ;;  %v11072_v56 = vld [vmem:[#allocation19 + $0x50] ss:$8 sps:$4 sm:$0xff]   ;;  %v11080_v32 = vld [vmem:[#allocation19 + $0x44] ss:$8 sps:$4 sm:$0xff]  }
 0xf4e   : > { %v11075_v38 = vld [vmem:[#allocation19 + $0x150] ss:$8 sps:$4 sm:$0xff]  }
 0xf4f   : > { %v15078_v8 = vpack.c.bf16 %v5346_v57, %v5344_v20  ;;  %v15080_v27 = vpack.c.bf16 %v5345_v30, %v5343_v16  ;;  %v5305_v12 = vmul.f32 %v14950_v24, %v5262_v17  ;;  %v5304_v5 = vmul.f32 %v14947_v47, %v5261_v60  ;;  %v11081_v20 = vld [vmem:[#allocation19 + $0x140] ss:$8 sps:$4 sm:$0xff]   ;;  %v11086_v16 = vld [vmem:[#allocation19 + $0x34] ss:$8 sps:$4 sm:$0xff]   ;;  %v11084_v30 = vld [vmem:[#allocation19 + $0x30] ss:$8 sps:$4 sm:$0xff]  }
 0xf50   : > { %v11567_v6 = vpop.eup %11566  ;;  %v11089_v57 = vld [vmem:[#allocation19 + $0x134] ss:$8 sps:$4 sm:$0xff]   ;;  %v11087_v17 = vld [vmem:[#allocation19 + $0x130] ss:$8 sps:$4 sm:$0xff]   ;;  %v11092_v60 = vld [vmem:[#allocation19 + $0x24] ss:$8 sps:$4 sm:$0xff]  }
 0xf51   : > { %6487 = vmatprep.mubr.bf16.mxu0 %v15078_v8  ;;  %6600 = vmatprep.mubr.bf16.mxu1 %v15078_v8  ;;  %v5264_v31 = vmul.f32 %v11567_v6, %v14920_v55  ;;  %v5263_v7 = vmul.f32 %v11567_v6, %v14917_v53  ;;  %v5348_v46 = vadd.f32 %v14960_v54, %v5305_v12  ;;  %v11093_v6 = vld [vmem:[#allocation19 + $0x120] ss:$8 sps:$4 sm:$0xff]   ;;  %v11098_v12 = vld [vmem:[#allocation19 + $0x14] ss:$8 sps:$4 sm:$0xff]  }
 0xf52   : > { %6488 = vmatmul.mubr.bf16.gmra.mxu0 %v15080_v27  ;;  %6601 = vmatmul.mubr.bf16.gmra.mxu1 %v15080_v27  ;;  %v5347_v42 = vadd.f32 %v14957_v28, %v5304_v5  ;;  %v11101_v5 = vld [vmem:[#allocation19 + $0x114] ss:$8 sps:$4 sm:$0xff]  }
 0xf53   : > { %v5307_v29 = vmul.f32 %v14950_v24, %v5264_v31  ;;  %v5306_v25 = vmul.f32 %v14947_v47, %v5263_v7  ;;  %v11096_v31 = vld [vmem:[#allocation19 + $0x10] ss:$8 sps:$4 sm:$0xff]  }
 0xf54   : > { %v11569_v26 = vpop.eup %11568  ;;  %v11099_v7 = vld [vmem:[#allocation19 + $0x110] ss:$8 sps:$4 sm:$0xff]  }
 0xf55   : > { %v5350_v49 = vadd.f32 %v14960_v54, %v5307_v29  ;;  %v5349_v19 = vadd.f32 %v14957_v28, %v5306_v25  ;;  %v5266_v55 = vmul.f32 %v11569_v26, %v14930_v41  ;;  %v5265_v53 = vmul.f32 %v11569_v26, %v14927_v36  ;;  %v11104_v29 = vld [vmem:[#allocation19 + $0x4] ss:$8 sps:$4 sm:$0xff]   ;;  %v11105_v25 = vld [vmem:[#allocation19 + $0x100] ss:$8 sps:$4 sm:$0xff]   ;;  %v11110_v26 = vld [vmem:[#allocation19 + $0xf4] ss:$8 sps:$4 sm:$0xff]  }
 0xf57   : > { %v15098_v14 = vpack.c.bf16 %v5350_v49, %v5348_v46  ;;  %v15100_v45 = vpack.c.bf16 %v5349_v19, %v5347_v42  ;;  %v5309_v1 = vmul.f32 %v14950_v24, %v5266_v55  ;;  %v5308_v18 = vmul.f32 %v14947_v47, %v5265_v53  ;;  %v11113_v46 = vld [vmem:[#allocation19 + $0x1f4] ss:$8 sps:$4 sm:$0xff]   ;;  %v11108_v42 = vld [vmem:[#allocation19 + $0xf0] ss:$8 sps:$4 sm:$0xff]   ;;  %v11116_v19 = vld [vmem:[#allocation19 + $0xe4] ss:$8 sps:$4 sm:$0xff]  }
 0xf58   : > { %v11571_v35 = vpop.eup %11570  ;;  %v11111_v49 = vld [vmem:[#allocation19 + $0x1f0] ss:$8 sps:$4 sm:$0xff]   ;;  %v11117_v55 = vld [vmem:[#allocation19 + $0x1e0] ss:$8 sps:$4 sm:$0xff]   ;;  %v11122_v53 = vld [vmem:[#allocation19 + $0xd4] ss:$8 sps:$4 sm:$0xff]  }
 0xf59   : > { %6497 = vmatprep.mubr.bf16.mxu0 %v15098_v14  ;;  %6610 = vmatprep.mubr.bf16.mxu1 %v15098_v14  ;;  %v5268_v10 = vmul.f32 %v11571_v35, %v14940_v2  ;;  %v5267_v4 = vmul.f32 %v11571_v35, %v14937_v37  ;;  %v5352_v15 = vadd.f32 %v14960_v54, %v5309_v1  ;;  %v11125_v35 = vld [vmem:[#allocation19 + $0x1d4] ss:$8 sps:$4 sm:$0xff]   ;;  %v11120_v1 = vld [vmem:[#allocation19 + $0xd0] ss:$8 sps:$4 sm:$0xff]  }
 0xf5a   : > { %6498 = vmatmul.mubr.bf16.gmra.mxu0 %v15100_v45  ;;  %6611 = vmatmul.mubr.bf16.gmra.mxu1 %v15100_v45  ;;  %v5351_v22 = vadd.f32 %v14957_v28, %v5308_v18  ;;  %v11129_v18 = vld [vmem:[#allocation19 + $0x1c0] ss:$8 sps:$4 sm:$0xff]  }
 0xf5b   : > { %v5311_v36 = vmul.f32 %v14950_v24, %v5268_v10  ;;  %v5310_v41 = vmul.f32 %v14947_v47, %v5267_v4  ;;  %v11060_v47 = vld [vmem:[#allocation19 + $0x70] ss:$8 sps:$4 sm:$0xff]   ;;  %v11128_v4 = vld [vmem:[#allocation19 + $0xc4] ss:$8 sps:$4 sm:$0xff]  }
 0xf5c   : > { %v11063_v24 = vld [vmem:[#allocation19 + $0x170] ss:$8 sps:$4 sm:$0xff]  }
 0xf5d   : > { %v5354_v62 = vadd.f32 %v14960_v54, %v5311_v36  ;;  %v5353_v2 = vadd.f32 %v14957_v28, %v5310_v41  ;;  %v11068_v54 = vld [vmem:[#allocation19 + $0x64] ss:$8 sps:$4 sm:$0xff]   ;;  %v11123_v10 = vld [vmem:[#allocation19 + $0x1d0] ss:$8 sps:$4 sm:$0xff]   ;;  %v11134_v36 = vld [vmem:[#allocation19 + $0xb4] ss:$8 sps:$4 sm:$0xff]  }
 0xf5e   : > { %v11071_v28 = vld [vmem:[#allocation19 + $0x164] ss:$8 sps:$4 sm:$0xff]   ;;  %v11137_v41 = vld [vmem:[#allocation19 + $0x1b4] ss:$8 sps:$4 sm:$0xff]  }
 0xf5f   : > { %v15116_v39 = vpack.c.bf16 %v5354_v62, %v5352_v15  ;;  %v15118_v37 = vpack.c.bf16 %v5353_v2, %v5351_v22  ;;  %v11132_v15 = vld [vmem:[#allocation19 + $0xb0] ss:$8 sps:$4 sm:$0xff]   ;;  %v11140_v22 = vld [vmem:[#allocation19 + $0xa4] ss:$8 sps:$4 sm:$0xff]   ;;  %v11141_v2 = vld [vmem:[#allocation19 + $0x1a0] ss:$8 sps:$4 sm:$0xff]  }
 0xf60   : > { %v11135_v62 = vld [vmem:[#allocation19 + $0x1b0] ss:$8 sps:$4 sm:$0xff]  }
 0xf61   : > { %6507 = vmatprep.mubr.bf16.mxu0 %v15116_v39  ;;  %6620 = vmatprep.mubr.bf16.mxu1 %v15116_v39 }
 0xf62   : > { %6508 = vmatmul.mubr.bf16.gmra.mxu0 %v15118_v37  ;;  %6621 = vmatmul.mubr.bf16.gmra.mxu1 %v15118_v37 }
 0xf63   : > { %6663 = vmatprep.mubr.bf16.mxu0 %v14972_v0  ;;  %6776 = vmatprep.mubr.bf16.mxu1 %v14972_v0  ;;  %v11077_v0 = vld [vmem:[#allocation19 + $0x154] ss:$8 sps:$4 sm:$0xff]  }
 0xf6a   : > { %6664 = vmatmul.mubr.bf16.vlgmr.msra.gmra.mxu0 %v14974_v61  ;;  %6777 = vmatmul.mubr.bf16.vlgmr.msra.gmra.mxu1 %v14974_v61  ;;  %v11083_v61 = vld [vmem:[#allocation19 + $0x144] ss:$8 sps:$4 sm:$0xff]  }
 0xf6b   : > { %6673 = vmatprep.mubr.bf16.mxu0 %v14998_v13  ;;  %6786 = vmatprep.mubr.bf16.mxu1 %v14998_v13  ;;  %v11078_v13 = vld [vmem:[#allocation19 + $0x40] ss:$8 sps:$4 sm:$0xff]  }
 0xf6c   : > { %8746 = vmatpush1.bf16.msra.mxu0 %v11060_v47  ;;  %8859 = vmatpush1.bf16.msra.mxu1 %v11063_v24  ;;  %v11146_v47 = vld [vmem:[#allocation19 + $0x94] ss:$8 sps:$4 sm:$0xff]  }
 0xf6d   : > { %8747 = vmatprep.subr.bf16.mxu0 %v11068_v54  ;;  %8860 = vmatprep.subr.bf16.mxu1 %v11071_v28  ;;  %v11149_v24 = vld [vmem:[#allocation19 + $0x194] ss:$8 sps:$4 sm:$0xff]   ;;  %v11144_v54 = vld [vmem:[#allocation19 + $0x90] ss:$8 sps:$4 sm:$0xff]  }
 0xf6e   : > { %v11147_v28 = vld [vmem:[#allocation19 + $0x190] ss:$8 sps:$4 sm:$0xff]  }
 0xf70   : > { %8748 = vmatpush1.bf16.msra.mxu0 %v11066_v21  ;;  %8861 = vmatpush1.bf16.msra.mxu1 %v11069_v23  ;;  %v11152_v21 = vld [vmem:[#allocation19 + $0x84] ss:$8 sps:$4 sm:$0xff]   ;;  %v11153_v23 = vld [vmem:[#allocation19 + $0x180] ss:$8 sps:$4 sm:$0xff]  }
 0xf71   : > { %8749 = vmatprep.subr.bf16.mxu0 %v11074_v51  ;;  %8862 = vmatprep.subr.bf16.mxu1 %v11077_v0  ;;  %v11158_v51 = vld [vmem:[#allocation19 + $0x274] ss:$8 sps:$4 sm:$0xff]  }
 0xf72   : > { %6674 = vmatmul.mubr.bf16.gmra.mxu0 %v15000_v44  ;;  %6787 = vmatmul.mubr.bf16.gmra.mxu1 %v15000_v44  ;;  %v11095_v44 = vld [vmem:[#allocation19 + $0x124] ss:$8 sps:$4 sm:$0xff]   ;;  %v11161_v0 = vld [vmem:[#allocation19 + $0x374] ss:$8 sps:$4 sm:$0xff]  }
 0xf73   : > { %6683 = vmatprep.mubr.bf16.mxu0 %v15018_v11  ;;  %6796 = vmatprep.mubr.bf16.mxu1 %v15018_v11  ;;  %v11090_v11 = vld [vmem:[#allocation19 + $0x20] ss:$8 sps:$4 sm:$0xff]  }
 0xf74   : > { %8750 = vmatpush1.bf16.msra.mxu0 %v11072_v56  ;;  %8863 = vmatpush1.bf16.msra.mxu1 %v11075_v38  ;;  %v5643_v56 = vld [vmem:[%s16469_s10] sm:$0xff] }
 0xf75   : > { %8751 = vmatprep.subr.bf16.mxu0 %v11080_v32  ;;  %8864 = vmatprep.subr.bf16.mxu1 %v11083_v61  ;;  %v15160_v38 = vrot.slane %v5643_v56, %v16766_v34 }
 0xf78   : > { %8752 = vmatpush1.bf16.msra.mxu0 %v11078_v13  ;;  %8865 = vmatpush1.bf16.msra.mxu1 %v11081_v20  ;;  %v15167_v13 = vrot.slane %v5643_v56, %v16767_v59 }
 0xf79   : > { %8753 = vmatprep.subr.bf16.mxu0 %v11086_v16  ;;  %8866 = vmatprep.subr.bf16.mxu1 %v11089_v57 }
 0xf7a   : > { %6684 = vmatmul.mubr.bf16.gmra.mxu0 %v15020_v63  ;;  %6797 = vmatmul.mubr.bf16.gmra.mxu1 %v15020_v63  ;;  %v11107_v63 = vld [vmem:[#allocation19 + $0x104] ss:$8 sps:$4 sm:$0xff]  }
 0xf7b   : > { %6693 = vmatprep.mubr.bf16.mxu0 %v15036_v3  ;;  %6806 = vmatprep.mubr.bf16.mxu1 %v15036_v3  ;;  %v11102_v3 = vld [vmem:[#allocation19] ss:$8 sps:$4 sm:$0xff]  }
 0xf7c   : > { %8754 = vmatpush1.bf16.msra.mxu0 %v11084_v30  ;;  %8867 = vmatpush1.bf16.msra.mxu1 %v11087_v17 }
 0xf7d   : > { %8755 = vmatprep.subr.bf16.mxu0 %v11092_v60  ;;  %8868 = vmatprep.subr.bf16.mxu1 %v11095_v44 }
 0xf80   : > { %8756 = vmatpush1.bf16.msra.mxu0 %v11090_v11  ;;  %8869 = vmatpush1.bf16.msra.mxu1 %v11093_v6 }
 0xf81   : > { %8757 = vmatprep.subr.bf16.mxu0 %v11098_v12  ;;  %8870 = vmatprep.subr.bf16.mxu1 %v11101_v5 }
 0xf82   : > { %6694 = vmatmul.mubr.bf16.gmra.mxu0 %v15038_v9  ;;  %6807 = vmatmul.mubr.bf16.gmra.mxu1 %v15038_v9  ;;  %v11119_v9 = vld [vmem:[#allocation19 + $0x1e4] ss:$8 sps:$4 sm:$0xff]  }
 0xf83   : > { %6703 = vmatprep.mubr.bf16.mxu0 %v15058_v58  ;;  %6816 = vmatprep.mubr.bf16.mxu1 %v15058_v58  ;;  %v11114_v58 = vld [vmem:[#allocation19 + $0xe0] ss:$8 sps:$4 sm:$0xff]  }
 0xf84   : > { %8758 = vmatpush1.bf16.msra.mxu0 %v11096_v31  ;;  %8871 = vmatpush1.bf16.msra.mxu1 %v11099_v7 }
 0xf85   : > { %8759 = vmatprep.subr.bf16.mxu0 %v11104_v29  ;;  %8872 = vmatprep.subr.bf16.mxu1 %v11107_v63 }
 0xf88   : > { %8760 = vmatpush1.bf16.msra.mxu0 %v11102_v3  ;;  %8873 = vmatpush1.bf16.msra.mxu1 %v11105_v25 }
 0xf89   : > { %8761 = vmatprep.subr.bf16.mxu0 %v11110_v26  ;;  %8874 = vmatprep.subr.bf16.mxu1 %v11113_v46 }
 0xf8a   : > { %6704 = vmatmul.mubr.bf16.gmra.mxu0 %v15060_v43  ;;  %6817 = vmatmul.mubr.bf16.gmra.mxu1 %v15060_v43  ;;  %v11131_v43 = vld [vmem:[#allocation19 + $0x1c4] ss:$8 sps:$4 sm:$0xff]  }
 0xf8b   : > { %6713 = vmatprep.mubr.bf16.mxu0 %v15078_v8  ;;  %6826 = vmatprep.mubr.bf16.mxu1 %v15078_v8  ;;  %v11126_v8 = vld [vmem:[#allocation19 + $0xc0] ss:$8 sps:$4 sm:$0xff]  }
 0xf8c   : > { %8762 = vmatpush2.bf16.msra.mxu0 %v11108_v42  ;;  %8875 = vmatpush2.bf16.msra.mxu1 %v11111_v49 }
 0xf8d   : > { %8763 = vmatprep.subr.bf16.mxu0 %v11116_v19  ;;  %8876 = vmatprep.subr.bf16.mxu1 %v11119_v9 }
 0xf90   : > { %8764 = vmatpush2.bf16.msra.mxu0 %v11114_v58  ;;  %8877 = vmatpush2.bf16.msra.mxu1 %v11117_v55 }
 0xf91   : > { %8765 = vmatprep.subr.bf16.mxu0 %v11122_v53  ;;  %8878 = vmatprep.subr.bf16.mxu1 %v11125_v35 }
 0xf92   : > { %6714 = vmatmul.mubr.bf16.gmra.mxu0 %v15080_v27  ;;  %6827 = vmatmul.mubr.bf16.gmra.mxu1 %v15080_v27  ;;  %v11143_v27 = vld [vmem:[#allocation19 + $0x1a4] ss:$8 sps:$4 sm:$0xff]  }
 0xf93   : > { %6723 = vmatprep.mubr.bf16.mxu0 %v15098_v14  ;;  %6836 = vmatprep.mubr.bf16.mxu1 %v15098_v14  ;;  %v11138_v14 = vld [vmem:[#allocation19 + $0xa0] ss:$8 sps:$4 sm:$0xff]  }
 0xf94   : > { %8766 = vmatpush2.bf16.msra.mxu0 %v11120_v1  ;;  %8879 = vmatpush2.bf16.msra.mxu1 %v11123_v10 }
 0xf95   : > { %8767 = vmatprep.subr.bf16.mxu0 %v11128_v4  ;;  %8880 = vmatprep.subr.bf16.mxu1 %v11131_v43 }
 0xf98   : > { %8768 = vmatpush2.bf16.msra.mxu0 %v11126_v8  ;;  %8881 = vmatpush2.bf16.msra.mxu1 %v11129_v18 }
 0xf99   : > { %8769 = vmatprep.subr.bf16.mxu0 %v11134_v36  ;;  %8882 = vmatprep.subr.bf16.mxu1 %v11137_v41 }
 0xf9a   : > { %6724 = vmatmul.mubr.bf16.gmra.mxu0 %v15100_v45  ;;  %6837 = vmatmul.mubr.bf16.gmra.mxu1 %v15100_v45  ;;  %v11155_v45 = vld [vmem:[#allocation19 + $0x184] ss:$8 sps:$4 sm:$0xff]  }
 0xf9b   : > { %6733 = vmatprep.mubr.bf16.mxu0 %v15116_v39  ;;  %6846 = vmatprep.mubr.bf16.mxu1 %v15116_v39  ;;  %v11150_v39 = vld [vmem:[#allocation19 + $0x80] ss:$8 sps:$4 sm:$0xff]  }
 0xf9c   : > { %8770 = vmatpush2.bf16.msra.mxu0 %v11132_v15  ;;  %8883 = vmatpush2.bf16.msra.mxu1 %v11135_v62 }
 0xf9d   : > { %8771 = vmatprep.subr.bf16.mxu0 %v11140_v22  ;;  %8884 = vmatprep.subr.bf16.mxu1 %v11143_v27 }
 0xfa0   : > { %8772 = vmatpush2.bf16.msra.mxu0 %v11138_v14  ;;  %8885 = vmatpush2.bf16.msra.mxu1 %v11141_v2 }
 0xfa1   : > { %8773 = vmatprep.subr.bf16.mxu0 %v11146_v47  ;;  %8886 = vmatprep.subr.bf16.mxu1 %v11149_v24 }
 0xfa2   : > { %6734 = vmatmul.mubr.bf16.gmra.mxu0 %v15118_v37  ;;  %6847 = vmatmul.mubr.bf16.gmra.mxu1 %v15118_v37  ;;  %v16770_v37 = vld [vmem:[#allocation28_spill] sm:$0xff] }
 0xfa3   : > { %v16771_v32 = vsub.s32 2, %v16770_v37  ;;  %v16772_v20 = vsub.s32 3, %v16770_v37 }
 0xfa4   : > { %8774 = vmatpush2.bf16.msra.mxu0 %v11144_v54  ;;  %8887 = vmatpush2.bf16.msra.mxu1 %v11147_v28 }
 0xfa5   : > { %8775 = vmatprep.subr.bf16.mxu0 %v11152_v21  ;;  %8888 = vmatprep.subr.bf16.mxu1 %v11155_v45  ;;  %v15164_v61 = vrot.slane %v5643_v56, %v16771_v32  ;;  %v15171_v16 = vrot.slane %v5643_v56, %v16772_v20 }
 0xfa8   : > { %8776 = vmatpush2.bf16.msra.mxu0 %v11150_v39  ;;  %8889 = vmatpush2.bf16.msra.mxu1 %v11153_v23 }
 0xfa9   : > { %8971 = vmatprep.subr.bf16.mxu0 %v11158_v51  ;;  %9084 = vmatprep.subr.bf16.mxu1 %v11161_v0 }
 0xfcb   : > { %v6439_v57 = vpop.f32.mrf.mxu0  ;;  %v6552_v30 = vpop.f32.mrf.mxu1 }
 0xfcc   : > { %v15174_v17 = vadd.f32 %v6439_v57, %v15160_v38  ;;  %v15177_v60 = vadd.f32 %v6552_v30, %v15164_v61 }
 0xfcd   : > { %v6441_v44 = vpop.f32.mrf.mxu0  ;;  %v6554_v11 = vpop.f32.mrf.mxu1 }
 0xfce   : > { %v10002_v6 = vmul.f32 -1.702, %v15174_v17  ;;  %v10004_v12 = vmul.f32 -1.702, %v15177_v60  ;;  %v15182_v5 = vadd.f32 %v6441_v44, %v15167_v13  ;;  %v15185_v31 = vadd.f32 %v6554_v11, %v15171_v16 }
 0xfcf   : > { %v6443_v7 = vpop.f32.mrf.mxu0  ;;  %v6556_v29 = vpop.f32.mrf.mxu1 }
 0xfd0   : > { %v7113_v63 = vmul.f32 1.442695, %v10002_v6  ;;  %v7117_v3 = vmul.f32 1.442695, %v10004_v12  ;;  %v10003_v25 = vmul.f32 -1.702, %v15182_v5  ;;  %v15189_v26 = vadd.f32 %v6443_v7, %v15160_v38 }
 0xfd1   : > { %v10005_v46 = vmul.f32 -1.702, %v15185_v31  ;;  %v15193_v42 = vadd.f32 %v6556_v29, %v15164_v61  ;;  %v6445_v49 = vpop.f32.mrf.mxu0  ;;  %v6558_v19 = vpop.f32.mrf.mxu1 }
 0xfd2   : > { %11572 = vpow2.f32 %v7113_v63  ;;  %v7115_v9 = vmul.f32 1.442695, %v10003_v25  ;;  %v10010_v58 = vmul.f32 -1.702, %v15189_v26  ;;  %v15197_v55 = vadd.f32 %v6445_v49, %v15167_v13 }
 0xfd3   : > { %11574 = vpow2.f32 %v7117_v3  ;;  %v7119_v53 = vmul.f32 1.442695, %v10005_v46  ;;  %v10012_v35 = vmul.f32 -1.702, %v15193_v42  ;;  %v15201_v1 = vadd.f32 %v6558_v19, %v15171_v16  ;;  %v6449_v10 = vpop.f32.mrf.mxu0  ;;  %v6562_v4 = vpop.f32.mrf.mxu1 }
 0xfd4   : > { %11576 = vpow2.f32 %v7115_v9  ;;  %v7129_v43 = vmul.f32 1.442695, %v10010_v58  ;;  %v10011_v8 = vmul.f32 -1.702, %v15197_v55  ;;  %v15205_v18 = vadd.f32 %v6449_v10, %v15160_v38 }
 0xfd5   : > { %11578 = vpow2.f32 %v7119_v53  ;;  %v7133_v36 = vmul.f32 1.442695, %v10012_v35  ;;  %v10013_v41 = vmul.f32 -1.702, %v15201_v1  ;;  %v15209_v15 = vadd.f32 %v6562_v4, %v15164_v61  ;;  %v6451_v62 = vpop.f32.mrf.mxu0  ;;  %v6564_v22 = vpop.f32.mrf.mxu1 }
 0xfd6   : > { %11580 = vpow2.f32 %v7129_v43  ;;  %v7131_v27 = vmul.f32 1.442695, %v10011_v8  ;;  %v10018_v14 = vmul.f32 -1.702, %v15205_v18  ;;  %v15213_v2 = vadd.f32 %v6451_v62, %v15167_v13 }
 0xfd7   : > { %11582 = vpow2.f32 %v7133_v36  ;;  %v7135_v47 = vmul.f32 1.442695, %v10013_v41  ;;  %v10020_v24 = vmul.f32 -1.702, %v15209_v15  ;;  %v15217_v54 = vadd.f32 %v6564_v22, %v15171_v16  ;;  %v6453_v28 = vpop.f32.mrf.mxu0  ;;  %v6566_v21 = vpop.f32.mrf.mxu1 }
 0xfd8   : > { %11584 = vpow2.f32 %v7131_v27  ;;  %v7145_v45 = vmul.f32 1.442695, %v10018_v14  ;;  %v10019_v39 = vmul.f32 -1.702, %v15213_v2  ;;  %v15221_v23 = vadd.f32 %v6453_v28, %v15160_v38 }
 0xfd9   : > { %11586 = vpow2.f32 %v7135_v47  ;;  %v7149_v51 = vmul.f32 1.442695, %v10020_v24  ;;  %v10021_v0 = vmul.f32 -1.702, %v15217_v54  ;;  %v15225_v56 = vadd.f32 %v6566_v21, %v15164_v61  ;;  %v6455_v32 = vpop.f32.mrf.mxu0  ;;  %v6568_v20 = vpop.f32.mrf.mxu1 }
 0xfda   : > { %11588 = vpow2.f32 %v7145_v45  ;;  %v7147_v57 = vmul.f32 1.442695, %v10019_v39  ;;  %v10026_v30 = vmul.f32 -1.702, %v15221_v23  ;;  %v15229_v44 = vadd.f32 %v6455_v32, %v15167_v13 }
 0xfdb   : > { %11590 = vpow2.f32 %v7149_v51  ;;  %v7151_v11 = vmul.f32 1.442695, %v10021_v0  ;;  %v10028_v6 = vmul.f32 -1.702, %v15225_v56  ;;  %v15233_v12 = vadd.f32 %v6568_v20, %v15171_v16  ;;  %v6459_v7 = vpop.f32.mrf.mxu0  ;;  %v6572_v29 = vpop.f32.mrf.mxu1 }
 0xfdc   : > { %11592 = vpow2.f32 %v7147_v57  ;;  %v7161_v63 = vmul.f32 1.442695, %v10026_v30  ;;  %v10027_v3 = vmul.f32 -1.702, %v15229_v44  ;;  %v15238_v58 = vadd.f32 %v6459_v7, %v15160_v38 }
 0xfdd   : > { %11594 = vpow2.f32 %v7151_v11  ;;  %v7165_v25 = vmul.f32 1.442695, %v10028_v6  ;;  %v10029_v46 = vmul.f32 -1.702, %v15233_v12  ;;  %v6461_v49 = vpop.f32.mrf.mxu0  ;;  %v6574_v19 = vpop.f32.mrf.mxu1  ;;  %v15241_v10 = vadd.f32 %v6572_v29, %v15164_v61 }
 0xfde   : > { %11596 = vpow2.f32 %v7161_v63  ;;  %v7163_v9 = vmul.f32 1.442695, %v10027_v3  ;;  %v10034_v24 = vmul.f32 -1.702, %v15238_v58  ;;  %v15246_v39 = vadd.f32 %v6461_v49, %v15167_v13 }
 0xfdf   : > { %v11573_v53 = vpop.eup %11572  ;;  %11598 = vpow2.f32 %v7165_v25  ;;  %v7167_v35 = vmul.f32 1.442695, %v10029_v46  ;;  %v6463_v4 = vpop.f32.mrf.mxu0  ;;  %v10036_v45 = vmul.f32 -1.702, %v15241_v10  ;;  %v15249_v32 = vadd.f32 %v6574_v19, %v15171_v16 }
 0xfe0   : > { %v6576_v43 = vpop.f32.mrf.mxu1  ;;  %v11575_v8 = vpop.eup %11574  ;;  %v7369_v36 = vadd.f32 1.0, %v11573_v53  ;;  %11600 = vpow2.f32 %v7163_v9  ;;  %v7177_v29 = vmul.f32 1.442695, %v10034_v24  ;;  %v10035_v46 = vmul.f32 -1.702, %v15246_v39 }
 0xfe1   : > { %v11577_v41 = vpop.eup %11576  ;;  %v7371_v62 = vadd.f32 1.0, %v11575_v8  ;;  %11602 = vpow2.f32 %v7167_v35  ;;  %v6465_v22 = vpop.f32.mrf.mxu0  ;;  %v15251_v25 = vmul.f32 1.442695, %v10036_v45  ;;  %v10037_v9 = vmul.f32 -1.702, %v15249_v32 }
 0xfe2   : > { %v6578_v27 = vpop.f32.mrf.mxu1  ;;  %v11579_v14 = vpop.eup %11578  ;;  %11604 = vrcp.f32 %v7369_v36  ;;  %v7370_v47 = vadd.f32 1.0, %v11577_v41  ;;  %v15256_v53 = vadd.f32 %v6463_v4, %v15160_v38  ;;  %v15259_v41 = vadd.f32 %v6576_v43, %v15164_v61 }
 0xfe3   : > { %v11581_v28 = vpop.eup %11580  ;;  %11606 = vrcp.f32 %v7371_v62  ;;  %v7372_v21 = vadd.f32 1.0, %v11579_v14  ;;  %v6469_v20 = vpop.f32.mrf.mxu0  ;;  %v15262_v62 = vadd.f32 %v6465_v22, %v15167_v13 }
 0xfe4   : > { %v11583_v51 = vpop.eup %11582  ;;  %11608 = vrcp.f32 %v7370_v47  ;;  %v7377_v0 = vadd.f32 1.0, %v11581_v28  ;;  %v6582_v11 = vpop.f32.mrf.mxu1  ;;  %v15265_v28 = vadd.f32 %v6578_v27, %v15171_v16  ;;  %v15268_v4 = vadd.f32 %v6469_v20, %v15160_v38 }
 0xfe5   : > { %v11585_v57 = vpop.eup %11584  ;;  %11610 = vrcp.f32 %v7372_v21  ;;  %v7379_v30 = vadd.f32 1.0, %v11583_v51  ;;  %v6471_v35 = vpop.f32.mrf.mxu0  ;;  %v15271_v51 = vadd.f32 %v6582_v11, %v15164_v61 }
 0xfe6   : > { %v11587_v6 = vpop.eup %11586  ;;  %11612 = vrcp.f32 %v7377_v0  ;;  %v7378_v7 = vadd.f32 1.0, %v11585_v57  ;;  %v6584_v14 = vpop.f32.mrf.mxu1  ;;  %v15274_v43 = vadd.f32 %v6471_v35, %v15167_v13  ;;  %v10042_v57 = vmul.f32 -1.702, %v15256_v53 }
 0xfe7   : > { %v11589_v63 = vpop.eup %11588  ;;  %11614 = vrcp.f32 %v7379_v30  ;;  %v7380_v3 = vadd.f32 1.0, %v11587_v6  ;;  %v15278_v27 = vadd.f32 %v6584_v14, %v15171_v16  ;;  %v10044_v6 = vmul.f32 -1.702, %v15259_v41  ;;  %v6473_v11 = vpop.f32.mrf.mxu0 }
 0xfe8   : > { %v11591_v49 = vpop.eup %11590  ;;  %11616 = vrcp.f32 %v7378_v7  ;;  %v7385_v19 = vadd.f32 1.0, %v11589_v63  ;;  %v10043_v7 = vmul.f32 -1.702, %v15262_v62  ;;  %v6586_v35 = vpop.f32.mrf.mxu1  ;;  %v10052_v14 = vmul.f32 -1.702, %v15271_v51 }
 0xfe9   : > { %v11593_v8 = vpop.eup %11592  ;;  %11618 = vrcp.f32 %v7380_v3  ;;  %v7387_v36 = vadd.f32 1.0, %v11591_v49  ;;  %v10045_v49 = vmul.f32 -1.702, %v15265_v28  ;;  %v7197_v50 = vmul.f32 1.442695, %v10044_v6  ;;  %v6475_v52 = vpop.f32.mrf.mxu0 }
 0xfea   : > { %v11595_v47 = vpop.eup %11594  ;;  %11620 = vrcp.f32 %v7385_v19  ;;  %v7386_v24 = vadd.f32 1.0, %v11593_v8  ;;  %v10050_v19 = vmul.f32 -1.702, %v15268_v4  ;;  %v15288_v48 = vadd.f32 %v6473_v11, %v15160_v38  ;;  %v6588_v40 = vpop.f32.mrf.mxu1 }
 0xfeb   : > { %v11597_v21 = vpop.eup %11596  ;;  %11622 = vrcp.f32 %v7387_v36  ;;  %v7388_v45 = vadd.f32 1.0, %v11595_v47  ;;  %v10051_v47 = vmul.f32 -1.702, %v15274_v43  ;;  %v7199_v33 = vmul.f32 1.442695, %v10045_v49 }
 0xfec   : > { %v11599_v22 = vpop.eup %11598  ;;  %11624 = vrcp.f32 %v7386_v24  ;;  %v7393_v0 = vadd.f32 1.0, %v11597_v21  ;;  %v7179_v21 = vmul.f32 1.442695, %v10035_v46  ;;  %v7209_v59 = vmul.f32 1.442695, %v10050_v19 }
 0xfed   : > { %v11601_v30 = vpop.eup %11600  ;;  %11626 = vrcp.f32 %v7388_v45  ;;  %v7395_v20 = vadd.f32 1.0, %v11599_v22  ;;  %v7183_v45 = vmul.f32 1.442695, %v10037_v9  ;;  %v10053_v22 = vmul.f32 -1.702, %v15278_v27 }
 0xfee   : > { %v11603_v63 = vpop.eup %11602  ;;  %11628 = vrcp.f32 %v7393_v0  ;;  %v7394_v3 = vadd.f32 1.0, %v11601_v30  ;;  %v7193_v30 = vmul.f32 1.442695, %v10042_v57  ;;  %v7213_v46 = vmul.f32 1.442695, %v10052_v14 }
 0xfef   : > { %v11605_v8 = vpop.eup %11604  ;;  %11630 = vrcp.f32 %v7395_v20  ;;  %v7396_v36 = vadd.f32 1.0, %v11603_v63  ;;  %v7195_v63 = vmul.f32 1.442695, %v10043_v7  ;;  %v7211_v9 = vmul.f32 1.442695, %v10051_v47 }
 0xff0   : > { %v11607_v24 = vpop.eup %11606  ;;  %11632 = vrcp.f32 %v7394_v3  ;;  %v15292_v3 = vadd.f32 %v6586_v35, %v15164_v61  ;;  %v7753_v6 = vmul.f32 %v11605_v8, %v15174_v17  ;;  %v7215_v11 = vmul.f32 1.442695, %v10053_v22 }
 0xff1   : > { %v11609_v0 = vpop.eup %11608  ;;  %11634 = vrcp.f32 %v7396_v36  ;;  %v15296_v36 = vadd.f32 %v6475_v52, %v15167_v13  ;;  %v10058_v49 = vmul.f32 -1.702, %v15288_v48 }
 0xff2   : > { %v11611_v20 = vpop.eup %11610  ;;  %11636 = vpow2.f32 %v7177_v29  ;;  %v7754_v35 = vmul.f32 %v11609_v0, %v15182_v5 }
 0xff3   : > { %v11613_v34 = vpop.eup %11612  ;;  %11638 = vpow2.f32 %v15251_v25  ;;  %v15301_v25 = vadd.f32 %v6588_v40, %v15171_v16  ;;  %v7756_v52 = vmul.f32 %v11611_v20, %v15185_v31  ;;  %v7755_v40 = vmul.f32 %v11607_v24, %v15177_v60  ;;  %v11159_v31 = vld [vmem:[#allocation19 + $0x370] ss:$8 sps:$4 sm:$0xff]  }
 0xff4   : > { %v11615_v57 = vpop.eup %11614  ;;  %11640 = vpow2.f32 %v7179_v21  ;;  %v7761_v7 = vmul.f32 %v11613_v34, %v15189_v26  ;;  %v10060_v34 = vmul.f32 -1.702, %v15292_v3  ;;  %v10059_v21 = vmul.f32 -1.702, %v15296_v36 }
 0xff5   : > { %v11617_v29 = vpop.eup %11616  ;;  %11642 = vpow2.f32 %v7183_v45  ;;  %v7763_v14 = vmul.f32 %v11615_v57, %v15193_v42  ;;  %v11156_v45 = vld [vmem:[#allocation19 + $0x270] ss:$8 sps:$4 sm:$0xff]   ;;  %v7225_v20 = vmul.f32 1.442695, %v10058_v49  ;;  %v11167_v57 = vld [vmem:[#allocation19 + $0x364] ss:$8 sps:$4 sm:$0xff]  }
 0xff6   : > { %v11619_v19 = vpop.eup %11618  ;;  %v7762_v17 = vmul.f32 %v11617_v29, %v15197_v55  ;;  %11644 = vpow2.f32 %v7193_v30  ;;  %v7913_v22 = vpack.c.bf16 %v7761_v7, %v7753_v6  ;;  %v10061_v55 = vmul.f32 -1.702, %v15301_v25  ;;  %v11164_v30 = vld [vmem:[#allocation19 + $0x264] ss:$8 sps:$4 sm:$0xff]   ;;  %v11170_v49 = vld [vmem:[#allocation19 + $0x254] ss:$8 sps:$4 sm:$0xff]  }
 0xff7   : > { %v11621_v8 = vpop.eup %11620  ;;  %v7764_v47 = vmul.f32 %v11619_v19, %v15201_v1  ;;  %11646 = vpow2.f32 %v7197_v50  ;;  %v7915_v50 = vpack.c.bf16 %v7763_v14, %v7755_v40  ;;  %v7229_v24 = vmul.f32 1.442695, %v10060_v34 }
 0xff8   : > { %v11623_v26 = vpop.eup %11622  ;;  %11648 = vpow2.f32 %v7195_v63  ;;  %v7914_v5 = vpack.c.bf16 %v7762_v17, %v7754_v35  ;;  %v7227_v6 = vmul.f32 1.442695, %v10059_v21  ;;  %v7231_v19 = vmul.f32 1.442695, %v10061_v55  ;;  %v11173_v17 = vld [vmem:[#allocation19 + $0x354] ss:$8 sps:$4 sm:$0xff]  }
 0xff9   : > { %v11625_v42 = vpop.eup %11624  ;;  %11650 = vpow2.f32 %v7199_v33  ;;  %v7916_v0 = vpack.c.bf16 %v7764_v47, %v7756_v52  ;;  %v11162_v33 = vld [vmem:[#allocation19 + $0x260] ss:$8 sps:$4 sm:$0xff]   ;;  %v7769_v47 = vmul.f32 %v11621_v8, %v15205_v18  ;;  %v7771_v40 = vmul.f32 %v11623_v26, %v15209_v15  ;;  %v11171_v18 = vld [vmem:[#allocation19 + $0x350] ss:$8 sps:$4 sm:$0xff]   ;;  %v11179_v15 = vld [vmem:[#allocation19 + $0x344] ss:$8 sps:$4 sm:$0xff]  }
 0xffa   : > { %v11627_v1 = vpop.eup %11626  ;;  %11652 = vpow2.f32 %v7209_v59  ;;  %8777 = vmatprep.mubr.bf16.mxu0 %v7914_v5  ;;  %v11165_v59 = vld [vmem:[#allocation19 + $0x360] ss:$8 sps:$4 sm:$0xff]  }
 0xffb   : > { %v11629_v60 = vpop.eup %11628  ;;  %11654 = vpow2.f32 %v7213_v46  ;;  %8890 = vmatprep.mubr.bf16.mxu1 %v7916_v0  ;;  %8778 = vmatmul.mubr.bf16.vlgmr.msra.gmra.mxu0 %v7913_v22  ;;  %v7770_v46 = vmul.f32 %v11625_v42, %v15213_v2 }
 0xffc   : > { %v11631_v63 = vpop.eup %11630  ;;  %11656 = vpow2.f32 %v7211_v9  ;;  %8891 = vmatmul.mubr.bf16.vlgmr.msra.gmra.mxu1 %v7915_v50  ;;  %8972 = vmatpush1.bf16.msra.mxu0 %v11156_v45  ;;  %v7777_v7 = vmul.f32 %v11629_v60, %v15221_v23  ;;  %v7772_v23 = vmul.f32 %v11627_v1, %v15217_v54  ;;  %v11176_v54 = vld [vmem:[#allocation19 + $0x244] ss:$8 sps:$4 sm:$0xff]  }
 0xffd   : > { %v11633_v29 = vpop.eup %11632  ;;  %11658 = vpow2.f32 %v7215_v11  ;;  %9085 = vmatpush1.bf16.msra.mxu1 %v11159_v31  ;;  %8973 = vmatprep.subr.bf16.mxu0 %v11164_v30  ;;  %v7779_v14 = vmul.f32 %v11631_v63, %v15225_v56  ;;  %v11168_v56 = vld [vmem:[#allocation19 + $0x250] ss:$8 sps:$4 sm:$0xff]   ;;  %v11174_v30 = vld [vmem:[#allocation19 + $0x240] ss:$8 sps:$4 sm:$0xff]   ;;  %v11185_v63 = vld [vmem:[#allocation19 + $0x334] ss:$8 sps:$4 sm:$0xff]  }
 0xffe   : > { %v11635_v35 = vpop.eup %11634  ;;  %v7778_v9 = vmul.f32 %v11633_v29, %v15229_v44  ;;  %11660 = vpow2.f32 %v7225_v20  ;;  %9086 = vmatprep.subr.bf16.mxu1 %v11167_v57  ;;  %v7921_v5 = vpack.c.bf16 %v7777_v7, %v7769_v47  ;;  %v11177_v20 = vld [vmem:[#allocation19 + $0x340] ss:$8 sps:$4 sm:$0xff]   ;;  %v11182_v57 = vld [vmem:[#allocation19 + $0x234] ss:$8 sps:$4 sm:$0xff]   ;;  %v11191_v47 = vld [vmem:[#allocation19 + $0x324] ss:$8 sps:$4 sm:$0xff]  }
 0xfff   : > { %v11637_v52 = vpop.eup %11636  ;;  %v7780_v11 = vmul.f32 %v11635_v35, %v15233_v12  ;;  %11662 = vpow2.f32 %v7229_v24  ;;  %v7923_v12 = vpack.c.bf16 %v7779_v14, %v7771_v40  ;;  %v11183_v35 = vld [vmem:[#allocation19 + $0x330] ss:$8 sps:$4 sm:$0xff]  }
0x1000   : > { %v11639_v34 = vpop.eup %11638  ;;  %v7401_v21 = vadd.f32 1.0, %v11637_v52  ;;  %11664 = vpow2.f32 %v7227_v6  ;;  %v7922_v2 = vpack.c.bf16 %v7778_v9, %v7770_v46  ;;  %8974 = vmatpush1.bf16.msra.mxu0 %v11162_v33  ;;  %v11188_v46 = vld [vmem:[#allocation19 + $0x224] ss:$8 sps:$4 sm:$0xff]  }
0x1001   : > { %v11641_v44 = vpop.eup %11640  ;;  %v7403_v45 = vadd.f32 1.0, %v11639_v34  ;;  %11666 = vpow2.f32 %v7231_v19  ;;  %v7924_v42 = vpack.c.bf16 %v7780_v11, %v7772_v23  ;;  %9087 = vmatpush1.bf16.msra.mxu1 %v11165_v59  ;;  %8975 = vmatprep.subr.bf16.mxu0 %v11170_v49  ;;  %v11180_v19 = vld [vmem:[#allocation19 + $0x230] ss:$8 sps:$4 sm:$0xff]  }
0x1002   : > { %v11643_v8 = vpop.eup %11642  ;;  %11668 = vrcp.f32 %v7401_v21  ;;  %v7402_v22 = vadd.f32 1.0, %v11641_v44  ;;  %8787 = vmatprep.mubr.bf16.mxu0 %v7922_v2  ;;  %9088 = vmatprep.subr.bf16.mxu1 %v11173_v17  ;;  %v11186_v21 = vld [vmem:[#allocation19 + $0x220] ss:$8 sps:$4 sm:$0xff]  }
0x1003   : > { %v11645_v26 = vpop.eup %11644  ;;  %11670 = vrcp.f32 %v7403_v45  ;;  %v7404_v55 = vadd.f32 1.0, %v11643_v8  ;;  %8900 = vmatprep.mubr.bf16.mxu1 %v7924_v42  ;;  %8788 = vmatmul.mubr.bf16.gmra.mxu0 %v7921_v5  ;;  %v11189_v45 = vld [vmem:[#allocation19 + $0x320] ss:$8 sps:$4 sm:$0xff]   ;;  %v11194_v42 = vld [vmem:[#allocation19 + $0x214] ss:$8 sps:$4 sm:$0xff]  }
0x1004   : > { %v11647_v0 = vpop.eup %11646  ;;  %11672 = vrcp.f32 %v7402_v22  ;;  %v7409_v31 = vadd.f32 1.0, %v11645_v26  ;;  %8901 = vmatmul.mubr.bf16.gmra.mxu1 %v7923_v12  ;;  %8976 = vmatpush1.bf16.msra.mxu0 %v11168_v56 }
0x1005   : > { %v11649_v1 = vpop.eup %11648  ;;  %11674 = vrcp.f32 %v7404_v55  ;;  %v7411_v50 = vadd.f32 1.0, %v11647_v0  ;;  %9089 = vmatpush1.bf16.msra.mxu1 %v11171_v18  ;;  %8977 = vmatprep.subr.bf16.mxu0 %v11176_v54 }
0x1006   : > { %v11651_v60 = vpop.eup %11650  ;;  %11676 = vrcp.f32 %v7409_v31  ;;  %v7410_v24 = vadd.f32 1.0, %v11649_v1  ;;  %9090 = vmatprep.subr.bf16.mxu1 %v11179_v15 }
0x1007   : > { %v11653_v6 = vpop.eup %11652  ;;  %11678 = vrcp.f32 %v7411_v50  ;;  %v7412_v33 = vadd.f32 1.0, %v11651_v60 }
0x1008   : > { %v11655_v29 = vpop.eup %11654  ;;  %11680 = vrcp.f32 %v7410_v24  ;;  %v7417_v7 = vadd.f32 1.0, %v11653_v6  ;;  %8978 = vmatpush1.bf16.msra.mxu0 %v11174_v30  ;;  %v11197_v30 = vld [vmem:[#allocation19 + $0x314] ss:$8 sps:$4 sm:$0xff]  }
0x1009   : > { %v11657_v59 = vpop.eup %11656  ;;  %11682 = vrcp.f32 %v7412_v33  ;;  %v7419_v49 = vadd.f32 1.0, %v11655_v29  ;;  %9091 = vmatpush1.bf16.msra.mxu1 %v11177_v20  ;;  %8979 = vmatprep.subr.bf16.mxu0 %v11182_v57  ;;  %v11192_v29 = vld [vmem:[#allocation19 + $0x210] ss:$8 sps:$4 sm:$0xff]  }
0x100a   : > { %v11659_v14 = vpop.eup %11658  ;;  %11684 = vrcp.f32 %v7417_v7  ;;  %v7418_v9 = vadd.f32 1.0, %v11657_v59  ;;  %v6479_v17 = vpop.f32.mrf.mxu0  ;;  %9092 = vmatprep.subr.bf16.mxu1 %v11185_v63 }
0x100b   : > { %v6592_v52 = vpop.f32.mrf.mxu1  ;;  %v11661_v23 = vpop.eup %11660  ;;  %11686 = vrcp.f32 %v7419_v49  ;;  %v7420_v11 = vadd.f32 1.0, %v11659_v14  ;;  %v15321_v34 = vadd.f32 %v6479_v17, %v15160_v38  ;;  %v11195_v49 = vld [vmem:[#allocation19 + $0x310] ss:$8 sps:$4 sm:$0xff]  }
0x100c   : > { %v15324_v40 = vadd.f32 %v6592_v52, %v15164_v61  ;;  %v11663_v2 = vpop.eup %11662  ;;  %11688 = vrcp.f32 %v7418_v9  ;;  %v7425_v56 = vadd.f32 1.0, %v11661_v23  ;;  %v6481_v44 = vpop.f32.mrf.mxu0  ;;  %8980 = vmatpush1.bf16.msra.mxu0 %v11180_v19 }
0x100d   : > { %v6594_v5 = vpop.f32.mrf.mxu1  ;;  %v11665_v18 = vpop.eup %11664  ;;  %11690 = vrcp.f32 %v7420_v11  ;;  %v7427_v54 = vadd.f32 1.0, %v11663_v2  ;;  %v10066_v8 = vmul.f32 -1.702, %v15321_v34  ;;  %9093 = vmatpush1.bf16.msra.mxu1 %v11183_v35  ;;  %8981 = vmatprep.subr.bf16.mxu0 %v11188_v46  ;;  %v15329_v26 = vadd.f32 %v6481_v44, %v15167_v13  ;;  %v11200_v35 = vld [vmem:[#allocation19 + $0x204] ss:$8 sps:$4 sm:$0xff]  }
0x100e   : > { %v10068_v12 = vmul.f32 -1.702, %v15324_v40  ;;  %v11667_v22 = vpop.eup %11666  ;;  %11692 = vrcp.f32 %v7425_v56  ;;  %v7426_v15 = vadd.f32 1.0, %v11665_v18  ;;  %v15332_v55 = vadd.f32 %v6594_v5, %v15171_v16  ;;  %v6483_v0 = vpop.f32.mrf.mxu0  ;;  %9094 = vmatprep.subr.bf16.mxu1 %v11191_v47  ;;  %v11203_v47 = vld [vmem:[#allocation19 + $0x304] ss:$8 sps:$4 sm:$0xff]  }
0x100f   : > { %v6596_v31 = vpop.f32.mrf.mxu1  ;;  %v11669_v1 = vpop.eup %11668  ;;  %11694 = vrcp.f32 %v7427_v54  ;;  %v7428_v50 = vadd.f32 1.0, %v11667_v22  ;;  %v7241_v20 = vmul.f32 1.442695, %v10066_v8  ;;  %v10067_v24 = vmul.f32 -1.702, %v15329_v26 }
0x1010   : > { %v7245_v57 = vmul.f32 1.442695, %v10068_v12  ;;  %v11671_v60 = vpop.eup %11670  ;;  %11696 = vrcp.f32 %v7426_v15  ;;  %v10069_v63 = vmul.f32 -1.702, %v15332_v55  ;;  %v6485_v6 = vpop.f32.mrf.mxu0  ;;  %8982 = vmatpush1.bf16.msra.mxu0 %v11186_v21  ;;  %v15337_v19 = vadd.f32 %v6483_v0, %v15160_v38  ;;  %v11201_v54 = vld [vmem:[#allocation19 + $0x300] ss:$8 sps:$4 sm:$0xff]  }
0x1011   : > { %v6598_v33 = vpop.f32.mrf.mxu1  ;;  %v11673_v7 = vpop.eup %11672  ;;  %11698 = vrcp.f32 %v7428_v50  ;;  %v15340_v59 = vadd.f32 %v6596_v31, %v15164_v61  ;;  %9095 = vmatpush1.bf16.msra.mxu1 %v11189_v45  ;;  %8983 = vmatprep.subr.bf16.mxu0 %v11194_v42  ;;  %v7243_v14 = vmul.f32 1.442695, %v10067_v24  ;;  %v15343_v11 = vmul.f32 %v11669_v1, %v15238_v58  ;;  %v11198_v58 = vld [vmem:[#allocation19 + $0x200] ss:$8 sps:$4 sm:$0xff]  }
0x1012   : > { %v11675_v46 = vpop.eup %11674  ;;  %11700 = vpow2.f32 %v7241_v20  ;;  %v7247_v9 = vmul.f32 1.442695, %v10069_v63  ;;  %v6489_v17 = vpop.f32.mrf.mxu0  ;;  %9096 = vmatprep.subr.bf16.mxu1 %v11197_v30  ;;  %v10074_v21 = vmul.f32 -1.702, %v15337_v19  ;;  %v7786_v44 = vmul.f32 %v11673_v7, %v15246_v39  ;;  %v11206_v39 = vld [vmem:[#allocation19 + $0x2f4] ss:$8 sps:$4 sm:$0xff]  }
0x1013   : > { %v6602_v52 = vpop.f32.mrf.mxu1  ;;  %v11677_v23 = vpop.eup %11676  ;;  %11702 = vpow2.f32 %v7245_v57  ;;  %v10076_v2 = vmul.f32 -1.702, %v15340_v59  ;;  %v15349_v5 = vadd.f32 %v6485_v6, %v15167_v13  ;;  %v15352_v45 = vadd.f32 %v6598_v33, %v15171_v16 }
0x1014   : > { %v11679_v56 = vpop.eup %11678  ;;  %11704 = vpow2.f32 %v7243_v14  ;;  %v6491_v42 = vpop.f32.mrf.mxu0  ;;  %8984 = vmatpush1.bf16.msra.mxu0 %v11192_v29  ;;  %v7793_v12 = vmul.f32 %v11677_v23, %v15256_v53  ;;  %v7257_v22 = vmul.f32 1.442695, %v10074_v21  ;;  %v11209_v53 = vld [vmem:[#allocation19 + $0x3f4] ss:$8 sps:$4 sm:$0xff]   ;;  %v7788_v63 = vmul.f32 %v11675_v46, %v15249_v32  ;;  %v11204_v14 = vld [vmem:[#allocation19 + $0x2f0] ss:$8 sps:$4 sm:$0xff]  }
0x1015   : > { %v6604_v18 = vpop.f32.mrf.mxu1  ;;  %v11681_v8 = vpop.eup %11680  ;;  %11706 = vpow2.f32 %v7247_v9  ;;  %v7261_v15 = vmul.f32 1.442695, %v10076_v2  ;;  %9097 = vmatpush1.bf16.msra.mxu1 %v11195_v49  ;;  %8985 = vmatprep.subr.bf16.mxu0 %v11200_v35  ;;  %v7795_v31 = vmul.f32 %v11679_v56, %v15259_v41  ;;  %v10075_v1 = vmul.f32 -1.702, %v15349_v5  ;;  %v11207_v9 = vld [vmem:[#allocation19 + $0x3f0] ss:$8 sps:$4 sm:$0xff]  }
0x1016   : > { %v11683_v0 = vpop.eup %11682  ;;  %v7794_v30 = vmul.f32 %v11681_v8, %v15262_v62  ;;  %v10077_v50 = vmul.f32 -1.702, %v15352_v45  ;;  %v6493_v20 = vpop.f32.mrf.mxu0  ;;  %9098 = vmatprep.subr.bf16.mxu1 %v11203_v47  ;;  %11708 = vpow2.f32 %v7257_v22  ;;  %v15364_v33 = vadd.f32 %v6489_v17, %v15160_v38 }
0x1017   : > { %v15359_v57 = vpop.f32.mrf.mxu1  ;;  %v11685_v24 = vpop.eup %11684  ;;  %v7796_v6 = vmul.f32 %v11683_v0, %v15265_v28  ;;  %v7787_v62 = vmul.f32 %v11671_v60, %v15241_v10  ;;  %11710 = vpow2.f32 %v7261_v15  ;;  %v7259_v7 = vmul.f32 1.442695, %v10075_v1  ;;  %v11212_v10 = vld [vmem:[#allocation19 + $0x2e4] ss:$8 sps:$4 sm:$0xff]   ;;  %v11210_v0 = vld [vmem:[#allocation19 + $0x2e0] ss:$8 sps:$4 sm:$0xff]  }
0x1018   : > { %v11687_v41 = vpop.eup %11686  ;;  %v7930_v29 = vpack.c.bf16 %v7794_v30, %v7786_v44  ;;  %v15367_v49 = vpop.f32.mrf.mxu0  ;;  %8986 = vmatpush1.bf16.msra.mxu0 %v11198_v58  ;;  %v7929_v28 = vpack.c.bf16 %v7793_v12, %v15343_v11  ;;  %v7263_v47 = vmul.f32 1.442695, %v10077_v50  ;;  %v10082_v17 = vmul.f32 -1.702, %v15364_v33  ;;  %v11215_v44 = vld [vmem:[#allocation19 + $0x3e4] ss:$8 sps:$4 sm:$0xff]  }
0x1019   : > { %v15369_v35 = vpop.f32.mrf.mxu1  ;;  %v11689_v32 = vpop.eup %11688  ;;  %v7932_v46 = vpack.c.bf16 %v7796_v6, %v7788_v63  ;;  %9099 = vmatpush1.bf16.msra.mxu1 %v11201_v54  ;;  %8987 = vmatprep.subr.bf16.mxu0 %v11206_v39  ;;  %v7931_v23 = vpack.c.bf16 %v7795_v31, %v7787_v62  ;;  %11712 = vpow2.f32 %v7259_v7  ;;  %v15374_v21 = vadd.f32 %v6602_v52, %v15164_v61  ;;  %v11218_v50 = vld [vmem:[#allocation19 + $0x2d4] ss:$8 sps:$4 sm:$0xff]  }
0x101a   : > { %v11691_v60 = vpop.eup %11690  ;;  %8797 = vmatprep.mubr.bf16.mxu0 %v7930_v29  ;;  %v15377_v2 = vadd.f32 %v6491_v42, %v15167_v13  ;;  %v15379_v56 = vpop.f32.mrf.mxu0  ;;  %9100 = vmatprep.subr.bf16.mxu1 %v11209_v53  ;;  %v15384_v54 = vmul.f32 %v11685_v24, %v15268_v4  ;;  %11714 = vpow2.f32 %v7263_v47  ;;  %v7273_v8 = vmul.f32 1.442695, %v10082_v17  ;;  %v11221_v53 = vld [vmem:[#allocation19 + $0x3d4] ss:$8 sps:$4 sm:$0xff]   ;;  %v11219_v47 = vld [vmem:[#allocation19 + $0x3d0] ss:$8 sps:$4 sm:$0xff]  }
0x101b   : > { %v15381_v11 = vpop.f32.mrf.mxu1  ;;  %v11693_v58 = vpop.eup %11692  ;;  %8910 = vmatprep.mubr.bf16.mxu1 %v7932_v46  ;;  %8798 = vmatmul.mubr.bf16.gmra.mxu0 %v7929_v28  ;;  %v15387_v52 = vadd.f32 %v6604_v18, %v15171_v16  ;;  %v15390_v42 = vmul.f32 %v11687_v41, %v15271_v51  ;;  %v10084_v15 = vmul.f32 -1.702, %v15374_v21  ;;  %v7802_v30 = vmul.f32 %v11689_v32, %v15274_v43  ;;  %v11216_v46 = vld [vmem:[#allocation19 + $0x2d0] ss:$8 sps:$4 sm:$0xff]  }
0x101c   : > { %v11695_v12 = vpop.eup %11694  ;;  %v7809_v22 = vmul.f32 %v11693_v58, %v15288_v48  ;;  %8911 = vmatmul.mubr.bf16.gmra.mxu1 %v7931_v23  ;;  %v10083_v39 = vmul.f32 -1.702, %v15377_v2  ;;  %v15395_v4 = vpop.f32.mrf.mxu0  ;;  %8988 = vmatpush2.bf16.msra.mxu0 %v11204_v14  ;;  %11716 = vpow2.f32 %v7273_v8  ;;  %v15400_v51 = vadd.f32 %v6493_v20, %v15160_v38  ;;  %v11213_v48 = vld [vmem:[#allocation19 + $0x3e0] ss:$8 sps:$4 sm:$0xff]   ;;  %v11227_v8 = vld [vmem:[#allocation19 + $0x3c4] ss:$8 sps:$4 sm:$0xff]  }
0x101d   : > { %v11697_v31 = vpop.eup %11696  ;;  %v7811_v18 = vmul.f32 %v11695_v12, %v15292_v3  ;;  %v15402_v1 = vpop.f32.mrf.mxu1  ;;  %9101 = vmatpush2.bf16.msra.mxu1 %v11207_v9  ;;  %8989 = vmatprep.subr.bf16.mxu0 %v11212_v10  ;;  %v7277_v6 = vmul.f32 1.442695, %v10084_v15  ;;  %v10085_v43 = vmul.f32 -1.702, %v15387_v52  ;;  %v7804_v62 = vmul.f32 %v11691_v60, %v15278_v27 }
0x101e   : > { %v11699_v24 = vpop.eup %11698  ;;  %v7810_v63 = vmul.f32 %v11697_v31, %v15296_v36  ;;  %v7275_v41 = vmul.f32 1.442695, %v10083_v39  ;;  %9102 = vmatprep.subr.bf16.mxu1 %v11215_v44  ;;  %v7937_v20 = vpack.c.bf16 %v7809_v22, %v15384_v54  ;;  %v15411_v7 = vadd.f32 %v15359_v57, %v15164_v61  ;;  %v15414_v28 = vpop.f32.mrf.mxu0  ;;  %v11224_v57 = vld [vmem:[#allocation19 + $0x2c4] ss:$8 sps:$4 sm:$0xff]  }
0x101f   : > { %v11701_v3 = vpop.eup %11700  ;;  %v7812_v29 = vmul.f32 %v11699_v24, %v15301_v25  ;;  %v7939_v9 = vpack.c.bf16 %v7811_v18, %v15390_v42  ;;  %11718 = vpow2.f32 %v7277_v6  ;;  %v10090_v25 = vmul.f32 -1.702, %v15400_v51  ;;  %v15417_v60 = vpop.f32.mrf.mxu1  ;;  %v11233_v6 = vld [vmem:[#allocation19 + $0x3b4] ss:$8 sps:$4 sm:$0xff]  }
0x1020   : > { %v11703_v14 = vpop.eup %11702  ;;  %v7433_v36 = vadd.f32 1.0, %v11701_v3  ;;  %v7938_v32 = vpack.c.bf16 %v7810_v63, %v7802_v30  ;;  %8990 = vmatpush2.bf16.msra.mxu0 %v11210_v0  ;;  %11720 = vpow2.f32 %v7275_v41  ;;  %v7279_v58 = vmul.f32 1.442695, %v10085_v43  ;;  %v15428_v39 = vpop.f32.mrf.mxu0  ;;  %v11225_v0 = vld [vmem:[#allocation19 + $0x3c0] ss:$8 sps:$4 sm:$0xff]  }
0x1021   : > { %v11705_v27 = vpop.eup %11704  ;;  %v7435_v17 = vadd.f32 1.0, %v11703_v14  ;;  %v7940_v10 = vpack.c.bf16 %v7812_v29, %v7804_v62  ;;  %9103 = vmatpush2.bf16.msra.mxu1 %v11213_v48  ;;  %8991 = vmatprep.subr.bf16.mxu0 %v11218_v50  ;;  %v15421_v54 = vadd.f32 %v15367_v49, %v15167_v13  ;;  %v15425_v42 = vadd.f32 %v15369_v35, %v15171_v16  ;;  %v11222_v49 = vld [vmem:[#allocation19 + $0x2c0] ss:$8 sps:$4 sm:$0xff]   ;;  %v15434_v35 = vpop.f32.mrf.mxu1  ;;  %v11230_v50 = vld [vmem:[#allocation19 + $0x2b4] ss:$8 sps:$4 sm:$0xff]  }
0x1022   : > { %v11707_v23 = vpop.eup %11706  ;;  %11722 = vrcp.f32 %v7433_v36  ;;  %v7434_v44 = vadd.f32 1.0, %v11705_v27  ;;  %8807 = vmatprep.mubr.bf16.mxu0 %v7938_v32  ;;  %9104 = vmatprep.subr.bf16.mxu1 %v11221_v53  ;;  %v10092_v15 = vmul.f32 -1.702, %v15411_v7  ;;  %v7289_v18 = vmul.f32 1.442695, %v10090_v25  ;;  %v6509_v14 = vpop.f32.mrf.mxu0 }
0x1023   : > { %11724 = vrcp.f32 %v7435_v17  ;;  %v7436_v12 = vadd.f32 1.0, %v11707_v23  ;;  %8920 = vmatprep.mubr.bf16.mxu1 %v7940_v10  ;;  %8808 = vmatmul.mubr.bf16.gmra.mxu0 %v7937_v20  ;;  %v11709_v22 = vpop.eup %11708  ;;  %v15432_v48 = vadd.f32 %v15379_v56, %v15160_v38  ;;  %v10091_v24 = vmul.f32 -1.702, %v15421_v54  ;;  %v11228_v43 = vld [vmem:[#allocation19 + $0x2b0] ss:$8 sps:$4 sm:$0xff]  }
0x1024   : > { %11726 = vrcp.f32 %v7434_v44  ;;  %8921 = vmatmul.mubr.bf16.gmra.mxu1 %v7939_v9  ;;  %8992 = vmatpush2.bf16.msra.mxu0 %v11216_v46  ;;  %v11711_v31 = vpop.eup %11710  ;;  %v7441_v30 = vadd.f32 1.0, %v11709_v22  ;;  %v15439_v63 = vadd.f32 %v15381_v11, %v15164_v61  ;;  %v10093_v56 = vmul.f32 -1.702, %v15425_v42  ;;  %v11231_v9 = vld [vmem:[#allocation19 + $0x3b0] ss:$8 sps:$4 sm:$0xff]   ;;  %v15451_v46 = vpop.f32.mrf.mxu1 }
0x1025   : > { %11728 = vrcp.f32 %v7436_v12  ;;  %9105 = vmatpush2.bf16.msra.mxu1 %v11219_v47  ;;  %8993 = vmatprep.subr.bf16.mxu0 %v11224_v57  ;;  %v7443_v53 = vadd.f32 1.0, %v11711_v31  ;;  %v7293_v20 = vmul.f32 1.442695, %v10092_v15  ;;  %v15444_v29 = vadd.f32 %v15395_v4, %v15167_v13  ;;  %v11236_v47 = vld [vmem:[#allocation19 + $0x2a4] ss:$8 sps:$4 sm:$0xff]  }
0x1026   : > { %11730 = vpow2.f32 %v7279_v58  ;;  %9106 = vmatprep.subr.bf16.mxu1 %v11227_v8  ;;  %v11713_v41 = vpop.eup %11712  ;;  %v10098_v36 = vmul.f32 -1.702, %v15432_v48  ;;  %v15449_v32 = vadd.f32 %v15402_v1, %v15171_v16  ;;  %v7291_v4 = vmul.f32 1.442695, %v10091_v24  ;;  %v11239_v10 = vld [vmem:[#allocation19 + $0x3a4] ss:$8 sps:$4 sm:$0xff]   ;;  %v6511_v58 = vpop.f32.mrf.mxu0 }
0x1027   : > { %11732 = vrcp.f32 %v7441_v30  ;;  %v11715_v3 = vpop.eup %11714  ;;  %v7442_v62 = vadd.f32 1.0, %v11713_v41  ;;  %v10100_v17 = vmul.f32 -1.702, %v15439_v63  ;;  %v7295_v57 = vmul.f32 1.442695, %v10093_v56 }
0x1028   : > { %11734 = vrcp.f32 %v7443_v53  ;;  %8994 = vmatpush2.bf16.msra.mxu0 %v11222_v49  ;;  %v7444_v11 = vadd.f32 1.0, %v11715_v3  ;;  %v15456_v23 = vadd.f32 %v15414_v28, %v15160_v38  ;;  %v10099_v1 = vmul.f32 -1.702, %v15444_v29  ;;  %v11234_v8 = vld [vmem:[#allocation19 + $0x2a0] ss:$8 sps:$4 sm:$0xff]  }
0x1029   : > { %11736 = vpow2.f32 %v7289_v18  ;;  %9107 = vmatpush2.bf16.msra.mxu1 %v11225_v0  ;;  %8995 = vmatprep.subr.bf16.mxu0 %v11230_v50  ;;  %v11717_v27 = vpop.eup %11716  ;;  %v15461_v44 = vadd.f32 %v15417_v60, %v15164_v61  ;;  %v11237_v12 = vld [vmem:[#allocation19 + $0x3a0] ss:$8 sps:$4 sm:$0xff]   ;;  %v7305_v15 = vmul.f32 1.442695, %v10098_v36  ;;  %v10101_v49 = vmul.f32 -1.702, %v15449_v32  ;;  %v15464_v0 = vpop.f32.mrf.mxu1 }
0x102a   : > { %11738 = vrcp.f32 %v7442_v62  ;;  %9108 = vmatprep.subr.bf16.mxu1 %v11233_v6  ;;  %v7449_v25 = vadd.f32 1.0, %v11717_v27  ;;  %v11242_v28 = vld [vmem:[#allocation19 + $0x294] ss:$8 sps:$4 sm:$0xff]   ;;  %v7309_v18 = vmul.f32 1.442695, %v10100_v17  ;;  %v15468_v60 = vadd.f32 %v15428_v39, %v15167_v13  ;;  %v15480_v39 = vpop.f32.mrf.mxu0 }
0x102b   : > { %11740 = vrcp.f32 %v7444_v11  ;;  %v11245_v50 = vld [vmem:[#allocation19 + $0x394] ss:$8 sps:$4 sm:$0xff]   ;;  %v10106_v6 = vmul.f32 -1.702, %v15456_v23  ;;  %v15475_v41 = vadd.f32 %v15434_v35, %v15171_v16  ;;  %v10108_v3 = vmul.f32 -1.702, %v15461_v44  ;;  %v15487_v36 = vpop.f32.mrf.mxu1 }
0x102c   : > { %11742 = vpow2.f32 %v7293_v20  ;;  %8996 = vmatpush2.bf16.msra.mxu0 %v11228_v43  ;;  %v11719_v22 = vpop.eup %11718  ;;  %16773 = vst [vmem:[#allocation42_spill] sm:$0xff] %v15468_v60  ;;  %v7307_v43 = vmul.f32 1.442695, %v10099_v1  ;;  %v11240_v62 = vld [vmem:[#allocation19 + $0x290] ss:$8 sps:$4 sm:$0xff]   ;;  %v15485_v11 = vadd.f32 %v6509_v14, %v15160_v38 }
0x102d   : > { %11744 = vrcp.f32 %v7449_v25  ;;  %9109 = vmatpush2.bf16.msra.mxu1 %v11231_v9  ;;  %8997 = vmatprep.subr.bf16.mxu0 %v11236_v47  ;;  %v11721_v31 = vpop.eup %11720  ;;  %v7451_v30 = vadd.f32 1.0, %v11719_v22  ;;  %16774 = vst [vmem:[#allocation28_spill] sm:$0xff] %v15475_v41  ;;  %v7311_v9 = vmul.f32 1.442695, %v10101_v49  ;;  %v11243_v35 = vld [vmem:[#allocation19 + $0x390] ss:$8 sps:$4 sm:$0xff]   ;;  %v15499_v22 = vpop.f32.mrf.mxu0 }
0x102e   : > { %11746 = vpow2.f32 %v7291_v4  ;;  %9110 = vmatprep.subr.bf16.mxu1 %v11239_v10  ;;  %v7450_v24 = vadd.f32 1.0, %v11721_v31  ;;  %16775 = vst [vmem:[#allocation64_spill] sm:$0xff] %v15485_v11  ;;  %v11248_v47 = vld [vmem:[#allocation19 + $0x284] ss:$8 sps:$4 sm:$0xff]   ;;  %v10107_v4 = vmul.f32 -1.702, %v15468_v60  ;;  %v15505_v31 = vadd.f32 %v6511_v58, %v15167_v13 }
0x102f   : > { %v15470_v53 = vpop.eup %11722  ;;  %11748 = vpow2.f32 %v7295_v57  ;;  %v11251_v17 = vld [vmem:[#allocation19 + $0x384] ss:$8 sps:$4 sm:$0xff]   ;;  %v7321_v25 = vmul.f32 1.442695, %v10106_v6  ;;  %v10109_v57 = vmul.f32 -1.702, %v15475_v41  ;;  %v15548_v41 = vadd.f32 %v15499_v22, %v15167_v13 }
0x1030   : > { %v15477_v56 = vpop.eup %11724  ;;  %11750 = vrcp.f32 %v7451_v30  ;;  %8998 = vmatpush2.bf16.msra.mxu0 %v11234_v8  ;;  %v7325_v8 = vmul.f32 1.442695, %v10108_v3  ;;  %16777 = vst [vmem:[#allocation66_spill] sm:$0xff] %v15505_v31  ;;  %v15507_v30 = vpop.f32.mrf.mxu1 }
0x1031   : > { %v15482_v20 = vpop.eup %11726  ;;  %11752 = vrcp.f32 %v7450_v24  ;;  %9111 = vmatpush2.bf16.msra.mxu1 %v11237_v12  ;;  %8999 = vmatprep.subr.bf16.mxu0 %v11242_v28  ;;  %v15497_v12 = vadd.f32 %v15451_v46, %v15164_v61  ;;  %v10114_v28 = vmul.f32 -1.702, %v15485_v11  ;;  %v7323_v46 = vmul.f32 1.442695, %v10107_v4  ;;  %16782 = vst [vmem:[#allocation70_spill] sm:$0xff] %v15548_v41 }
0x1032   : > { %v15489_v27 = vpop.eup %11728  ;;  %11754 = vpow2.f32 %v7305_v15  ;;  %9112 = vmatprep.subr.bf16.mxu1 %v11245_v50  ;;  %v11246_v15 = vld [vmem:[#allocation19 + $0x280] ss:$8 sps:$4 sm:$0xff]  }
0x1033   : > { %v11731_v10 = vpop.eup %11730  ;;  %11756 = vpow2.f32 %v7309_v18  ;;  %16776 = vst [vmem:[#allocation65_spill] sm:$0xff] %v15497_v12  ;;  %v11249_v18 = vld [vmem:[#allocation19 + $0x380] ss:$8 sps:$4 sm:$0xff]   ;;  %v10116_v58 = vmul.f32 -1.702, %v15497_v12 }
0x1034   : > { %v15493_v14 = vpop.eup %11732  ;;  %v7452_v1 = vadd.f32 1.0, %v11731_v10  ;;  %11758 = vpow2.f32 %v7307_v43  ;;  %9000 = vmatpush2.bf16.msra.mxu0 %v11240_v62  ;;  %v7327_v43 = vmul.f32 1.442695, %v10109_v57  ;;  %v6665_v62 = vpop.f32.mrf.mxu0 }
0x1035   : > { %v15501_v49 = vpop.eup %11734  ;;  %11760 = vpow2.f32 %v7311_v9  ;;  %9113 = vmatpush2.bf16.msra.mxu1 %v11243_v35  ;;  %9001 = vmatprep.subr.bf16.mxu0 %v11248_v47  ;;  %v7337_v35 = vmul.f32 1.442695, %v10114_v28  ;;  %v10115_v47 = vmul.f32 -1.702, %v15505_v31  ;;  %v6778_v10 = vpop.f32.mrf.mxu1  ;;  %v5671_v28 = vsub.s32 6, %v16770_v37 }
0x1036   : > { %v11737_v50 = vpop.eup %11736  ;;  %11762 = vrcp.f32 %v7452_v1  ;;  %9114 = vmatprep.subr.bf16.mxu1 %v11251_v17 }
0x1037   : > { %v15509_v24 = vpop.eup %11738  ;;  %v7457_v6 = vadd.f32 1.0, %v11737_v50  ;;  %11764 = vpow2.f32 %v7321_v25  ;;  %v15519_v25 = vadd.f32 %v15464_v0, %v15171_v16  ;;  %v6667_v50 = vpop.f32.mrf.mxu0  ;;  %v7339_v31 = vmul.f32 1.442695, %v10115_v47 }
0x1038   : > { %v15511_v3 = vpop.eup %11740  ;;  %11766 = vpow2.f32 %v7325_v8  ;;  %9002 = vmatpush2.bf16.msra.mxu0 %v11246_v15  ;;  %v7341_v15 = vmul.f32 1.442695, %v10116_v58  ;;  %v6780_v0 = vpop.f32.mrf.mxu1  ;;  %v15533_v58 = vadd.f32 %v15487_v36, %v15164_v61  ;;  %v5675_v47 = vsub.s32 7, %v16770_v37 }
0x1039   : > { %v11743_v9 = vpop.eup %11742  ;;  %11768 = vrcp.f32 %v7457_v6  ;;  %9115 = vmatpush2.bf16.msra.mxu1 %v11249_v18  ;;  %16778 = vst [vmem:[#allocation67_spill] sm:$0xff] %v15519_v25 }
0x103a   : > { %v15515_v4 = vpop.eup %11744  ;;  %v7459_v17 = vadd.f32 1.0, %v11743_v9  ;;  %11770 = vpow2.f32 %v7323_v46  ;;  %v15526_v46 = vadd.f32 %v15480_v39, %v15160_v38  ;;  %16780 = vst [vmem:[#allocation69_spill] sm:$0xff] %v15533_v58  ;;  %v12117_v38 = vld [vmem:[%s16469_s10] sm:$0xff]  ;;  %v16781_v39 = vsub.s32 4, %v16770_v37 }
0x103b   : > { %v11747_v57 = vpop.eup %11746  ;;  %11772 = vpow2.f32 %v7327_v43  ;;  %v10117_v43 = vmul.f32 -1.702, %v15519_v25  ;;  %v15544_v36 = vrot.slane %v12117_v38, %v5671_v28  ;;  %v15564_v13 = vrot.slane %v12117_v38, %v5675_v47 }
0x103c   : > { %v11749_v1 = vpop.eup %11748  ;;  %11774 = vrcp.f32 %v7459_v17  ;;  %v7458_v8 = vadd.f32 1.0, %v11747_v57  ;;  %16779 = vst [vmem:[#allocation68_spill] sm:$0xff] %v15526_v46  ;;  %v10122_v61 = vmul.f32 -1.702, %v15526_v46 }
0x103d   : > { %v15522_v6 = vpop.eup %11750  ;;  %v7460_v18 = vadd.f32 1.0, %v11749_v1  ;;  %11776 = vpow2.f32 %v7337_v35  ;;  %v15540_v35 = vrot.slane %v12117_v38, %v16781_v39  ;;  %v7343_v11 = vmul.f32 1.442695, %v10117_v43 }
0x103e   : > { %v15528_v9 = vpop.eup %11752  ;;  %11778 = vrcp.f32 %v7458_v8  ;;  %v6669_v8 = vpop.f32.mrf.mxu0  ;;  %v15567_v46 = vadd.f32 %v6778_v10, %v15544_v36 }
0x103f   : > { %v11755_v17 = vpop.eup %11754  ;;  %11780 = vrcp.f32 %v7460_v18 }
0x1040   : > { %v11757_v57 = vpop.eup %11756  ;;  %v7465_v1 = vadd.f32 1.0, %v11755_v17  ;;  %11782 = vpow2.f32 %v7341_v15  ;;  %v6782_v17 = vpop.f32.mrf.mxu1  ;;  %16786 = vst [vmem:[#allocation73_spill] sm:$0xff] %v15567_v46 }
0x1041   : > { %v11759_v25 = vpop.eup %11758  ;;  %v7467_v18 = vadd.f32 1.0, %v11757_v57  ;;  %11784 = vpow2.f32 %v7339_v31  ;;  %v10124_v57 = vmul.f32 -1.702, %v15533_v58  ;;  %v15555_v31 = vadd.f32 %v15507_v30, %v15171_v16  ;;  %v6671_v22 = vpop.f32.mrf.mxu0 }
0x1042   : > { %v11761_v15 = vpop.eup %11760  ;;  %11786 = vrcp.f32 %v7465_v1  ;;  %v7466_v12 = vadd.f32 1.0, %v11759_v25  ;;  %v15558_v1 = vadd.f32 %v6665_v62, %v15540_v35  ;;  %v16785_v25 = vsub.s32 5, %v16770_v37  ;;  %v6784_v16 = vpop.f32.mrf.mxu1 }
0x1043   : > { %v15550_v39 = vpop.eup %11762  ;;  %11788 = vrcp.f32 %v7467_v18  ;;  %v7468_v60 = vadd.f32 1.0, %v11761_v15  ;;  %16783 = vst [vmem:[#allocation71_spill] sm:$0xff] %v15555_v31  ;;  %v7353_v58 = vmul.f32 1.442695, %v10122_v61  ;;  %v10123_v62 = vmul.f32 -1.702, %v15548_v41 }
0x1044   : > { %v11765_v28 = vpop.eup %11764  ;;  %11790 = vrcp.f32 %v7466_v12  ;;  %16784 = vst [vmem:[#allocation72_spill] sm:$0xff] %v15558_v1  ;;  %v15562_v43 = vrot.slane %v12117_v38, %v16785_v25  ;;  %v15573_v12 = vmul.f32 %v15470_v53, %v15321_v34  ;;  %v7357_v47 = vmul.f32 1.442695, %v10124_v57  ;;  %v6675_v53 = vpop.f32.mrf.mxu0 }
0x1045   : > { %v11767_v18 = vpop.eup %11766  ;;  %11792 = vrcp.f32 %v7468_v60  ;;  %v7473_v15 = vadd.f32 1.0, %v11765_v28  ;;  %v15578_v60 = vmul.f32 %v15477_v56, %v15324_v40  ;;  %v10125_v10 = vmul.f32 -1.702, %v15555_v31  ;;  %v6788_v57 = vpop.f32.mrf.mxu1 }
0x1046   : > { %v15569_v30 = vpop.eup %11768  ;;  %v7475_v37 = vadd.f32 1.0, %v11767_v18  ;;  %11794 = vpow2.f32 %v7343_v11  ;;  %v10006_v25 = vmul.f32 -1.702, %v15558_v1  ;;  %v15583_v34 = vadd.f32 %v6667_v50, %v15562_v43 }
0x1047   : > { %v11771_v38 = vpop.eup %11770  ;;  %11796 = vrcp.f32 %v7473_v15  ;;  %v10008_v40 = vmul.f32 -1.702, %v15567_v46  ;;  %v15589_v56 = vadd.f32 %v6780_v0, %v15564_v13  ;;  %v15596_v50 = vadd.f32 %v6669_v8, %v15540_v35  ;;  %v6677_v8 = vpop.f32.mrf.mxu0 }
0x1048   : > { %v11773_v61 = vpop.eup %11772  ;;  %11798 = vrcp.f32 %v7475_v37  ;;  %v7474_v28 = vadd.f32 1.0, %v11771_v38  ;;  %v15593_v37 = vmul.f32 %v15482_v20, %v15329_v26  ;;  %v7355_v38 = vmul.f32 1.442695, %v10123_v62 }
0x1049   : > { %v15585_v11 = vpop.eup %11774  ;;  %v7476_v18 = vadd.f32 1.0, %v11773_v61  ;;  %11800 = vpow2.f32 %v7353_v58  ;;  %16787 = vst [vmem:[#allocation74_spill] sm:$0xff] %v15596_v50  ;;  %v7359_v61 = vmul.f32 1.442695, %v10125_v10  ;;  %v15601_v46 = vadd.f32 %v6782_v17, %v15544_v36 }
0x104a   : > { %v11777_v15 = vpop.eup %11776  ;;  %11802 = vrcp.f32 %v7474_v28  ;;  %v7820_v31 = vmul.f32 %v15489_v27, %v15332_v55  ;;  %v15609_v26 = vmul.f32 %v15493_v14, %v15337_v19  ;;  %v10007_v20 = vmul.f32 -1.702, %v15583_v34 }
0x104b   : > { %v15598_v1 = vpop.eup %11778  ;;  %11804 = vrcp.f32 %v7476_v18  ;;  %v7481_v58 = vadd.f32 1.0, %v11777_v15  ;;  %16788 = vst [vmem:[#allocation75_spill] sm:$0xff] %v15601_v46  ;;  %v7121_v28 = vmul.f32 1.442695, %v10006_v25  ;;  %v7125_v10 = vmul.f32 1.442695, %v10008_v40  ;;  %v6790_v18 = vpop.f32.mrf.mxu1 }
0x104c   : > { %v15603_v0 = vpop.eup %11780  ;;  %11806 = vpow2.f32 %v7357_v47  ;;  %v10009_v17 = vmul.f32 -1.702, %v15589_v56  ;;  %v10014_v55 = vmul.f32 -1.702, %v15596_v50  ;;  %v15615_v27 = vadd.f32 %v6671_v22, %v15562_v43 }
0x104d   : > { %v11783_v62 = vpop.eup %11782  ;;  %11808 = vrcp.f32 %v7481_v58  ;;  %v10016_v47 = vmul.f32 -1.702, %v15601_v46  ;;  %v15621_v25 = vadd.f32 %v6784_v16, %v15564_v13  ;;  %v7826_v58 = vmul.f32 %v15509_v24, %v15349_v5  ;;  %v15638_v46 = vpop.f32.mrf.mxu1 }
0x104e   : > { %v11785_v15 = vpop.eup %11784  ;;  %v7483_v41 = vadd.f32 1.0, %v11783_v62  ;;  %11810 = vpow2.f32 %v7355_v38  ;;  %v7828_v38 = vmul.f32 %v15511_v3, %v15352_v45  ;;  %v7123_v22 = vmul.f32 1.442695, %v10007_v20  ;;  %v15629_v62 = vpop.f32.mrf.mxu0 }
0x104f   : > { %v15617_v19 = vpop.eup %11786  ;;  %v7482_v14 = vadd.f32 1.0, %v11785_v15  ;;  %11812 = vpow2.f32 %v7359_v61  ;;  %16789 = vst [vmem:[#allocation76_spill] sm:$0xff] %v15621_v25  ;;  %v7827_v61 = vmul.f32 %v15501_v49, %v15340_v59  ;;  %v7127_v16 = vmul.f32 1.442695, %v10009_v17 }
0x1050   : > { %v15623_v40 = vpop.eup %11788  ;;  %11814 = vrcp.f32 %v7483_v41  ;;  %v15636_v15 = vadd.f32 %v6675_v53, %v15540_v35  ;;  %v7945_v45 = vpack.c.bf16 %v15609_v26, %v15573_v12  ;;  %v7137_v41 = vmul.f32 1.442695, %v10014_v55 }
0x1051   : > { %v15631_v50 = vpop.eup %11790  ;;  %11816 = vrcp.f32 %v7482_v14  ;;  %v10015_v24 = vmul.f32 -1.702, %v15615_v27  ;;  %v7141_v20 = vmul.f32 1.442695, %v10016_v47  ;;  %v10017_v59 = vmul.f32 -1.702, %v15621_v25  ;;  %v15651_v14 = vpop.f32.mrf.mxu0 }
0x1052   : > { %v15640_v5 = vpop.eup %11792  ;;  %11818 = vpow2.f32 %v7121_v28  ;;  %v15647_v49 = vadd.f32 %v6788_v57, %v15544_v36  ;;  %v7946_v12 = vpack.c.bf16 %v7826_v58, %v15593_v37  ;;  %v7948_v26 = vpack.c.bf16 %v7828_v38, %v7820_v31  ;;  %v15661_v57 = vpop.f32.mrf.mxu1 }
0x1053   : > { %v11795_v3 = vpop.eup %11794  ;;  %11820 = vpow2.f32 %v7125_v10  ;;  %v7947_v55 = vpack.c.bf16 %v7827_v61, %v15578_v60  ;;  %v10022_v10 = vmul.f32 -1.702, %v15636_v15  ;;  %v15659_v47 = vadd.f32 %v6677_v8, %v15562_v43  ;;  %v15671_v38 = vpop.f32.mrf.mxu0 }
0x1054   : > { %v15649_v53 = vpop.eup %11796  ;;  %v7484_v17 = vadd.f32 1.0, %v11795_v3  ;;  %11822 = vpow2.f32 %v7123_v22  ;;  %v7139_v22 = vmul.f32 1.442695, %v10015_v24  ;;  %8817 = vmatprep.mubr.bf16.mxu0 %v7946_v12  ;;  %8930 = vmatprep.mubr.bf16.mxu1 %v7948_v26  ;;  %v7143_v37 = vmul.f32 1.442695, %v10017_v59 }
0x1055   : > { %v15654_v28 = vpop.eup %11798  ;;  %11824 = vpow2.f32 %v7127_v16  ;;  %v15666_v60 = vadd.f32 %v6790_v18, %v15564_v13  ;;  %8818 = vmatmul.mubr.bf16.gmra.mxu0 %v7945_v45  ;;  %8931 = vmatmul.mubr.bf16.gmra.mxu1 %v7947_v55  ;;  %v10024_v8 = vmul.f32 -1.702, %v15647_v49  ;;  %v15675_v16 = vmul.f32 %v15515_v4, %v15364_v33  ;;  %v15678_v18 = vpop.f32.mrf.mxu1 }
0x1056   : > { %v11801_v25 = vpop.eup %11800  ;;  %11826 = vrcp.f32 %v7484_v17  ;;  %v15684_v24 = vmul.f32 %v15522_v6, %v15374_v21  ;;  %v7834_v4 = vmul.f32 %v15528_v9, %v15377_v2  ;;  %v15694_v17 = vmul.f32 %v15585_v11, %v15411_v7 }
0x1057   : > { %v15663_v3 = vpop.eup %11802  ;;  %v7489_v31 = vadd.f32 1.0, %v11801_v25  ;;  %11828 = vpow2.f32 %v7137_v41  ;;  %v7153_v25 = vmul.f32 1.442695, %v10022_v10  ;;  %v10023_v41 = vmul.f32 -1.702, %v15659_v47  ;;  %v15707_v9 = vpop.f32.mrf.mxu1 }
0x1058   : > { %v15668_v58 = vpop.eup %11804  ;;  %11830 = vpow2.f32 %v7141_v20  ;;  %v15688_v20 = vmul.f32 %v15569_v30, %v15400_v51  ;;  %v10025_v12 = vmul.f32 -1.702, %v15666_v60  ;;  %v7157_v6 = vmul.f32 1.442695, %v10024_v8  ;;  %v6687_v30 = vpop.f32.mrf.mxu0 }
0x1059   : > { %v11807_v61 = vpop.eup %11806  ;;  %11832 = vrcp.f32 %v7489_v31  ;;  %v15699_v51 = vadd.f32 %v15629_v62, %v15540_v35  ;;  %v7155_v2 = vmul.f32 1.442695, %v10023_v41  ;;  %v15705_v7 = vadd.f32 %v15638_v46, %v15544_v36 }
0x105a   : > { %v15680_v45 = vpop.eup %11808  ;;  %v7491_v59 = vadd.f32 1.0, %v11807_v61  ;;  %11834 = vpow2.f32 %v7139_v22  ;;  %v7836_v22 = vmul.f32 %v15550_v39, %v15387_v52  ;;  %v7953_v62 = vpack.c.bf16 %v15688_v20, %v15675_v16 }
0x105b   : > { %v11811_v33 = vpop.eup %11810  ;;  %11836 = vpow2.f32 %v7143_v37  ;;  %v7842_v31 = vmul.f32 %v15598_v1, %v15421_v54  ;;  %v7955_v8 = vpack.c.bf16 %v15694_v17, %v15684_v24  ;;  %v7844_v46 = vmul.f32 %v15603_v0, %v15425_v42  ;;  %v15726_v54 = vpop.f32.mrf.mxu0 }
0x105c   : > { %v11813_v26 = vpop.eup %11812  ;;  %11838 = vrcp.f32 %v7491_v59  ;;  %v7490_v21 = vadd.f32 1.0, %v11811_v33  ;;  %v7159_v61 = vmul.f32 1.442695, %v10025_v12  ;;  %v10030_v52 = vmul.f32 -1.702, %v15699_v51  ;;  %v15733_v0 = vpop.f32.mrf.mxu1 }
0x105d   : > { %v15701_v55 = vpop.eup %11814  ;;  %v7492_v10 = vadd.f32 1.0, %v11813_v26  ;;  %11840 = vpow2.f32 %v7153_v25  ;;  %v15724_v39 = vadd.f32 %v15651_v14, %v15562_v43  ;;  %v15730_v16 = vmul.f32 %v15617_v19, %v15432_v48 }
0x105e   : > { %v15709_v11 = vpop.eup %11816  ;;  %11842 = vrcp.f32 %v7490_v21  ;;  %v10032_v42 = vmul.f32 -1.702, %v15705_v7  ;;  %v15737_v14 = vadd.f32 %v15661_v57, %v15564_v13  ;;  %v7954_v33 = vpack.c.bf16 %v7842_v31, %v7834_v4 }
0x105f   : > { %v11819_v37 = vpop.eup %11818  ;;  %11844 = vrcp.f32 %v7492_v10  ;;  %v15743_v48 = vmul.f32 %v15623_v40, %v15439_v63  ;;  %v7956_v12 = vpack.c.bf16 %v7844_v46, %v7836_v22  ;;  %v15747_v21 = vmul.f32 %v15631_v50, %v15444_v29  ;;  %v6691_v10 = vpop.f32.mrf.mxu0 }
0x1060   : > { %v11821_v25 = vpop.eup %11820  ;;  %v7373_v41 = vadd.f32 1.0, %v11819_v37  ;;  %11846 = vpow2.f32 %v7157_v6  ;;  %v7169_v6 = vmul.f32 1.442695, %v10030_v52  ;;  %v10031_v57 = vmul.f32 -1.702, %v15724_v39  ;;  %8827 = vmatprep.mubr.bf16.mxu0 %v7954_v33  ;;  %v6804_v22 = vpop.f32.mrf.mxu1 }
0x1061   : > { %v11823_v1 = vpop.eup %11822  ;;  %v7375_v24 = vadd.f32 1.0, %v11821_v25  ;;  %11848 = vpow2.f32 %v7155_v2  ;;  %v15752_v63 = vadd.f32 %v15671_v38, %v15540_v35  ;;  %v15756_v40 = vadd.f32 %v15678_v18, %v15544_v36  ;;  %8940 = vmatprep.mubr.bf16.mxu1 %v7956_v12  ;;  %8828 = vmatmul.mubr.bf16.gmra.mxu0 %v7953_v62 }
0x1062   : > { %v11825_v20 = vpop.eup %11824  ;;  %11850 = vrcp.f32 %v7373_v41  ;;  %v7374_v59 = vadd.f32 1.0, %v11823_v1  ;;  %v10033_v31 = vmul.f32 -1.702, %v15737_v14  ;;  %v15762_v37 = vadd.f32 %v6687_v30, %v15562_v43  ;;  %8941 = vmatmul.mubr.bf16.gmra.mxu1 %v7955_v8  ;;  %v6695_v8 = vpop.f32.mrf.mxu0 }
0x1063   : > { %v15739_v17 = vpop.eup %11826  ;;  %11852 = vrcp.f32 %v7375_v24  ;;  %v7376_v19 = vadd.f32 1.0, %v11825_v20  ;;  %v15766_v38 = vmul.f32 %v15640_v5, %v15449_v32  ;;  %v15770_v18 = vmul.f32 %v15649_v53, %v15456_v23  ;;  %v6808_v5 = vpop.f32.mrf.mxu1 }
0x1064   : > { %v11829_v26 = vpop.eup %11828  ;;  %11854 = vrcp.f32 %v7374_v59  ;;  %v7173_v62 = vmul.f32 1.442695, %v10032_v42  ;;  %v7171_v41 = vmul.f32 1.442695, %v10031_v57  ;;  %v15774_v30 = vadd.f32 %v15707_v9, %v15564_v13  ;;  %v6697_v57 = vpop.f32.mrf.mxu0 }
0x1065   : > { %v11831_v4 = vpop.eup %11830  ;;  %11856 = vrcp.f32 %v7376_v19  ;;  %v7381_v2 = vadd.f32 1.0, %v11829_v26  ;;  %v10038_v32 = vmul.f32 -1.702, %v15752_v63  ;;  %v10040_v23 = vmul.f32 -1.702, %v15756_v40  ;;  %v16791_v26 = vld [vmem:[#allocation42_spill] sm:$0xff] }
0x1066   : > { %v15758_v29 = vpop.eup %11832  ;;  %v7383_v50 = vadd.f32 1.0, %v11831_v4  ;;  %11858 = vpow2.f32 %v7159_v61  ;;  %16790 = vst [vmem:[#allocation77_spill] sm:$0xff] %v15774_v30  ;;  %v7859_v24 = vmul.f32 %v15654_v28, %v15461_v44  ;;  %v7175_v42 = vmul.f32 1.442695, %v10033_v31  ;;  %v16793_v4 = vld [vmem:[#allocation28_spill] sm:$0xff]  ;;  %v6810_v31 = vpop.f32.mrf.mxu1 }
0x1067   : > { %v11835_v46 = vpop.eup %11834  ;;  %11860 = vrcp.f32 %v7381_v2  ;;  %v10039_v20 = vmul.f32 -1.702, %v15762_v37  ;;  %v7961_v59 = vpack.c.bf16 %v15770_v18, %v15730_v16  ;;  %v15789_v19 = vadd.f32 %v15726_v54, %v15540_v35 }
0x1068   : > { %v11837_v25 = vpop.eup %11836  ;;  %11862 = vrcp.f32 %v7383_v50  ;;  %v7382_v61 = vadd.f32 1.0, %v11835_v46  ;;  %v7858_v44 = vmul.f32 %v15663_v3, %v16791_v26  ;;  %v10041_v28 = vmul.f32 -1.702, %v15774_v30 }
0x1069   : > { %v15776_v52 = vpop.eup %11838  ;;  %v7384_v1 = vadd.f32 1.0, %v11837_v25  ;;  %11864 = vpow2.f32 %v7169_v6  ;;  %v15798_v6 = vadd.f32 %v15733_v0, %v15544_v36  ;;  %v7860_v2 = vmul.f32 %v15668_v58, %v16793_v4 }
0x106a   : > { %v11841_v53 = vpop.eup %11840  ;;  %11866 = vrcp.f32 %v7382_v61  ;;  %v7185_v54 = vmul.f32 1.442695, %v10038_v32  ;;  %v7189_v50 = vmul.f32 1.442695, %v10040_v23  ;;  %v7187_v3 = vmul.f32 1.442695, %v10039_v20 }
0x106b   : > { %v15783_v9 = vpop.eup %11842  ;;  %11868 = vrcp.f32 %v7384_v1  ;;  %v7389_v33 = vadd.f32 1.0, %v11841_v53  ;;  %16792 = vst [vmem:[#allocation42_spill] sm:$0xff] %v15798_v6  ;;  %v10046_v61 = vmul.f32 -1.702, %v15789_v19  ;;  %v15809_v1 = vadd.f32 %v6804_v22, %v15564_v13  ;;  %v6812_v22 = vpop.f32.mrf.mxu1 }
0x106c   : > { %v15791_v12 = vpop.eup %11844  ;;  %11870 = vpow2.f32 %v7173_v62  ;;  %v15803_v62 = vadd.f32 %v6691_v10, %v15562_v43  ;;  %v7191_v32 = vmul.f32 1.442695, %v10041_v28  ;;  %v10048_v23 = vmul.f32 -1.702, %v15798_v6 }
0x106d   : > { %v11847_v16 = vpop.eup %11846  ;;  %11872 = vrcp.f32 %v7389_v33  ;;  %v7962_v53 = vpack.c.bf16 %v7858_v44, %v15747_v21  ;;  %v15818_v20 = vadd.f32 %v6695_v8, %v15540_v35  ;;  %v7964_v33 = vpack.c.bf16 %v7860_v2, %v15766_v38 }
0x106e   : > { %v11849_v46 = vpop.eup %11848  ;;  %v7391_v18 = vadd.f32 1.0, %v11847_v16  ;;  %11874 = vpow2.f32 %v7171_v41  ;;  %v6699_v41 = vpop.f32.mrf.mxu0  ;;  %v7963_v28 = vpack.c.bf16 %v7859_v24, %v15743_v48  ;;  %v10047_v16 = vmul.f32 -1.702, %v15803_v62 }
0x106f   : > { %v15805_v25 = vpop.eup %11850  ;;  %v7390_v0 = vadd.f32 1.0, %v11849_v46  ;;  %11876 = vpow2.f32 %v7175_v42  ;;  %16794 = vst [vmem:[#allocation28_spill] sm:$0xff] %v15818_v20  ;;  %v15821_v42 = vadd.f32 %v6808_v5, %v15544_v36  ;;  %8837 = vmatprep.mubr.bf16.mxu0 %v7962_v53  ;;  %v7201_v44 = vmul.f32 1.442695, %v10046_v61  ;;  %8950 = vmatprep.mubr.bf16.mxu1 %v7964_v33 }
0x1070   : > { %v15811_v58 = vpop.eup %11852  ;;  %11878 = vrcp.f32 %v7391_v18  ;;  %v10049_v8 = vmul.f32 -1.702, %v15809_v1  ;;  %8838 = vmatmul.mubr.bf16.gmra.mxu0 %v7961_v59  ;;  %v7205_v38 = vmul.f32 1.442695, %v10048_v23  ;;  %v15832_v2 = vadd.f32 %v6697_v57, %v15562_v43  ;;  %v6701_v48 = vpop.f32.mrf.mxu0  ;;  %8951 = vmatmul.mubr.bf16.gmra.mxu1 %v7963_v28  ;;  %v16799_v57 = vld [vmem:[#allocation66_spill] sm:$0xff] }
0x1071   : > { %v15815_v10 = vpop.eup %11854  ;;  %11880 = vrcp.f32 %v7390_v0  ;;  %16795 = vst [vmem:[#allocation78_spill] sm:$0xff] %v15821_v42  ;;  %v10054_v46 = vmul.f32 -1.702, %v15818_v20  ;;  %v10056_v59 = vmul.f32 -1.702, %v15821_v42  ;;  %v6814_v18 = vpop.f32.mrf.mxu1  ;;  %v15848_v23 = vmul.f32 %v15709_v11, %v16799_v57 }
0x1072   : > { %v15824_v26 = vpop.eup %11856  ;;  %11882 = vpow2.f32 %v7185_v54  ;;  %16796 = vst [vmem:[#allocation79_spill] sm:$0xff] %v15832_v2  ;;  %v16797_v54 = vld [vmem:[#allocation64_spill] sm:$0xff]  ;;  %v7203_v53 = vmul.f32 1.442695, %v10047_v16  ;;  %v15853_v28 = vadd.f32 %v6810_v31, %v15564_v13  ;;  %v10055_v11 = vmul.f32 -1.702, %v15832_v2  ;;  %v6705_v16 = vpop.f32.mrf.mxu0 }
0x1073   : > { %v11859_v21 = vpop.eup %11858  ;;  %11884 = vpow2.f32 %v7189_v50  ;;  %v15838_v50 = vmul.f32 %v15680_v45, %v16797_v54  ;;  %v16801_v54 = vld [vmem:[#allocation67_spill] sm:$0xff]  ;;  %v6818_v31 = vpop.f32.mrf.mxu1  ;;  %v16808_v2 = vld [vmem:[#allocation69_spill] sm:$0xff] }
0x1074   : > { %v15829_v5 = vpop.eup %11860  ;;  %v7392_v4 = vadd.f32 1.0, %v11859_v21  ;;  %11886 = vpow2.f32 %v7187_v3  ;;  %v16798_v3 = vld [vmem:[#allocation65_spill] sm:$0xff]  ;;  %16800 = vst [vmem:[#allocation64_spill] sm:$0xff] %v15853_v28  ;;  %v6707_v30 = vpop.f32.mrf.mxu0 }
0x1075   : > { %v15834_v24 = vpop.eup %11862  ;;  %11888 = vpow2.f32 %v7191_v32  ;;  %v15844_v61 = vmul.f32 %v15701_v55, %v16798_v3  ;;  %v7207_v32 = vmul.f32 1.442695, %v10049_v8  ;;  %v7868_v55 = vmul.f32 %v15739_v17, %v16801_v54  ;;  %v16802_v3 = vld [vmem:[#allocation68_spill] sm:$0xff]  ;;  %v16806_v54 = vld [vmem:[#allocation70_spill] sm:$0xff] }
0x1076   : > { %v11865_v0 = vpop.eup %11864  ;;  %11890 = vrcp.f32 %v7392_v4  ;;  %v7873_v42 = vmul.f32 %v15758_v29, %v16802_v3  ;;  %v15863_v8 = vadd.f32 %v6699_v41, %v15540_v35  ;;  %v15868_v17 = vadd.f32 %v6812_v22, %v15544_v36 }
0x1077   : > { %v15850_v33 = vpop.eup %11866  ;;  %v7397_v45 = vadd.f32 1.0, %v11865_v0  ;;  %11892 = vpow2.f32 %v7201_v44  ;;  %v7217_v0 = vmul.f32 1.442695, %v10054_v46  ;;  %v7221_v44 = vmul.f32 1.442695, %v10056_v59  ;;  %v16807_v46 = vld [vmem:[#allocation71_spill] sm:$0xff] }
0x1078   : > { %v15855_v21 = vpop.eup %11868  ;;  %11894 = vpow2.f32 %v7205_v38  ;;  %16803 = vst [vmem:[#allocation65_spill] sm:$0xff] %v15863_v8  ;;  %16804 = vst [vmem:[#allocation66_spill] sm:$0xff] %v15868_v17  ;;  %v15871_v29 = vadd.f32 %v6701_v48, %v15562_v43  ;;  %v7876_v59 = vmul.f32 %v15791_v12, %v16807_v46  ;;  %v10057_v41 = vmul.f32 -1.702, %v15853_v28  ;;  %v6820_v12 = vpop.f32.mrf.mxu1 }
0x1079   : > { %v11871_v4 = vpop.eup %11870  ;;  %11896 = vrcp.f32 %v7397_v45  ;;  %v7874_v45 = vmul.f32 %v15783_v9, %v16806_v54  ;;  %v10062_v9 = vmul.f32 -1.702, %v15863_v8  ;;  %v15884_v54 = vadd.f32 %v6814_v18, %v15564_v13 }
0x107a   : > { %v15865_v57 = vpop.eup %11872  ;;  %v7399_v20 = vadd.f32 1.0, %v11871_v4  ;;  %11898 = vpow2.f32 %v7203_v53  ;;  %16805 = vst [vmem:[#allocation67_spill] sm:$0xff] %v15871_v29  ;;  %v7875_v53 = vmul.f32 %v15776_v52, %v16808_v2  ;;  %v7219_v4 = vmul.f32 1.442695, %v10055_v11 }
0x107b   : > { %v11875_v38 = vpop.eup %11874  ;;  %11900 = vpow2.f32 %v7207_v32  ;;  %v7969_v46 = vpack.c.bf16 %v7873_v42, %v15838_v50  ;;  %v10064_v52 = vmul.f32 -1.702, %v15868_v17  ;;  %v15892_v11 = vadd.f32 %v6705_v16, %v15540_v35  ;;  %v6709_v42 = vpop.f32.mrf.mxu0 }
0x107c   : > { %v11877_v3 = vpop.eup %11876  ;;  %11902 = vrcp.f32 %v7399_v20  ;;  %v7398_v22 = vadd.f32 1.0, %v11875_v38  ;;  %v10063_v20 = vmul.f32 -1.702, %v15871_v29  ;;  %v7972_v38 = vpack.c.bf16 %v7876_v59, %v7868_v55 }
0x107d   : > { %v15880_v48 = vpop.eup %11878  ;;  %v7400_v6 = vadd.f32 1.0, %v11877_v3  ;;  %11904 = vpow2.f32 %v7217_v0  ;;  %v7970_v0 = vpack.c.bf16 %v7874_v45, %v15848_v23  ;;  %v7971_v3 = vpack.c.bf16 %v7875_v53, %v15844_v61 }
0x107e   : > { %v15886_v32 = vpop.eup %11880  ;;  %11906 = vrcp.f32 %v7398_v22  ;;  %v7223_v8 = vmul.f32 1.442695, %v10057_v41  ;;  %v7233_v17 = vmul.f32 1.442695, %v10062_v9  ;;  %v10065_v29 = vmul.f32 -1.702, %v15884_v54  ;;  %8960 = vmatprep.mubr.bf16.mxu1 %v7972_v38 }
0x107f   : > { %v11883_v2 = vpop.eup %11882  ;;  %11908 = vrcp.f32 %v7400_v6  ;;  %v6822_v6 = vpop.f32.mrf.mxu1  ;;  %8847 = vmatprep.mubr.bf16.mxu0 %v7970_v0  ;;  %v7237_v55 = vmul.f32 1.442695, %v10064_v52  ;;  %v15898_v45 = vadd.f32 %v6818_v31, %v15544_v36  ;;  %8961 = vmatmul.mubr.bf16.gmra.mxu1 %v7971_v3  ;;  %v7235_v59 = vmul.f32 1.442695, %v10063_v20 }
0x1080   : > { %v11885_v18 = vpop.eup %11884  ;;  %v7405_v28 = vadd.f32 1.0, %v11883_v2  ;;  %11910 = vpow2.f32 %v7221_v44  ;;  %8848 = vmatmul.mubr.bf16.gmra.mxu0 %v7969_v46  ;;  %v10070_v41 = vmul.f32 -1.702, %v15892_v11  ;;  %v15912_v31 = vadd.f32 %v6707_v30, %v15562_v43  ;;  %v6711_v46 = vpop.f32.mrf.mxu0 }
0x1081   : > { %v11887_v50 = vpop.eup %11886  ;;  %v7407_v22 = vadd.f32 1.0, %v11885_v18  ;;  %11912 = vpow2.f32 %v7219_v4  ;;  %16809 = vst [vmem:[#allocation68_spill] sm:$0xff] %v15898_v45  ;;  %v16810_v4 = vld [vmem:[#allocation72_spill] sm:$0xff]  ;;  %v7758_v20 = vmul.f32 %v15815_v10, %v15583_v34  ;;  %v7239_v38 = vmul.f32 1.442695, %v10065_v29  ;;  %v6824_v18 = vpop.f32.mrf.mxu1 }
0x1082   : > { %v11889_v16 = vpop.eup %11888  ;;  %11914 = vrcp.f32 %v7405_v28  ;;  %v7406_v23 = vadd.f32 1.0, %v11887_v50  ;;  %v15905_v9 = vmul.f32 %v15805_v25, %v16810_v4  ;;  %v16811_v28 = vld [vmem:[#allocation73_spill] sm:$0xff]  ;;  %v7760_v25 = vmul.f32 %v15824_v26, %v15589_v56  ;;  %v16814_v4 = vld [vmem:[#allocation76_spill] sm:$0xff] }
0x1083   : > { %v15900_v61 = vpop.eup %11890  ;;  %11916 = vrcp.f32 %v7407_v22  ;;  %v7408_v44 = vadd.f32 1.0, %v11889_v16  ;;  %v15909_v52 = vmul.f32 %v15811_v58, %v16811_v28  ;;  %v10072_v50 = vmul.f32 -1.702, %v15898_v45  ;;  %v16812_v22 = vld [vmem:[#allocation74_spill] sm:$0xff] }
0x1084   : > { %v11893_v53 = vpop.eup %11892  ;;  %11918 = vrcp.f32 %v7406_v23  ;;  %v7765_v16 = vmul.f32 %v15829_v5, %v16812_v22  ;;  %v15923_v23 = vmul.f32 1.442695, %v10070_v41  ;;  %v15926_v34 = vadd.f32 %v6820_v12, %v15564_v13  ;;  %v6828_v12 = vpop.f32.mrf.mxu1 }
0x1085   : > { %v11895_v2 = vpop.eup %11894  ;;  %11920 = vrcp.f32 %v7408_v44  ;;  %v7413_v0 = vadd.f32 1.0, %v11893_v53  ;;  %v7766_v29 = vmul.f32 %v15850_v33, %v15615_v27  ;;  %v10071_v26 = vmul.f32 -1.702, %v15912_v31  ;;  %v16813_v53 = vld [vmem:[#allocation75_spill] sm:$0xff] }
0x1086   : > { %v15916_v3 = vpop.eup %11896  ;;  %v7415_v58 = vadd.f32 1.0, %v11895_v2  ;;  %11922 = vpow2.f32 %v7223_v8  ;;  %v6715_v8 = vpop.f32.mrf.mxu0  ;;  %v7767_v5 = vmul.f32 %v15834_v24, %v16813_v53  ;;  %v7768_v41 = vmul.f32 %v15855_v21, %v16814_v4 }
0x1087   : > { %v11899_v30 = vpop.eup %11898  ;;  %11924 = vrcp.f32 %v7413_v0  ;;  %v7253_v0 = vmul.f32 1.442695, %v10072_v50  ;;  %v15938_v27 = vadd.f32 %v6709_v42, %v15540_v35  ;;  %v15941_v33 = vadd.f32 %v6822_v6, %v15544_v36  ;;  %v6830_v4 = vpop.f32.mrf.mxu1 }
0x1088   : > { %v11901_v10 = vpop.eup %11900  ;;  %11926 = vrcp.f32 %v7415_v58  ;;  %v7414_v56 = vadd.f32 1.0, %v11899_v30  ;;  %v15946_v24 = vadd.f32 %v6711_v46, %v15562_v43  ;;  %v15949_v21 = vadd.f32 %v6824_v18, %v15564_v13  ;;  %v6717_v22 = vpop.f32.mrf.mxu0 }
0x1089   : > { %v15931_v44 = vpop.eup %11902  ;;  %v7416_v28 = vadd.f32 1.0, %v11901_v10  ;;  %11928 = vpow2.f32 %v7233_v17  ;;  %v7917_v50 = vpack.c.bf16 %v7765_v16, %v15905_v9  ;;  %v10073_v42 = vmul.f32 -1.702, %v15926_v34 }
0x108a   : > { %v11905_v2 = vpop.eup %11904  ;;  %11930 = vrcp.f32 %v7414_v56  ;;  %v7918_v6 = vpack.c.bf16 %v7766_v29, %v7758_v20  ;;  %v7919_v56 = vpack.c.bf16 %v7767_v5, %v15909_v52  ;;  %v7251_v53 = vmul.f32 1.442695, %v10071_v26  ;;  %v6719_v26 = vpop.f32.mrf.mxu0 }
0x108b   : > { %v15943_v58 = vpop.eup %11906  ;;  %11932 = vrcp.f32 %v7416_v28  ;;  %v7421_v30 = vadd.f32 1.0, %v11905_v2  ;;  %v7920_v46 = vpack.c.bf16 %v7768_v41, %v7760_v25  ;;  %v10078_v18 = vmul.f32 -1.702, %v15938_v27 }
0x108c   : > { %v15951_v17 = vpop.eup %11908  ;;  %11934 = vpow2.f32 %v7237_v55  ;;  %v10080_v45 = vmul.f32 -1.702, %v15941_v33  ;;  %9003 = vmatprep.mubr.bf16.mxu0 %v7918_v6  ;;  %v10079_v20 = vmul.f32 -1.702, %v15946_v24  ;;  %v10081_v52 = vmul.f32 -1.702, %v15949_v21 }
0x108d   : > { %v11911_v10 = vpop.eup %11910  ;;  %11936 = vrcp.f32 %v7421_v30  ;;  %9116 = vmatprep.mubr.bf16.mxu1 %v7920_v46  ;;  %9004 = vmatmul.mubr.bf16.vlgmr.msra.gmra.mxu0 %v7917_v50  ;;  %v7255_v25 = vmul.f32 1.442695, %v10073_v42  ;;  %v15968_v29 = vadd.f32 %v6828_v12, %v15544_v36  ;;  %v15977_v41 = vadd.f32 %v6717_v22, %v15562_v43 }
0x108e   : > { %v11913_v28 = vpop.eup %11912  ;;  %v7423_v2 = vadd.f32 1.0, %v11911_v10  ;;  %11938 = vpow2.f32 %v7235_v59  ;;  %v15965_v59 = vadd.f32 %v6715_v8, %v15540_v35  ;;  %9117 = vmatmul.mubr.bf16.vlgmr.msra.gmra.mxu1 %v7919_v56  ;;  %v15980_v30 = vadd.f32 %v6830_v4, %v15564_v13  ;;  %v6832_v8 = vpop.f32.mrf.mxu1 }
0x108f   : > { %v15958_v55 = vpop.eup %11914  ;;  %v7422_v9 = vadd.f32 1.0, %v11913_v28  ;;  %11940 = vpow2.f32 %v7239_v38  ;;  %16815 = vst [vmem:[#allocation70_spill] sm:$0xff] %v15968_v29  ;;  %v15974_v38 = vmul.f32 %v15865_v57, %v15636_v15  ;;  %v15986_v12 = vmul.f32 %v15880_v48, %v15647_v49  ;;  %v6721_v48 = vpop.f32.mrf.mxu0 }
0x1090   : > { %v15962_v16 = vpop.eup %11916  ;;  %11942 = vrcp.f32 %v7423_v2  ;;  %v7265_v42 = vmul.f32 1.442695, %v10078_v18  ;;  %v7269_v6 = vmul.f32 1.442695, %v10080_v45  ;;  %v7774_v57 = vmul.f32 %v15886_v32, %v15659_v47  ;;  %v6834_v32 = vpop.f32.mrf.mxu1 }
0x1091   : > { %v15970_v5 = vpop.eup %11918  ;;  %11944 = vrcp.f32 %v7422_v9  ;;  %v7267_v22 = vmul.f32 1.442695, %v10079_v20  ;;  %v7271_v10 = vmul.f32 1.442695, %v10081_v52  ;;  %v10086_v46 = vmul.f32 -1.702, %v15965_v59 }
0x1092   : > { %v15982_v50 = vpop.eup %11920  ;;  %11946 = vpow2.f32 %v15923_v23  ;;  %v10088_v49 = vmul.f32 -1.702, %v15968_v29  ;;  %v10087_v45 = vmul.f32 -1.702, %v15977_v41  ;;  %v10089_v23 = vmul.f32 -1.702, %v15980_v30 }
0x1093   : > { %v11923_v15 = vpop.eup %11922  ;;  %11948 = vpow2.f32 %v7253_v0  ;;  %v16000_v47 = vadd.f32 %v6719_v26, %v15540_v35  ;;  %v7782_v2 = vmul.f32 %v15943_v58, %v15724_v39  ;;  %v16007_v18 = vadd.f32 %v6832_v8, %v15544_v36  ;;  %v6725_v58 = vpop.f32.mrf.mxu0 }
0x1094   : > { %v15991_v56 = vpop.eup %11924  ;;  %v7424_v4 = vadd.f32 1.0, %v11923_v15  ;;  %11950 = vpow2.f32 %v7251_v53  ;;  %v7781_v53 = vmul.f32 %v15916_v3, %v15699_v51  ;;  %v7784_v20 = vmul.f32 %v15951_v17, %v15737_v14  ;;  %v6838_v15 = vpop.f32.mrf.mxu1 }
0x1095   : > { %v15995_v28 = vpop.eup %11926  ;;  %11952 = vpow2.f32 %v7255_v25  ;;  %v16014_v25 = vadd.f32 %v6721_v48, %v15562_v43  ;;  %v7776_v51 = vmul.f32 %v15900_v61, %v15666_v60  ;;  %v7783_v39 = vmul.f32 %v15931_v44, %v15705_v7  ;;  %v6727_v29 = vpop.f32.mrf.mxu0 }
0x1096   : > { %v11929_v0 = vpop.eup %11928  ;;  %11954 = vrcp.f32 %v7424_v4  ;;  %v16023_v3 = vadd.f32 %v6834_v32, %v15564_v13  ;;  %v7281_v14 = vmul.f32 1.442695, %v10086_v46  ;;  %v7285_v17 = vmul.f32 1.442695, %v10088_v49 }
0x1097   : > { %v16009_v9 = vpop.eup %11930  ;;  %v7429_v52 = vadd.f32 1.0, %v11929_v0  ;;  %11956 = vpow2.f32 %v7265_v42  ;;  %v10094_v42 = vmul.f32 -1.702, %v16000_v47  ;;  %v10096_v60 = vmul.f32 -1.702, %v16007_v18 }
0x1098   : > { %v16016_v26 = vpop.eup %11932  ;;  %11958 = vpow2.f32 %v7269_v6  ;;  %v7926_v61 = vpack.c.bf16 %v7782_v2, %v7774_v57  ;;  %v7925_v44 = vpack.c.bf16 %v7781_v53, %v15974_v38  ;;  %v10095_v6 = vmul.f32 -1.702, %v16014_v25 }
0x1099   : > { %v11935_v8 = vpop.eup %11934  ;;  %11960 = vrcp.f32 %v7429_v52  ;;  %v7928_v32 = vpack.c.bf16 %v7784_v20, %v7776_v51  ;;  %v7927_v46 = vpack.c.bf16 %v7783_v39, %v15986_v12  ;;  %v10097_v52 = vmul.f32 -1.702, %v16023_v3 }
0x109a   : > { %v16026_v4 = vpop.eup %11936  ;;  %v7431_v48 = vadd.f32 1.0, %v11935_v8  ;;  %11962 = vpow2.f32 %v7267_v22  ;;  %9013 = vmatprep.mubr.bf16.mxu0 %v7926_v61  ;;  %v7283_v57 = vmul.f32 1.442695, %v10087_v45  ;;  %v16036_v38 = vadd.f32 %v6725_v58, %v15540_v35 }
0x109b   : > { %v11939_v7 = vpop.eup %11938  ;;  %11964 = vpow2.f32 %v7271_v10  ;;  %v6840_v10 = vpop.f32.mrf.mxu1  ;;  %9126 = vmatprep.mubr.bf16.mxu1 %v7928_v32  ;;  %9014 = vmatmul.mubr.bf16.gmra.mxu0 %v7925_v44  ;;  %v7287_v12 = vmul.f32 1.442695, %v10089_v23  ;;  %v7297_v2 = vmul.f32 1.442695, %v10094_v42  ;;  %v16041_v20 = vadd.f32 %v6838_v15, %v15544_v36 }
0x109c   : > { %v11941_v0 = vpop.eup %11940  ;;  %11966 = vrcp.f32 %v7431_v48  ;;  %v7430_v49 = vadd.f32 1.0, %v11939_v7  ;;  %9127 = vmatmul.mubr.bf16.gmra.mxu1 %v7927_v46  ;;  %v16043_v39 = vmul.f32 1.442695, %v10096_v60  ;;  %v16045_v45 = vmul.f32 1.442695, %v10095_v6 }
0x109d   : > { %v16033_v22 = vpop.eup %11942  ;;  %v7432_v8 = vadd.f32 1.0, %v11941_v0  ;;  %11968 = vpow2.f32 %v7281_v14  ;;  %v16048_v58 = vadd.f32 %v6727_v29, %v15562_v43  ;;  %v16050_v61 = vmul.f32 1.442695, %v10097_v52 }
0x109e   : > { %v16038_v53 = vpop.eup %11944  ;;  %11970 = vrcp.f32 %v7430_v49  ;;  %v16053_v23 = vadd.f32 %v6840_v10, %v15564_v13  ;;  %v7789_v15 = vmul.f32 %v15958_v55, %v15752_v63  ;;  %v10102_v60 = vmul.f32 -1.702, %v16036_v38  ;;  %v6729_v55 = vpop.f32.mrf.mxu0 }
0x109f   : > { %v11947_v51 = vpop.eup %11946  ;;  %11972 = vrcp.f32 %v7432_v8  ;;  %v7791_v29 = vmul.f32 %v15962_v16, %v15756_v40  ;;  %v7798_v0 = vmul.f32 %v16009_v9, %v15803_v62  ;;  %v10103_v63 = vmul.f32 -1.702, %v16048_v58  ;;  %v6842_v49 = vpop.f32.mrf.mxu1  ;;  %v16816_v9 = vld [vmem:[#allocation42_spill] sm:$0xff] }
0x10a0   : > { %v11949_v14 = vpop.eup %11948  ;;  %v7437_v48 = vadd.f32 1.0, %v11947_v51  ;;  %11974 = vpow2.f32 %v7285_v17  ;;  %v10104_v17 = vmul.f32 -1.702, %v16041_v20  ;;  %v7797_v8 = vmul.f32 %v15991_v56, %v15789_v19 }
0x10a1   : > { %v11951_v42 = vpop.eup %11950  ;;  %v7439_v7 = vadd.f32 1.0, %v11949_v14  ;;  %11976 = vpow2.f32 %v7283_v57  ;;  %v7800_v40 = vmul.f32 %v16016_v26, %v15809_v1  ;;  %v16069_v16 = vmul.f32 -1.702, %v16053_v23 }
0x10a2   : > { %v11953_v44 = vpop.eup %11952  ;;  %11978 = vrcp.f32 %v7437_v48  ;;  %v7438_v6 = vadd.f32 1.0, %v11951_v42  ;;  %v7790_v62 = vmul.f32 %v15970_v5, %v15762_v37  ;;  %v7799_v10 = vmul.f32 %v15995_v28, %v16816_v9  ;;  %v16817_v48 = vld [vmem:[#allocation77_spill] sm:$0xff]  ;;  %v6731_v37 = vpop.f32.mrf.mxu0 }
0x10a3   : > { %v11955_v32 = vpop.eup %11954  ;;  %11980 = vrcp.f32 %v7439_v7  ;;  %v7440_v46 = vadd.f32 1.0, %v11953_v44  ;;  %v7792_v19 = vmul.f32 %v15982_v50, %v16817_v48  ;;  %v16077_v1 = vmul.f32 1.442695, %v10102_v60  ;;  %v6844_v5 = vpop.f32.mrf.mxu1 }
0x10a4   : > { %v11957_v52 = vpop.eup %11956  ;;  %11982 = vrcp.f32 %v7438_v6  ;;  %v16079_v42 = vmul.f32 1.442695, %v10104_v17  ;;  %v16082_v7 = vadd.f32 %v6729_v55, %v15540_v35  ;;  %v7934_v28 = vpack.c.bf16 %v7798_v0, %v7790_v62  ;;  %v16819_v62 = vld [vmem:[#allocation79_spill] sm:$0xff] }
0x10a5   : > { %v11959_v57 = vpop.eup %11958  ;;  %11984 = vrcp.f32 %v7440_v46  ;;  %v7445_v51 = vadd.f32 1.0, %v11957_v52  ;;  %v7933_v6 = vpack.c.bf16 %v7797_v8, %v7789_v15  ;;  %v7936_v52 = vpack.c.bf16 %v7800_v40, %v7792_v19  ;;  %v16818_v8 = vld [vmem:[#allocation28_spill] sm:$0xff]  ;;  %v6735_v40 = vpop.f32.mrf.mxu0  ;;  %v16821_v19 = vld [vmem:[#allocation67_spill] sm:$0xff] }
0x10a6   : > { %v11961_v14 = vpop.eup %11960  ;;  %v7447_v56 = vadd.f32 1.0, %v11959_v57  ;;  %11986 = vpow2.f32 %v7287_v12  ;;  %v7935_v57 = vpack.c.bf16 %v7799_v10, %v7791_v29  ;;  %v7315_v60 = vmul.f32 1.442695, %v10103_v63  ;;  %9023 = vmatprep.mubr.bf16.mxu0 %v7934_v28 }
0x10a7   : > { %v11963_v26 = vpop.eup %11962  ;;  %11988 = vrcp.f32 %v7445_v51  ;;  %v16085_v17 = vadd.f32 %v6842_v49, %v15544_v36  ;;  %v16088_v55 = vadd.f32 %v6731_v37, %v15562_v43  ;;  %v16091_v0 = vadd.f32 %v6844_v5, %v15564_v13  ;;  %9136 = vmatprep.mubr.bf16.mxu1 %v7936_v52  ;;  %9024 = vmatmul.mubr.bf16.gmra.mxu0 %v7933_v6  ;;  %v16820_v51 = vld [vmem:[#allocation65_spill] sm:$0xff]  ;;  %v16822_v37 = vld [vmem:[#allocation64_spill] sm:$0xff] }
0x10a8   : > { %v11965_v44 = vpop.eup %11964  ;;  %11990 = vrcp.f32 %v7447_v56  ;;  %v7446_v46 = vadd.f32 1.0, %v11963_v26  ;;  %v7805_v29 = vmul.f32 %v16026_v4, %v16818_v8  ;;  %v10110_v63 = vmul.f32 -1.702, %v16082_v7  ;;  %9137 = vmatmul.mubr.bf16.gmra.mxu1 %v7935_v57  ;;  %v16823_v4 = vld [vmem:[#allocation66_spill] sm:$0xff]  ;;  %v6737_v8 = vpop.f32.mrf.mxu0 }
0x10a9   : > { %v11967_v50 = vpop.eup %11966  ;;  %v7448_v12 = vadd.f32 1.0, %v11965_v44  ;;  %11992 = vpow2.f32 %v7297_v2  ;;  %v7806_v10 = vmul.f32 %v16038_v53, %v16819_v62  ;;  %v7813_v48 = vmul.f32 %v11961_v14, %v16820_v51  ;;  %v6848_v14 = vpop.f32.mrf.mxu1 }
0x10aa   : > { %v11969_v9 = vpop.eup %11968  ;;  %11994 = vrcp.f32 %v7446_v46  ;;  %v7808_v5 = vmul.f32 %v11955_v32, %v16822_v37  ;;  %v7815_v28 = vmul.f32 %v11967_v50, %v16823_v4  ;;  %v16106_v53 = vadd.f32 %v6735_v40, %v15540_v35  ;;  %v6739_v4 = vpop.f32.mrf.mxu0 }
0x10ab   : > { %v11971_v15 = vpop.eup %11970  ;;  %11996 = vrcp.f32 %v7448_v12  ;;  %v7453_v2 = vadd.f32 1.0, %v11969_v9  ;;  %v16824_v12 = vld [vmem:[#allocation78_spill] sm:$0xff]  ;;  %v7329_v51 = vmul.f32 1.442695, %v10110_v63 }
0x10ac   : > { %v11973_v49 = vpop.eup %11972  ;;  %v7814_v56 = vmul.f32 %v11971_v15, %v16821_v19  ;;  %11998 = vpow2.f32 %v16043_v39  ;;  %v7807_v39 = vmul.f32 %v16033_v22, %v16824_v12  ;;  %v7319_v15 = vmul.f32 1.442695, %v16069_v16  ;;  %v6850_v16 = vpop.f32.mrf.mxu1 }
0x10ad   : > { %v11975_v26 = vpop.eup %11974  ;;  %v7816_v44 = vmul.f32 %v11973_v49, %v15884_v54  ;;  %12000 = vrcp.f32 %v7453_v2  ;;  %v7941_v54 = vpack.c.bf16 %v7813_v48, %v7805_v29  ;;  %v10111_v49 = vmul.f32 -1.702, %v16088_v55 }
0x10ae   : > { %v11977_v6 = vpop.eup %11976  ;;  %v7455_v46 = vadd.f32 1.0, %v11975_v26  ;;  %12002 = vpow2.f32 %v16045_v45  ;;  %v7942_v52 = vpack.c.bf16 %v7814_v56, %v7806_v10  ;;  %v10112_v45 = vmul.f32 -1.702, %v16085_v17  ;;  %v6852_v63 = vpop.f32.mrf.mxu1 }
0x10af   : > { %v11979_v57 = vpop.eup %11978  ;;  %v7454_v9 = vadd.f32 1.0, %v11977_v6  ;;  %12004 = vpow2.f32 %v16050_v61  ;;  %v7944_v32 = vpack.c.bf16 %v7816_v44, %v7808_v5  ;;  %v7943_v40 = vpack.c.bf16 %v7815_v28, %v7807_v39 }
0x10b0   : > { %v11981_v50 = vpop.eup %11980  ;;  %12006 = vrcp.f32 %v7455_v46  ;;  %9033 = vmatprep.mubr.bf16.mxu0 %v7942_v52  ;;  %v10113_v22 = vmul.f32 -1.702, %v16091_v0  ;;  %v10118_v61 = vmul.f32 -1.702, %v16106_v53  ;;  %v16118_v29 = vadd.f32 %v6848_v14, %v15544_v36 }
0x10b1   : > { %v11983_v2 = vpop.eup %11982  ;;  %12008 = vrcp.f32 %v7454_v9  ;;  %9146 = vmatprep.mubr.bf16.mxu1 %v7944_v32  ;;  %9034 = vmatmul.mubr.bf16.gmra.mxu0 %v7941_v54  ;;  %v16122_v48 = vadd.f32 %v6737_v8, %v15562_v43  ;;  %v7333_v26 = vmul.f32 1.442695, %v10112_v45  ;;  %v7331_v37 = vmul.f32 1.442695, %v10111_v49  ;;  %v16825_v49 = vld [vmem:[#allocation68_spill] sm:$0xff] }
0x10b2   : > { %v11985_v62 = vpop.eup %11984  ;;  %12010 = vpow2.f32 %v16077_v1  ;;  %9147 = vmatmul.mubr.bf16.gmra.mxu1 %v7943_v40  ;;  %v7335_v5 = vmul.f32 1.442695, %v10113_v22  ;;  %v7345_v44 = vmul.f32 1.442695, %v10118_v61  ;;  %v10120_v6 = vmul.f32 -1.702, %v16118_v29 }
0x10b3   : > { %v11987_v10 = vpop.eup %11986  ;;  %12012 = vpow2.f32 %v16079_v42  ;;  %v16126_v42 = vadd.f32 %v6850_v16, %v15564_v13  ;;  %v7822_v39 = vmul.f32 %v11983_v2, %v15912_v31  ;;  %v7824_v45 = vmul.f32 %v11985_v62, %v15926_v34  ;;  %v6854_v31 = vpop.f32.mrf.mxu1 }
0x10b4   : > { %v11989_v19 = vpop.eup %11988  ;;  %v7456_v56 = vadd.f32 1.0, %v11987_v10  ;;  %12014 = vpow2.f32 %v7315_v60  ;;  %v10119_v60 = vmul.f32 -1.702, %v16122_v48  ;;  %v7823_v22 = vmul.f32 %v11981_v50, %v16825_v49 }
0x10b5   : > { %v11991_v1 = vpop.eup %11990  ;;  %12016 = vpow2.f32 %v7319_v15  ;;  %v7829_v14 = vmul.f32 %v11989_v19, %v15938_v27  ;;  %v7821_v15 = vmul.f32 %v11979_v57, %v15892_v11  ;;  %v6741_v27 = vpop.f32.mrf.mxu0  ;;  %v7349_v57 = vmul.f32 1.442695, %v10120_v6 }
0x10b6   : > { %v11993_v28 = vpop.eup %11992  ;;  %12018 = vrcp.f32 %v7456_v56  ;;  %v7831_v9 = vmul.f32 %v11991_v1, %v15941_v33  ;;  %v7347_v19 = vmul.f32 1.442695, %v10119_v60  ;;  %v16146_v56 = vadd.f32 %v6739_v4, %v15540_v35 }
0x10b7   : > { %v11995_v46 = vpop.eup %11994  ;;  %v7461_v52 = vadd.f32 1.0, %v11993_v28  ;;  %12020 = vpow2.f32 %v7329_v51  ;;  %v16158_v35 = vadd.f32 %v6852_v63, %v15544_v36 }
0x10b8   : > { %v11997_v12 = vpop.eup %11996  ;;  %v7830_v32 = vmul.f32 %v11995_v46, %v15946_v24  ;;  %12022 = vpow2.f32 %v7333_v26  ;;  %v7949_v24 = vpack.c.bf16 %v7829_v14, %v7821_v15  ;;  %v7951_v34 = vpack.c.bf16 %v7831_v9, %v7823_v22 }
0x10b9   : > { %v11999_v54 = vpop.eup %11998  ;;  %v7832_v8 = vmul.f32 %v11997_v12, %v15949_v21  ;;  %12024 = vrcp.f32 %v7461_v52  ;;  %v10126_v60 = vmul.f32 -1.702, %v16146_v56  ;;  %v10128_v22 = vmul.f32 -1.702, %v16158_v35 }
0x10ba   : > { %v16136_v40 = vpop.eup %12000  ;;  %v7463_v61 = vadd.f32 1.0, %v11999_v54  ;;  %12026 = vpow2.f32 %v7331_v37  ;;  %v7950_v33 = vpack.c.bf16 %v7830_v32, %v7822_v39  ;;  %v10121_v37 = vmul.f32 -1.702, %v16126_v42 }
0x10bb   : > { %v12003_v2 = vpop.eup %12002  ;;  %12028 = vpow2.f32 %v7335_v5  ;;  %v7952_v16 = vpack.c.bf16 %v7832_v8, %v7824_v45  ;;  %v16139_v10 = vpop.f32.mrf.mxu0  ;;  %v16166_v54 = vadd.f32 %v6741_v27, %v15562_v43  ;;  %v16171_v45 = vadd.f32 %v6854_v31, %v15564_v13 }
0x10bc   : > { %v12005_v11 = vpop.eup %12004  ;;  %12030 = vrcp.f32 %v7463_v61  ;;  %v7462_v21 = vadd.f32 1.0, %v12003_v2  ;;  %9043 = vmatprep.mubr.bf16.mxu0 %v7950_v33  ;;  %v16141_v62 = vpop.f32.mrf.mxu1  ;;  %v7351_v32 = vmul.f32 1.442695, %v10121_v37 }
0x10bd   : > { %v16143_v51 = vpop.eup %12006  ;;  %v7464_v50 = vadd.f32 1.0, %v12005_v11  ;;  %12032 = vpow2.f32 %v7345_v44  ;;  %9156 = vmatprep.mubr.bf16.mxu1 %v7952_v16  ;;  %9044 = vmatmul.mubr.bf16.gmra.mxu0 %v7949_v24  ;;  %v16148_v26 = vpop.f32.mrf.mxu0  ;;  %v7361_v24 = vmul.f32 1.442695, %v10126_v60 }
0x10be   : > { %v16150_v1 = vpop.eup %12008  ;;  %12034 = vrcp.f32 %v7462_v21  ;;  %9157 = vmatmul.mubr.bf16.gmra.mxu1 %v7951_v34  ;;  %v16153_v5 = vpop.f32.mrf.mxu1  ;;  %v10127_v34 = vmul.f32 -1.702, %v16166_v54  ;;  %v10129_v21 = vmul.f32 -1.702, %v16171_v45 }
0x10bf   : > { %v12011_v28 = vpop.eup %12010  ;;  %12036 = vrcp.f32 %v7464_v50  ;;  %v16155_v6 = vpop.f32.mrf.mxu0 }
0x10c0   : > { %v12013_v44 = vpop.eup %12012  ;;  %v7469_v46 = vadd.f32 1.0, %v12011_v28  ;;  %12038 = vpow2.f32 %v7349_v57  ;;  %v16160_v4 = vpop.f32.mrf.mxu1  ;;  %v7365_v28 = vmul.f32 1.442695, %v10128_v22  ;;  %v7838_v22 = vmul.f32 %v16150_v1, %v15977_v41 }
0x10c1   : > { %v12015_v14 = vpop.eup %12014  ;;  %v7471_v52 = vadd.f32 1.0, %v12013_v44  ;;  %12040 = vpow2.f32 %v7347_v19  ;;  %v16163_v12 = vpop.f32.mrf.mxu0 }
0x10c2   : > { %v12017_v39 = vpop.eup %12016  ;;  %12042 = vrcp.f32 %v7469_v46  ;;  %v7470_v9 = vadd.f32 1.0, %v12015_v14  ;;  %v16168_v15 = vpop.f32.mrf.mxu1 }
0x10c3   : > { %v12019_v36 = vpop.eup %12018  ;;  %12044 = vrcp.f32 %v7471_v52  ;;  %v7472_v63 = vadd.f32 1.0, %v12017_v39  ;;  %v8789_v8 = vpop.f32.mrf.mxu0 }
0x10c4   : > { %v12021_v49 = vpop.eup %12020  ;;  %12046 = vrcp.f32 %v7470_v9  ;;  %v8902_v61 = vpop.f32.mrf.mxu1  ;;  %v7363_v9 = vmul.f32 1.442695, %v10127_v34  ;;  %v7840_v34 = vmul.f32 %v12019_v36, %v15980_v30 }
0x10c5   : > { %v12023_v33 = vpop.eup %12022  ;;  %12048 = vrcp.f32 %v7472_v63  ;;  %v7477_v2 = vadd.f32 1.0, %v12021_v49  ;;  %v16174_v43 = vadd.f32 %v8902_v61, %v8789_v8  ;;  %v8791_v27 = vpop.f32.mrf.mxu0  ;;  %v7367_v49 = vmul.f32 1.442695, %v10129_v21 }
0x10c6   : > { %v12025_v16 = vpop.eup %12024  ;;  %v7479_v11 = vadd.f32 1.0, %v12023_v33  ;;  %12050 = vpow2.f32 %v7351_v32  ;;  %v8904_v13 = vpop.f32.mrf.mxu1 }
0x10c7   : > { %v12027_v31 = vpop.eup %12026  ;;  %12052 = vrcp.f32 %v7477_v2  ;;  %v16178_v57 = vadd.f32 %v8904_v13, %v8791_v27  ;;  %v8793_v50 = vpop.f32.mrf.mxu0  ;;  %v7845_v8 = vmul.f32 %v12025_v16, %v16000_v47  ;;  %v16826_v13 = vld [vmem:[#allocation70_spill] sm:$0xff] }
0x10c8   : > { %v12029_v19 = vpop.eup %12028  ;;  %12054 = vrcp.f32 %v7479_v11  ;;  %v7478_v37 = vadd.f32 1.0, %v12027_v31  ;;  %v8906_v44 = vpop.f32.mrf.mxu1  ;;  %v7837_v11 = vmul.f32 %v16136_v40, %v15965_v59  ;;  %v7839_v31 = vmul.f32 %v16143_v51, %v16826_v13 }
0x10c9   : > { %v12031_v46 = vpop.eup %12030  ;;  %v7480_v14 = vadd.f32 1.0, %v12029_v19  ;;  %12056 = vpow2.f32 %v7361_v24  ;;  %v16180_v52 = vadd.f32 %v8906_v44, %v8793_v50  ;;  %v8795_v60 = vpop.f32.mrf.mxu0 }
0x10ca   : > { %v12033_v39 = vpop.eup %12032  ;;  %12058 = vrcp.f32 %v7478_v37  ;;  %v8908_v32 = vpop.f32.mrf.mxu1  ;;  %v7847_v2 = vmul.f32 %v12031_v46, %v16007_v18  ;;  %v7957_v1 = vpack.c.bf16 %v7845_v8, %v7837_v11 }
0x10cb   : > { %v12035_v63 = vpop.eup %12034  ;;  %12060 = vrcp.f32 %v7480_v14  ;;  %v16183_v61 = vadd.f32 %v8908_v32, %v8795_v60 }
0x10cc   : > { %v12037_v33 = vpop.eup %12036  ;;  %v7846_v24 = vmul.f32 %v12035_v63, %v16014_v25  ;;  %12062 = vpow2.f32 %v7365_v28  ;;  %v7959_v50 = vpack.c.bf16 %v7847_v2, %v7839_v31 }
0x10cd   : > { %v12039_v27 = vpop.eup %12038  ;;  %v7848_v47 = vmul.f32 %v12037_v33, %v16023_v3  ;;  %12064 = vpow2.f32 %v7363_v9  ;;  %v7485_v3 = vadd.f32 1.0, %v12033_v39 }
0x10ce   : > { %v12041_v16 = vpop.eup %12040  ;;  %v7958_v21 = vpack.c.bf16 %v7846_v24, %v7838_v22  ;;  %12066 = vpow2.f32 %v7367_v49  ;;  %v7487_v37 = vadd.f32 1.0, %v12039_v27 }
0x10cf   : > { %v12043_v41 = vpop.eup %12042  ;;  %v7960_v18 = vpack.c.bf16 %v7848_v47, %v7840_v34  ;;  %v7486_v28 = vadd.f32 1.0, %v12041_v16  ;;  %12068 = vrcp.f32 %v7485_v3 }
0x10d0   : > { %v12045_v25 = vpop.eup %12044  ;;  %9053 = vmatprep.mubr.bf16.mxu0 %v7958_v21  ;;  %v7853_v9 = vmul.f32 %v12043_v41, %v16036_v38  ;;  %12070 = vrcp.f32 %v7487_v37 }
0x10d1   : > { %v12047_v19 = vpop.eup %12046  ;;  %9166 = vmatprep.mubr.bf16.mxu1 %v7960_v18  ;;  %9054 = vmatmul.mubr.bf16.gmra.mxu0 %v7957_v1  ;;  %12072 = vrcp.f32 %v7486_v28 }
0x10d2   : > { %v12049_v59 = vpop.eup %12048  ;;  %9167 = vmatmul.mubr.bf16.gmra.mxu1 %v7959_v50  ;;  %v7854_v32 = vmul.f32 %v12047_v19, %v16048_v58 }
0x10d3   : > { %v12051_v30 = vpop.eup %12050  ;;  %v7856_v49 = vmul.f32 %v12049_v59, %v16053_v23 }
0x10d4   : > { %v12053_v40 = vpop.eup %12052  ;;  %v7488_v22 = vadd.f32 1.0, %v12051_v30 }
0x10d5   : > { %v12055_v36 = vpop.eup %12054  ;;  %v7861_v46 = vmul.f32 %v12053_v40, %v16082_v7  ;;  %v7855_v7 = vmul.f32 %v12045_v25, %v16041_v20 }
0x10d6   : > { %v12057_v51 = vpop.eup %12056  ;;  %v7863_v63 = vmul.f32 %v12055_v36, %v16085_v17 }
0x10d7   : > { %v12059_v44 = vpop.eup %12058  ;;  %v7493_v14 = vadd.f32 1.0, %v12057_v51  ;;  %v7965_v38 = vpack.c.bf16 %v7861_v46, %v7853_v9 }
0x10d8   : > { %v12061_v60 = vpop.eup %12060  ;;  %v7862_v8 = vmul.f32 %v12059_v44, %v16088_v55  ;;  %v7967_v34 = vpack.c.bf16 %v7863_v63, %v7855_v7 }
0x10d9   : > { %v12063_v39 = vpop.eup %12062  ;;  %v7864_v33 = vmul.f32 %v12061_v60, %v16091_v0  ;;  %12074 = vrcp.f32 %v7493_v14 }
0x10da   : > { %v7495_v2 = vadd.f32 1.0, %v12063_v39  ;;  %v7966_v24 = vpack.c.bf16 %v7862_v8, %v7854_v32  ;;  %v12065_v27 = vpop.eup %12064 }
0x10db   : > { %v7968_v58 = vpack.c.bf16 %v7864_v33, %v7856_v49  ;;  %v8799_v11 = vpop.f32.mrf.mxu0  ;;  %v12067_v17 = vpop.eup %12066  ;;  %v7494_v55 = vadd.f32 1.0, %v12065_v27 }
0x10dc   : > { %12076 = vrcp.f32 %v7495_v2  ;;  %9063 = vmatprep.mubr.bf16.mxu0 %v7966_v24  ;;  %v8912_v23 = vpop.f32.mrf.mxu1  ;;  %v7496_v0 = vadd.f32 1.0, %v12067_v17  ;;  %v12069_v19 = vpop.eup %12068 }
0x10dd   : > { %12078 = vrcp.f32 %v7488_v22  ;;  %9176 = vmatprep.mubr.bf16.mxu1 %v7968_v58  ;;  %9064 = vmatmul.mubr.bf16.gmra.mxu0 %v7965_v38  ;;  %v16203_v47 = vadd.f32 %v8912_v23, %v8799_v11  ;;  %v8801_v20 = vpop.f32.mrf.mxu0  ;;  %v12071_v40 = vpop.eup %12070  ;;  %v7869_v24 = vmul.f32 %v12069_v19, %v16106_v53 }
0x10de   : > { %12080 = vrcp.f32 %v7494_v55  ;;  %9177 = vmatmul.mubr.bf16.gmra.mxu1 %v7967_v34  ;;  %v8914_v16 = vpop.f32.mrf.mxu1  ;;  %v12073_v37 = vpop.eup %12072  ;;  %v7871_v58 = vmul.f32 %v12071_v40, %v16118_v29 }
0x10df   : > { %12082 = vrcp.f32 %v7496_v0  ;;  %v16205_v13 = vadd.f32 %v8914_v16, %v8801_v20  ;;  %v8803_v31 = vpop.f32.mrf.mxu0  ;;  %v7870_v22 = vmul.f32 %v12073_v37, %v16122_v48 }
0x10e0   : > { %v8916_v21 = vpop.f32.mrf.mxu1 }
0x10e1   : > { %v16207_v41 = vadd.f32 %v8916_v21, %v8803_v31  ;;  %v8805_v1 = vpop.f32.mrf.mxu0 }
0x10e2   : > { %v8918_v18 = vpop.f32.mrf.mxu1 }
0x10e3   : > { %v16209_v25 = vadd.f32 %v8918_v18, %v8805_v1  ;;  %v8809_v50 = vpop.f32.mrf.mxu0 }
0x10e4   : > { %v8922_v59 = vpop.f32.mrf.mxu1 }
0x10e5   : > { %v16211_v30 = vadd.f32 %v8922_v59, %v8809_v50  ;;  %v8811_v3 = vpop.f32.mrf.mxu0 }
0x10e6   : > { %v8924_v36 = vpop.f32.mrf.mxu1  ;;  %v12075_v44 = vpop.eup %12074 }
0x10e7   : > { %v16213_v51 = vadd.f32 %v8924_v36, %v8811_v3  ;;  %v8813_v28 = vpop.f32.mrf.mxu0  ;;  %v7877_v39 = vmul.f32 %v12075_v44, %v16146_v56 }
0x10e8   : > { %v8926_v46 = vpop.f32.mrf.mxu1 }
0x10e9   : > { %v12077_v14 = vpop.eup %12076  ;;  %v16215_v60 = vadd.f32 %v8926_v46, %v8813_v28  ;;  %v8815_v9 = vpop.f32.mrf.mxu0  ;;  %v7973_v17 = vpack.c.bf16 %v7877_v39, %v7869_v24 }
0x10ea   : > { %v12079_v32 = vpop.eup %12078  ;;  %v8928_v63 = vpop.f32.mrf.mxu1  ;;  %v7879_v7 = vmul.f32 %v12077_v14, %v16158_v35 }
0x10eb   : > { %v12081_v8 = vpop.eup %12080  ;;  %v16218_v49 = vadd.f32 %v8928_v63, %v8815_v9  ;;  %v7872_v27 = vmul.f32 %v12079_v32, %v16126_v42 }
0x10ec   : > { %v12083_v33 = vpop.eup %12082  ;;  %v7878_v2 = vmul.f32 %v12081_v8, %v16166_v54  ;;  %v7975_v34 = vpack.c.bf16 %v7879_v7, %v7871_v58 }
0x10ed   : > { %v7880_v38 = vmul.f32 %v12083_v33, %v16171_v45 }
0x10ee   : > { %v7974_v11 = vpack.c.bf16 %v7878_v2, %v7870_v22 }
0x10ef   : > { %v7976_v56 = vpack.c.bf16 %v7880_v38, %v7872_v27 }
0x10f0   : > { %9073 = vmatprep.mubr.bf16.mxu0 %v7974_v11 }
0x10f1   : > { %9186 = vmatprep.mubr.bf16.mxu1 %v7976_v56  ;;  %9074 = vmatmul.mubr.bf16.gmra.mxu0 %v7973_v17 }
0x10f2   : > { %9187 = vmatmul.mubr.bf16.gmra.mxu1 %v7975_v34 }
0x1115   : > { %v8819_v48 = vpop.f32.mrf.mxu0  ;;  %v8932_v35 = vpop.f32.mrf.mxu1 }
0x1116   : > { %v16227_v55 = vadd.f32 %v8932_v35, %v8819_v48 }
0x1117   : > { %v8821_v54 = vpop.f32.mrf.mxu0  ;;  %v8934_v53 = vpop.f32.mrf.mxu1 }
0x1118   : > { %v16229_v23 = vadd.f32 %v8934_v53, %v8821_v54 }
0x1119   : > { %v8823_v42 = vpop.f32.mrf.mxu0  ;;  %v8936_v45 = vpop.f32.mrf.mxu1 }
0x111a   : > { %v16231_v0 = vadd.f32 %v8936_v45, %v8823_v42  ;;  %v8893_v42 = vadd.f32 %v16141_v62, %v16139_v10 }
0x111b   : > { %v8825_v29 = vpop.f32.mrf.mxu0  ;;  %v8938_v20 = vpop.f32.mrf.mxu1 }
0x111c   : > { %v16233_v16 = vadd.f32 %v8938_v20, %v8825_v29  ;;  %v9360_v29 = vld [vmem:[%s16827_s9] sm:$0x3]  ;;  %v8895_v20 = vadd.f32 %v16153_v5, %v16148_v26  ;;  %v16830_v5 = vld [vmem:[#allocation29_spill] sm:$0xff] }
0x1121   : > { %v8829_v31 = vpop.f32.mrf.mxu0 }
0x1122   : > { %v8942_v21 = vpop.f32.mrf.mxu1 }
0x1123   : > { %v16235_v1 = vadd.f32 %v8942_v21, %v8829_v31  ;;  %v8831_v18 = vpop.f32.mrf.mxu0 }
0x1124   : > { %v8944_v50 = vpop.f32.mrf.mxu1 }
0x1125   : > { %v16237_v19 = vadd.f32 %v8944_v50, %v8831_v18  ;;  %v8833_v59 = vpop.f32.mrf.mxu0  ;;  %v8897_v50 = vadd.f32 %v16160_v4, %v16155_v6 }
0x1126   : > { %v8946_v3 = vpop.f32.mrf.mxu1 }
0x1127   : > { %v16239_v40 = vadd.f32 %v8946_v3, %v8833_v59  ;;  %v8835_v36 = vpop.f32.mrf.mxu0  ;;  %v16828_v3 = vld [vmem:[#allocation30_spill] sm:$0xff] }
0x1128   : > { %v8948_v37 = vpop.f32.mrf.mxu1 }
0x1129   : > { %v16241_v28 = vadd.f32 %v8948_v37, %v8835_v36  ;;  %v16269_v36 = vrot.slane %v9360_v29, %v16828_v3  ;;  %v8899_v37 = vadd.f32 %v16168_v15, %v16163_v12  ;;  %v16832_v15 = vld [vmem:[#allocation59_spill] sm:$0xff]  ;;  %v16834_v3 = vld [vmem:[#allocation57_spill] sm:$0xff] }
0x1130   : > { %v8839_v44 = vpop.f32.mrf.mxu0  ;;  %v8952_v46 = vpop.f32.mrf.mxu1 }
0x1131   : > { %v16243_v14 = vadd.f32 %v8952_v46, %v8839_v44  ;;  %v16829_v46 = vld [vmem:[#allocation32_spill] sm:$0xff] }
0x1132   : > { %v8841_v9 = vpop.f32.mrf.mxu0  ;;  %v8954_v32 = vpop.f32.mrf.mxu1 }
0x1133   : > { %v16245_v63 = vadd.f32 %v8954_v32, %v8841_v9  ;;  %v16275_v32 = vrot.slane %v9360_v29, %v16830_v5 }
0x1134   : > { %v8843_v8 = vpop.f32.mrf.mxu0  ;;  %v8956_v39 = vpop.f32.mrf.mxu1 }
0x1135   : > { %v16247_v33 = vadd.f32 %v8956_v39, %v8843_v8 }
0x1136   : > { %v8845_v22 = vpop.f32.mrf.mxu0  ;;  %v8958_v7 = vpop.f32.mrf.mxu1 }
0x1137   : > { %v16249_v2 = vadd.f32 %v8958_v7, %v8845_v22  ;;  %v16831_v22 = vld [vmem:[#allocation31_spill] sm:$0xff] }
0x113f   : > { %v8962_v27 = vpop.f32.mrf.mxu1 }
0x1140   : > { %v8849_v24 = vpop.f32.mrf.mxu0 }
0x1141   : > { %v16251_v38 = vadd.f32 %v8962_v27, %v8849_v24  ;;  %v8964_v11 = vpop.f32.mrf.mxu1 }
0x1142   : > { %v8851_v58 = vpop.f32.mrf.mxu0 }
0x1143   : > { %v16253_v17 = vadd.f32 %v8964_v11, %v8851_v58  ;;  %v8966_v34 = vpop.f32.mrf.mxu1 }
0x1144   : > { %v8853_v56 = vpop.f32.mrf.mxu0 }
0x1145   : > { %v16255_v48 = vadd.f32 %v8966_v34, %v8853_v56  ;;  %v8968_v54 = vpop.f32.mrf.mxu1 }
0x1146   : > { %v8855_v35 = vpop.f32.mrf.mxu0 }
0x1147   : > { %v16257_v53 = vadd.f32 %v8968_v54, %v8855_v35  ;;  %v16833_v35 = vld [vmem:[#allocation58_spill] sm:$0xff] }
0x114d   : > { %v9005_v45 = vpop.f32.mrf.mxu0 }
0x114e   : > { %v9006_v31 = vadd.f32 %v9005_v45, %v8893_v42  ;;  %v9118_v21 = vpop.f32.mrf.mxu1 }
0x114f   : > { %v9007_v18 = vpop.f32.mrf.mxu0 }
0x1150   : > { %v9119_v59 = vadd.f32 %v9118_v21, %v9006_v31  ;;  %v9008_v10 = vadd.f32 %v9007_v18, %v8895_v20  ;;  %v9120_v62 = vpop.f32.mrf.mxu1 }
0x1151   : > { %v9009_v44 = vpop.f32.mrf.mxu0 }
0x1152   : > { %v9328_v9 = vadd.f32 %v9119_v59, %v16829_v46  ;;  %v9121_v26 = vadd.f32 %v9120_v62, %v9008_v10  ;;  %v9010_v8 = vadd.f32 %v9009_v44, %v8897_v50  ;;  %v9122_v39 = vpop.f32.mrf.mxu1 }
0x1153   : > { %v9011_v6 = vpop.f32.mrf.mxu0 }
0x1154   : > { %v9372_v4 = vadd.f32 %v16269_v36, %v9328_v9  ;;  %v9329_v7 = vadd.f32 %v9121_v26, %v16831_v22  ;;  %v9123_v24 = vadd.f32 %v9122_v39, %v9010_v8  ;;  %v9012_v27 = vadd.f32 %v9011_v6, %v8899_v37  ;;  %v9124_v58 = vpop.f32.mrf.mxu1  ;;  %v16836_v6 = vld [vmem:[#allocation40_spill] sm:$0xff] }
0x1156   : > { %9404 = vst [vmem:[%s16281_s18] sm:$0xff] %v9372_v4  ;;  %v9373_v12 = vadd.f32 %v16275_v32, %v9329_v7  ;;  %v9330_v11 = vadd.f32 %v9123_v24, %v16832_v15  ;;  %v9125_v56 = vadd.f32 %v9124_v58, %v9012_v27  ;;  %v16837_v7 = vld [vmem:[#allocation54_spill] sm:$0xff] }
0x1158   : > { %9405 = vst [vmem:[%s16281_s18 + $0x8] sm:$0xff] %v9373_v12  ;;  %v9374_v34 = vadd.f32 %v16269_v36, %v9330_v11  ;;  %v9331_v54 = vadd.f32 %v9125_v56, %v16833_v35 }
0x115a   : > { %9406 = vst [vmem:[%s16281_s18 + $0x10] sm:$0xff] %v9374_v34  ;;  %v9375_v42 = vadd.f32 %v16275_v32, %v9331_v54  ;;  %v16838_v54 = vld [vmem:[#allocation55_spill] sm:$0xff] }
0x115b   : > { %v9015_v45 = vpop.f32.mrf.mxu0 }
0x115c   : > { %9407 = vst [vmem:[%s16281_s18 + $0x18] sm:$0xff] %v9375_v42  ;;  %v9016_v29 = vadd.f32 %v9015_v45, %v16174_v43  ;;  %v9128_v20 = vpop.f32.mrf.mxu1  ;;  %v16835_v43 = vld [vmem:[#allocation56_spill] sm:$0xff] }
0x115d   : > { %v9017_v31 = vpop.f32.mrf.mxu0 }
0x115e   : > { %v9129_v21 = vadd.f32 %v9128_v20, %v9016_v29  ;;  %v9018_v18 = vadd.f32 %v9017_v31, %v16178_v57  ;;  %v9130_v50 = vpop.f32.mrf.mxu1 }
0x115f   : > { %v9019_v59 = vpop.f32.mrf.mxu0 }
0x1160   : > { %v9332_v10 = vadd.f32 %v9129_v21, %v16834_v3  ;;  %v9131_v62 = vadd.f32 %v9130_v50, %v9018_v18  ;;  %v9020_v37 = vadd.f32 %v9019_v59, %v16180_v52  ;;  %v9132_v44 = vpop.f32.mrf.mxu1 }
0x1161   : > { %v9021_v46 = vpop.f32.mrf.mxu0 }
0x1162   : > { %v9376_v9 = vadd.f32 %v16269_v36, %v9332_v10  ;;  %v9333_v26 = vadd.f32 %v9131_v62, %v16835_v43  ;;  %v9133_v5 = vadd.f32 %v9132_v44, %v9020_v37  ;;  %v9022_v8 = vadd.f32 %v9021_v46, %v16183_v61  ;;  %v9134_v57 = vpop.f32.mrf.mxu1  ;;  %v16840_v62 = vld [vmem:[#allocation49_spill] sm:$0xff] }
0x1164   : > { %9408 = vst [vmem:[%s16281_s18 + $0x20] sm:$0xff] %v9376_v9  ;;  %v9377_v39 = vadd.f32 %v16275_v32, %v9333_v26  ;;  %v9334_v4 = vadd.f32 %v9133_v5, %v16836_v6  ;;  %v9135_v22 = vadd.f32 %v9134_v57, %v9022_v8  ;;  %v16841_v26 = vld [vmem:[#allocation46_spill] sm:$0xff] }
0x1166   : > { %9409 = vst [vmem:[%s16281_s18 + $0x28] sm:$0xff] %v9377_v39  ;;  %v9378_v52 = vadd.f32 %v16269_v36, %v9334_v4  ;;  %v9335_v24 = vadd.f32 %v9135_v22, %v16837_v7  ;;  %v16842_v4 = vld [vmem:[#allocation50_spill] sm:$0xff] }
0x1167   : > { %v9025_v58 = vpop.f32.mrf.mxu0 }
0x1168   : > { %9410 = vst [vmem:[%s16281_s18 + $0x30] sm:$0xff] %v9378_v52  ;;  %v9379_v27 = vadd.f32 %v16275_v32, %v9335_v24  ;;  %v9026_v12 = vadd.f32 %v9025_v58, %v16203_v47  ;;  %v9138_v15 = vpop.f32.mrf.mxu1  ;;  %v16839_v47 = vld [vmem:[#allocation43_spill] sm:$0xff]  ;;  %v16843_v58 = vld [vmem:[#allocation60_spill] sm:$0xff] }
0x1169   : > { %v9027_v61 = vpop.f32.mrf.mxu0 }
0x116a   : > { %9411 = vst [vmem:[%s16281_s18 + $0x38] sm:$0xff] %v9379_v27  ;;  %v9139_v11 = vadd.f32 %v9138_v15, %v9026_v12  ;;  %v9028_v56 = vadd.f32 %v9027_v61, %v16205_v13  ;;  %v9140_v34 = vpop.f32.mrf.mxu1 }
0x116b   : > { %v9029_v35 = vpop.f32.mrf.mxu0 }
0x116c   : > { %v9336_v42 = vadd.f32 %v9139_v11, %v16838_v54  ;;  %v9141_v45 = vadd.f32 %v9140_v34, %v9028_v56  ;;  %v9030_v29 = vadd.f32 %v9029_v35, %v16207_v41  ;;  %v9142_v20 = vpop.f32.mrf.mxu1  ;;  %v16844_v56 = vld [vmem:[#allocation52_spill] sm:$0xff]  ;;  %v16845_v54 = vld [vmem:[#allocation53_spill] sm:$0xff] }
0x116d   : > { %v9031_v31 = vpop.f32.mrf.mxu0 }
0x116e   : > { %v9380_v21 = vadd.f32 %v16269_v36, %v9336_v42  ;;  %v9337_v18 = vadd.f32 %v9141_v45, %v16839_v47  ;;  %v9143_v50 = vadd.f32 %v9142_v20, %v9030_v29  ;;  %v9032_v59 = vadd.f32 %v9031_v31, %v16209_v25  ;;  %v9144_v3 = vpop.f32.mrf.mxu1 }
0x1170   : > { %9412 = vst [vmem:[%s16281_s18 + $0x40] sm:$0xff] %v9380_v21  ;;  %v9381_v10 = vadd.f32 %v16275_v32, %v9337_v18  ;;  %v9338_v37 = vadd.f32 %v9143_v50, %v16840_v62  ;;  %v9145_v44 = vadd.f32 %v9144_v3, %v9032_v59  ;;  %v16846_v59 = vld [vmem:[#allocation45_spill] sm:$0xff] }
0x1171   : > { %v9035_v13 = vpop.f32.mrf.mxu0 }
0x1172   : > { %v9036_v41 = vadd.f32 %v9035_v13, %v16211_v30  ;;  %v9148_v46 = vpop.f32.mrf.mxu1  ;;  %9413 = vst [vmem:[%s16281_s18 + $0x48] sm:$0xff] %v9381_v10  ;;  %v9382_v43 = vadd.f32 %v16269_v36, %v9338_v37  ;;  %v9339_v5 = vadd.f32 %v9145_v44, %v16841_v26  ;;  %v16847_v44 = vld [vmem:[#allocation47_spill] sm:$0xff]  ;;  %v16848_v26 = vld [vmem:[#allocation36_spill] sm:$0xff] }
0x1173   : > { %v9037_v9 = vpop.f32.mrf.mxu0 }
0x1174   : > { %v9149_v25 = vadd.f32 %v9148_v46, %v9036_v41  ;;  %v9038_v8 = vadd.f32 %v9037_v9, %v16213_v51  ;;  %v9150_v57 = vpop.f32.mrf.mxu1  ;;  %9414 = vst [vmem:[%s16281_s18 + $0x50] sm:$0xff] %v9382_v43  ;;  %v9383_v6 = vadd.f32 %v16275_v32, %v9339_v5 }
0x1175   : > { %v9039_v39 = vpop.f32.mrf.mxu0 }
0x1176   : > { %v9340_v30 = vadd.f32 %v9149_v25, %v16842_v4  ;;  %v9151_v22 = vadd.f32 %v9150_v57, %v9038_v8  ;;  %v9040_v52 = vadd.f32 %v9039_v39, %v16215_v60  ;;  %v9152_v7 = vpop.f32.mrf.mxu1  ;;  %9415 = vst [vmem:[%s16281_s18 + $0x58] sm:$0xff] %v9383_v6  ;;  %v16849_v8 = vld [vmem:[#allocation48_spill] sm:$0xff] }
0x1177   : > { %v9041_v24 = vpop.f32.mrf.mxu0 }
0x1178   : > { %v9384_v27 = vadd.f32 %v16269_v36, %v9340_v30  ;;  %v9341_v51 = vadd.f32 %v9151_v22, %v16843_v58  ;;  %v9153_v12 = vadd.f32 %v9152_v7, %v9040_v52  ;;  %v9042_v15 = vadd.f32 %v9041_v24, %v16218_v49  ;;  %v9154_v61 = vpop.f32.mrf.mxu1 }
0x117a   : > { %9416 = vst [vmem:[%s16281_s18 + $0x60] sm:$0xff] %v9384_v27  ;;  %v9385_v11 = vadd.f32 %v16275_v32, %v9341_v51  ;;  %v9342_v34 = vadd.f32 %v9153_v12, %v16844_v56  ;;  %v9155_v35 = vadd.f32 %v9154_v61, %v9042_v15  ;;  %v16850_v27 = vld [vmem:[#allocation35_spill] sm:$0xff] }
0x117c   : > { %9417 = vst [vmem:[%s16281_s18 + $0x68] sm:$0xff] %v9385_v11  ;;  %v9386_v60 = vadd.f32 %v16269_v36, %v9342_v34  ;;  %v9343_v42 = vadd.f32 %v9155_v35, %v16845_v54  ;;  %v16852_v54 = vld [vmem:[#allocation38_spill] sm:$0xff] }
0x117d   : > { %v9045_v45 = vpop.f32.mrf.mxu0 }
0x117e   : > { %v9046_v29 = vadd.f32 %v9045_v45, %v16227_v55  ;;  %v9158_v20 = vpop.f32.mrf.mxu1  ;;  %9418 = vst [vmem:[%s16281_s18 + $0x70] sm:$0xff] %v9386_v60  ;;  %v9387_v49 = vadd.f32 %v16275_v32, %v9343_v42 }
0x117f   : > { %v9047_v31 = vpop.f32.mrf.mxu0 }
0x1180   : > { %v9159_v21 = vadd.f32 %v9158_v20, %v9046_v29  ;;  %v9048_v47 = vadd.f32 %v9047_v31, %v16229_v23  ;;  %v9160_v18 = vpop.f32.mrf.mxu1  ;;  %9419 = vst [vmem:[%s16281_s18 + $0x78] sm:$0xff] %v9387_v49  ;;  %v16853_v29 = vld [vmem:[#allocation61_spill] sm:$0xff] }
0x1181   : > { %v9049_v50 = vpop.f32.mrf.mxu0 }
0x1182   : > { %v9344_v3 = vadd.f32 %v9159_v21, %v16846_v59  ;;  %v9161_v13 = vadd.f32 %v9160_v18, %v9048_v47  ;;  %v9050_v10 = vadd.f32 %v9049_v50, %v16231_v0  ;;  %v9162_v55 = vpop.f32.mrf.mxu1 }
0x1183   : > { %v9051_v62 = vpop.f32.mrf.mxu0 }
0x1184   : > { %v9388_v37 = vadd.f32 %v16269_v36, %v9344_v3  ;;  %v9345_v41 = vadd.f32 %v9161_v13, %v16847_v44  ;;  %v9163_v46 = vadd.f32 %v9162_v55, %v9050_v10  ;;  %v9052_v23 = vadd.f32 %v9051_v62, %v16233_v16  ;;  %v9164_v9 = vpop.f32.mrf.mxu1  ;;  %v16854_v13 = vld [vmem:[#allocation34_spill] sm:$0xff] }
0x1186   : > { %9420 = vst [vmem:[%s16281_s18 + $0x80] sm:$0xff] %v9388_v37  ;;  %v9389_v43 = vadd.f32 %v16275_v32, %v9345_v41  ;;  %v9346_v5 = vadd.f32 %v9163_v46, %v16848_v26  ;;  %v9165_v25 = vadd.f32 %v9164_v9, %v9052_v23  ;;  %v16855_v41 = vld [vmem:[#allocation39_spill] sm:$0xff]  ;;  %v16856_v26 = vld [vmem:[#allocation37_spill] sm:$0xff] }
0x1188   : > { %9421 = vst [vmem:[%s16281_s18 + $0x88] sm:$0xff] %v9389_v43  ;;  %v9390_v0 = vadd.f32 %v16269_v36, %v9346_v5  ;;  %v9347_v57 = vadd.f32 %v9165_v25, %v16849_v8 }
0x118a   : > { %9422 = vst [vmem:[%s16281_s18 + $0x90] sm:$0xff] %v9390_v0  ;;  %v9391_v39 = vadd.f32 %v16275_v32, %v9347_v57  ;;  %v16857_v0 = vld [vmem:[#allocation62_spill] sm:$0xff] }
0x118c   : > { %9423 = vst [vmem:[%s16281_s18 + $0x98] sm:$0xff] %v9391_v39 }
0x1191   : > { %v9055_v6 = vpop.f32.mrf.mxu0 }
0x1192   : > { %v9056_v4 = vadd.f32 %v9055_v6, %v16235_v1  ;;  %v9168_v16 = vpop.f32.mrf.mxu1  ;;  %v16851_v1 = vld [vmem:[#allocation51_spill] sm:$0xff] }
0x1193   : > { %v9057_v30 = vpop.f32.mrf.mxu0 }
0x1194   : > { %v9169_v22 = vadd.f32 %v9168_v16, %v9056_v4  ;;  %v9058_v52 = vadd.f32 %v9057_v30, %v16237_v19  ;;  %v9170_v7 = vpop.f32.mrf.mxu1 }
0x1195   : > { %v9059_v24 = vpop.f32.mrf.mxu0 }
0x1196   : > { %v9348_v58 = vadd.f32 %v9169_v22, %v16850_v27  ;;  %v9171_v51 = vadd.f32 %v9170_v7, %v9058_v52  ;;  %v9060_v12 = vadd.f32 %v9059_v24, %v16239_v40  ;;  %v9172_v15 = vpop.f32.mrf.mxu1  ;;  %v16859_v7 = vld [vmem:[#allocation41_spill] sm:$0xff] }
0x1197   : > { %v9061_v61 = vpop.f32.mrf.mxu0 }
0x1198   : > { %v9392_v11 = vadd.f32 %v16269_v36, %v9348_v58  ;;  %v9349_v56 = vadd.f32 %v9171_v51, %v16851_v1  ;;  %v9173_v34 = vadd.f32 %v9172_v15, %v9060_v12  ;;  %v9062_v35 = vadd.f32 %v9061_v61, %v16241_v28  ;;  %v9174_v19 = vpop.f32.mrf.mxu1  ;;  %v16860_v15 = vld [vmem:[#allocation63_spill] sm:$0xff] }
0x119a   : > { %9424 = vst [vmem:[%s16281_s18 + $0xa0] sm:$0xff] %v9392_v11  ;;  %v9393_v60 = vadd.f32 %v16275_v32, %v9349_v56  ;;  %v9350_v42 = vadd.f32 %v9173_v34, %v16852_v54  ;;  %v9175_v45 = vadd.f32 %v9174_v19, %v9062_v35  ;;  %v16861_v34 = vld [vmem:[#allocation33_spill] sm:$0xff] }
0x119c   : > { %9425 = vst [vmem:[%s16281_s18 + $0xa8] sm:$0xff] %v9393_v60  ;;  %v9394_v40 = vadd.f32 %v16269_v36, %v9350_v42  ;;  %v9351_v20 = vadd.f32 %v9175_v45, %v16853_v29  ;;  %v16862_v60 = vld [vmem:[#allocation44_spill] sm:$0xff] }
0x119d   : > { %v9065_v49 = vpop.f32.mrf.mxu0 }
0x119e   : > { %9426 = vst [vmem:[%s16281_s18 + $0xb0] sm:$0xff] %v9394_v40  ;;  %v9395_v31 = vadd.f32 %v16275_v32, %v9351_v20  ;;  %v9066_v21 = vadd.f32 %v9065_v49, %v16243_v14  ;;  %v9178_v47 = vpop.f32.mrf.mxu1 }
0x119f   : > { %v9067_v28 = vpop.f32.mrf.mxu0 }
0x11a0   : > { %9427 = vst [vmem:[%s16281_s18 + $0xb8] sm:$0xff] %v9395_v31  ;;  %v9179_v18 = vadd.f32 %v9178_v47, %v9066_v21  ;;  %v9068_v50 = vadd.f32 %v9067_v28, %v16245_v63  ;;  %v9180_v59 = vpop.f32.mrf.mxu1 }
0x11a1   : > { %v9069_v3 = vpop.f32.mrf.mxu0 }
0x11a2   : > { %v9352_v10 = vadd.f32 %v9179_v18, %v16854_v13  ;;  %v9181_v55 = vadd.f32 %v9180_v59, %v9068_v50  ;;  %v9070_v62 = vadd.f32 %v9069_v3, %v16247_v33  ;;  %v9182_v37 = vpop.f32.mrf.mxu1 }
0x11a3   : > { %v9071_v44 = vpop.f32.mrf.mxu0 }
0x11a4   : > { %v9396_v14 = vadd.f32 %v16269_v36, %v9352_v10  ;;  %v9353_v46 = vadd.f32 %v9181_v55, %v16855_v41  ;;  %v9183_v23 = vadd.f32 %v9182_v37, %v9070_v62  ;;  %v9072_v9 = vadd.f32 %v9071_v44, %v16249_v2  ;;  %v9184_v63 = vpop.f32.mrf.mxu1 }
0x11a6   : > { %9428 = vst [vmem:[%s16281_s18 + $0xc0] sm:$0xff] %v9396_v14  ;;  %v9397_v43 = vadd.f32 %v16275_v32, %v9353_v46  ;;  %v9354_v5 = vadd.f32 %v9183_v23, %v16856_v26  ;;  %v9185_v25 = vadd.f32 %v9184_v63, %v9072_v9 }
0x11a8   : > { %9429 = vst [vmem:[%s16281_s18 + $0xc8] sm:$0xff] %v9397_v43  ;;  %v9398_v33 = vadd.f32 %v16269_v36, %v9354_v5  ;;  %v9355_v8 = vadd.f32 %v9185_v25, %v16857_v0 }
0x11aa   : > { %9430 = vst [vmem:[%s16281_s18 + $0xd0] sm:$0xff] %v9398_v33  ;;  %v9399_v57 = vadd.f32 %v16275_v32, %v9355_v8 }
0x11ac   : > { %9431 = vst [vmem:[%s16281_s18 + $0xd8] sm:$0xff] %v9399_v57 }
0x11b1   : > { %v9075_v39 = vpop.f32.mrf.mxu0 }
0x11b2   : > { %v9076_v6 = vadd.f32 %v9075_v39, %v16251_v38  ;;  %v9188_v2 = vpop.f32.mrf.mxu1 }
0x11b3   : > { %v9077_v4 = vpop.f32.mrf.mxu0 }
0x11b4   : > { %v9189_v16 = vadd.f32 %v9188_v2, %v9076_v6  ;;  %v9078_v30 = vadd.f32 %v9077_v4, %v16253_v17  ;;  %v9190_v22 = vpop.f32.mrf.mxu1 }
0x11b5   : > { %v9079_v52 = vpop.f32.mrf.mxu0 }
0x11b6   : > { %v9356_v24 = vadd.f32 %v9189_v16, %v16859_v7  ;;  %v9191_v27 = vadd.f32 %v9190_v22, %v9078_v30  ;;  %v9080_v58 = vadd.f32 %v9079_v52, %v16255_v48  ;;  %v9192_v51 = vpop.f32.mrf.mxu1 }
0x11b7   : > { %v9081_v12 = vpop.f32.mrf.mxu0 }
0x11b8   : > { %v9400_v38 = vadd.f32 %v16269_v36, %v9356_v24  ;;  %v9357_v61 = vadd.f32 %v9191_v27, %v16860_v15  ;;  %v9193_v11 = vadd.f32 %v9192_v51, %v9080_v58  ;;  %v9082_v17 = vadd.f32 %v9081_v12, %v16257_v53  ;;  %v9194_v1 = vpop.f32.mrf.mxu1 }
0x11ba   : > { %9432 = vst [vmem:[%s16281_s18 + $0xe0] sm:$0xff] %v9400_v38  ;;  %v9401_v56 = vadd.f32 %v16275_v32, %v9357_v61  ;;  %v9358_v35 = vadd.f32 %v9193_v11, %v16861_v34  ;;  %v9195_v48 = vadd.f32 %v9194_v1, %v9082_v17 }
0x11bc   : > { %9433 = vst [vmem:[%s16281_s18 + $0xe8] sm:$0xff] %v9401_v56  ;;  %v9402_v19 = vadd.f32 %v16269_v36, %v9358_v35  ;;  %v9359_v54 = vadd.f32 %v9195_v48, %v16862_v60 }
0x11be   : > { %9434 = vst [vmem:[%s16281_s18 + $0xf0] sm:$0xff] %v9402_v19  ;;  %v9403_v53 = vadd.f32 %v16275_v32, %v9359_v54 }
0x11c0   : > { %9435 = vst [vmem:[%s16281_s18 + $0xf8] sm:$0xff] %v9403_v53 }
0x11c1   : > { %12367 = shalt.err (!%p12364_p6)
}
0x11c2   : > { %s12368_s3 = scalar_lea.hbm %s16406_s28, 4096  ;;  %s12372_s18 = scalar_lea.hbm %s16863_s16, 8192 }
0x11c3   : > { %p12369_p8 = scmp.ne.s32.totalorder %s16406_s28, %s12368_s3  ;;  %p12373_p12 = scmp.lt.s32.totalorder %s16406_s28, %s16863_s16 }
0x11c4   : > { %p12374_p0 = scmp.lt.s32.totalorder %s12372_s18, %s12368_s3 }
0x11c5   : > { %p12370_p9 = pnand %p12369_p8, %p12688_p11 }
0x11c6   : > { %p12375_p10 = por %p12374_p0, %p12373_p12 }
0x11c7   : > { %p12371_p2 = pneg %p12370_p9 }
0x11c9   : > { %p12376_p3 = pnand %p12375_p10, %p12371_p2 }
0x11cb   : > { %12379 = shalt.err (!%p12376_p3)
}
0x11cc   : > { %s12472_s7 = smov 256   ;;  %s12473_s15 = smov 16  }
0x11cd   : > { %10747 = dma.vmem_to_hbm [thread:$0]  (%p12688_p11), %s16408_s5, 4096, %s16406_s28, %s9437_s1, %s12472_s7, %s12472_s7, %s12473_s15  }
0x11ce PF: > { %s9465_s22 = sand.u32 1, %s12430_s25   ;;  %p16864_p7 = scmp.ge.s32.totalorder %s12450_s30, 2 }
0x11cf   : > { %s9466_s21 = scalar_lea.sflag [#allocation7], %s9465_s22 }
0x11d0   : > { %p10779_p4 = pnand %p16864_p7, %p12695_p13 }
0x11d2   : > { %p10780_p1 = pneg %p10779_p4 }
0x11d4   : > { %12425 = dma.done.wait (%p10780_p1), %s9466_s21, 4096  }
0x11d5   : > { %12427 = vsyncadd (%p10780_p1), %s9466_s21, 4294963200  ;;  %s33_s30 = sadd.s32 1, %s12450_s30   ;;  %s16865_s25 = smov %s12434_s26 }
0x11d6   : > { %p30_p5 = scmp.ge.s32.totalorder %s33_s30, 4   ;;  %s16866_s26 = smov %s12438_s27 }
0x11d7   : > { %s16867_s27 = smov %s12693_s20  ;;  %s16868_s28 = smov %s12446_s29 }
0x11d8   : > { %s16869_s29 = smov %s16871_s24  ;;  %32 = sbr.rel (!%p30_p5) target bundleno = 20 (0x14), region = 162 }
0x11dd   :  { %9471 = vsyncpa [#allocation6], 1 }
0x11de   :  { %9473 = vsyncpa [#allocation6 + $0x1], 1 }
0x11df   :  { %9474 = vsyncpa [#allocation9], 1 }
0x11e0   :  { %9475 = vsyncpa [#allocation12], 1 }
0x11e1   :  { %9476 = vsyncpa [#allocation15], 1 }
0x11e2   :  { %9477 = vsyncpa [#allocation18], 1 }
0x11e3   :  { %9478 = vsyncpa [#allocation7], 1 }
0x11e4   :  { %9480 = vsyncpa [#allocation7 + $0x1], 1 }

</bundles_post_ra>
